<compile_context>
chip_gen: v5e
topology: v5e:2x2
jax: 0.10.0
libtpu: 0.0.40
codegen_flags: <defaults>
</compile_context>

<pallas_src>
import functools
import math

import jax
import jax.numpy as jnp
from jax.experimental import pallas as pl
from jax.experimental.pallas import tpu as pltpu

HEAD_LANES = 128  # lane-dense width of the fused (objectness + delta) head matmul


# -----------------------------------------------------------------------------
# Fused Pallas kernel: backbone conv -> RPN conv -> heads -> decode + clip
# -----------------------------------------------------------------------------
def fused_rpn_kernel(x_ref, wbb_ref, bbb_ref, wrpn_ref, brpn_ref, wh_ref,
                     bhd_ref, o_ref, feat_ref, *, block_h, out_w, num_anchors,
                     img_h, img_w, anchor_sizes, out_lanes, scale_clamp):
    """One row band of the image -> proposals for that band.

    x_ref   : (1, 1, block_h+4, out_w+4, Cin)  bf16 mean-subtracted image band,
              2-pixel zero halo
    wbb_ref : (9*Cin, Cf) bf16   backbone conv (im2col layout, 1/std folded in)
    bbb_ref : (1, Cf)     f32
    wrpn_ref: (9*Cf, Cf)  bf16   RPN 3x3 conv (im2col layout)
    brpn_ref: (1, Cf)     f32
    wh_ref  : (Cf, 128)   bf16   fused heads: cols [0:A)=obj, [A:5A)=deltas
                                 coord-major dx|dy|dw|dh, rest zero
    bhd_ref : (1, 128)    f32
    o_ref   : (1, block_h*out_w, out_lanes) f32
              per position: [logit*A | x1*A | y1*A | x2*A | y2*A | pad]
    feat_ref: (block_h+2, out_w+2, Cf) bf16 VMEM scratch (feature band + halo)
    """
    a = num_anchors
    bh2, w2 = block_h + 2, out_w + 2
    rows2 = bh2 * w2
    rows = block_h * out_w
    y0 = pl.program_id(1) * block_h                       # first output row

    x = x_ref[0, 0]                                       # (bh+4, W+4, Cin) bf16

    # ---- backbone 3x3 conv + ReLU over the 1-px feature-halo extent --------
    # single im2col matmul: (rows2, 9*Cin) x (9*Cin, Cf)
    p1 = jnp.concatenate(
        [x[dy:dy + bh2, dx:dx + w2, :].reshape(rows2, -1)
         for dy in range(3) for dx in range(3)], axis=-1)
    f = jnp.dot(p1, wbb_ref[...], preferred_element_type=jnp.float32)
    f = jnp.maximum(f + bbb_ref[...], 0.0)                # (rows2, Cf) f32

    # ---- stash into the (bh2, w2, Cf) VMEM scratch, zeroing halo positions
    #      outside the global feature map (reference RPN conv zero-pads the
    #      feature map).  Row-wise stores avoid a 2D->3D value reshape.
    col = jax.lax.broadcasted_iota(jnp.int32, (w2, 1), 0)
    col_ok = jnp.logical_and(col >= 1, col <= out_w)
    for r in range(bh2):
        gy = y0 + (r - 1)                                  # global feature row
        row_ok = jnp.logical_and(gy >= 0, gy < img_h)
        frow = f[r * w2:(r + 1) * w2, :]
        feat_ref[r] = jnp.where(jnp.logical_and(row_ok, col_ok), frow,
                                0.0).astype(feat_ref.dtype)

    feat = feat_ref[...]                                   # (bh2, w2, Cf) bf16

    # ---- RPN 3x3 conv + ReLU: single im2col matmul, K = 9*Cf ----------------
    p2 = jnp.concatenate(
        [feat[dy:dy + block_h, dx:dx + out_w, :].reshape(rows, -1)
         for dy in range(3) for dx in range(3)], axis=-1)  # (rows, 9*Cf)
    hidden = jnp.dot(p2, wrpn_ref[...], preferred_element_type=jnp.float32)
    hidden = jnp.maximum(hidden + brpn_ref[...], 0.0).astype(jnp.bfloat16)

    # ---- fused objectness / delta heads (lane-dense 128-wide matmul) -------
    heads = jnp.dot(hidden, wh_ref[...],
                    preferred_element_type=jnp.float32) + bhd_ref[...]
    logits = heads[:, 0:a]
    dxy = heads[:, a:3 * a]                                # [dx*A | dy*A]
    dwh = jnp.minimum(heads[:, 3 * a:5 * a], scale_clamp)  # [dw*A | dh*A]

    # ---- anchors generated in-kernel (no HBM anchor stream) ----------------
    pidx = jax.lax.broadcasted_iota(jnp.int32, (rows, 2 * a), 0)
    pidx = pidx.astype(jnp.float32)
    py_loc = jnp.floor((pidx + 0.5) * (1.0 / float(out_w)))  # local row index
    px = pidx - py_loc * float(out_w)                         # column index
    py = py_loc + (pl.program_id(1) * block_h).astype(jnp.float32)
    lane = jax.lax.broadcasted_iota(jnp.int32, (1, 2 * a), 1)
    centers = jnp.where(lane < a, px, py)                     # [cx*A | cy*A]
    sizes2 = jnp.full((1, 2 * a), float(anchor_sizes[0]), jnp.float32)
    for i in range(1, a):
        sizes2 = jnp.where(jnp.logical_or(lane == i, lane == a + i),
                           jnp.float32(anchor_sizes[i]), sizes2)
    lims = jnp.where(lane < a, jnp.float32(img_w), jnp.float32(img_h))

    # ---- decode + clip on coord-major slabs (full-width VPU/EUP ops) --------
    pcxy = dxy * sizes2 + centers                             # [pcx*A | pcy*A]
    pwh = jnp.exp(dwh) * sizes2                               # [pw*A  | ph*A]
    xy1 = jnp.clip(pcxy - 0.5 * pwh, 0.0, lims)               # [x1*A  | y1*A]
    xy2 = jnp.clip(pcxy + 0.5 * pwh, 0.0, lims)               # [x2*A  | y2*A]

    pieces = [logits, xy1, xy2]
    if out_lanes > 5 * a:
        pieces.append(jnp.zeros((rows, out_lanes - 5 * a), jnp.float32))
    o_ref[0] = jnp.concatenate(pieces, axis=-1)               # (rows, out_lanes)


# -----------------------------------------------------------------------------
# Pallas wrapper
# -----------------------------------------------------------------------------
def _vmem_limit_bytes():
    # v7x only has 64 MiB physical VMEM (default scoped limit 16/32 MiB
    # everywhere); derive the budget from the chip and leave headroom.
    try:
        cap = pltpu.get_tpu_info().vmem_capacity_bytes
    except Exception:
        cap = 64 * 1024 * 1024
    return int(min(cap * 3 // 4, 96 * 1024 * 1024))


def pallas_fused_rpn(bands, w_bb, b_bb, w_rpn, b_rpn, w_heads, b_heads, *,
                     out_w, num_anchors, img_h, img_w, block_h, anchor_sizes):
    n, ht, bh4, w4, cin = bands.shape
    assert bh4 == block_h + 4 and w4 == out_w + 4
    cf = w_rpn.shape[1]
    rows = block_h * out_w
    if ht > 1 and rows % 8 != 0:
        raise ValueError("block_h * W must be a multiple of 8 when tiling H")
    hw = ht * rows
    out_lanes = ((5 * num_anchors + 7) // 8) * 8

    kern = functools.partial(
        fused_rpn_kernel, block_h=block_h, out_w=out_w, num_anchors=num_anchors,
        img_h=img_h, img_w=img_w, anchor_sizes=tuple(anchor_sizes),
        out_lanes=out_lanes, scale_clamp=math.log(1000.0 / 16.0))

    # Weight/bias operands have constant index maps, so the pipeline only
    # fetches them once; their VMEM footprint is small next to the band.
    return pl.pallas_call(
        kern,
        out_shape=jax.ShapeDtypeStruct((n, hw, out_lanes), jnp.float32),
        grid=(n, ht),
        in_specs=[
            pl.BlockSpec((1, 1, bh4, w4, cin), lambda ni, i: (ni, i, 0, 0, 0)),
            pl.BlockSpec(w_bb.shape, lambda ni, i: (0, 0)),
            pl.BlockSpec(b_bb.shape, lambda ni, i: (0, 0)),
            pl.BlockSpec(w_rpn.shape, lambda ni, i: (0, 0)),
            pl.BlockSpec(b_rpn.shape, lambda ni, i: (0, 0)),
            pl.BlockSpec(w_heads.shape, lambda ni, i: (0, 0)),
            pl.BlockSpec(b_heads.shape, lambda ni, i: (0, 0)),
        ],
        out_specs=pl.BlockSpec((1, rows, out_lanes), lambda ni, i: (ni, i, 0)),
        scratch_shapes=[pltpu.VMEM((block_h + 2, out_w + 2, cf), jnp.bfloat16)],
        compiler_params=pltpu.CompilerParams(
            dimension_semantics=("parallel", "parallel"),
            vmem_limit_bytes=_vmem_limit_bytes()),
    )(bands, w_bb, b_bb, w_rpn, b_rpn, w_heads, b_heads)


# -----------------------------------------------------------------------------
# JAX glue
# -----------------------------------------------------------------------------
def make_halo_bands(x_nhwc, block_h, halo):
    """(N,H,W,C) -> (N, H//block_h, block_h+2*halo, W+2*halo, C) zero-padded
    row bands.  TODO(synk): add a W-tiling axis (halo in both H and W) for very
    wide images so rows per grid step stays ~1024 without shrinking block_h."""
    n, h, w, c = x_nhwc.shape
    assert h % block_h == 0  # TODO(synk): pad + mask padded rows before top_k
    xp = jnp.pad(x_nhwc, ((0, 0), (halo, halo), (halo, halo), (0, 0)))
    ht = h // block_h
    bands = [xp[:, i * block_h:i * block_h + block_h + 2 * halo]
             for i in range(ht)]
    return jnp.stack(bands, axis=1)


def _pick_block_h(h, w, target_rows=1024):
    """Largest divisor of H with block_h*W <= target_rows (VMEM / overhead)."""
    best = 1
    for bh in range(1, h + 1):
        if h % bh == 0 and bh * w <= target_rows:
            best = bh
    return best


def init_params(key, c_in, c_feat, num_anchors):
    assert 5 * num_anchors <= HEAD_LANES
    ks = jax.random.split(key, 4)
    p = {}
    p["w_backbone"] = jax.random.normal(ks[0], (9, c_in, c_feat), jnp.float32) * 0.01
    p["b_backbone"] = jnp.zeros((1, c_feat), jnp.float32)
    p["w_rpn"] = jax.random.normal(ks[1], (9, c_feat, c_feat), jnp.float32) * 0.01
    p["b_rpn"] = jnp.zeros((1, c_feat), jnp.float32)
    # Fused 1x1 heads, lane-padded to 128 output columns:
    #   cols [0:A)   objectness logits
    #   cols [A:5A)  deltas, coordinate-major (dx*A | dy*A | dw*A | dh*A)
    #   cols [5A:)   zero padding (keeps the head matmul lane-dense)
    # TODO(synk): detectron2's RPN delta head is per-anchor interleaved; real
    # checkpoints would need a column permutation of w_heads/b_heads.
    w_obj = jax.random.normal(ks[2], (c_feat, num_anchors), jnp.float32) * 0.01
    w_delta = jax.random.normal(ks[3], (c_feat, 4 * num_anchors), jnp.float32) * 0.01
    w_heads = jnp.zeros((c_feat, HEAD_LANES), jnp.float32)
    w_heads = w_heads.at[:, :num_anchors].set(w_obj)
    w_heads = w_heads.at[:, num_anchors:5 * num_anchors].set(w_delta)
    p["w_heads"] = w_heads
    p["b_heads"] = jnp.zeros((1, HEAD_LANES), jnp.float32)
    # detectron2 default pixel mean/std (BGR).
    p["pixel_mean"] = jnp.array([103.53, 116.28, 123.675], jnp.float32)
    p["pixel_std"] = jnp.array([1.0, 1.0, 1.0], jnp.float32)
    return p


def proposal_network_forward(images_nchw, params, *,
                             anchor_sizes=(4.0, 8.0, 16.0),
                             pre_nms_topk=50, block_h=None):
    """Inference forward of ProposalNetwork.  images: (N, C, H, W) float32."""
    n, c, h, w = images_nchw.shape
    a = len(anchor_sizes)
    hw = h * w
    cf = params["w_rpn"].shape[1]
    if block_h is None:
        block_h = _pick_block_h(h, w)

    x = jnp.transpose(images_nchw, (0, 2, 3, 1))                       # NHWC

    # 1) pixel normalization: subtract mean in f32 (exact, before the bf16
    #    cast), fold only the 1/std scale into the backbone conv weights.
    #    Zero halo padding of (x - mean) matches the reference zero-padded
    #    conv on the normalized image.
    x = x - params["pixel_mean"].reshape(1, 1, 1, c)
    inv_std = (1.0 / params["pixel_std"]).reshape(1, c, 1)
    w_bb = (params["w_backbone"] * inv_std).reshape(9 * c, cf).astype(jnp.bfloat16)
    b_bb = params["b_backbone"]
    w_rpn = params["w_rpn"].reshape(9 * cf, cf).astype(jnp.bfloat16)
    b_rpn = params["b_rpn"]
    w_heads = params["w_heads"].astype(jnp.bfloat16)
    b_heads = params["b_heads"]

    bands = make_halo_bands(x, block_h, halo=2).astype(jnp.bfloat16)

    # 2)+3) fused backbone conv + RPN conv + heads + decode/clip; features and
    #        hidden activations never leave VMEM.
    # TODO(synk): clipping uses the feature-grid size (stride-1 synthetic
    # backbone); a strided backbone would need the original image size here
    # (detector_postprocess rescaling).
    fused = pallas_fused_rpn(
        bands, w_bb, b_bb, w_rpn, b_rpn, w_heads, b_heads,
        out_w=w, num_anchors=a, img_h=h, img_w=w, block_h=block_h,
        anchor_sizes=anchor_sizes)                                     # (N,HW,16)

    m = hw * a
    obj_logits = fused[:, :, :a].reshape(n, m)
    boxes = fused[:, :, a:5 * a].reshape(n, hw, 4, a)
    boxes = jnp.transpose(boxes, (0, 1, 3, 2)).reshape(n, m, 4)

    # 4) pre-NMS top-k selection (glue)
    k = min(pre_nms_topk, m)
    topk_logits, topk_idx = jax.lax.top_k(obj_logits, k)
    topk_boxes = jnp.take_along_axis(boxes, topk_idx[:, :, None], axis=1)

    # TODO(synk): NMS (torchvision batched_nms) and detector_postprocess have
    # no clean Pallas equivalent; returning top-k pre-NMS proposals per image.
    results = []
    for i in range(n):
        results.append({
            "proposals": {
                "proposal_boxes": topk_boxes[i],
                "objectness_logits": topk_logits[i],
            }
        })
    return results


# -----------------------------------------------------------------------------
if __name__ == "__main__":
    key = jax.random.PRNGKey(0)
    k_img, k_par = jax.random.split(key)

    N, C, H, W = 2, 3, 16, 16          # small NCHW images, 3-channel (BGR)
    C_FEAT, NUM_ANCHORS = 32, 3

    images = jax.random.uniform(k_img, (N, C, H, W), jnp.float32) * 255.0
    params = init_params(k_par, C, C_FEAT, NUM_ANCHORS)

    forward = jax.jit(functools.partial(proposal_network_forward, block_h=8))
    results = forward(images, params)
    jax.block_until_ready(results[0]["proposals"]["proposal_boxes"])
    jax.block_until_ready(results[0]["proposals"]["objectness_logits"])
    jax.block_until_ready(results[1]["proposals"]["proposal_boxes"])

    assert results[0]["proposals"]["proposal_boxes"].shape == (50, 4)
    assert results[0]["proposals"]["objectness_logits"].shape == (50,)
    print("KERNEL_OK")
</pallas_src>

<mosaic_0001>
module attributes {stable_mosaic.version = 11 : i64} {
  func.func @fused_rpn_kernel(%arg0: i32, %arg1: i32, %arg2: memref<1x1x12x20x3xbf16, #tpu.memory_space<vmem>>, %arg3: memref<27x32xbf16, #tpu.memory_space<vmem>>, %arg4: memref<1x32xf32, #tpu.memory_space<vmem>>, %arg5: memref<288x32xbf16, #tpu.memory_space<vmem>>, %arg6: memref<1x32xf32, #tpu.memory_space<vmem>>, %arg7: memref<32x128xbf16, #tpu.memory_space<vmem>>, %arg8: memref<1x128xf32, #tpu.memory_space<vmem>>, %arg9: memref<1x128x16xf32, #tpu.memory_space<vmem>>, %arg10: memref<10x18x32xbf16, #tpu.memory_space<vmem>>) attributes {dimension_semantics = [#tpu.dimension_semantics<parallel>, #tpu.dimension_semantics<parallel>], iteration_bounds = array<i64: 2, 2>, scalar_prefetch = 0 : i64, scratch_operands = 1 : i64, tpu.core_type = #tpu.core_type<tc>, window_params = [{transform_indices = @transform_0, window_bounds = array<i64: 1, 1, 12, 20, 3>}, {pipeline_mode = #tpu.pipeline_mode<synchronous>, transform_indices = @transform_1, window_bounds = array<i64: 27, 32>}, {pipeline_mode = #tpu.pipeline_mode<synchronous>, transform_indices = @transform_2, window_bounds = array<i64: 1, 32>}, {pipeline_mode = #tpu.pipeline_mode<synchronous>, transform_indices = @transform_3, window_bounds = array<i64: 288, 32>}, {pipeline_mode = #tpu.pipeline_mode<synchronous>, transform_indices = @transform_4, window_bounds = array<i64: 1, 32>}, {pipeline_mode = #tpu.pipeline_mode<synchronous>, transform_indices = @transform_5, window_bounds = array<i64: 32, 128>}, {pipeline_mode = #tpu.pipeline_mode<synchronous>, transform_indices = @transform_6, window_bounds = array<i64: 1, 128>}, {transform_indices = @transform_7, window_bounds = array<i64: 1, 128, 16>}]} {
    %c8_i32 = arith.constant 8 : i32
    %0 = arith.muli %arg1, %c8_i32 : i32
    %c0 = arith.constant 0 : index
    %c0_0 = arith.constant 0 : index
    %c0_1 = arith.constant 0 : index
    %c0_2 = arith.constant 0 : index
    %c0_3 = arith.constant 0 : index
    %1 = vector.load %arg2[%c0, %c0_0, %c0_1, %c0_2, %c0_3] : memref<1x1x12x20x3xbf16, #tpu.memory_space<vmem>>, vector<1x1x12x20x3xbf16>
    %2 = vector.shape_cast %1 : vector<1x1x12x20x3xbf16> to vector<12x20x3xbf16>
    %3 = vector.extract_strided_slice %2 {offsets = [0, 0, 0], sizes = [10, 18, 3], strides = [1, 1, 1]} : vector<12x20x3xbf16> to vector<10x18x3xbf16>
    %4 = vector.shape_cast %3 : vector<10x18x3xbf16> to vector<180x3xbf16>
    %5 = vector.extract_strided_slice %2 {offsets = [0, 1, 0], sizes = [10, 18, 3], strides = [1, 1, 1]} : vector<12x20x3xbf16> to vector<10x18x3xbf16>
    %6 = vector.shape_cast %5 : vector<10x18x3xbf16> to vector<180x3xbf16>
    %7 = vector.extract_strided_slice %2 {offsets = [0, 2, 0], sizes = [10, 18, 3], strides = [1, 1, 1]} : vector<12x20x3xbf16> to vector<10x18x3xbf16>
    %8 = vector.shape_cast %7 : vector<10x18x3xbf16> to vector<180x3xbf16>
    %9 = vector.extract_strided_slice %2 {offsets = [1, 0, 0], sizes = [10, 18, 3], strides = [1, 1, 1]} : vector<12x20x3xbf16> to vector<10x18x3xbf16>
    %10 = vector.shape_cast %9 : vector<10x18x3xbf16> to vector<180x3xbf16>
    %11 = vector.extract_strided_slice %2 {offsets = [1, 1, 0], sizes = [10, 18, 3], strides = [1, 1, 1]} : vector<12x20x3xbf16> to vector<10x18x3xbf16>
    %12 = vector.shape_cast %11 : vector<10x18x3xbf16> to vector<180x3xbf16>
    %13 = vector.extract_strided_slice %2 {offsets = [1, 2, 0], sizes = [10, 18, 3], strides = [1, 1, 1]} : vector<12x20x3xbf16> to vector<10x18x3xbf16>
    %14 = vector.shape_cast %13 : vector<10x18x3xbf16> to vector<180x3xbf16>
    %15 = vector.extract_strided_slice %2 {offsets = [2, 0, 0], sizes = [10, 18, 3], strides = [1, 1, 1]} : vector<12x20x3xbf16> to vector<10x18x3xbf16>
    %16 = vector.shape_cast %15 : vector<10x18x3xbf16> to vector<180x3xbf16>
    %17 = vector.extract_strided_slice %2 {offsets = [2, 1, 0], sizes = [10, 18, 3], strides = [1, 1, 1]} : vector<12x20x3xbf16> to vector<10x18x3xbf16>
    %18 = vector.shape_cast %17 : vector<10x18x3xbf16> to vector<180x3xbf16>
    %19 = vector.extract_strided_slice %2 {offsets = [2, 2, 0], sizes = [10, 18, 3], strides = [1, 1, 1]} : vector<12x20x3xbf16> to vector<10x18x3xbf16>
    %20 = vector.shape_cast %19 : vector<10x18x3xbf16> to vector<180x3xbf16>
    %21 = tpu.concatenate %4, %6, %8, %10, %12, %14, %16, %18, %20 in 1 : vector<180x3xbf16>, vector<180x3xbf16>, vector<180x3xbf16>, vector<180x3xbf16>, vector<180x3xbf16>, vector<180x3xbf16>, vector<180x3xbf16>, vector<180x3xbf16>, vector<180x3xbf16> -> vector<180x27xbf16>
    %c0_4 = arith.constant 0 : index
    %c0_5 = arith.constant 0 : index
    %22 = vector.load %arg3[%c0_4, %c0_5] : memref<27x32xbf16, #tpu.memory_space<vmem>>, vector<27x32xbf16>
    %cst = arith.constant dense<0.000000e+00> : vector<180x32xf32>
    %23 = tpu.matmul %21, %22, %cst {dimension_numbers = #tpu.dot_dimension_numbers<[1], [0], [0], [1], [0, 0, 1, 1], [], []>} : vector<180x27xbf16>, vector<27x32xbf16>, vector<180x32xf32> -> vector<180x32xf32>
    %c0_6 = arith.constant 0 : index
    %c0_7 = arith.constant 0 : index
    %24 = vector.load %arg4[%c0_6, %c0_7] : memref<1x32xf32, #tpu.memory_space<vmem>>, vector<1x32xf32>
    %25 = vector.broadcast %24 : vector<1x32xf32> to vector<180x32xf32>
    %26 = arith.addf %23, %25 : vector<180x32xf32>
    %cst_8 = arith.constant 0.000000e+00 : f32
    %27 = vector.broadcast %cst_8 : f32 to vector<180x32xf32>
    %28 = arith.maximumf %26, %27 : vector<180x32xf32>
    %29 = tpu.iota {dimensions = array<i32: 0>} : vector<18x1xi32>
    %c1_i32 = arith.constant 1 : i32
    %30 = vector.broadcast %c1_i32 : i32 to vector<18x1xi32>
    %31 = arith.cmpi sge, %29, %30 : vector<18x1xi32>
    %c16_i32 = arith.constant 16 : i32
    %32 = vector.broadcast %c16_i32 : i32 to vector<18x1xi32>
    %33 = arith.cmpi sle, %29, %32 : vector<18x1xi32>
    %34 = arith.andi %31, %33 : vector<18x1xi1>
    %c-1_i32 = arith.constant -1 : i32
    %35 = arith.addi %0, %c-1_i32 : i32
    %c0_i32 = arith.constant 0 : i32
    %36 = arith.cmpi sge, %35, %c0_i32 : i32
    %c16_i32_9 = arith.constant 16 : i32
    %37 = arith.cmpi slt, %35, %c16_i32_9 : i32
    %38 = arith.andi %36, %37 : i1
    %39 = vector.extract_strided_slice %28 {offsets = [0, 0], sizes = [18, 32], strides = [1, 1]} : vector<180x32xf32> to vector<18x32xf32>
    %40 = vector.broadcast %38 : i1 to vector<18x1xi1>
    %41 = arith.andi %40, %34 : vector<18x1xi1>
    %cst_10 = arith.constant 0.000000e+00 : f32
    %42 = vector.shape_cast %41 : vector<18x1xi1> to vector<18x1xi1>
    %43 = vector.broadcast %42 : vector<18x1xi1> to vector<18x32xi1>
    %44 = vector.broadcast %cst_10 : f32 to vector<18x32xf32>
    %45 = arith.select %43, %39, %44 : vector<18x32xi1>, vector<18x32xf32>
    %46 = arith.truncf %45 : vector<18x32xf32> to vector<18x32xbf16>
    %c0_11 = arith.constant 0 : index
    %c0_12 = arith.constant 0 : index
    %c0_13 = arith.constant 0 : index
    %47 = vector.load %arg10[%c0_11, %c0_12, %c0_13] : memref<10x18x32xbf16, #tpu.memory_space<vmem>>, vector<1x18x32xbf16>
    %48 = vector.shape_cast %47 : vector<1x18x32xbf16> to vector<18x32xbf16>
    %49 = vector.shape_cast %46 : vector<18x32xbf16> to vector<1x18x32xbf16>
    tpu.vector_store %arg10[%c0_11, %c0_12, %c0_13], %49 {strides = array<i32>} : memref<10x18x32xbf16, #tpu.memory_space<vmem>>, vector<1x18x32xbf16>,
    %c0_i32_14 = arith.constant 0 : i32
    %50 = arith.addi %0, %c0_i32_14 : i32
    %c0_i32_15 = arith.constant 0 : i32
    %51 = arith.cmpi sge, %50, %c0_i32_15 : i32
    %c16_i32_16 = arith.constant 16 : i32
    %52 = arith.cmpi slt, %50, %c16_i32_16 : i32
    %53 = arith.andi %51, %52 : i1
    %54 = vector.extract_strided_slice %28 {offsets = [18, 0], sizes = [18, 32], strides = [1, 1]} : vector<180x32xf32> to vector<18x32xf32>
    %55 = vector.broadcast %53 : i1 to vector<18x1xi1>
    %56 = arith.andi %55, %34 : vector<18x1xi1>
    %cst_17 = arith.constant 0.000000e+00 : f32
    %57 = vector.shape_cast %56 : vector<18x1xi1> to vector<18x1xi1>
    %58 = vector.broadcast %57 : vector<18x1xi1> to vector<18x32xi1>
    %59 = vector.broadcast %cst_17 : f32 to vector<18x32xf32>
    %60 = arith.select %58, %54, %59 : vector<18x32xi1>, vector<18x32xf32>
    %61 = arith.truncf %60 : vector<18x32xf32> to vector<18x32xbf16>
    %c1 = arith.constant 1 : index
    %c0_18 = arith.constant 0 : index
    %c0_19 = arith.constant 0 : index
    %62 = vector.load %arg10[%c1, %c0_18, %c0_19] : memref<10x18x32xbf16, #tpu.memory_space<vmem>>, vector<1x18x32xbf16>
    %63 = vector.shape_cast %62 : vector<1x18x32xbf16> to vector<18x32xbf16>
    %64 = vector.shape_cast %61 : vector<18x32xbf16> to vector<1x18x32xbf16>
    tpu.vector_store %arg10[%c1, %c0_18, %c0_19], %64 {strides = array<i32>} : memref<10x18x32xbf16, #tpu.memory_space<vmem>>, vector<1x18x32xbf16>,
    %c1_i32_20 = arith.constant 1 : i32
    %65 = arith.addi %0, %c1_i32_20 : i32
    %c0_i32_21 = arith.constant 0 : i32
    %66 = arith.cmpi sge, %65, %c0_i32_21 : i32
    %c16_i32_22 = arith.constant 16 : i32
    %67 = arith.cmpi slt, %65, %c16_i32_22 : i32
    %68 = arith.andi %66, %67 : i1
    %69 = vector.extract_strided_slice %28 {offsets = [36, 0], sizes = [18, 32], strides = [1, 1]} : vector<180x32xf32> to vector<18x32xf32>
    %70 = vector.broadcast %68 : i1 to vector<18x1xi1>
    %71 = arith.andi %70, %34 : vector<18x1xi1>
    %cst_23 = arith.constant 0.000000e+00 : f32
    %72 = vector.shape_cast %71 : vector<18x1xi1> to vector<18x1xi1>
    %73 = vector.broadcast %72 : vector<18x1xi1> to vector<18x32xi1>
    %74 = vector.broadcast %cst_23 : f32 to vector<18x32xf32>
    %75 = arith.select %73, %69, %74 : vector<18x32xi1>, vector<18x32xf32>
    %76 = arith.truncf %75 : vector<18x32xf32> to vector<18x32xbf16>
    %c2 = arith.constant 2 : index
    %c0_24 = arith.constant 0 : index
    %c0_25 = arith.constant 0 : index
    %77 = vector.load %arg10[%c2, %c0_24, %c0_25] : memref<10x18x32xbf16, #tpu.memory_space<vmem>>, vector<1x18x32xbf16>
    %78 = vector.shape_cast %77 : vector<1x18x32xbf16> to vector<18x32xbf16>
    %79 = vector.shape_cast %76 : vector<18x32xbf16> to vector<1x18x32xbf16>
    tpu.vector_store %arg10[%c2, %c0_24, %c0_25], %79 {strides = array<i32>} : memref<10x18x32xbf16, #tpu.memory_space<vmem>>, vector<1x18x32xbf16>,
    %c2_i32 = arith.constant 2 : i32
    %80 = arith.addi %0, %c2_i32 : i32
    %c0_i32_26 = arith.constant 0 : i32
    %81 = arith.cmpi sge, %80, %c0_i32_26 : i32
    %c16_i32_27 = arith.constant 16 : i32
    %82 = arith.cmpi slt, %80, %c16_i32_27 : i32
    %83 = arith.andi %81, %82 : i1
    %84 = vector.extract_strided_slice %28 {offsets = [54, 0], sizes = [18, 32], strides = [1, 1]} : vector<180x32xf32> to vector<18x32xf32>
    %85 = vector.broadcast %83 : i1 to vector<18x1xi1>
    %86 = arith.andi %85, %34 : vector<18x1xi1>
    %cst_28 = arith.constant 0.000000e+00 : f32
    %87 = vector.shape_cast %86 : vector<18x1xi1> to vector<18x1xi1>
    %88 = vector.broadcast %87 : vector<18x1xi1> to vector<18x32xi1>
    %89 = vector.broadcast %cst_28 : f32 to vector<18x32xf32>
    %90 = arith.select %88, %84, %89 : vector<18x32xi1>, vector<18x32xf32>
    %91 = arith.truncf %90 : vector<18x32xf32> to vector<18x32xbf16>
    %c3 = arith.constant 3 : index
    %c0_29 = arith.constant 0 : index
    %c0_30 = arith.constant 0 : index
    %92 = vector.load %arg10[%c3, %c0_29, %c0_30] : memref<10x18x32xbf16, #tpu.memory_space<vmem>>, vector<1x18x32xbf16>
    %93 = vector.shape_cast %92 : vector<1x18x32xbf16> to vector<18x32xbf16>
    %94 = vector.shape_cast %91 : vector<18x32xbf16> to vector<1x18x32xbf16>
    tpu.vector_store %arg10[%c3, %c0_29, %c0_30], %94 {strides = array<i32>} : memref<10x18x32xbf16, #tpu.memory_space<vmem>>, vector<1x18x32xbf16>,
    %c3_i32 = arith.constant 3 : i32
    %95 = arith.addi %0, %c3_i32 : i32
    %c0_i32_31 = arith.constant 0 : i32
    %96 = arith.cmpi sge, %95, %c0_i32_31 : i32
    %c16_i32_32 = arith.constant 16 : i32
    %97 = arith.cmpi slt, %95, %c16_i32_32 : i32
    %98 = arith.andi %96, %97 : i1
    %99 = vector.extract_strided_slice %28 {offsets = [72, 0], sizes = [18, 32], strides = [1, 1]} : vector<180x32xf32> to vector<18x32xf32>
    %100 = vector.broadcast %98 : i1 to vector<18x1xi1>
    %101 = arith.andi %100, %34 : vector<18x1xi1>
    %cst_33 = arith.constant 0.000000e+00 : f32
    %102 = vector.shape_cast %101 : vector<18x1xi1> to vector<18x1xi1>
    %103 = vector.broadcast %102 : vector<18x1xi1> to vector<18x32xi1>
    %104 = vector.broadcast %cst_33 : f32 to vector<18x32xf32>
    %105 = arith.select %103, %99, %104 : vector<18x32xi1>, vector<18x32xf32>
    %106 = arith.truncf %105 : vector<18x32xf32> to vector<18x32xbf16>
    %c4 = arith.constant 4 : index
    %c0_34 = arith.constant 0 : index
    %c0_35 = arith.constant 0 : index
    %107 = vector.load %arg10[%c4, %c0_34, %c0_35] : memref<10x18x32xbf16, #tpu.memory_space<vmem>>, vector<1x18x32xbf16>
    %108 = vector.shape_cast %107 : vector<1x18x32xbf16> to vector<18x32xbf16>
    %109 = vector.shape_cast %106 : vector<18x32xbf16> to vector<1x18x32xbf16>
    tpu.vector_store %arg10[%c4, %c0_34, %c0_35], %109 {strides = array<i32>} : memref<10x18x32xbf16, #tpu.memory_space<vmem>>, vector<1x18x32xbf16>,
    %c4_i32 = arith.constant 4 : i32
    %110 = arith.addi %0, %c4_i32 : i32
    %c0_i32_36 = arith.constant 0 : i32
    %111 = arith.cmpi sge, %110, %c0_i32_36 : i32
    %c16_i32_37 = arith.constant 16 : i32
    %112 = arith.cmpi slt, %110, %c16_i32_37 : i32
    %113 = arith.andi %111, %112 : i1
    %114 = vector.extract_strided_slice %28 {offsets = [90, 0], sizes = [18, 32], strides = [1, 1]} : vector<180x32xf32> to vector<18x32xf32>
    %115 = vector.broadcast %113 : i1 to vector<18x1xi1>
    %116 = arith.andi %115, %34 : vector<18x1xi1>
    %cst_38 = arith.constant 0.000000e+00 : f32
    %117 = vector.shape_cast %116 : vector<18x1xi1> to vector<18x1xi1>
    %118 = vector.broadcast %117 : vector<18x1xi1> to vector<18x32xi1>
    %119 = vector.broadcast %cst_38 : f32 to vector<18x32xf32>
    %120 = arith.select %118, %114, %119 : vector<18x32xi1>, vector<18x32xf32>
    %121 = arith.truncf %120 : vector<18x32xf32> to vector<18x32xbf16>
    %c5 = arith.constant 5 : index
    %c0_39 = arith.constant 0 : index
    %c0_40 = arith.constant 0 : index
    %122 = vector.load %arg10[%c5, %c0_39, %c0_40] : memref<10x18x32xbf16, #tpu.memory_space<vmem>>, vector<1x18x32xbf16>
    %123 = vector.shape_cast %122 : vector<1x18x32xbf16> to vector<18x32xbf16>
    %124 = vector.shape_cast %121 : vector<18x32xbf16> to vector<1x18x32xbf16>
    tpu.vector_store %arg10[%c5, %c0_39, %c0_40], %124 {strides = array<i32>} : memref<10x18x32xbf16, #tpu.memory_space<vmem>>, vector<1x18x32xbf16>,
    %c5_i32 = arith.constant 5 : i32
    %125 = arith.addi %0, %c5_i32 : i32
    %c0_i32_41 = arith.constant 0 : i32
    %126 = arith.cmpi sge, %125, %c0_i32_41 : i32
    %c16_i32_42 = arith.constant 16 : i32
    %127 = arith.cmpi slt, %125, %c16_i32_42 : i32
    %128 = arith.andi %126, %127 : i1
    %129 = vector.extract_strided_slice %28 {offsets = [108, 0], sizes = [18, 32], strides = [1, 1]} : vector<180x32xf32> to vector<18x32xf32>
    %130 = vector.broadcast %128 : i1 to vector<18x1xi1>
    %131 = arith.andi %130, %34 : vector<18x1xi1>
    %cst_43 = arith.constant 0.000000e+00 : f32
    %132 = vector.shape_cast %131 : vector<18x1xi1> to vector<18x1xi1>
    %133 = vector.broadcast %132 : vector<18x1xi1> to vector<18x32xi1>
    %134 = vector.broadcast %cst_43 : f32 to vector<18x32xf32>
    %135 = arith.select %133, %129, %134 : vector<18x32xi1>, vector<18x32xf32>
    %136 = arith.truncf %135 : vector<18x32xf32> to vector<18x32xbf16>
    %c6 = arith.constant 6 : index
    %c0_44 = arith.constant 0 : index
    %c0_45 = arith.constant 0 : index
    %137 = vector.load %arg10[%c6, %c0_44, %c0_45] : memref<10x18x32xbf16, #tpu.memory_space<vmem>>, vector<1x18x32xbf16>
    %138 = vector.shape_cast %137 : vector<1x18x32xbf16> to vector<18x32xbf16>
    %139 = vector.shape_cast %136 : vector<18x32xbf16> to vector<1x18x32xbf16>
    tpu.vector_store %arg10[%c6, %c0_44, %c0_45], %139 {strides = array<i32>} : memref<10x18x32xbf16, #tpu.memory_space<vmem>>, vector<1x18x32xbf16>,
    %c6_i32 = arith.constant 6 : i32
    %140 = arith.addi %0, %c6_i32 : i32
    %c0_i32_46 = arith.constant 0 : i32
    %141 = arith.cmpi sge, %140, %c0_i32_46 : i32
    %c16_i32_47 = arith.constant 16 : i32
    %142 = arith.cmpi slt, %140, %c16_i32_47 : i32
    %143 = arith.andi %141, %142 : i1
    %144 = vector.extract_strided_slice %28 {offsets = [126, 0], sizes = [18, 32], strides = [1, 1]} : vector<180x32xf32> to vector<18x32xf32>
    %145 = vector.broadcast %143 : i1 to vector<18x1xi1>
    %146 = arith.andi %145, %34 : vector<18x1xi1>
    %cst_48 = arith.constant 0.000000e+00 : f32
    %147 = vector.shape_cast %146 : vector<18x1xi1> to vector<18x1xi1>
    %148 = vector.broadcast %147 : vector<18x1xi1> to vector<18x32xi1>
    %149 = vector.broadcast %cst_48 : f32 to vector<18x32xf32>
    %150 = arith.select %148, %144, %149 : vector<18x32xi1>, vector<18x32xf32>
    %151 = arith.truncf %150 : vector<18x32xf32> to vector<18x32xbf16>
    %c7 = arith.constant 7 : index
    %c0_49 = arith.constant 0 : index
    %c0_50 = arith.constant 0 : index
    %152 = vector.load %arg10[%c7, %c0_49, %c0_50] : memref<10x18x32xbf16, #tpu.memory_space<vmem>>, vector<1x18x32xbf16>
    %153 = vector.shape_cast %152 : vector<1x18x32xbf16> to vector<18x32xbf16>
    %154 = vector.shape_cast %151 : vector<18x32xbf16> to vector<1x18x32xbf16>
    tpu.vector_store %arg10[%c7, %c0_49, %c0_50], %154 {strides = array<i32>} : memref<10x18x32xbf16, #tpu.memory_space<vmem>>, vector<1x18x32xbf16>,
    %c7_i32 = arith.constant 7 : i32
    %155 = arith.addi %0, %c7_i32 : i32
    %c0_i32_51 = arith.constant 0 : i32
    %156 = arith.cmpi sge, %155, %c0_i32_51 : i32
    %c16_i32_52 = arith.constant 16 : i32
    %157 = arith.cmpi slt, %155, %c16_i32_52 : i32
    %158 = arith.andi %156, %157 : i1
    %159 = vector.extract_strided_slice %28 {offsets = [144, 0], sizes = [18, 32], strides = [1, 1]} : vector<180x32xf32> to vector<18x32xf32>
    %160 = vector.broadcast %158 : i1 to vector<18x1xi1>
    %161 = arith.andi %160, %34 : vector<18x1xi1>
    %cst_53 = arith.constant 0.000000e+00 : f32
    %162 = vector.shape_cast %161 : vector<18x1xi1> to vector<18x1xi1>
    %163 = vector.broadcast %162 : vector<18x1xi1> to vector<18x32xi1>
    %164 = vector.broadcast %cst_53 : f32 to vector<18x32xf32>
    %165 = arith.select %163, %159, %164 : vector<18x32xi1>, vector<18x32xf32>
    %166 = arith.truncf %165 : vector<18x32xf32> to vector<18x32xbf16>
    %c8 = arith.constant 8 : index
    %c0_54 = arith.constant 0 : index
    %c0_55 = arith.constant 0 : index
    %167 = vector.load %arg10[%c8, %c0_54, %c0_55] : memref<10x18x32xbf16, #tpu.memory_space<vmem>>, vector<1x18x32xbf16>
    %168 = vector.shape_cast %167 : vector<1x18x32xbf16> to vector<18x32xbf16>
    %169 = vector.shape_cast %166 : vector<18x32xbf16> to vector<1x18x32xbf16>
    tpu.vector_store %arg10[%c8, %c0_54, %c0_55], %169 {strides = array<i32>} : memref<10x18x32xbf16, #tpu.memory_space<vmem>>, vector<1x18x32xbf16>,
    %c8_i32_56 = arith.constant 8 : i32
    %170 = arith.addi %0, %c8_i32_56 : i32
    %c0_i32_57 = arith.constant 0 : i32
    %171 = arith.cmpi sge, %170, %c0_i32_57 : i32
    %c16_i32_58 = arith.constant 16 : i32
    %172 = arith.cmpi slt, %170, %c16_i32_58 : i32
    %173 = arith.andi %171, %172 : i1
    %174 = vector.extract_strided_slice %28 {offsets = [162, 0], sizes = [18, 32], strides = [1, 1]} : vector<180x32xf32> to vector<18x32xf32>
    %175 = vector.broadcast %173 : i1 to vector<18x1xi1>
    %176 = arith.andi %175, %34 : vector<18x1xi1>
    %cst_59 = arith.constant 0.000000e+00 : f32
    %177 = vector.shape_cast %176 : vector<18x1xi1> to vector<18x1xi1>
    %178 = vector.broadcast %177 : vector<18x1xi1> to vector<18x32xi1>
    %179 = vector.broadcast %cst_59 : f32 to vector<18x32xf32>
    %180 = arith.select %178, %174, %179 : vector<18x32xi1>, vector<18x32xf32>
    %181 = arith.truncf %180 : vector<18x32xf32> to vector<18x32xbf16>
    %c9 = arith.constant 9 : index
    %c0_60 = arith.constant 0 : index
    %c0_61 = arith.constant 0 : index
    %182 = vector.load %arg10[%c9, %c0_60, %c0_61] : memref<10x18x32xbf16, #tpu.memory_space<vmem>>, vector<1x18x32xbf16>
    %183 = vector.shape_cast %182 : vector<1x18x32xbf16> to vector<18x32xbf16>
    %184 = vector.shape_cast %181 : vector<18x32xbf16> to vector<1x18x32xbf16>
    tpu.vector_store %arg10[%c9, %c0_60, %c0_61], %184 {strides = array<i32>} : memref<10x18x32xbf16, #tpu.memory_space<vmem>>, vector<1x18x32xbf16>,
    %c0_62 = arith.constant 0 : index
    %c0_63 = arith.constant 0 : index
    %c0_64 = arith.constant 0 : index
    %185 = vector.load %arg10[%c0_62, %c0_63, %c0_64] : memref<10x18x32xbf16, #tpu.memory_space<vmem>>, vector<10x18x32xbf16>
    %186 = vector.extract_strided_slice %185 {offsets = [0, 0, 0], sizes = [8, 16, 32], strides = [1, 1, 1]} : vector<10x18x32xbf16> to vector<8x16x32xbf16>
    %187 = vector.shape_cast %186 : vector<8x16x32xbf16> to vector<128x32xbf16>
    %188 = vector.extract_strided_slice %185 {offsets = [0, 1, 0], sizes = [8, 16, 32], strides = [1, 1, 1]} : vector<10x18x32xbf16> to vector<8x16x32xbf16>
    %189 = vector.shape_cast %188 : vector<8x16x32xbf16> to vector<128x32xbf16>
    %190 = vector.extract_strided_slice %185 {offsets = [0, 2, 0], sizes = [8, 16, 32], strides = [1, 1, 1]} : vector<10x18x32xbf16> to vector<8x16x32xbf16>
    %191 = vector.shape_cast %190 : vector<8x16x32xbf16> to vector<128x32xbf16>
    %192 = vector.extract_strided_slice %185 {offsets = [1, 0, 0], sizes = [8, 16, 32], strides = [1, 1, 1]} : vector<10x18x32xbf16> to vector<8x16x32xbf16>
    %193 = vector.shape_cast %192 : vector<8x16x32xbf16> to vector<128x32xbf16>
    %194 = vector.extract_strided_slice %185 {offsets = [1, 1, 0], sizes = [8, 16, 32], strides = [1, 1, 1]} : vector<10x18x32xbf16> to vector<8x16x32xbf16>
    %195 = vector.shape_cast %194 : vector<8x16x32xbf16> to vector<128x32xbf16>
    %196 = vector.extract_strided_slice %185 {offsets = [1, 2, 0], sizes = [8, 16, 32], strides = [1, 1, 1]} : vector<10x18x32xbf16> to vector<8x16x32xbf16>
    %197 = vector.shape_cast %196 : vector<8x16x32xbf16> to vector<128x32xbf16>
    %198 = vector.extract_strided_slice %185 {offsets = [2, 0, 0], sizes = [8, 16, 32], strides = [1, 1, 1]} : vector<10x18x32xbf16> to vector<8x16x32xbf16>
    %199 = vector.shape_cast %198 : vector<8x16x32xbf16> to vector<128x32xbf16>
    %200 = vector.extract_strided_slice %185 {offsets = [2, 1, 0], sizes = [8, 16, 32], strides = [1, 1, 1]} : vector<10x18x32xbf16> to vector<8x16x32xbf16>
    %201 = vector.shape_cast %200 : vector<8x16x32xbf16> to vector<128x32xbf16>
    %202 = vector.extract_strided_slice %185 {offsets = [2, 2, 0], sizes = [8, 16, 32], strides = [1, 1, 1]} : vector<10x18x32xbf16> to vector<8x16x32xbf16>
    %203 = vector.shape_cast %202 : vector<8x16x32xbf16> to vector<128x32xbf16>
    %204 = tpu.concatenate %187, %189, %191, %193, %195, %197, %199, %201, %203 in 1 : vector<128x32xbf16>, vector<128x32xbf16>, vector<128x32xbf16>, vector<128x32xbf16>, vector<128x32xbf16>, vector<128x32xbf16>, vector<128x32xbf16>, vector<128x32xbf16>, vector<128x32xbf16> -> vector<128x288xbf16>
    %c0_65 = arith.constant 0 : index
    %c0_66 = arith.constant 0 : index
    %205 = vector.load %arg5[%c0_65, %c0_66] : memref<288x32xbf16, #tpu.memory_space<vmem>>, vector<288x32xbf16>
    %cst_67 = arith.constant dense<0.000000e+00> : vector<128x32xf32>
    %206 = tpu.matmul %204, %205, %cst_67 {dimension_numbers = #tpu.dot_dimension_numbers<[1], [0], [0], [1], [0, 0, 1, 1], [], []>} : vector<128x288xbf16>, vector<288x32xbf16>, vector<128x32xf32> -> vector<128x32xf32>
    %c0_68 = arith.constant 0 : index
    %c0_69 = arith.constant 0 : index
    %207 = vector.load %arg6[%c0_68, %c0_69] : memref<1x32xf32, #tpu.memory_space<vmem>>, vector<1x32xf32>
    %208 = vector.broadcast %207 : vector<1x32xf32> to vector<128x32xf32>
    %209 = arith.addf %206, %208 : vector<128x32xf32>
    %cst_70 = arith.constant 0.000000e+00 : f32
    %210 = vector.broadcast %cst_70 : f32 to vector<128x32xf32>
    %211 = arith.maximumf %209, %210 : vector<128x32xf32>
    %212 = arith.truncf %211 : vector<128x32xf32> to vector<128x32xbf16>
    %c0_71 = arith.constant 0 : index
    %c0_72 = arith.constant 0 : index
    %213 = vector.load %arg7[%c0_71, %c0_72] : memref<32x128xbf16, #tpu.memory_space<vmem>>, vector<32x128xbf16>
    %cst_73 = arith.constant dense<0.000000e+00> : vector<128x128xf32>
    %214 = tpu.matmul %212, %213, %cst_73 {dimension_numbers = #tpu.dot_dimension_numbers<[1], [0], [0], [1], [0, 0, 1, 1], [], []>} : vector<128x32xbf16>, vector<32x128xbf16>, vector<128x128xf32> -> vector<128x128xf32>
    %c0_74 = arith.constant 0 : index
    %c0_75 = arith.constant 0 : index
    %215 = vector.load %arg8[%c0_74, %c0_75] : memref<1x128xf32, #tpu.memory_space<vmem>>, vector<1x128xf32>
    %216 = vector.broadcast %215 : vector<1x128xf32> to vector<128x128xf32>
    %217 = arith.addf %214, %216 : vector<128x128xf32>
    %218 = vector.extract_strided_slice %217 {offsets = [0, 0], sizes = [128, 3], strides = [1, 1]} : vector<128x128xf32> to vector<128x3xf32>
    %219 = vector.extract_strided_slice %217 {offsets = [0, 3], sizes = [128, 6], strides = [1, 1]} : vector<128x128xf32> to vector<128x6xf32>
    %220 = vector.extract_strided_slice %217 {offsets = [0, 9], sizes = [128, 6], strides = [1, 1]} : vector<128x128xf32> to vector<128x6xf32>
    %cst_76 = arith.constant 4.13516665 : f32
    %221 = vector.broadcast %cst_76 : f32 to vector<128x6xf32>
    %222 = arith.minimumf %220, %221 : vector<128x6xf32>
    %223 = tpu.iota {dimensions = array<i32: 0>} : vector<128x6xi32>
    %224 = arith.sitofp %223 : vector<128x6xi32> to vector<128x6xf32>
    %cst_77 = arith.constant 5.000000e-01 : f32
    %225 = vector.broadcast %cst_77 : f32 to vector<128x6xf32>
    %226 = arith.addf %224, %225 : vector<128x6xf32>
    %cst_78 = arith.constant 6.250000e-02 : f32
    %227 = vector.broadcast %cst_78 : f32 to vector<128x6xf32>
    %228 = arith.mulf %226, %227 : vector<128x6xf32>
    %229 = math.floor %228 : vector<128x6xf32>
    %cst_79 = arith.constant 1.600000e+01 : f32
    %230 = vector.broadcast %cst_79 : f32 to vector<128x6xf32>
    %231 = arith.mulf %229, %230 : vector<128x6xf32>
    %232 = arith.subf %224, %231 : vector<128x6xf32>
    %c8_i32_80 = arith.constant 8 : i32
    %233 = arith.muli %arg1, %c8_i32_80 : i32
    %234 = arith.sitofp %233 : i32 to f32
    %235 = vector.broadcast %234 : f32 to vector<128x6xf32>
    %236 = arith.addf %229, %235 : vector<128x6xf32>
    %237 = tpu.iota {dimensions = array<i32: 1>} : vector<1x6xi32>
    %c3_i32_81 = arith.constant 3 : i32
    %238 = vector.broadcast %c3_i32_81 : i32 to vector<1x6xi32>
    %239 = arith.cmpi slt, %237, %238 : vector<1x6xi32>
    %240 = vector.shape_cast %239 : vector<1x6xi1> to vector<1x6xi1>
    %241 = vector.broadcast %240 : vector<1x6xi1> to vector<128x6xi1>
    %242 = arith.select %241, %232, %236 : vector<128x6xi1>, vector<128x6xf32>
    %cst_82 = arith.constant 4.000000e+00 : f32
    %243 = vector.broadcast %cst_82 : f32 to vector<1x6xf32>
    %c1_i32_83 = arith.constant 1 : i32
    %244 = vector.broadcast %c1_i32_83 : i32 to vector<1x6xi32>
    %245 = arith.cmpi eq, %237, %244 : vector<1x6xi32>
    %c4_i32_84 = arith.constant 4 : i32
    %246 = vector.broadcast %c4_i32_84 : i32 to vector<1x6xi32>
    %247 = arith.cmpi eq, %237, %246 : vector<1x6xi32>
    %248 = arith.ori %245, %247 : vector<1x6xi1>
    %cst_85 = arith.constant 8.000000e+00 : f32
    %249 = vector.broadcast %cst_85 : f32 to vector<1x6xf32>
    %250 = arith.select %248, %249, %243 : vector<1x6xi1>, vector<1x6xf32>
    %c2_i32_86 = arith.constant 2 : i32
    %251 = vector.broadcast %c2_i32_86 : i32 to vector<1x6xi32>
    %252 = arith.cmpi eq, %237, %251 : vector<1x6xi32>
    %c5_i32_87 = arith.constant 5 : i32
    %253 = vector.broadcast %c5_i32_87 : i32 to vector<1x6xi32>
    %254 = arith.cmpi eq, %237, %253 : vector<1x6xi32>
    %255 = arith.ori %252, %254 : vector<1x6xi1>
    %cst_88 = arith.constant 1.600000e+01 : f32
    %256 = vector.broadcast %cst_88 : f32 to vector<1x6xf32>
    %257 = arith.select %255, %256, %250 : vector<1x6xi1>, vector<1x6xf32>
    %c3_i32_89 = arith.constant 3 : i32
    %258 = vector.broadcast %c3_i32_89 : i32 to vector<1x6xi32>
    %259 = arith.cmpi slt, %237, %258 : vector<1x6xi32>
    %cst_90 = arith.constant 1.600000e+01 : f32
    %cst_91 = arith.constant 1.600000e+01 : f32
    %260 = vector.broadcast %cst_90 : f32 to vector<1x6xf32>
    %261 = vector.broadcast %cst_91 : f32 to vector<1x6xf32>
    %262 = arith.select %259, %260, %261 : vector<1x6xi1>, vector<1x6xf32>
    %263 = vector.broadcast %257 : vector<1x6xf32> to vector<128x6xf32>
    %264 = arith.mulf %219, %263 : vector<128x6xf32>
    %265 = arith.addf %264, %242 : vector<128x6xf32>
    %266 = math.exp %222 : vector<128x6xf32>
    %267 = vector.broadcast %257 : vector<1x6xf32> to vector<128x6xf32>
    %268 = arith.mulf %266, %267 : vector<128x6xf32>
    %cst_92 = arith.constant 5.000000e-01 : f32
    %269 = vector.broadcast %cst_92 : f32 to vector<128x6xf32>
    %270 = arith.mulf %269, %268 : vector<128x6xf32>
    %271 = arith.subf %265, %270 : vector<128x6xf32>
    %cst_93 = arith.constant 0.000000e+00 : f32
    %272 = vector.broadcast %cst_93 : f32 to vector<128x6xf32>
    %273 = arith.maximumf %272, %271 : vector<128x6xf32>
    %274 = vector.broadcast %262 : vector<1x6xf32> to vector<128x6xf32>
    %275 = arith.minimumf %274, %273 : vector<128x6xf32>
    %cst_94 = arith.constant 5.000000e-01 : f32
    %276 = vector.broadcast %cst_94 : f32 to vector<128x6xf32>
    %277 = arith.mulf %276, %268 : vector<128x6xf32>
    %278 = arith.addf %265, %277 : vector<128x6xf32>
    %cst_95 = arith.constant 0.000000e+00 : f32
    %279 = vector.broadcast %cst_95 : f32 to vector<128x6xf32>
    %280 = arith.maximumf %279, %278 : vector<128x6xf32>
    %281 = vector.broadcast %262 : vector<1x6xf32> to vector<128x6xf32>
    %282 = arith.minimumf %281, %280 : vector<128x6xf32>
    %cst_96 = arith.constant 0.000000e+00 : f32
    %283 = vector.broadcast %cst_96 : f32 to vector<128x1xf32>
    %284 = tpu.concatenate %218, %275, %282, %283 in 1 : vector<128x3xf32>, vector<128x6xf32>, vector<128x6xf32>, vector<128x1xf32> -> vector<128x16xf32>
    %c0_97 = arith.constant 0 : index
    %c0_98 = arith.constant 0 : index
    %c0_99 = arith.constant 0 : index
    %285 = vector.load %arg9[%c0_97, %c0_98, %c0_99] : memref<1x128x16xf32, #tpu.memory_space<vmem>>, vector<1x128x16xf32>
    %286 = vector.shape_cast %285 : vector<1x128x16xf32> to vector<128x16xf32>
    %287 = vector.shape_cast %284 : vector<128x16xf32> to vector<1x128x16xf32>
    tpu.vector_store %arg9[%c0_97, %c0_98, %c0_99], %287 {strides = array<i32>} : memref<1x128x16xf32, #tpu.memory_space<vmem>>, vector<1x128x16xf32>,
    return
  }
  func.func @transform_0(%arg0: i32, %arg1: i32) -> (i32, i32, i32, i32, i32) {
    %c0_i32 = arith.constant 0 : i32
    %c0_i32_0 = arith.constant 0 : i32
    %c0_i32_1 = arith.constant 0 : i32
    %c0_i32_2 = arith.constant 0 : i32
    return %arg0, %arg1, %c0_i32, %c0_i32_0, %c0_i32_1 : i32, i32, i32, i32, i32
  }
  func.func @transform_1(%arg0: i32, %arg1: i32) -> (i32, i32) {
    %c0_i32 = arith.constant 0 : i32
    %c0_i32_0 = arith.constant 0 : i32
    %c0_i32_1 = arith.constant 0 : i32
    return %c0_i32, %c0_i32_0 : i32, i32
  }
  func.func @transform_2(%arg0: i32, %arg1: i32) -> (i32, i32) {
    %c0_i32 = arith.constant 0 : i32
    %c0_i32_0 = arith.constant 0 : i32
    %c0_i32_1 = arith.constant 0 : i32
    return %c0_i32, %c0_i32_0 : i32, i32
  }
  func.func @transform_3(%arg0: i32, %arg1: i32) -> (i32, i32) {
    %c0_i32 = arith.constant 0 : i32
    %c0_i32_0 = arith.constant 0 : i32
    %c0_i32_1 = arith.constant 0 : i32
    return %c0_i32, %c0_i32_0 : i32, i32
  }
  func.func @transform_4(%arg0: i32, %arg1: i32) -> (i32, i32) {
    %c0_i32 = arith.constant 0 : i32
    %c0_i32_0 = arith.constant 0 : i32
    %c0_i32_1 = arith.constant 0 : i32
    return %c0_i32, %c0_i32_0 : i32, i32
  }
  func.func @transform_5(%arg0: i32, %arg1: i32) -> (i32, i32) {
    %c0_i32 = arith.constant 0 : i32
    %c0_i32_0 = arith.constant 0 : i32
    %c0_i32_1 = arith.constant 0 : i32
    return %c0_i32, %c0_i32_0 : i32, i32
  }
  func.func @transform_6(%arg0: i32, %arg1: i32) -> (i32, i32) {
    %c0_i32 = arith.constant 0 : i32
    %c0_i32_0 = arith.constant 0 : i32
    %c0_i32_1 = arith.constant 0 : i32
    return %c0_i32, %c0_i32_0 : i32, i32
  }
  func.func @transform_7(%arg0: i32, %arg1: i32) -> (i32, i32, i32) {
    %c0_i32 = arith.constant 0 : i32
    %c0_i32_0 = arith.constant 0 : i32
    return %arg0, %arg1, %c0_i32 : i32, i32, i32
  }
}

</mosaic_0001>

<bundles_post_ra>
// kernel: proposal_network_forward.1
= control target key start
LH: loop header
LB: loop body
LE: loop exit
PB: predicated region body
PF: predicated region fallthrough
CT: control target
= control target key end

     0   :  { %s6473_s24 = smov 0   ;;  %s6475_s25 = smov 0   ;;  %s11148_s0 = inlined_call_operand.vmem [shape: bf16[2,2,12,20,3], index: 0, kind: input, shape index: {}]   ;;  %s11149_s1 = inlined_call_operand.vmem [shape: bf16[27,32], index: 1, kind: input, shape index: {}]   ;;  %s11150_s2 = inlined_call_operand.vmem [shape: f32[1,32], index: 2, kind: input, shape index: {}]   ;;  %s11151_s3 = inlined_call_operand.vmem [shape: bf16[288,32], index: 3, kind: input, shape index: {}]   ;;  %s11152_s4 = inlined_call_operand.vmem [shape: f32[1,32], index: 4, kind: input, shape index: {}]   ;;  %s11153_s5 = inlined_call_operand.vmem [shape: bf16[32,128], index: 5, kind: input, shape index: {}]   ;;  %s11154_s6 = inlined_call_operand.vmem [shape: f32[1,128], index: 6, kind: input, shape index: {}]   ;;  %s11155_s7 = inlined_call_operand.vmem [shape: f32[2,256,16], index: 7, kind: output, shape index: {}]  }
   0x1   :  { %s6477_s26 = smov 0   ;;  %s6479_s27 = smov 0  }
   0x2   :  { %s6481_s28 = smov 0  }
   0x3 LB: > { %s26_s29 = sadd.s32 1, %s6409_s26  ;;  %s29_s30 = sadd.s32 1, %s6413_s27  ;;  %s6417_s28 = sphi %s6481_s28, %s17_s28   ;;  %s6413_s27 = sphi %s6479_s27, %s12680_s27   ;;  %s6409_s26 = sphi %s6477_s26, %s12679_s26   ;;  %s6405_s25 = sphi %s6475_s25, %s12678_s25   ;;  %s6401_s24 = sphi %s6473_s24, %s12677_s24  }
   0x4   : > { %p27_p0 = scmp.ge.s32.totalorder %s26_s29, 2  ;;  %p5957_p1 = scmp.ge.s32.totalorder %s6417_s28, 1 }
   0x5   : > { %p257_p2 = scmp.lt.s32.totalorder %s6417_s28, 5 }
   0x6   : > { %s12682_s29 = smov (%p27_p0, %s26_s29), 0  ;;  %s12684_s30 = smov (!%p27_p0, %s29_s30), %s6413_s27 }
   0x7   : > { %p258_p3 = pnand %p5957_p1, %p257_p2  ;;  %p31_p4 = scmp.ge.s32.totalorder %s12684_s30, 2 }
   0x9   : > { %s12686_s30 = smov (%p31_p4, %s12684_s30), 0  ;;  %261 = sbr.rel (%p258_p3) target bundleno = 3220 (0xc94), region = 48 }
   0xe   : > { %p297_p5 = scmp.lt.s32.totalorder %s6405_s25, 1  ;;  %p299_p6 = scmp.lt.s32.totalorder %s6401_s24, 1  ;;  %vm418_vm0 = vcmask 1041409   ;;  %vm422_vm1 = vcmask 1042434   ;;  %vm426_vm2 = vcmask 1043459   ;;  %vm414_vm3 = vcmask 1040384  }
   0xf   : > { %vm718_vm4 = vsmask.f32 256  ;;  %vm719_vm5 = vsmask.f32 1284  ;;  %vm721_vm7 = vsmask.f32 2312 }
  0x10   : > { %s12688_s25 = smov (!%p297_p5, %s6405_s25), 1  ;;  %vm720_vm6 = vmor %vm718_vm4, %vm719_vm5  ;;  %vm723_vm9 = vsmask.f32 3340  ;;  %vm725_vm11 = vsmask.f32 4368  ;;  %s6419_s16 = smov 3  }
  0x11   : > { %s300_s8 = scalar_select %p299_p6, %s6401_s24, 1  ;;  %vm722_vm8 = vmor %vm720_vm6, %vm721_vm7  ;;  %vm727_vm13 = vsmask.f32 5396  ;;  %vm729_vm15 = vsmask.f32 6424  ;;  %vm11489_vm7 = vcmask 72704  }
  0x12   : > { %s6286_s9 = smul.u32 72, %s12688_s25  ;;  %vm724_vm10 = vmor %vm722_vm8, %vm723_vm9  ;;  %vm731_vm5 = vsmask.f32 7452  ;;  %s6420_s17 = smov 6   ;;  %vm11490_vm8 = vcmask 97280   ;;  %vm11492_vm9 = vcmask 121856  }
  0x13   : > { %s6285_s10 = smul.u32 36, %s300_s8  ;;  %vm726_vm12 = vmor %vm724_vm10, %vm725_vm11  ;;  %s6421_s18 = smov 9   ;;  %vm3528_vm10 = vcmask 146432   ;;  %vm3553_vm11 = vcmask 171008  }
  0x14   : > { %vm728_vm14 = vmor %vm726_vm12, %vm727_vm13  ;;  %s6422_s19 = smov 12   ;;  %s6423_s20 = smov 15   ;;  %vm3622_vm12 = vcmask 220160   ;;  %vm3578_vm13 = vcmask 195584  }
  0x15   : > { %s303_s11 = sadd.s32 %s6286_s9, %s6285_s10  ;;  %vm730_vm4 = vmor %vm728_vm14, %vm729_vm15  ;;  %s6424_s21 = smov 18  }
  0x16   : > { %s5958_s12 = sshll.u32 %s303_s11, 2  ;;  %vm7783_vm6 = vmor %vm730_vm4, %vm731_vm5  ;;  %s6425_s22 = smov 21   ;;  %vm3781_vm5 = vcmask 257024  }
  0x17   : > { %s6513_s15 = scalar_lea.vmem %s11148_s0, %s5958_s12  ;;  %s6426_s23 = smov 24  }
  0x18   : > { %v6516_v0 = vld [vmem:[%s6513_s15] sm:$0xf]  ;;  %v6519_v1 = vld [vmem:[%s6513_s15 + $0x4] sm:$0xf]  ;;  %v6524_v2 = vld [vmem:[%s6513_s15 + $0x8] sm:$0x3] }
  0x19   : > { %1433 = vst [vmem:[#allocation1] sm:$0xff] %v6516_v0  ;;  %v6531_v5 = vld [vmem:[%s6513_s15 + $0xc] sm:$0xf]  ;;  %v6546_v11 = vld [vmem:[%s6513_s15 + $0x10] sm:$0xf]  ;;  %v11156_v35 = vrot.slane %v6524_v2, 3 }
  0x1a   : > { %1434 = vst [vmem:[#allocation1 + $0x20] sm:$0xff] %v6519_v1  ;;  %v6549_v12 = vld [vmem:[%s6513_s15 + $0x14] sm:$0x3]  ;;  %v6564_v18 = vld [vmem:[%s6513_s15 + $0x18] sm:$0xf]  ;;  %s9668_s14 = sshll.u32 %s6401_s24, 3 }
  0x1b   : > { %v6571_v21 = vld [vmem:[%s6513_s15 + $0x1c] sm:$0xf]  ;;  %v6584_v26 = vld [vmem:[%s6513_s15 + $0x20] sm:$0x3]  ;;  %v6589_v28 = vld [vmem:[%s6513_s15 + $0x24] sm:$0xf]  ;;  %v6616_v38 = vsel %vm418_vm0, %v6524_v2, %v11156_v35 }
  0x1c   : > { %v6607_v36 = vld [vmem:[%s6513_s15 + $0x28] sm:$0xf]  ;;  %v6610_v37 = vld [vmem:[%s6513_s15 + $0x2c] sm:$0x3]  ;;  %v6631_v44 = vld [vmem:[%s6513_s15 + $0x30] sm:$0xf] }
  0x1d   : > { %v6638_v47 = vld [vmem:[%s6513_s15 + $0x34] sm:$0xf]  ;;  %v6651_v52 = vld [vmem:[%s6513_s15 + $0x38] sm:$0x3]  ;;  %v6660_v56 = vld [vmem:[%s6513_s15 + $0x3c] sm:$0xf] }
  0x1e   : > { %v6673_v61 = vld [vmem:[%s6513_s15 + $0x40] sm:$0xf]  ;;  %v6680_v35 = vld [vmem:[%s6513_s15 + $0x44] sm:$0x3]  ;;  %p3786_p10 = scmp.ge.s32.totalorder %s9668_s14, 0  ;;  %p3787_p11 = scmp.lt.s32.totalorder %s9668_s14, 16 }
  0x1f   : > { %s3823_s10 = sadd.s32 1, %s9668_s14  ;;  %s3899_s8 = sadd.s32 3, %s9668_s14 }
  0x20   : > { %v6526_v3 = vld [vmem:[#allocation1 + $0x1] ss:$4 sm:$0xff]  ;;  %v6528_v4 = vld [vmem:[#allocation1 + $0x2] ss:$4 sm:$0xff]  ;;  %v6533_v6 = vld [vmem:[#allocation1 + $0x3] ss:$4 sm:$0xff]  ;;  %p9731_p12 = pnand %p3787_p11, %p3786_p10 }
  0x21   : > { %11493 = vst [vmem:[#allocation3_spill] sm:$0xff] %v6526_v3  ;;  %v6535_v7 = vld [vmem:[#allocation1 + $0x20] ss:$4 sm:$0xff]  ;;  %v6537_v8 = vld [vmem:[#allocation1 + $0x21] ss:$4 sm:$0xff]  ;;  %p9759_p13 = scmp.ge.s32.totalorder %s3823_s10, 0 }
  0x22   : > { %11494 = vst [vmem:[#allocation4_spill] sm:$0xff] %v6528_v4  ;;  %v6539_v9 = vld [vmem:[#allocation1 + $0x22] ss:$4 sm:$0xff]  ;;  %v6541_v10 = vld [vmem:[#allocation1 + $0x23] ss:$4 sm:$0xff]  ;;  %p9763_p0 = scmp.lt.s32.totalorder %s3823_s10, 16 }
  0x23   : > { %11495 = vst [vmem:[#allocation5_spill] sm:$0xff] %v6533_v6  ;;  %s6092_s9 = scalar_select %p9731_p12, 0, 1 }
  0x24   : > { %11496 = vst [vmem:[#allocation6_spill] sm:$0xff] %v6535_v7  ;;  %p3826_p1 = pnand %p9763_p0, %p9759_p13  ;;  %p9876_p5 = scmp.ge.s32.totalorder %s3899_s8, 0 }
  0x25   : > { %11497 = vst [vmem:[#allocation7_spill] sm:$0xff] %v6537_v8  ;;  %p9880_p6 = scmp.lt.s32.totalorder %s3899_s8, 16  ;;  %s4038_s8 = sadd.s32 7, %s9668_s14 }
  0x26   : > { %11498 = vst [vmem:[#allocation8_spill] sm:$0xff] %v6539_v9  ;;  %s9803_s13 = scalar_select %p3826_p1, 0, 1 }
  0x27   : > { %11499 = vst [vmem:[#allocation9_spill] sm:$0xff] %v6541_v10 }
  0x28   : > { %1449 = vst [vmem:[#allocation1] sm:$0xff] %v6524_v2 }
  0x29   : > { %1452 = vst [vmem:[#allocation1 + $0x20] sm:$0xff] %v6531_v5 }
  0x2f   : > { %v6551_v13 = vld [vmem:[#allocation1] ss:$4 sm:$0xff]  ;;  %v6553_v14 = vld [vmem:[#allocation1 + $0x1] ss:$4 sm:$0xff] }
  0x30   : > { %11500 = vst [vmem:[#allocation10_spill] sm:$0xff] %v6551_v13  ;;  %v6555_v15 = vld [vmem:[#allocation1 + $0x21] ss:$4 sm:$0xff]  ;;  %v6558_v16 = vld [vmem:[#allocation1 + $0x22] ss:$4 sm:$0xff] }
  0x31   : > { %11501 = vst [vmem:[#allocation11_spill] sm:$0xff] %v6553_v14  ;;  %v6560_v17 = vld [vmem:[#allocation1 + $0x23] ss:$4 sm:$0xff] }
  0x32   : > { %11502 = vst [vmem:[#allocation12_spill] sm:$0xff] %v6555_v15 }
  0x33   : > { %1456 = vst [vmem:[#allocation1] sm:$0xff] %v6546_v11 }
  0x34   : > { %11503 = vst [vmem:[#allocation13_spill] sm:$0xff] %v6558_v16 }
  0x35   : > { %11504 = vst [vmem:[#allocation14_spill] sm:$0xff] %v6560_v17 }
  0x36   : > { %1457 = vst [vmem:[#allocation1 + $0x20] sm:$0xff] %v6549_v12 }
  0x3a   : > { %v6566_v19 = vld [vmem:[#allocation1] ss:$4 sm:$0xff]  ;;  %v6568_v20 = vld [vmem:[#allocation1 + $0x1] ss:$4 sm:$0xff]  ;;  %v6573_v22 = vld [vmem:[#allocation1 + $0x2] ss:$4 sm:$0xff] }
  0x3b   : > { %11505 = vst [vmem:[#allocation15_spill] sm:$0xff] %v6566_v19  ;;  %v6575_v23 = vld [vmem:[#allocation1 + $0x3] ss:$4 sm:$0xff] }
  0x3c   : > { %11506 = vst [vmem:[#allocation16_spill] sm:$0xff] %v6568_v20 }
  0x3d   : > { %11507 = vst [vmem:[#allocation17_spill] sm:$0xff] %v6573_v22  ;;  %v6577_v24 = vld [vmem:[#allocation1 + $0x20] ss:$4 sm:$0xff]  ;;  %v6579_v25 = vld [vmem:[#allocation1 + $0x21] ss:$4 sm:$0xff] }
  0x3e   : > { %11508 = vst [vmem:[#allocation18_spill] sm:$0xff] %v6575_v23 }
  0x3f   : > { %11509 = vst [vmem:[#allocation19_spill] sm:$0xff] %v6577_v24 }
  0x40   : > { %11510 = vst [vmem:[#allocation20_spill] sm:$0xff] %v6579_v25 }
  0x41   : > { %1464 = vst [vmem:[#allocation1] sm:$0xff] %v6564_v18 }
  0x42   : > { %1465 = vst [vmem:[#allocation1 + $0x20] sm:$0xff] %v6571_v21 }
  0x48   : > { %v6586_v27 = vld [vmem:[#allocation1 + $0x1] ss:$4 sm:$0xff]  ;;  %v6591_v29 = vld [vmem:[#allocation1 + $0x2] ss:$4 sm:$0xff]  ;;  %v6593_v30 = vld [vmem:[#allocation1 + $0x3] ss:$4 sm:$0xff] }
  0x49   : > { %11511 = vst [vmem:[#allocation21_spill] sm:$0xff] %v6586_v27  ;;  %v6595_v31 = vld [vmem:[#allocation1 + $0x20] ss:$4 sm:$0xff]  ;;  %v6597_v32 = vld [vmem:[#allocation1 + $0x21] ss:$4 sm:$0xff] }
  0x4a   : > { %11512 = vst [vmem:[#allocation22_spill] sm:$0xff] %v6591_v29  ;;  %v6599_v33 = vld [vmem:[#allocation1 + $0x22] ss:$4 sm:$0xff]  ;;  %v6601_v34 = vld [vmem:[#allocation1 + $0x23] ss:$4 sm:$0xff] }
  0x4b   : > { %11513 = vst [vmem:[#allocation23_spill] sm:$0xff] %v6593_v30 }
  0x4c   : > { %11514 = vst [vmem:[#allocation24_spill] sm:$0xff] %v6595_v31 }
  0x4d   : > { %11515 = vst [vmem:[#allocation25_spill] sm:$0xff] %v6597_v32 }
  0x4e   : > { %11516 = vst [vmem:[#allocation26_spill] sm:$0xff] %v6599_v33 }
  0x4f   : > { %11517 = vst [vmem:[#allocation27_spill] sm:$0xff] %v6601_v34 }
  0x50   : > { %1473 = vst [vmem:[#allocation1] sm:$0xff] %v6584_v26 }
  0x51   : > { %1476 = vst [vmem:[#allocation1 + $0x20] sm:$0xff] %v6589_v28 }
  0x57   : > { %v6618_v39 = vld [vmem:[#allocation1] ss:$4 sm:$0xff]  ;;  %v6620_v40 = vld [vmem:[#allocation1 + $0x1] ss:$4 sm:$0xff] }
  0x58   : > { %11518 = vst [vmem:[#allocation28_spill] sm:$0xff] %v6618_v39  ;;  %v6622_v41 = vld [vmem:[#allocation1 + $0x21] ss:$4 sm:$0xff]  ;;  %v6624_v42 = vld [vmem:[#allocation1 + $0x22] ss:$4 sm:$0xff] }
  0x59   : > { %11519 = vst [vmem:[#allocation29_spill] sm:$0xff] %v6620_v40  ;;  %v6626_v43 = vld [vmem:[#allocation1 + $0x23] ss:$4 sm:$0xff] }
  0x5a   : > { %11520 = vst [vmem:[#allocation30_spill] sm:$0xff] %v6622_v41  ;;  %v6793_v41 = vld [vmem:[%s6513_s15 + $0x70] sm:$0xf] }
  0x5b   : > { %11521 = vst [vmem:[#allocation31_spill] sm:$0xff] %v6624_v42 }
  0x5c   : > { %11522 = vst [vmem:[#allocation32_spill] sm:$0xff] %v6626_v43 }
  0x5d   : > { %1480 = vst [vmem:[#allocation1] sm:$0xff] %v6607_v36 }
  0x5e   : > { %1481 = vst [vmem:[#allocation1 + $0x20] sm:$0xff] %v6610_v37 }
  0x64   : > { %v6633_v45 = vld [vmem:[#allocation1] ss:$4 sm:$0xff]  ;;  %v6635_v46 = vld [vmem:[#allocation1 + $0x1] ss:$4 sm:$0xff]  ;;  %v6640_v48 = vld [vmem:[#allocation1 + $0x2] ss:$4 sm:$0xff] }
  0x65   : > { %11523 = vst [vmem:[#allocation33_spill] sm:$0xff] %v6633_v45  ;;  %v6642_v49 = vld [vmem:[#allocation1 + $0x3] ss:$4 sm:$0xff]  ;;  %v6644_v50 = vld [vmem:[#allocation1 + $0x20] ss:$4 sm:$0xff] }
  0x66   : > { %11524 = vst [vmem:[#allocation34_spill] sm:$0xff] %v6635_v46  ;;  %v6646_v51 = vld [vmem:[#allocation1 + $0x21] ss:$4 sm:$0xff] }
  0x67   : > { %11525 = vst [vmem:[#allocation35_spill] sm:$0xff] %v6640_v48  ;;  %v6762_v45 = vld [vmem:[%s6513_s15 + $0x64] sm:$0xf] }
  0x68   : > { %11526 = vst [vmem:[#allocation36_spill] sm:$0xff] %v6642_v49 }
  0x69   : > { %11527 = vst [vmem:[#allocation37_spill] sm:$0xff] %v6644_v50 }
  0x6a   : > { %11528 = vst [vmem:[#allocation38_spill] sm:$0xff] %v6646_v51  ;;  %v6720_v51 = vld [vmem:[%s6513_s15 + $0x54] sm:$0xf] }
  0x6b   : > { %1488 = vst [vmem:[#allocation1] sm:$0xff] %v6631_v44 }
  0x6c   : > { %1489 = vst [vmem:[#allocation1 + $0x20] sm:$0xff] %v6638_v47 }
  0x72   : > { %v6653_v53 = vld [vmem:[#allocation1 + $0x1] ss:$4 sm:$0xff]  ;;  %v6655_v54 = vld [vmem:[#allocation1 + $0x2] ss:$4 sm:$0xff]  ;;  %v6657_v55 = vld [vmem:[#allocation1 + $0x3] ss:$4 sm:$0xff] }
  0x73   : > { %11529 = vst [vmem:[#allocation39_spill] sm:$0xff] %v6653_v53  ;;  %v6662_v57 = vld [vmem:[#allocation1 + $0x20] ss:$4 sm:$0xff]  ;;  %v6665_v58 = vld [vmem:[#allocation1 + $0x21] ss:$4 sm:$0xff] }
  0x74   : > { %11530 = vst [vmem:[#allocation40_spill] sm:$0xff] %v6655_v54  ;;  %v6667_v59 = vld [vmem:[#allocation1 + $0x22] ss:$4 sm:$0xff]  ;;  %v6669_v60 = vld [vmem:[#allocation1 + $0x23] ss:$4 sm:$0xff] }
  0x75   : > { %11531 = vst [vmem:[#allocation41_spill] sm:$0xff] %v6657_v55  ;;  %v6700_v54 = vld [vmem:[%s6513_s15 + $0x4c] sm:$0xf] }
  0x76   : > { %11532 = vst [vmem:[#allocation42_spill] sm:$0xff] %v6662_v57 }
  0x77   : > { %1497 = vst [vmem:[#allocation1] sm:$0xff] %v6651_v52 }
  0x78   : > { %11533 = vst [vmem:[#allocation43_spill] sm:$0xff] %v6665_v58 }
  0x79   : > { %11534 = vst [vmem:[#allocation44_spill] sm:$0xff] %v6667_v59 }
  0x7a   : > { %11535 = vst [vmem:[#allocation45_spill] sm:$0xff] %v6669_v60  ;;  %v6691_v60 = vld [vmem:[%s6513_s15 + $0x48] sm:$0xf] }
  0x7b   : > { %1500 = vst [vmem:[#allocation1 + $0x20] sm:$0xff] %v6660_v56 }
  0x7e   : > { %v6675_v62 = vld [vmem:[#allocation1] ss:$4 sm:$0xff]  ;;  %v6677_v63 = vld [vmem:[#allocation1 + $0x1] ss:$4 sm:$0xff] }
  0x7f   : > { %11536 = vst [vmem:[#allocation46_spill] sm:$0xff] %v6675_v62 }
  0x80   : > { %11537 = vst [vmem:[#allocation47_spill] sm:$0xff] %v6677_v63 }
  0x81   : > { %1504 = vst [vmem:[#allocation1] sm:$0xff] %v6673_v61 }
  0x82   : > { %v6683_v57 = vld [vmem:[#allocation1 + $0x21] ss:$4 sm:$0xff]  ;;  %v6685_v58 = vld [vmem:[#allocation1 + $0x22] ss:$4 sm:$0xff]  ;;  %v6687_v59 = vld [vmem:[#allocation1 + $0x23] ss:$4 sm:$0xff] }
  0x83   : > { %11538 = vst [vmem:[#allocation48_spill] sm:$0xff] %v6683_v57 }
  0x84   : > { %11539 = vst [vmem:[#allocation49_spill] sm:$0xff] %v6685_v58  ;;  %v6711_v58 = vld [vmem:[%s6513_s15 + $0x50] sm:$0x3] }
  0x85   : > { %11540 = vst [vmem:[#allocation50_spill] sm:$0xff] %v6687_v59 }
  0x86   : > { %1505 = vst [vmem:[#allocation1 + $0x20] sm:$0xff] %v6680_v35 }
  0x88   : > { %v6693_v55 = vld [vmem:[#allocation1] ss:$4 sm:$0xff]  ;;  %v6695_v62 = vld [vmem:[#allocation1 + $0x1] ss:$4 sm:$0xff]  ;;  %v6697_v63 = vld [vmem:[#allocation1 + $0x2] ss:$4 sm:$0xff] }
  0x89   : > { %11541 = vst [vmem:[#allocation51_spill] sm:$0xff] %v6693_v55  ;;  %v6702_v53 = vld [vmem:[#allocation1 + $0x3] ss:$4 sm:$0xff] }
  0x8a   : > { %11542 = vst [vmem:[#allocation52_spill] sm:$0xff] %v6695_v62 }
  0x8b   : > { %11543 = vst [vmem:[#allocation53_spill] sm:$0xff] %v6697_v63 }
  0x8c   : > { %11544 = vst [vmem:[#allocation54_spill] sm:$0xff] %v6702_v53 }
  0x8d   : > { %v6704_v57 = vld [vmem:[#allocation1 + $0x20] ss:$4 sm:$0xff]  ;;  %1512 = vst [vmem:[#allocation1] sm:$0xff] %v6691_v60  ;;  %v6707_v59 = vld [vmem:[#allocation1 + $0x21] ss:$4 sm:$0xff] }
  0x8e   : > { %11545 = vst [vmem:[#allocation55_spill] sm:$0xff] %v6704_v57 }
  0x8f   : > { %11546 = vst [vmem:[#allocation56_spill] sm:$0xff] %v6707_v59 }
  0x90   : > { %1513 = vst [vmem:[#allocation1 + $0x20] sm:$0xff] %v6700_v54 }
  0x94   : > { %v6713_v55 = vld [vmem:[#allocation1 + $0x1] ss:$4 sm:$0xff]  ;;  %v6715_v62 = vld [vmem:[#allocation1 + $0x2] ss:$4 sm:$0xff]  ;;  %v6717_v63 = vld [vmem:[#allocation1 + $0x3] ss:$4 sm:$0xff] }
  0x95   : > { %11547 = vst [vmem:[#allocation57_spill] sm:$0xff] %v6713_v55  ;;  %v6733_v55 = vld [vmem:[%s6513_s15 + $0x58] sm:$0xf] }
  0x96   : > { %11548 = vst [vmem:[#allocation58_spill] sm:$0xff] %v6715_v62 }
  0x97   : > { %11549 = vst [vmem:[#allocation59_spill] sm:$0xff] %v6717_v63  ;;  %v6722_v53 = vld [vmem:[#allocation1 + $0x20] ss:$4 sm:$0xff]  ;;  %v6725_v57 = vld [vmem:[#allocation1 + $0x21] ss:$4 sm:$0xff] }
  0x98   : > { %11550 = vst [vmem:[#allocation60_spill] sm:$0xff] %v6722_v53  ;;  %v6727_v59 = vld [vmem:[#allocation1 + $0x22] ss:$4 sm:$0xff]  ;;  %v6729_v50 = vld [vmem:[#allocation1 + $0x23] ss:$4 sm:$0xff] }
  0x99   : > { %1521 = vst [vmem:[#allocation1] sm:$0xff] %v6711_v58  ;;  %v6741_v53 = vld [vmem:[%s6513_s15 + $0x5c] sm:$0x3] }
  0x9a   : > { %11551 = vst [vmem:[#allocation61_spill] sm:$0xff] %v6725_v57 }
  0x9b   : > { %11552 = vst [vmem:[#allocation62_spill] sm:$0xff] %v6727_v59 }
  0x9c   : > { %11553 = vst [vmem:[#allocation63_spill] sm:$0xff] %v6729_v50  ;;  %v6751_v50 = vld [vmem:[%s6513_s15 + $0x60] sm:$0xf] }
  0x9d   : > { %1524 = vst [vmem:[#allocation1 + $0x20] sm:$0xff] %v6720_v51 }
  0xa0   : > { %v6735_v62 = vld [vmem:[#allocation1] ss:$4 sm:$0xff]  ;;  %v6737_v63 = vld [vmem:[#allocation1 + $0x1] ss:$4 sm:$0xff] }
  0xa1   : > { %11554 = vst [vmem:[#allocation64_spill] sm:$0xff] %v6735_v62 }
  0xa2   : > { %11555 = vst [vmem:[#allocation65_spill] sm:$0xff] %v6737_v63 }
  0xa3   : > { %1528 = vst [vmem:[#allocation1] sm:$0xff] %v6733_v55 }
  0xa4   : > { %v6743_v49 = vld [vmem:[#allocation1 + $0x21] ss:$4 sm:$0xff]  ;;  %v6745_v57 = vld [vmem:[#allocation1 + $0x22] ss:$4 sm:$0xff]  ;;  %v6747_v59 = vld [vmem:[#allocation1 + $0x23] ss:$4 sm:$0xff] }
  0xa5   : > { %11556 = vst [vmem:[#allocation66_spill] sm:$0xff] %v6743_v49  ;;  %v6771_v49 = vld [vmem:[%s6513_s15 + $0x68] sm:$0x3] }
  0xa6   : > { %11557 = vst [vmem:[#allocation67_spill] sm:$0xff] %v6745_v57 }
  0xa7   : > { %11558 = vst [vmem:[#allocation68_spill] sm:$0xff] %v6747_v59 }
  0xa8   : > { %1529 = vst [vmem:[#allocation1 + $0x20] sm:$0xff] %v6741_v53 }
  0xa9   : > { %11565 = vst [vmem:[#allocation75_spill] sm:$0xff] %v6771_v49 }
  0xaa   : > { %v6753_v48 = vld [vmem:[#allocation1] ss:$4 sm:$0xff]  ;;  %v6755_v62 = vld [vmem:[#allocation1 + $0x1] ss:$4 sm:$0xff]  ;;  %v6757_v63 = vld [vmem:[#allocation1 + $0x2] ss:$4 sm:$0xff] }
  0xab   : > { %11559 = vst [vmem:[#allocation69_spill] sm:$0xff] %v6753_v48  ;;  %v6759_v46 = vld [vmem:[#allocation1 + $0x3] ss:$4 sm:$0xff] }
  0xac   : > { %11560 = vst [vmem:[#allocation70_spill] sm:$0xff] %v6755_v62 }
  0xad   : > { %11561 = vst [vmem:[#allocation71_spill] sm:$0xff] %v6757_v63 }
  0xae   : > { %11562 = vst [vmem:[#allocation72_spill] sm:$0xff] %v6759_v46  ;;  %v6781_v46 = vld [vmem:[%s6513_s15 + $0x6c] sm:$0xf] }
  0xaf   : > { %1536 = vst [vmem:[#allocation1] sm:$0xff] %v6751_v50  ;;  %v6765_v57 = vld [vmem:[#allocation1 + $0x20] ss:$4 sm:$0xff]  ;;  %v6767_v59 = vld [vmem:[#allocation1 + $0x21] ss:$4 sm:$0xff] }
  0xb0   : > { %11563 = vst [vmem:[#allocation73_spill] sm:$0xff] %v6765_v57 }
  0xb1   : > { %11564 = vst [vmem:[#allocation74_spill] sm:$0xff] %v6767_v59 }
  0xb2   : > { %1537 = vst [vmem:[#allocation1 + $0x20] sm:$0xff] %v6762_v45 }
  0xb6   : > { %v6773_v48 = vld [vmem:[#allocation1 + $0x1] ss:$4 sm:$0xff]  ;;  %v6775_v62 = vld [vmem:[#allocation1 + $0x2] ss:$4 sm:$0xff]  ;;  %v6777_v63 = vld [vmem:[#allocation1 + $0x3] ss:$4 sm:$0xff] }
  0xb7   : > { %11566 = vst [vmem:[#allocation76_spill] sm:$0xff] %v6773_v48 }
  0xb8   : > { %11567 = vst [vmem:[#allocation77_spill] sm:$0xff] %v6775_v62 }
  0xb9   : > { %11568 = vst [vmem:[#allocation78_spill] sm:$0xff] %v6777_v63  ;;  %v6783_v43 = vld [vmem:[#allocation1 + $0x20] ss:$4 sm:$0xff]  ;;  %v6785_v57 = vld [vmem:[#allocation1 + $0x21] ss:$4 sm:$0xff] }
  0xba   : > { %1545 = vst [vmem:[#allocation1] sm:$0xff] %v6771_v49  ;;  %v6787_v59 = vld [vmem:[#allocation1 + $0x22] ss:$4 sm:$0xff]  ;;  %v6789_v42 = vld [vmem:[#allocation1 + $0x23] ss:$4 sm:$0xff] }
  0xbb   : > { %11569 = vst [vmem:[#allocation79_spill] sm:$0xff] %v6783_v43  ;;  %v6801_v63 = vld [vmem:[%s6513_s15 + $0x74] sm:$0x3] }
  0xbc   : > { %11570 = vst [vmem:[#allocation80_spill] sm:$0xff] %v6785_v57 }
  0xbd   : > { %11571 = vst [vmem:[#allocation81_spill] sm:$0xff] %v6787_v59 }
  0xbe   : > { %11572 = vst [vmem:[#allocation82_spill] sm:$0xff] %v6789_v42 }
  0xbf   : > { %1548 = vst [vmem:[#allocation1 + $0x20] sm:$0xff] %v6781_v46 }
  0xc0   : > { %11575 = vst [vmem:[#allocation85_spill] sm:$0xff] %v6801_v63 }
  0xc1   : > { %v6795_v48 = vld [vmem:[#allocation1] ss:$4 sm:$0xff]  ;;  %v6797_v62 = vld [vmem:[#allocation1 + $0x1] ss:$4 sm:$0xff] }
  0xc2   : > { %11573 = vst [vmem:[#allocation83_spill] sm:$0xff] %v6795_v48 }
  0xc3   : > { %11574 = vst [vmem:[#allocation84_spill] sm:$0xff] %v6797_v62 }
  0xc4   : > { %1552 = vst [vmem:[#allocation1] sm:$0xff] %v6793_v41 }
  0xc6   : > { %v6803_v40 = vld [vmem:[#allocation1 + $0x21] ss:$4 sm:$0xff]  ;;  %v6805_v43 = vld [vmem:[#allocation1 + $0x22] ss:$4 sm:$0xff]  ;;  %v6807_v57 = vld [vmem:[#allocation1 + $0x23] ss:$4 sm:$0xff] }
  0xc7   : > { %11576 = vst [vmem:[#allocation86_spill] sm:$0xff] %v6803_v40 }
  0xc8   : > { %11577 = vst [vmem:[#allocation87_spill] sm:$0xff] %v6805_v43 }
  0xc9   : > { %11578 = vst [vmem:[#allocation88_spill] sm:$0xff] %v6807_v57 }
  0xca   : > { %1553 = vst [vmem:[#allocation1 + $0x20] sm:$0xff] %v6801_v63 }
  0xcb   : > { %v6810_v42 = vld [vmem:[#allocation1] ss:$4 sm:$0xff]  ;;  %v6812_v59 = vld [vmem:[#allocation1 + $0x1] ss:$4 sm:$0xff]  ;;  %v6814_v39 = vld [vmem:[#allocation1 + $0x2] ss:$4 sm:$0xff] }
  0xcc   : > { %11579 = vst [vmem:[#allocation89_spill] sm:$0xff] %v6810_v42  ;;  %v6816_v48 = vld [vmem:[#allocation1 + $0x3] ss:$4 sm:$0xff] }
  0xcd   : > { %11580 = vst [vmem:[#allocation90_spill] sm:$0xff] %v6812_v59 }
  0xce   : > { %11581 = vst [vmem:[#allocation91_spill] sm:$0xff] %v6814_v39 }
  0xcf   : > { %11582 = vst [vmem:[#allocation92_spill] sm:$0xff] %v6816_v48 }
  0xd0   : > { %1666 = vst [vmem:[#allocation1] sm:$0xff] %v6531_v5 }
  0xd1   : > { %v6819_v62 = vld [vmem:[#allocation1 + $0x20] ss:$4 sm:$0xff]  ;;  %v6821_v34 = vld [vmem:[#allocation1 + $0x21] ss:$4 sm:$0xff] }
  0xd2   : > { %11583 = vst [vmem:[#allocation93_spill] sm:$0xff] %v6819_v62 }
  0xd3   : > { %11584 = vst [vmem:[#allocation94_spill] sm:$0xff] %v6821_v34 }
  0xd4   : > { %1667 = vst [vmem:[#allocation1 + $0x20] sm:$0xff] %v6546_v11 }
  0xd7   : > { %v6824_v43 = vld [vmem:[#allocation1 + $0x1] ss:$4 sm:$0xff]  ;;  %v6826_v57 = vld [vmem:[#allocation1 + $0x2] ss:$4 sm:$0xff]  ;;  %v6828_v40 = vld [vmem:[#allocation1 + $0x3] ss:$4 sm:$0xff] }
  0xd8   : > { %11585 = vst [vmem:[#allocation95_spill] sm:$0xff] %v6824_v43 }
  0xd9   : > { %11586 = vst [vmem:[#allocation96_spill] sm:$0xff] %v6826_v57 }
  0xda   : > { %11587 = vst [vmem:[#allocation97_spill] sm:$0xff] %v6828_v40 }
  0xdb   : > { %1682 = vst [vmem:[#allocation1] sm:$0xff] %v6549_v12  ;;  %v6831_v59 = vld [vmem:[#allocation1 + $0x20] ss:$4 sm:$0xff]  ;;  %v6833_v39 = vld [vmem:[#allocation1 + $0x21] ss:$4 sm:$0xff] }
  0xdc   : > { %11588 = vst [vmem:[#allocation98_spill] sm:$0xff] %v6831_v59  ;;  %v6835_v48 = vld [vmem:[#allocation1 + $0x22] ss:$4 sm:$0xff]  ;;  %v6837_v42 = vld [vmem:[#allocation1 + $0x23] ss:$4 sm:$0xff] }
  0xdd   : > { %11589 = vst [vmem:[#allocation99_spill] sm:$0xff] %v6833_v39 }
  0xde   : > { %11590 = vst [vmem:[#allocation100_spill] sm:$0xff] %v6835_v48 }
  0xdf   : > { %11591 = vst [vmem:[#allocation101_spill] sm:$0xff] %v6837_v42 }
  0xe0   : > { %1685 = vst [vmem:[#allocation1 + $0x20] sm:$0xff] %v6564_v18 }
  0xe2   : > { %v6840_v34 = vld [vmem:[#allocation1] ss:$4 sm:$0xff]  ;;  %v6842_v62 = vld [vmem:[#allocation1 + $0x1] ss:$4 sm:$0xff] }
  0xe3   : > { %11592 = vst [vmem:[#allocation102_spill] sm:$0xff] %v6840_v34 }
  0xe4   : > { %11593 = vst [vmem:[#allocation103_spill] sm:$0xff] %v6842_v62 }
  0xe5   : > { %1689 = vst [vmem:[#allocation1] sm:$0xff] %v6571_v21 }
  0xe7   : > { %v6845_v57 = vld [vmem:[#allocation1 + $0x21] ss:$4 sm:$0xff]  ;;  %v6847_v40 = vld [vmem:[#allocation1 + $0x22] ss:$4 sm:$0xff]  ;;  %v6849_v43 = vld [vmem:[#allocation1 + $0x23] ss:$4 sm:$0xff] }
  0xe8   : > { %11594 = vst [vmem:[#allocation104_spill] sm:$0xff] %v6845_v57 }
  0xe9   : > { %11595 = vst [vmem:[#allocation105_spill] sm:$0xff] %v6847_v40 }
  0xea   : > { %11596 = vst [vmem:[#allocation106_spill] sm:$0xff] %v6849_v43 }
  0xeb   : > { %1690 = vst [vmem:[#allocation1 + $0x20] sm:$0xff] %v6584_v26 }
  0xec   : > { %v6852_v39 = vld [vmem:[#allocation1] ss:$4 sm:$0xff]  ;;  %v6854_v48 = vld [vmem:[#allocation1 + $0x1] ss:$4 sm:$0xff]  ;;  %v6856_v42 = vld [vmem:[#allocation1 + $0x2] ss:$4 sm:$0xff] }
  0xed   : > { %11597 = vst [vmem:[#allocation107_spill] sm:$0xff] %v6852_v39  ;;  %v6858_v59 = vld [vmem:[#allocation1 + $0x3] ss:$4 sm:$0xff] }
  0xee   : > { %11598 = vst [vmem:[#allocation108_spill] sm:$0xff] %v6854_v48 }
  0xef   : > { %11599 = vst [vmem:[#allocation109_spill] sm:$0xff] %v6856_v42 }
  0xf0   : > { %11600 = vst [vmem:[#allocation110_spill] sm:$0xff] %v6858_v59 }
  0xf1   : > { %1697 = vst [vmem:[#allocation1] sm:$0xff] %v6589_v28 }
  0xf2   : > { %v6861_v62 = vld [vmem:[#allocation1 + $0x20] ss:$4 sm:$0xff]  ;;  %v6863_v34 = vld [vmem:[#allocation1 + $0x21] ss:$4 sm:$0xff] }
  0xf3   : > { %11601 = vst [vmem:[#allocation111_spill] sm:$0xff] %v6861_v62 }
  0xf4   : > { %11602 = vst [vmem:[#allocation112_spill] sm:$0xff] %v6863_v34 }
  0xf5   : > { %1698 = vst [vmem:[#allocation1 + $0x20] sm:$0xff] %v6607_v36 }
  0xf8   : > { %v6866_v40 = vld [vmem:[#allocation1 + $0x1] ss:$4 sm:$0xff]  ;;  %v6868_v43 = vld [vmem:[#allocation1 + $0x2] ss:$4 sm:$0xff]  ;;  %v6870_v57 = vld [vmem:[#allocation1 + $0x3] ss:$4 sm:$0xff] }
  0xf9   : > { %11603 = vst [vmem:[#allocation113_spill] sm:$0xff] %v6866_v40 }
  0xfa   : > { %11604 = vst [vmem:[#allocation114_spill] sm:$0xff] %v6868_v43 }
  0xfb   : > { %11605 = vst [vmem:[#allocation115_spill] sm:$0xff] %v6870_v57 }
  0xfc   : > { %1706 = vst [vmem:[#allocation1] sm:$0xff] %v6610_v37  ;;  %v6873_v48 = vld [vmem:[#allocation1 + $0x20] ss:$4 sm:$0xff]  ;;  %v6875_v42 = vld [vmem:[#allocation1 + $0x21] ss:$4 sm:$0xff] }
  0xfd   : > { %11606 = vst [vmem:[#allocation116_spill] sm:$0xff] %v6873_v48  ;;  %v6877_v59 = vld [vmem:[#allocation1 + $0x22] ss:$4 sm:$0xff]  ;;  %v6879_v39 = vld [vmem:[#allocation1 + $0x23] ss:$4 sm:$0xff] }
  0xfe   : > { %11607 = vst [vmem:[#allocation117_spill] sm:$0xff] %v6875_v42 }
  0xff   : > { %11608 = vst [vmem:[#allocation118_spill] sm:$0xff] %v6877_v59 }
 0x100   : > { %11609 = vst [vmem:[#allocation119_spill] sm:$0xff] %v6879_v39 }
 0x101   : > { %1709 = vst [vmem:[#allocation1 + $0x20] sm:$0xff] %v6631_v44 }
 0x103   : > { %v6882_v34 = vld [vmem:[#allocation1] ss:$4 sm:$0xff]  ;;  %v6884_v62 = vld [vmem:[#allocation1 + $0x1] ss:$4 sm:$0xff] }
 0x104   : > { %11610 = vst [vmem:[#allocation120_spill] sm:$0xff] %v6882_v34 }
 0x105   : > { %11611 = vst [vmem:[#allocation121_spill] sm:$0xff] %v6884_v62 }
 0x106   : > { %1713 = vst [vmem:[#allocation1] sm:$0xff] %v6638_v47 }
 0x108   : > { %v6887_v43 = vld [vmem:[#allocation1 + $0x21] ss:$4 sm:$0xff]  ;;  %v6889_v57 = vld [vmem:[#allocation1 + $0x22] ss:$4 sm:$0xff]  ;;  %v6891_v40 = vld [vmem:[#allocation1 + $0x23] ss:$4 sm:$0xff] }
 0x109   : > { %11612 = vst [vmem:[#allocation122_spill] sm:$0xff] %v6887_v43 }
 0x10a   : > { %11613 = vst [vmem:[#allocation123_spill] sm:$0xff] %v6889_v57 }
 0x10b   : > { %11614 = vst [vmem:[#allocation124_spill] sm:$0xff] %v6891_v40 }
 0x10c   : > { %1714 = vst [vmem:[#allocation1 + $0x20] sm:$0xff] %v6651_v52 }
 0x10d   : > { %v6894_v42 = vld [vmem:[#allocation1] ss:$4 sm:$0xff]  ;;  %v6896_v59 = vld [vmem:[#allocation1 + $0x1] ss:$4 sm:$0xff]  ;;  %v6898_v39 = vld [vmem:[#allocation1 + $0x2] ss:$4 sm:$0xff] }
 0x10e   : > { %11615 = vst [vmem:[#allocation125_spill] sm:$0xff] %v6894_v42  ;;  %v6900_v48 = vld [vmem:[#allocation1 + $0x3] ss:$4 sm:$0xff] }
 0x10f   : > { %11616 = vst [vmem:[#allocation126_spill] sm:$0xff] %v6896_v59 }
 0x110   : > { %11617 = vst [vmem:[#allocation127_spill] sm:$0xff] %v6898_v39 }
 0x111   : > { %11618 = vst [vmem:[#allocation128_spill] sm:$0xff] %v6900_v48 }
 0x112   : > { %1721 = vst [vmem:[#allocation1] sm:$0xff] %v6660_v56 }
 0x113   : > { %v6903_v62 = vld [vmem:[#allocation1 + $0x20] ss:$4 sm:$0xff]  ;;  %v6905_v34 = vld [vmem:[#allocation1 + $0x21] ss:$4 sm:$0xff] }
 0x114   : > { %11619 = vst [vmem:[#allocation129_spill] sm:$0xff] %v6903_v62 }
 0x115   : > { %11620 = vst [vmem:[#allocation130_spill] sm:$0xff] %v6905_v34 }
 0x116   : > { %1722 = vst [vmem:[#allocation1 + $0x20] sm:$0xff] %v6673_v61 }
 0x119   : > { %v6908_v57 = vld [vmem:[#allocation1 + $0x1] ss:$4 sm:$0xff]  ;;  %v6910_v40 = vld [vmem:[#allocation1 + $0x2] ss:$4 sm:$0xff]  ;;  %v6912_v43 = vld [vmem:[#allocation1 + $0x3] ss:$4 sm:$0xff] }
 0x11a   : > { %11621 = vst [vmem:[#allocation131_spill] sm:$0xff] %v6908_v57 }
 0x11b   : > { %11622 = vst [vmem:[#allocation132_spill] sm:$0xff] %v6910_v40 }
 0x11c   : > { %11623 = vst [vmem:[#allocation133_spill] sm:$0xff] %v6912_v43 }
 0x11d   : > { %1730 = vst [vmem:[#allocation1] sm:$0xff] %v6680_v35  ;;  %v6915_v59 = vld [vmem:[#allocation1 + $0x20] ss:$4 sm:$0xff]  ;;  %v6917_v39 = vld [vmem:[#allocation1 + $0x21] ss:$4 sm:$0xff] }
 0x11e   : > { %11624 = vst [vmem:[#allocation134_spill] sm:$0xff] %v6915_v59  ;;  %v6919_v48 = vld [vmem:[#allocation1 + $0x22] ss:$4 sm:$0xff]  ;;  %v6921_v42 = vld [vmem:[#allocation1 + $0x23] ss:$4 sm:$0xff] }
 0x11f   : > { %11625 = vst [vmem:[#allocation135_spill] sm:$0xff] %v6917_v39 }
 0x120   : > { %11626 = vst [vmem:[#allocation136_spill] sm:$0xff] %v6919_v48 }
 0x121   : > { %11627 = vst [vmem:[#allocation137_spill] sm:$0xff] %v6921_v42 }
 0x122   : > { %1733 = vst [vmem:[#allocation1 + $0x20] sm:$0xff] %v6691_v60 }
 0x124   : > { %v6924_v34 = vld [vmem:[#allocation1] ss:$4 sm:$0xff]  ;;  %v6926_v62 = vld [vmem:[#allocation1 + $0x1] ss:$4 sm:$0xff] }
 0x125   : > { %11628 = vst [vmem:[#allocation138_spill] sm:$0xff] %v6924_v34 }
 0x126   : > { %11629 = vst [vmem:[#allocation139_spill] sm:$0xff] %v6926_v62 }
 0x127   : > { %1737 = vst [vmem:[#allocation1] sm:$0xff] %v6700_v54 }
 0x129   : > { %v6929_v40 = vld [vmem:[#allocation1 + $0x21] ss:$4 sm:$0xff]  ;;  %v6931_v43 = vld [vmem:[#allocation1 + $0x22] ss:$4 sm:$0xff]  ;;  %v6933_v57 = vld [vmem:[#allocation1 + $0x23] ss:$4 sm:$0xff] }
 0x12a   : > { %11630 = vst [vmem:[#allocation140_spill] sm:$0xff] %v6929_v40 }
 0x12b   : > { %11631 = vst [vmem:[#allocation141_spill] sm:$0xff] %v6931_v43 }
 0x12c   : > { %11632 = vst [vmem:[#allocation142_spill] sm:$0xff] %v6933_v57 }
 0x12d   : > { %1738 = vst [vmem:[#allocation1 + $0x20] sm:$0xff] %v6711_v58 }
 0x12e   : > { %v6936_v39 = vld [vmem:[#allocation1] ss:$4 sm:$0xff]  ;;  %v6938_v48 = vld [vmem:[#allocation1 + $0x1] ss:$4 sm:$0xff]  ;;  %v6940_v42 = vld [vmem:[#allocation1 + $0x2] ss:$4 sm:$0xff] }
 0x12f   : > { %11633 = vst [vmem:[#allocation143_spill] sm:$0xff] %v6936_v39  ;;  %v6942_v59 = vld [vmem:[#allocation1 + $0x3] ss:$4 sm:$0xff] }
 0x130   : > { %11634 = vst [vmem:[#allocation144_spill] sm:$0xff] %v6938_v48 }
 0x131   : > { %11635 = vst [vmem:[#allocation145_spill] sm:$0xff] %v6940_v42 }
 0x132   : > { %11636 = vst [vmem:[#allocation146_spill] sm:$0xff] %v6942_v59 }
 0x133   : > { %1745 = vst [vmem:[#allocation1] sm:$0xff] %v6720_v51 }
 0x134   : > { %v6945_v62 = vld [vmem:[#allocation1 + $0x20] ss:$4 sm:$0xff]  ;;  %v6947_v34 = vld [vmem:[#allocation1 + $0x21] ss:$4 sm:$0xff] }
 0x135   : > { %11637 = vst [vmem:[#allocation147_spill] sm:$0xff] %v6945_v62 }
 0x136   : > { %11638 = vst [vmem:[#allocation148_spill] sm:$0xff] %v6947_v34 }
 0x137   : > { %1746 = vst [vmem:[#allocation1 + $0x20] sm:$0xff] %v6733_v55 }
 0x13a   : > { %v6950_v43 = vld [vmem:[#allocation1 + $0x1] ss:$4 sm:$0xff]  ;;  %v6952_v57 = vld [vmem:[#allocation1 + $0x2] ss:$4 sm:$0xff]  ;;  %v6954_v40 = vld [vmem:[#allocation1 + $0x3] ss:$4 sm:$0xff] }
 0x13b   : > { %11639 = vst [vmem:[#allocation149_spill] sm:$0xff] %v6950_v43  ;;  %v7012_v43 = vld [vmem:[%s6513_s15 + $0x7c] sm:$0xf] }
 0x13c   : > { %11640 = vst [vmem:[#allocation150_spill] sm:$0xff] %v6952_v57 }
 0x13d   : > { %11641 = vst [vmem:[#allocation151_spill] sm:$0xff] %v6954_v40 }
 0x13e   : > { %1754 = vst [vmem:[#allocation1] sm:$0xff] %v6741_v53  ;;  %v6957_v48 = vld [vmem:[#allocation1 + $0x20] ss:$4 sm:$0xff]  ;;  %v6959_v42 = vld [vmem:[#allocation1 + $0x21] ss:$4 sm:$0xff] }
 0x13f   : > { %11642 = vst [vmem:[#allocation152_spill] sm:$0xff] %v6957_v48  ;;  %v6961_v59 = vld [vmem:[#allocation1 + $0x22] ss:$4 sm:$0xff]  ;;  %v6963_v39 = vld [vmem:[#allocation1 + $0x23] ss:$4 sm:$0xff] }
 0x140   : > { %11643 = vst [vmem:[#allocation153_spill] sm:$0xff] %v6959_v42 }
 0x141   : > { %11644 = vst [vmem:[#allocation154_spill] sm:$0xff] %v6961_v59 }
 0x142   : > { %11645 = vst [vmem:[#allocation155_spill] sm:$0xff] %v6963_v39 }
 0x143   : > { %1757 = vst [vmem:[#allocation1 + $0x20] sm:$0xff] %v6751_v50 }
 0x144   : > { %11665 = vst [vmem:[#allocation175_spill] sm:$0xff] %v7012_v43 }
 0x145   : > { %v6966_v34 = vld [vmem:[#allocation1] ss:$4 sm:$0xff]  ;;  %v6968_v62 = vld [vmem:[#allocation1 + $0x1] ss:$4 sm:$0xff] }
 0x146   : > { %11646 = vst [vmem:[#allocation156_spill] sm:$0xff] %v6966_v34 }
 0x147   : > { %11647 = vst [vmem:[#allocation157_spill] sm:$0xff] %v6968_v62 }
 0x148   : > { %1761 = vst [vmem:[#allocation1] sm:$0xff] %v6762_v45 }
 0x14a   : > { %v6971_v57 = vld [vmem:[#allocation1 + $0x21] ss:$4 sm:$0xff]  ;;  %v6973_v40 = vld [vmem:[#allocation1 + $0x22] ss:$4 sm:$0xff]  ;;  %v6975_v48 = vld [vmem:[#allocation1 + $0x23] ss:$4 sm:$0xff] }
 0x14b   : > { %11648 = vst [vmem:[#allocation158_spill] sm:$0xff] %v6971_v57 }
 0x14c   : > { %11649 = vst [vmem:[#allocation159_spill] sm:$0xff] %v6973_v40 }
 0x14d   : > { %11650 = vst [vmem:[#allocation160_spill] sm:$0xff] %v6975_v48 }
 0x14e   : > { %1762 = vst [vmem:[#allocation1 + $0x20] sm:$0xff] %v6771_v49 }
 0x14f   : > { %v6978_v59 = vld [vmem:[#allocation1] ss:$4 sm:$0xff]  ;;  %v6980_v39 = vld [vmem:[#allocation1 + $0x1] ss:$4 sm:$0xff]  ;;  %v6982_v42 = vld [vmem:[#allocation1 + $0x2] ss:$4 sm:$0xff] }
 0x150   : > { %11651 = vst [vmem:[#allocation161_spill] sm:$0xff] %v6978_v59  ;;  %v6984_v34 = vld [vmem:[#allocation1 + $0x3] ss:$4 sm:$0xff] }
 0x151   : > { %11652 = vst [vmem:[#allocation162_spill] sm:$0xff] %v6980_v39 }
 0x152   : > { %11653 = vst [vmem:[#allocation163_spill] sm:$0xff] %v6982_v42  ;;  %v7000_v42 = vld [vmem:[%s6513_s15 + $0x78] sm:$0xf] }
 0x153   : > { %11654 = vst [vmem:[#allocation164_spill] sm:$0xff] %v6984_v34 }
 0x154   : > { %1769 = vst [vmem:[#allocation1] sm:$0xff] %v6781_v46 }
 0x155   : > { %v6987_v62 = vld [vmem:[#allocation1 + $0x20] ss:$4 sm:$0xff]  ;;  %v6989_v57 = vld [vmem:[#allocation1 + $0x21] ss:$4 sm:$0xff]  ;;  %11660 = vst [vmem:[#allocation170_spill] sm:$0xff] %v7000_v42 }
 0x156   : > { %11655 = vst [vmem:[#allocation165_spill] sm:$0xff] %v6987_v62 }
 0x157   : > { %11656 = vst [vmem:[#allocation166_spill] sm:$0xff] %v6989_v57 }
 0x158   : > { %1770 = vst [vmem:[#allocation1 + $0x20] sm:$0xff] %v6793_v41 }
 0x15b   : > { %v6992_v48 = vld [vmem:[#allocation1 + $0x1] ss:$4 sm:$0xff]  ;;  %v6994_v40 = vld [vmem:[#allocation1 + $0x2] ss:$4 sm:$0xff]  ;;  %v6996_v59 = vld [vmem:[#allocation1 + $0x3] ss:$4 sm:$0xff] }
 0x15c   : > { %11657 = vst [vmem:[#allocation167_spill] sm:$0xff] %v6992_v48 }
 0x15d   : > { %11658 = vst [vmem:[#allocation168_spill] sm:$0xff] %v6994_v40 }
 0x15e   : > { %11659 = vst [vmem:[#allocation169_spill] sm:$0xff] %v6996_v59  ;;  %v7020_v59 = vld [vmem:[%s6513_s15 + $0x80] sm:$0x3] }
 0x15f   : > { %1778 = vst [vmem:[#allocation1] sm:$0xff] %v6801_v63  ;;  %v7002_v34 = vld [vmem:[#allocation1 + $0x20] ss:$4 sm:$0xff]  ;;  %v7004_v39 = vld [vmem:[#allocation1 + $0x21] ss:$4 sm:$0xff] }
 0x160   : > { %11661 = vst [vmem:[#allocation171_spill] sm:$0xff] %v7002_v34  ;;  %v7006_v62 = vld [vmem:[#allocation1 + $0x22] ss:$4 sm:$0xff]  ;;  %v7008_v57 = vld [vmem:[#allocation1 + $0x23] ss:$4 sm:$0xff] }
 0x161   : > { %11662 = vst [vmem:[#allocation172_spill] sm:$0xff] %v7004_v39 }
 0x162   : > { %11663 = vst [vmem:[#allocation173_spill] sm:$0xff] %v7006_v62 }
 0x163   : > { %11664 = vst [vmem:[#allocation174_spill] sm:$0xff] %v7008_v57 }
 0x164   : > { %1781 = vst [vmem:[#allocation1 + $0x20] sm:$0xff] %v7000_v42 }
 0x165   : > { %11668 = vst [vmem:[#allocation178_spill] sm:$0xff] %v7020_v59 }
 0x166   : > { %v7014_v48 = vld [vmem:[#allocation1] ss:$4 sm:$0xff]  ;;  %v7016_v40 = vld [vmem:[#allocation1 + $0x1] ss:$4 sm:$0xff] }
 0x167   : > { %11666 = vst [vmem:[#allocation176_spill] sm:$0xff] %v7014_v48 }
 0x168   : > { %11667 = vst [vmem:[#allocation177_spill] sm:$0xff] %v7016_v40 }
 0x169   : > { %1785 = vst [vmem:[#allocation1] sm:$0xff] %v7012_v43 }
 0x16b   : > { %v7022_v33 = vld [vmem:[#allocation1 + $0x21] ss:$4 sm:$0xff]  ;;  %v7024_v34 = vld [vmem:[#allocation1 + $0x22] ss:$4 sm:$0xff]  ;;  %v7026_v39 = vld [vmem:[#allocation1 + $0x23] ss:$4 sm:$0xff] }
 0x16c   : > { %11669 = vst [vmem:[#allocation179_spill] sm:$0xff] %v7022_v33 }
 0x16d   : > { %11670 = vst [vmem:[#allocation180_spill] sm:$0xff] %v7024_v34 }
 0x16e   : > { %11671 = vst [vmem:[#allocation181_spill] sm:$0xff] %v7026_v39 }
 0x16f   : > { %1786 = vst [vmem:[#allocation1 + $0x20] sm:$0xff] %v7020_v59 }
 0x170   : > { %v7029_v57 = vld [vmem:[#allocation1] ss:$4 sm:$0xff]  ;;  %v7031_v62 = vld [vmem:[#allocation1 + $0x1] ss:$4 sm:$0xff]  ;;  %v7033_v32 = vld [vmem:[#allocation1 + $0x2] ss:$4 sm:$0xff] }
 0x171   : > { %11672 = vst [vmem:[#allocation182_spill] sm:$0xff] %v7029_v57  ;;  %v7035_v48 = vld [vmem:[#allocation1 + $0x3] ss:$4 sm:$0xff] }
 0x172   : > { %11673 = vst [vmem:[#allocation183_spill] sm:$0xff] %v7031_v62 }
 0x173   : > { %11674 = vst [vmem:[#allocation184_spill] sm:$0xff] %v7033_v32 }
 0x174   : > { %11675 = vst [vmem:[#allocation185_spill] sm:$0xff] %v7035_v48 }
 0x175   : > { %1899 = vst [vmem:[#allocation1] sm:$0xff] %v6564_v18 }
 0x176   : > { %v7038_v40 = vld [vmem:[#allocation1 + $0x20] ss:$4 sm:$0xff]  ;;  %v7040_v31 = vld [vmem:[#allocation1 + $0x21] ss:$4 sm:$0xff] }
 0x177   : > { %11676 = vst [vmem:[#allocation186_spill] sm:$0xff] %v7038_v40 }
 0x178   : > { %11677 = vst [vmem:[#allocation187_spill] sm:$0xff] %v7040_v31 }
 0x179   : > { %1900 = vst [vmem:[#allocation1 + $0x20] sm:$0xff] %v6571_v21 }
 0x17c   : > { %v7043_v34 = vld [vmem:[#allocation1 + $0x1] ss:$4 sm:$0xff]  ;;  %v7045_v39 = vld [vmem:[#allocation1 + $0x2] ss:$4 sm:$0xff]  ;;  %v7047_v33 = vld [vmem:[#allocation1 + $0x3] ss:$4 sm:$0xff] }
 0x17d   : > { %11678 = vst [vmem:[#allocation188_spill] sm:$0xff] %v7043_v34 }
 0x17e   : > { %11679 = vst [vmem:[#allocation189_spill] sm:$0xff] %v7045_v39 }
 0x17f   : > { %11680 = vst [vmem:[#allocation190_spill] sm:$0xff] %v7047_v33 }
 0x180   : > { %1915 = vst [vmem:[#allocation1] sm:$0xff] %v6584_v26  ;;  %v7050_v62 = vld [vmem:[#allocation1 + $0x20] ss:$4 sm:$0xff]  ;;  %v7052_v32 = vld [vmem:[#allocation1 + $0x21] ss:$4 sm:$0xff] }
 0x181   : > { %11681 = vst [vmem:[#allocation191_spill] sm:$0xff] %v7050_v62  ;;  %v7054_v48 = vld [vmem:[#allocation1 + $0x22] ss:$4 sm:$0xff]  ;;  %v7056_v57 = vld [vmem:[#allocation1 + $0x23] ss:$4 sm:$0xff] }
 0x182   : > { %11682 = vst [vmem:[#allocation192_spill] sm:$0xff] %v7052_v32 }
 0x183   : > { %11683 = vst [vmem:[#allocation193_spill] sm:$0xff] %v7054_v48 }
 0x184   : > { %11684 = vst [vmem:[#allocation194_spill] sm:$0xff] %v7056_v57 }
 0x185   : > { %1918 = vst [vmem:[#allocation1 + $0x20] sm:$0xff] %v6589_v28 }
 0x187   : > { %v7059_v31 = vld [vmem:[#allocation1] ss:$4 sm:$0xff]  ;;  %v7061_v40 = vld [vmem:[#allocation1 + $0x1] ss:$4 sm:$0xff] }
 0x188   : > { %11685 = vst [vmem:[#allocation195_spill] sm:$0xff] %v7059_v31 }
 0x189   : > { %11686 = vst [vmem:[#allocation196_spill] sm:$0xff] %v7061_v40 }
 0x18a   : > { %1922 = vst [vmem:[#allocation1] sm:$0xff] %v6607_v36 }
 0x18c   : > { %v7064_v39 = vld [vmem:[#allocation1 + $0x21] ss:$4 sm:$0xff]  ;;  %v7066_v33 = vld [vmem:[#allocation1 + $0x22] ss:$4 sm:$0xff]  ;;  %v7068_v34 = vld [vmem:[#allocation1 + $0x23] ss:$4 sm:$0xff] }
 0x18d   : > { %11687 = vst [vmem:[#allocation197_spill] sm:$0xff] %v7064_v39 }
 0x18e   : > { %11688 = vst [vmem:[#allocation198_spill] sm:$0xff] %v7066_v33 }
 0x18f   : > { %11689 = vst [vmem:[#allocation199_spill] sm:$0xff] %v7068_v34 }
 0x190   : > { %1923 = vst [vmem:[#allocation1 + $0x20] sm:$0xff] %v6610_v37 }
 0x191   : > { %v7071_v32 = vld [vmem:[#allocation1] ss:$4 sm:$0xff]  ;;  %v7073_v48 = vld [vmem:[#allocation1 + $0x1] ss:$4 sm:$0xff]  ;;  %v7075_v57 = vld [vmem:[#allocation1 + $0x2] ss:$4 sm:$0xff] }
 0x192   : > { %11690 = vst [vmem:[#allocation200_spill] sm:$0xff] %v7071_v32  ;;  %v7077_v62 = vld [vmem:[#allocation1 + $0x3] ss:$4 sm:$0xff] }
 0x193   : > { %11691 = vst [vmem:[#allocation201_spill] sm:$0xff] %v7073_v48 }
 0x194   : > { %11692 = vst [vmem:[#allocation202_spill] sm:$0xff] %v7075_v57 }
 0x195   : > { %11693 = vst [vmem:[#allocation203_spill] sm:$0xff] %v7077_v62 }
 0x196   : > { %1930 = vst [vmem:[#allocation1] sm:$0xff] %v6631_v44 }
 0x197   : > { %v7080_v40 = vld [vmem:[#allocation1 + $0x20] ss:$4 sm:$0xff]  ;;  %v7082_v31 = vld [vmem:[#allocation1 + $0x21] ss:$4 sm:$0xff] }
 0x198   : > { %11694 = vst [vmem:[#allocation204_spill] sm:$0xff] %v7080_v40 }
 0x199   : > { %11695 = vst [vmem:[#allocation205_spill] sm:$0xff] %v7082_v31 }
 0x19a   : > { %1931 = vst [vmem:[#allocation1 + $0x20] sm:$0xff] %v6638_v47 }
 0x19d   : > { %v7085_v33 = vld [vmem:[#allocation1 + $0x1] ss:$4 sm:$0xff]  ;;  %v7087_v34 = vld [vmem:[#allocation1 + $0x2] ss:$4 sm:$0xff]  ;;  %v7089_v39 = vld [vmem:[#allocation1 + $0x3] ss:$4 sm:$0xff] }
 0x19e   : > { %11696 = vst [vmem:[#allocation206_spill] sm:$0xff] %v7085_v33 }
 0x19f   : > { %11697 = vst [vmem:[#allocation207_spill] sm:$0xff] %v7087_v34 }
 0x1a0   : > { %11698 = vst [vmem:[#allocation208_spill] sm:$0xff] %v7089_v39 }
 0x1a1   : > { %1939 = vst [vmem:[#allocation1] sm:$0xff] %v6651_v52  ;;  %v7092_v48 = vld [vmem:[#allocation1 + $0x20] ss:$4 sm:$0xff]  ;;  %v7094_v57 = vld [vmem:[#allocation1 + $0x21] ss:$4 sm:$0xff] }
 0x1a2   : > { %11699 = vst [vmem:[#allocation209_spill] sm:$0xff] %v7092_v48  ;;  %v7096_v62 = vld [vmem:[#allocation1 + $0x22] ss:$4 sm:$0xff]  ;;  %v7098_v32 = vld [vmem:[#allocation1 + $0x23] ss:$4 sm:$0xff] }
 0x1a3   : > { %11700 = vst [vmem:[#allocation210_spill] sm:$0xff] %v7094_v57 }
 0x1a4   : > { %11701 = vst [vmem:[#allocation211_spill] sm:$0xff] %v7096_v62 }
 0x1a5   : > { %11702 = vst [vmem:[#allocation212_spill] sm:$0xff] %v7098_v32 }
 0x1a6   : > { %1942 = vst [vmem:[#allocation1 + $0x20] sm:$0xff] %v6660_v56 }
 0x1a8   : > { %v7101_v31 = vld [vmem:[#allocation1] ss:$4 sm:$0xff]  ;;  %v7103_v40 = vld [vmem:[#allocation1 + $0x1] ss:$4 sm:$0xff] }
 0x1a9   : > { %11703 = vst [vmem:[#allocation213_spill] sm:$0xff] %v7101_v31 }
 0x1aa   : > { %11704 = vst [vmem:[#allocation214_spill] sm:$0xff] %v7103_v40 }
 0x1ab   : > { %1946 = vst [vmem:[#allocation1] sm:$0xff] %v6673_v61 }
 0x1ad   : > { %v7106_v34 = vld [vmem:[#allocation1 + $0x21] ss:$4 sm:$0xff]  ;;  %v7108_v39 = vld [vmem:[#allocation1 + $0x22] ss:$4 sm:$0xff]  ;;  %v7110_v33 = vld [vmem:[#allocation1 + $0x23] ss:$4 sm:$0xff] }
 0x1ae   : > { %11705 = vst [vmem:[#allocation215_spill] sm:$0xff] %v7106_v34 }
 0x1af   : > { %11706 = vst [vmem:[#allocation216_spill] sm:$0xff] %v7108_v39 }
 0x1b0   : > { %11707 = vst [vmem:[#allocation217_spill] sm:$0xff] %v7110_v33 }
 0x1b1   : > { %1947 = vst [vmem:[#allocation1 + $0x20] sm:$0xff] %v6680_v35 }
 0x1b2   : > { %v7113_v57 = vld [vmem:[#allocation1] ss:$4 sm:$0xff]  ;;  %v7115_v62 = vld [vmem:[#allocation1 + $0x1] ss:$4 sm:$0xff]  ;;  %v7117_v32 = vld [vmem:[#allocation1 + $0x2] ss:$4 sm:$0xff] }
 0x1b3   : > { %11708 = vst [vmem:[#allocation218_spill] sm:$0xff] %v7113_v57  ;;  %v7119_v48 = vld [vmem:[#allocation1 + $0x3] ss:$4 sm:$0xff] }
 0x1b4   : > { %11709 = vst [vmem:[#allocation219_spill] sm:$0xff] %v7115_v62 }
 0x1b5   : > { %11710 = vst [vmem:[#allocation220_spill] sm:$0xff] %v7117_v32 }
 0x1b6   : > { %11711 = vst [vmem:[#allocation221_spill] sm:$0xff] %v7119_v48 }
 0x1b7   : > { %1954 = vst [vmem:[#allocation1] sm:$0xff] %v6691_v60 }
 0x1b8   : > { %v7122_v40 = vld [vmem:[#allocation1 + $0x20] ss:$4 sm:$0xff]  ;;  %v7124_v31 = vld [vmem:[#allocation1 + $0x21] ss:$4 sm:$0xff] }
 0x1b9   : > { %11712 = vst [vmem:[#allocation222_spill] sm:$0xff] %v7122_v40 }
 0x1ba   : > { %11713 = vst [vmem:[#allocation223_spill] sm:$0xff] %v7124_v31 }
 0x1bb   : > { %1955 = vst [vmem:[#allocation1 + $0x20] sm:$0xff] %v6700_v54 }
 0x1be   : > { %v7127_v39 = vld [vmem:[#allocation1 + $0x1] ss:$4 sm:$0xff]  ;;  %v7129_v33 = vld [vmem:[#allocation1 + $0x2] ss:$4 sm:$0xff]  ;;  %v7131_v34 = vld [vmem:[#allocation1 + $0x3] ss:$4 sm:$0xff] }
 0x1bf   : > { %11714 = vst [vmem:[#allocation224_spill] sm:$0xff] %v7127_v39 }
 0x1c0   : > { %11715 = vst [vmem:[#allocation225_spill] sm:$0xff] %v7129_v33 }
 0x1c1   : > { %11716 = vst [vmem:[#allocation226_spill] sm:$0xff] %v7131_v34 }
 0x1c2   : > { %1963 = vst [vmem:[#allocation1] sm:$0xff] %v6711_v58  ;;  %v7134_v62 = vld [vmem:[#allocation1 + $0x20] ss:$4 sm:$0xff]  ;;  %v7136_v32 = vld [vmem:[#allocation1 + $0x21] ss:$4 sm:$0xff] }
 0x1c3   : > { %11717 = vst [vmem:[#allocation227_spill] sm:$0xff] %v7134_v62  ;;  %v7138_v48 = vld [vmem:[#allocation1 + $0x22] ss:$4 sm:$0xff]  ;;  %v7140_v57 = vld [vmem:[#allocation1 + $0x23] ss:$4 sm:$0xff] }
 0x1c4   : > { %11718 = vst [vmem:[#allocation228_spill] sm:$0xff] %v7136_v32 }
 0x1c5   : > { %11719 = vst [vmem:[#allocation229_spill] sm:$0xff] %v7138_v48 }
 0x1c6   : > { %11720 = vst [vmem:[#allocation230_spill] sm:$0xff] %v7140_v57 }
 0x1c7   : > { %1966 = vst [vmem:[#allocation1 + $0x20] sm:$0xff] %v6720_v51 }
 0x1c9   : > { %v7143_v31 = vld [vmem:[#allocation1] ss:$4 sm:$0xff]  ;;  %v7145_v40 = vld [vmem:[#allocation1 + $0x1] ss:$4 sm:$0xff] }
 0x1ca   : > { %11721 = vst [vmem:[#allocation231_spill] sm:$0xff] %v7143_v31 }
 0x1cb   : > { %11722 = vst [vmem:[#allocation232_spill] sm:$0xff] %v7145_v40 }
 0x1cc   : > { %1970 = vst [vmem:[#allocation1] sm:$0xff] %v6733_v55 }
 0x1ce   : > { %v7148_v33 = vld [vmem:[#allocation1 + $0x21] ss:$4 sm:$0xff]  ;;  %v7150_v34 = vld [vmem:[#allocation1 + $0x22] ss:$4 sm:$0xff]  ;;  %v7152_v39 = vld [vmem:[#allocation1 + $0x23] ss:$4 sm:$0xff] }
 0x1cf   : > { %11723 = vst [vmem:[#allocation233_spill] sm:$0xff] %v7148_v33 }
 0x1d0   : > { %11724 = vst [vmem:[#allocation234_spill] sm:$0xff] %v7150_v34 }
 0x1d1   : > { %11725 = vst [vmem:[#allocation235_spill] sm:$0xff] %v7152_v39 }
 0x1d2   : > { %1971 = vst [vmem:[#allocation1 + $0x20] sm:$0xff] %v6741_v53 }
 0x1d3   : > { %v7155_v32 = vld [vmem:[#allocation1] ss:$4 sm:$0xff]  ;;  %v7157_v48 = vld [vmem:[#allocation1 + $0x1] ss:$4 sm:$0xff]  ;;  %v7159_v57 = vld [vmem:[#allocation1 + $0x2] ss:$4 sm:$0xff] }
 0x1d4   : > { %11726 = vst [vmem:[#allocation236_spill] sm:$0xff] %v7155_v32  ;;  %v7161_v62 = vld [vmem:[#allocation1 + $0x3] ss:$4 sm:$0xff] }
 0x1d5   : > { %11727 = vst [vmem:[#allocation237_spill] sm:$0xff] %v7157_v48 }
 0x1d6   : > { %11728 = vst [vmem:[#allocation238_spill] sm:$0xff] %v7159_v57 }
 0x1d7   : > { %11729 = vst [vmem:[#allocation239_spill] sm:$0xff] %v7161_v62 }
 0x1d8   : > { %1978 = vst [vmem:[#allocation1] sm:$0xff] %v6751_v50 }
 0x1d9   : > { %v7164_v40 = vld [vmem:[#allocation1 + $0x20] ss:$4 sm:$0xff]  ;;  %v7166_v31 = vld [vmem:[#allocation1 + $0x21] ss:$4 sm:$0xff] }
 0x1da   : > { %11730 = vst [vmem:[#allocation240_spill] sm:$0xff] %v7164_v40 }
 0x1db   : > { %11731 = vst [vmem:[#allocation241_spill] sm:$0xff] %v7166_v31 }
 0x1dc   : > { %1979 = vst [vmem:[#allocation1 + $0x20] sm:$0xff] %v6762_v45 }
 0x1df   : > { %v7169_v34 = vld [vmem:[#allocation1 + $0x1] ss:$4 sm:$0xff]  ;;  %v7171_v39 = vld [vmem:[#allocation1 + $0x2] ss:$4 sm:$0xff]  ;;  %v7173_v33 = vld [vmem:[#allocation1 + $0x3] ss:$4 sm:$0xff] }
 0x1e0   : > { %11732 = vst [vmem:[#allocation242_spill] sm:$0xff] %v7169_v34  ;;  %v7231_v34 = vld [vmem:[%s6513_s15 + $0x88] sm:$0xf] }
 0x1e1   : > { %11733 = vst [vmem:[#allocation243_spill] sm:$0xff] %v7171_v39 }
 0x1e2   : > { %11734 = vst [vmem:[#allocation244_spill] sm:$0xff] %v7173_v33 }
 0x1e3   : > { %1987 = vst [vmem:[#allocation1] sm:$0xff] %v6771_v49  ;;  %v7176_v48 = vld [vmem:[#allocation1 + $0x20] ss:$4 sm:$0xff]  ;;  %v7178_v57 = vld [vmem:[#allocation1 + $0x21] ss:$4 sm:$0xff] }
 0x1e4   : > { %11735 = vst [vmem:[#allocation245_spill] sm:$0xff] %v7176_v48  ;;  %v7180_v62 = vld [vmem:[#allocation1 + $0x22] ss:$4 sm:$0xff]  ;;  %v7182_v32 = vld [vmem:[#allocation1 + $0x23] ss:$4 sm:$0xff] }
 0x1e5   : > { %11736 = vst [vmem:[#allocation246_spill] sm:$0xff] %v7178_v57 }
 0x1e6   : > { %11737 = vst [vmem:[#allocation247_spill] sm:$0xff] %v7180_v62 }
 0x1e7   : > { %11738 = vst [vmem:[#allocation248_spill] sm:$0xff] %v7182_v32 }
 0x1e8   : > { %1990 = vst [vmem:[#allocation1 + $0x20] sm:$0xff] %v6781_v46 }
 0x1e9   : > { %11758 = vst [vmem:[#allocation268_spill] sm:$0xff] %v7231_v34 }
 0x1ea   : > { %v7185_v31 = vld [vmem:[#allocation1] ss:$4 sm:$0xff]  ;;  %v7187_v40 = vld [vmem:[#allocation1 + $0x1] ss:$4 sm:$0xff] }
 0x1eb   : > { %11739 = vst [vmem:[#allocation249_spill] sm:$0xff] %v7185_v31 }
 0x1ec   : > { %11740 = vst [vmem:[#allocation250_spill] sm:$0xff] %v7187_v40 }
 0x1ed   : > { %1994 = vst [vmem:[#allocation1] sm:$0xff] %v6793_v41 }
 0x1ef   : > { %v7190_v39 = vld [vmem:[#allocation1 + $0x21] ss:$4 sm:$0xff]  ;;  %v7192_v33 = vld [vmem:[#allocation1 + $0x22] ss:$4 sm:$0xff]  ;;  %v7194_v48 = vld [vmem:[#allocation1 + $0x23] ss:$4 sm:$0xff] }
 0x1f0   : > { %11741 = vst [vmem:[#allocation251_spill] sm:$0xff] %v7190_v39 }
 0x1f1   : > { %11742 = vst [vmem:[#allocation252_spill] sm:$0xff] %v7192_v33 }
 0x1f2   : > { %11743 = vst [vmem:[#allocation253_spill] sm:$0xff] %v7194_v48 }
 0x1f3   : > { %1995 = vst [vmem:[#allocation1 + $0x20] sm:$0xff] %v6801_v63 }
 0x1f4   : > { %v7197_v62 = vld [vmem:[#allocation1] ss:$4 sm:$0xff]  ;;  %v7199_v32 = vld [vmem:[#allocation1 + $0x1] ss:$4 sm:$0xff]  ;;  %v7201_v57 = vld [vmem:[#allocation1 + $0x2] ss:$4 sm:$0xff] }
 0x1f5   : > { %11744 = vst [vmem:[#allocation254_spill] sm:$0xff] %v7197_v62  ;;  %v7203_v31 = vld [vmem:[#allocation1 + $0x3] ss:$4 sm:$0xff] }
 0x1f6   : > { %11745 = vst [vmem:[#allocation255_spill] sm:$0xff] %v7199_v32 }
 0x1f7   : > { %11746 = vst [vmem:[#allocation256_spill] sm:$0xff] %v7201_v57  ;;  %v7219_v57 = vld [vmem:[%s6513_s15 + $0x84] sm:$0xf] }
 0x1f8   : > { %11747 = vst [vmem:[#allocation257_spill] sm:$0xff] %v7203_v31 }
 0x1f9   : > { %2002 = vst [vmem:[#allocation1] sm:$0xff] %v7000_v42 }
 0x1fa   : > { %v7206_v40 = vld [vmem:[#allocation1 + $0x20] ss:$4 sm:$0xff]  ;;  %v7208_v39 = vld [vmem:[#allocation1 + $0x21] ss:$4 sm:$0xff]  ;;  %11753 = vst [vmem:[#allocation263_spill] sm:$0xff] %v7219_v57 }
 0x1fb   : > { %11748 = vst [vmem:[#allocation258_spill] sm:$0xff] %v7206_v40 }
 0x1fc   : > { %11749 = vst [vmem:[#allocation259_spill] sm:$0xff] %v7208_v39 }
 0x1fd   : > { %2003 = vst [vmem:[#allocation1 + $0x20] sm:$0xff] %v7012_v43 }
 0x200   : > { %v7211_v48 = vld [vmem:[#allocation1 + $0x1] ss:$4 sm:$0xff]  ;;  %v7213_v33 = vld [vmem:[#allocation1 + $0x2] ss:$4 sm:$0xff]  ;;  %v7215_v62 = vld [vmem:[#allocation1 + $0x3] ss:$4 sm:$0xff] }
 0x201   : > { %11750 = vst [vmem:[#allocation260_spill] sm:$0xff] %v7211_v48 }
 0x202   : > { %11751 = vst [vmem:[#allocation261_spill] sm:$0xff] %v7213_v33 }
 0x203   : > { %11752 = vst [vmem:[#allocation262_spill] sm:$0xff] %v7215_v62  ;;  %v7239_v62 = vld [vmem:[%s6513_s15 + $0x8c] sm:$0x3]  ;;  %s3758_s15 = sadd.s32 4294967295, %s9668_s14 }
 0x204   : > { %2011 = vst [vmem:[#allocation1] sm:$0xff] %v7020_v59  ;;  %v7221_v31 = vld [vmem:[#allocation1 + $0x20] ss:$4 sm:$0xff]  ;;  %v7223_v32 = vld [vmem:[#allocation1 + $0x21] ss:$4 sm:$0xff]  ;;  %p9673_p7 = scmp.ge.s32.totalorder %s3758_s15, 0 }
 0x205   : > { %11754 = vst [vmem:[#allocation264_spill] sm:$0xff] %v7221_v31  ;;  %v7225_v40 = vld [vmem:[#allocation1 + $0x22] ss:$4 sm:$0xff]  ;;  %v7227_v39 = vld [vmem:[#allocation1 + $0x23] ss:$4 sm:$0xff]  ;;  %v384_v31 = vrot.slane %v6516_v0, 3 }
 0x206   : > { %11755 = vst [vmem:[#allocation265_spill] sm:$0xff] %v7223_v32  ;;  %p9677_p8 = scmp.lt.s32.totalorder %s3758_s15, 16  ;;  %s3861_s15 = sadd.s32 2, %s9668_s14 }
 0x207   : > { %11756 = vst [vmem:[#allocation266_spill] sm:$0xff] %v7225_v40  ;;  %p9824_p2 = scmp.ge.s32.totalorder %s3861_s15, 0  ;;  %p9828_p3 = scmp.lt.s32.totalorder %s3861_s15, 16 }
 0x208   : > { %11757 = vst [vmem:[#allocation267_spill] sm:$0xff] %v7227_v39  ;;  %v423_v39 = vsel %vm422_vm1, %v6516_v0, %v384_v31  ;;  %p3761_p9 = pnand %p9677_p8, %p9673_p7  ;;  %p3902_p7 = pnand %p9880_p6, %p9876_p5 }
 0x209   : > { %2014 = vst [vmem:[#allocation1 + $0x20] sm:$0xff] %v7219_v57  ;;  %v7270_v42 = vrot.slane %v423_v39, 2  ;;  %p3864_p4 = pnand %p9828_p3, %p9824_p2  ;;  %p10168_p3 = scmp.ge.s32.totalorder %s4038_s8, 0 }
 0x20a   : > { %11761 = vst [vmem:[#allocation271_spill] sm:$0xff] %v7239_v62  ;;  %s6095_s12 = scalar_select %p3902_p7, 0, 1 }
 0x20b   : > { %v7233_v48 = vld [vmem:[#allocation1] ss:$4 sm:$0xff]  ;;  %v7235_v33 = vld [vmem:[#allocation1 + $0x1] ss:$4 sm:$0xff] }
 0x20c   : > { %11759 = vst [vmem:[#allocation269_spill] sm:$0xff] %v7233_v48  ;;  %v419_v48 = vsel %vm418_vm0, %v6516_v0, %v384_v31 }
 0x20d   : > { %11760 = vst [vmem:[#allocation270_spill] sm:$0xff] %v7235_v33  ;;  %v385_v33 = vrot.slane %v6519_v1, 3 }
 0x20e   : > { %2018 = vst [vmem:[#allocation1] sm:$0xff] %v7231_v34  ;;  %v7254_v34 = vrot.slane %v419_v48, 1 }
 0x20f   : > { %v433_v48 = vsel %vm418_vm0, %v6519_v1, %v385_v33  ;;  %v7287_v39 = vsel %vm414_vm3, %v6519_v1, %v385_v33 }
 0x210   : > { %v7242_v59 = vld [vmem:[#allocation1 + $0x21] ss:$4 sm:$0xff]  ;;  %v7244_v32 = vld [vmem:[#allocation1 + $0x22] ss:$4 sm:$0xff]  ;;  %v7246_v40 = vld [vmem:[#allocation1 + $0x23] ss:$4 sm:$0xff] }
 0x211   : > { %11762 = vst [vmem:[#allocation272_spill] sm:$0xff] %v7242_v59 }
 0x212   : > { %11763 = vst [vmem:[#allocation273_spill] sm:$0xff] %v7244_v32  ;;  %v427_v32 = vsel %vm426_vm2, %v6516_v0, %v384_v31 }
 0x213   : > { %11764 = vst [vmem:[#allocation274_spill] sm:$0xff] %v7246_v40  ;;  %v7262_v40 = vsel %vm414_vm3, %v6516_v0, %v384_v31  ;;  %v7274_v30 = vrot.slane %v427_v32, 3  ;;  %v439_v31 = vsel %vm426_vm2, %v6519_v1, %v385_v33 }
 0x214   : > { %2019 = vst [vmem:[#allocation1 + $0x20] sm:$0xff] %v7239_v62 }
 0x215   : > { %v7258_v59 = vld [vmem:[#allocation1] ss:$4 sm:$0xff]  ;;  %v7264_v62 = vld [vmem:[#allocation1 + $0x1] ss:$4 sm:$0xff]  ;;  %v7266_v57 = vld [vmem:[#allocation1 + $0x2] ss:$4 sm:$0xff] }
 0x216   : > { %11765 = vst [vmem:[#allocation275_spill] sm:$0xff] %v7258_v59  ;;  %v7268_v43 = vld [vmem:[#allocation1 + $0x3] ss:$4 sm:$0xff]  ;;  %v436_v59 = vsel %vm422_vm1, %v6519_v1, %v385_v33  ;;  %v388_v1 = vrot.slane %v6546_v11, 3 }
 0x217   : > { %11766 = vst [vmem:[#allocation276_spill] sm:$0xff] %v7264_v62  ;;  %v7292_v32 = vrot.slane %v436_v59, 2 }
 0x218   : > { %11767 = vst [vmem:[#allocation277_spill] sm:$0xff] %v7266_v57  ;;  %v460_v24 = vsel %vm418_vm0, %v6546_v11, %v388_v1 }
 0x219   : > { %11768 = vst [vmem:[#allocation278_spill] sm:$0xff] %v7268_v43  ;;  %v7289_v43 = vrot.slane %v433_v48, 1  ;;  %v11771_v48 = vrot.slane %v6524_v2, 3 }
 0x21b   : > { %v7278_v29 = vld [vmem:[#allocation1 + $0x20] ss:$4 sm:$0xff]  ;;  %v7280_v0 = vld [vmem:[#allocation1 + $0x21] ss:$4 sm:$0xff] }
 0x21c   : > { %11769 = vst [vmem:[#allocation279_spill] sm:$0xff] %v7278_v29  ;;  %v7295_v29 = vrot.slane %v439_v31, 3  ;;  %v7312_v31 = vsel %vm414_vm3, %v6524_v2, %v11771_v48  ;;  %v463_v2 = vsel %vm422_vm1, %v6546_v11, %v388_v1  ;;  %v391_v48 = vrot.slane %v6571_v21, 3 }
 0x21d   : > { %11770 = vst [vmem:[#allocation280_spill] sm:$0xff] %v7280_v0  ;;  %v387_v0 = vrot.slane %v6531_v5, 3 }
 0x21e   : > { %2026 = vst [vmem:[#allocation1] ss:$9 sm:$0xff] %v7262_v40  ;;  %v487_v15 = vsel %vm418_vm0, %v6571_v21, %v391_v48 }
 0x21f   : > { %2028 = vst [vmem:[#allocation1 + $0x1] ss:$9 sm:$0xff] %v7254_v34  ;;  %v448_v33 = vsel %vm418_vm0, %v6531_v5, %v387_v0  ;;  %v451_v59 = vsel %vm422_vm1, %v6531_v5, %v387_v0  ;;  %v454_v57 = vsel %vm426_vm2, %v6531_v5, %v387_v0  ;;  %v7318_v62 = vsel %vm414_vm3, %v6531_v5, %v387_v0 }
 0x220   : > { %2030 = vst [vmem:[#allocation1 + $0x2] ss:$9 sm:$0xff] %v7270_v42  ;;  %v7320_v27 = vrot.slane %v448_v33, 1  ;;  %v7322_v25 = vrot.slane %v451_v59, 2  ;;  %v7328_v22 = vrot.slane %v454_v57, 3  ;;  %v7336_v5 = vsel %vm414_vm3, %v6546_v11, %v388_v1 }
 0x221   : > { %2032 = vst [vmem:[#allocation1 + $0x3] ss:$9 sm:$0xff] %v7274_v30  ;;  %v7338_v0 = vrot.slane %v460_v24, 1  ;;  %v7341_v33 = vrot.slane %v463_v2, 2  ;;  %v390_v57 = vrot.slane %v6564_v18, 3  ;;  %v466_v24 = vsel %vm426_vm2, %v6546_v11, %v388_v1 }
 0x222   : > { %2034 = vst [vmem:[#allocation1 + $0x4] ss:$9 sm:$0xff] %v7287_v39  ;;  %v11169_v59 = vrot.slane %v6549_v12, 3  ;;  %v7353_v2 = vrot.slane %v466_v24, 3 }
 0x223   : > { %2036 = vst [vmem:[#allocation1 + $0x5] ss:$9 sm:$0xff] %v7289_v43  ;;  %v478_v20 = vsel %vm422_vm1, %v6564_v18, %v390_v57  ;;  %v481_v11 = vsel %vm426_vm2, %v6564_v18, %v390_v57  ;;  %v7369_v1 = vsel %vm414_vm3, %v6564_v18, %v390_v57 }
 0x224   : > { %2038 = vst [vmem:[#allocation1 + $0x6] ss:$9 sm:$0xff] %v7292_v32  ;;  %v7363_v19 = vsel %vm414_vm3, %v6549_v12, %v11169_v59  ;;  %v7375_v16 = vrot.slane %v478_v20, 2  ;;  %v7380_v59 = vrot.slane %v481_v11, 3  ;;  %v393_v20 = vrot.slane %v6589_v28, 3 }
 0x225   : > { %2040 = vst [vmem:[#allocation1 + $0x7] ss:$9 sm:$0xff] %v7295_v29  ;;  %v493_v11 = vsel %vm426_vm2, %v6571_v21, %v391_v48 }
 0x226   : > { %v7403_v14 = vrot.slane %v493_v11, 3  ;;  %v502_v13 = vsel %vm418_vm0, %v6589_v28, %v393_v20  ;;  %v505_v10 = vsel %vm422_vm1, %v6589_v28, %v393_v20  ;;  %v7422_v11 = vsel %vm414_vm3, %v6589_v28, %v393_v20 }
 0x227   : > { %v7424_v8 = vrot.slane %v502_v13, 1  ;;  %v7427_v7 = vrot.slane %v505_v10, 2  ;;  %v396_v13 = vrot.slane %v6631_v44, 3 }
 0x229   : > { %11775 = vst [vmem:[#allocation284_spill] sm:$0xff] %v7427_v7 }
 0x22c   : > { %v7326_v23 = vld [vmem:[#allocation1] sm:$0xff] }
 0x22d   : > { %11772 = vst [vmem:[#allocation281_spill] sm:$0xff] %v7326_v23  ;;  %v475_v23 = vsel %vm418_vm0, %v6564_v18, %v390_v57  ;;  %v7386_v18 = vsel %vm414_vm3, %v6571_v21, %v391_v48  ;;  %v490_v57 = vsel %vm422_vm1, %v6571_v21, %v391_v48  ;;  %v508_v21 = vsel %vm426_vm2, %v6589_v28, %v393_v20 }
 0x22e   : > { %2042 = vst [vmem:[#allocation1] ss:$9 sm:$0xff] %v7312_v31  ;;  %v7371_v24 = vrot.slane %v475_v23, 1  ;;  %v7388_v23 = vrot.slane %v487_v15, 1  ;;  %v11170_v15 = vrot.slane %v6584_v26, 3 }
 0x22f   : > { %2043 = vst [vmem:[#allocation1 + $0x1] ss:$9 sm:$0xff] %v7318_v62 }
 0x230   : > { %2044 = vst [vmem:[#allocation1 + $0x2] ss:$9 sm:$0xff] %v7320_v27  ;;  %v7413_v9 = vsel %vm414_vm3, %v6584_v26, %v11170_v15  ;;  %v7430_v15 = vrot.slane %v508_v21, 3  ;;  %v11177_v21 = vrot.slane %v6610_v37, 3 }
 0x231   : > { %2045 = vst [vmem:[#allocation1 + $0x3] ss:$9 sm:$0xff] %v7322_v25 }
 0x232   : > { %2046 = vst [vmem:[#allocation1 + $0x4] ss:$9 sm:$0xff] %v7328_v22 }
 0x233   : > { %2047 = vst [vmem:[#allocation1 + $0x5] ss:$9 sm:$0xff] %v7336_v5 }
 0x234   : > { %2048 = vst [vmem:[#allocation1 + $0x6] ss:$9 sm:$0xff] %v7338_v0 }
 0x235   : > { %2049 = vst [vmem:[#allocation1 + $0x7] ss:$9 sm:$0xff] %v7341_v33 }
 0x236   : > { %11776 = vst [vmem:[#allocation285_spill] sm:$0xff] %v7430_v15 }
 0x23c   : > { %v7373_v17 = vld [vmem:[#allocation1] sm:$0xff] }
 0x23d   : > { %11773 = vst [vmem:[#allocation282_spill] sm:$0xff] %v7373_v17  ;;  %v7401_v17 = vrot.slane %v490_v57, 2  ;;  %v394_v57 = vrot.slane %v6607_v36, 3 }
 0x23e   : > { %2051 = vst [vmem:[#allocation1] ss:$9 sm:$0xff] %v7353_v2 }
 0x23f   : > { %2052 = vst [vmem:[#allocation1 + $0x1] ss:$9 sm:$0xff] %v7363_v19  ;;  %v514_v10 = vsel %vm418_vm0, %v6607_v36, %v394_v57  ;;  %v517_v28 = vsel %vm422_vm1, %v6607_v36, %v394_v57  ;;  %v520_v20 = vsel %vm426_vm2, %v6607_v36, %v394_v57 }
 0x240   : > { %2053 = vst [vmem:[#allocation1 + $0x2] ss:$9 sm:$0xff] %v7369_v1  ;;  %v7450_v6 = vrot.slane %v514_v10, 1  ;;  %v7452_v4 = vrot.slane %v517_v28, 2  ;;  %v7454_v3 = vrot.slane %v520_v20, 3  ;;  %v7473_v10 = vsel %vm414_vm3, %v6631_v44, %v396_v13 }
 0x241   : > { %2054 = vst [vmem:[#allocation1 + $0x3] ss:$9 sm:$0xff] %v7371_v24 }
 0x242   : > { %2055 = vst [vmem:[#allocation1 + $0x4] ss:$9 sm:$0xff] %v7375_v16 }
 0x243   : > { %2056 = vst [vmem:[#allocation1 + $0x5] ss:$9 sm:$0xff] %v7380_v59 }
 0x244   : > { %2057 = vst [vmem:[#allocation1 + $0x6] ss:$9 sm:$0xff] %v7386_v18 }
 0x245   : > { %2058 = vst [vmem:[#allocation1 + $0x7] ss:$9 sm:$0xff] %v7388_v23 }
 0x246   : > { %11778 = vst [vmem:[#allocation287_spill] sm:$0xff] %v7452_v4 }
 0x247   : > { %11779 = vst [vmem:[#allocation288_spill] sm:$0xff] %v7454_v3 }
 0x248   : > { %11782 = vst [vmem:[#allocation291_spill] sm:$0xff] %v7473_v10 }
 0x24c   : > { %v7417_v48 = vld [vmem:[#allocation1] sm:$0xff] }
 0x24d   : > { %11774 = vst [vmem:[#allocation283_spill] sm:$0xff] %v7417_v48  ;;  %v7436_v48 = vsel %vm414_vm3, %v6607_v36, %v394_v57  ;;  %v7466_v36 = vsel %vm414_vm3, %v6610_v37, %v11177_v21  ;;  %v535_v57 = vsel %vm426_vm2, %v6631_v44, %v396_v13  ;;  %v397_v21 = vrot.slane %v6638_v47, 3 }
 0x24e   : > { %2060 = vst [vmem:[#allocation1] ss:$9 sm:$0xff] %v7401_v17 }
 0x24f   : > { %2061 = vst [vmem:[#allocation1 + $0x1] ss:$9 sm:$0xff] %v7403_v14 }
 0x250   : > { %2062 = vst [vmem:[#allocation1 + $0x2] ss:$9 sm:$0xff] %v7413_v9 }
 0x251   : > { %2063 = vst [vmem:[#allocation1 + $0x3] ss:$9 sm:$0xff] %v7422_v11 }
 0x252   : > { %11777 = vst [vmem:[#allocation286_spill] sm:$0xff] %v7436_v48 }
 0x253   : > { %2064 = vst [vmem:[#allocation1 + $0x4] ss:$9 sm:$0xff] %v7424_v8 }
 0x254   : > { %2065 = vst [vmem:[#allocation1 + $0x5] ss:$9 sm:$0xff] %v7427_v7 }
 0x255   : > { %2066 = vst [vmem:[#allocation1 + $0x6] ss:$9 sm:$0xff] %v7430_v15  ;;  %v532_v15 = vsel %vm422_vm1, %v6631_v44, %v396_v13 }
 0x256   : > { %2067 = vst [vmem:[#allocation1 + $0x7] ss:$9 sm:$0xff] %v7436_v48  ;;  %v529_v48 = vsel %vm418_vm0, %v6631_v44, %v396_v13  ;;  %v7478_v20 = vrot.slane %v532_v15, 2  ;;  %v541_v44 = vsel %vm418_vm0, %v6638_v47, %v397_v21  ;;  %v399_v15 = vrot.slane %v6660_v56, 3 }
 0x257   : > { %11781 = vst [vmem:[#allocation290_spill] sm:$0xff] %v7466_v36  ;;  %v7475_v28 = vrot.slane %v529_v48, 1  ;;  %v544_v48 = vsel %vm422_vm1, %v6638_v47, %v397_v21  ;;  %v547_v13 = vsel %vm426_vm2, %v6638_v47, %v397_v21 }
 0x258   : > { %11784 = vst [vmem:[#allocation293_spill] sm:$0xff] %v7478_v20 }
 0x259   : > { %11783 = vst [vmem:[#allocation292_spill] sm:$0xff] %v7475_v28 }
 0x25d   : > { %v7460_v7 = vld [vmem:[#allocation1] sm:$0xff] }
 0x25e   : > { %11780 = vst [vmem:[#allocation289_spill] sm:$0xff] %v7460_v7  ;;  %v7481_v7 = vrot.slane %v535_v57, 3  ;;  %v11192_v57 = vrot.slane %v6651_v52, 3 }
 0x25f   : > { %2069 = vst [vmem:[#allocation1] ss:$9 sm:$0xff] %v7450_v6 }
 0x260   : > { %2070 = vst [vmem:[#allocation1 + $0x1] ss:$9 sm:$0xff] %v7452_v4  ;;  %v559_v4 = vsel %vm422_vm1, %v6660_v56, %v399_v15 }
 0x261   : > { %2071 = vst [vmem:[#allocation1 + $0x2] ss:$9 sm:$0xff] %v7454_v3 }
 0x262   : > { %11785 = vst [vmem:[#allocation294_spill] sm:$0xff] %v7481_v7 }
 0x263   : > { %2072 = vst [vmem:[#allocation1 + $0x3] ss:$9 sm:$0xff] %v7466_v36  ;;  %v556_v36 = vsel %vm418_vm0, %v6660_v56, %v399_v15 }
 0x264   : > { %2073 = vst [vmem:[#allocation1 + $0x4] ss:$9 sm:$0xff] %v7473_v10  ;;  %v7505_v10 = vrot.slane %v547_v13, 3  ;;  %v400_v13 = vrot.slane %v6673_v61, 3 }
 0x265   : > { %2074 = vst [vmem:[#allocation1 + $0x5] ss:$9 sm:$0xff] %v7475_v28  ;;  %v7499_v28 = vsel %vm414_vm3, %v6638_v47, %v397_v21  ;;  %v7518_v47 = vsel %vm414_vm3, %v6651_v52, %v11192_v57  ;;  %v7523_v21 = vsel %vm414_vm3, %v6660_v56, %v399_v15 }
 0x266   : > { %2075 = vst [vmem:[#allocation1 + $0x6] ss:$9 sm:$0xff] %v7478_v20  ;;  %v7501_v20 = vrot.slane %v541_v44, 1  ;;  %v7525_v44 = vrot.slane %v556_v36, 1  ;;  %v562_v36 = vsel %vm426_vm2, %v6660_v56, %v399_v15  ;;  %v568_v57 = vsel %vm418_vm0, %v6673_v61, %v400_v13 }
 0x267   : > { %2076 = vst [vmem:[#allocation1 + $0x7] ss:$9 sm:$0xff] %v7481_v7  ;;  %v7503_v7 = vrot.slane %v544_v48, 2  ;;  %v7528_v48 = vrot.slane %v559_v4, 2  ;;  %v402_v4 = vrot.slane %v6691_v60, 3  ;;  %v7552_v56 = vrot.slane %v568_v57, 1 }
 0x268   : > { %11786 = vst [vmem:[#allocation295_spill] sm:$0xff] %v7499_v28 }
 0x269   : > { %11787 = vst [vmem:[#allocation296_spill] sm:$0xff] %v7501_v20  ;;  %v7573_v57 = vsel %vm414_vm3, %v6691_v60, %v402_v4 }
 0x26a   : > { %11788 = vst [vmem:[#allocation297_spill] sm:$0xff] %v7503_v7 }
 0x26b   : > { %11789 = vst [vmem:[#allocation298_spill] sm:$0xff] %v7505_v10 }
 0x26c   : > { %11791 = vst [vmem:[#allocation300_spill] sm:$0xff] %v7518_v47 }
 0x26d   : > { %11792 = vst [vmem:[#allocation301_spill] sm:$0xff] %v7523_v21 }
 0x26e   : > { %v7509_v3 = vld [vmem:[#allocation1] sm:$0xff]  ;;  %11793 = vst [vmem:[#allocation302_spill] sm:$0xff] %v7525_v44 }
 0x26f   : > { %11790 = vst [vmem:[#allocation299_spill] sm:$0xff] %v7509_v3  ;;  %v7541_v3 = vrot.slane %v562_v36, 3 }
 0x270   : > { %2078 = vst [vmem:[#allocation1] ss:$9 sm:$0xff] %v7499_v28 }
 0x271   : > { %2079 = vst [vmem:[#allocation1 + $0x1] ss:$9 sm:$0xff] %v7501_v20 }
 0x272   : > { %2080 = vst [vmem:[#allocation1 + $0x2] ss:$9 sm:$0xff] %v7503_v7  ;;  %v583_v7 = vsel %vm418_vm0, %v6691_v60, %v402_v4 }
 0x273   : > { %11794 = vst [vmem:[#allocation303_spill] sm:$0xff] %v7528_v48 }
 0x274   : > { %2081 = vst [vmem:[#allocation1 + $0x3] ss:$9 sm:$0xff] %v7505_v10 }
 0x275   : > { %2082 = vst [vmem:[#allocation1 + $0x4] ss:$9 sm:$0xff] %v7518_v47  ;;  %v571_v47 = vsel %vm422_vm1, %v6673_v61, %v400_v13 }
 0x276   : > { %2083 = vst [vmem:[#allocation1 + $0x5] ss:$9 sm:$0xff] %v7523_v21  ;;  %v574_v21 = vsel %vm426_vm2, %v6673_v61, %v400_v13  ;;  %v7554_v15 = vrot.slane %v571_v47, 2  ;;  %v7575_v47 = vrot.slane %v583_v7, 1 }
 0x277   : > { %2084 = vst [vmem:[#allocation1 + $0x6] ss:$9 sm:$0xff] %v7525_v44  ;;  %v11205_v44 = vrot.slane %v6680_v35, 3  ;;  %v7558_v36 = vrot.slane %v574_v21, 3  ;;  %v403_v21 = vrot.slane %v6700_v54, 3 }
 0x278   : > { %2085 = vst [vmem:[#allocation1 + $0x7] ss:$9 sm:$0xff] %v7528_v48  ;;  %v7550_v48 = vsel %vm414_vm3, %v6673_v61, %v400_v13  ;;  %v586_v13 = vsel %vm422_vm1, %v6691_v60, %v402_v4 }
 0x279   : > { %11795 = vst [vmem:[#allocation304_spill] sm:$0xff] %v7541_v3  ;;  %v7568_v61 = vsel %vm414_vm3, %v6680_v35, %v11205_v44  ;;  %v589_v44 = vsel %vm426_vm2, %v6691_v60, %v402_v4  ;;  %v7587_v7 = vrot.slane %v586_v13, 2  ;;  %v405_v13 = vrot.slane %v6720_v51, 3 }
 0x27a   : > { %11796 = vst [vmem:[#allocation305_spill] sm:$0xff] %v7550_v48 }
 0x27b   : > { %11797 = vst [vmem:[#allocation306_spill] sm:$0xff] %v7552_v56 }
 0x27c   : > { %11798 = vst [vmem:[#allocation307_spill] sm:$0xff] %v7554_v15 }
 0x27d   : > { %11800 = vst [vmem:[#allocation309_spill] sm:$0xff] %v7558_v36 }
 0x27e   : > { %11801 = vst [vmem:[#allocation310_spill] sm:$0xff] %v7568_v61 }
 0x27f   : > { %v7556_v10 = vld [vmem:[#allocation1] sm:$0xff]  ;;  %11802 = vst [vmem:[#allocation311_spill] sm:$0xff] %v7573_v57 }
 0x280   : > { %11799 = vst [vmem:[#allocation308_spill] sm:$0xff] %v7556_v10  ;;  %v595_v10 = vsel %vm418_vm0, %v6700_v54, %v403_v21 }
 0x281   : > { %2087 = vst [vmem:[#allocation1] ss:$9 sm:$0xff] %v7541_v3  ;;  %v7602_v60 = vrot.slane %v595_v10, 1  ;;  %v7623_v10 = vsel %vm414_vm3, %v6720_v51, %v405_v13 }
 0x282   : > { %2088 = vst [vmem:[#allocation1 + $0x1] ss:$9 sm:$0xff] %v7550_v48 }
 0x283   : > { %2089 = vst [vmem:[#allocation1 + $0x2] ss:$9 sm:$0xff] %v7552_v56 }
 0x284   : > { %11803 = vst [vmem:[#allocation312_spill] sm:$0xff] %v7575_v47 }
 0x285   : > { %2090 = vst [vmem:[#allocation1 + $0x3] ss:$9 sm:$0xff] %v7554_v15  ;;  %v7600_v15 = vsel %vm414_vm3, %v6700_v54, %v403_v21 }
 0x286   : > { %2091 = vst [vmem:[#allocation1 + $0x4] ss:$9 sm:$0xff] %v7558_v36  ;;  %v7591_v36 = vrot.slane %v589_v44, 3 }
 0x287   : > { %2092 = vst [vmem:[#allocation1 + $0x5] ss:$9 sm:$0xff] %v7568_v61  ;;  %v601_v61 = vsel %vm426_vm2, %v6700_v54, %v403_v21 }
 0x288   : > { %2093 = vst [vmem:[#allocation1 + $0x6] ss:$9 sm:$0xff] %v7573_v57  ;;  %v598_v57 = vsel %vm422_vm1, %v6700_v54, %v403_v21  ;;  %v7610_v56 = vrot.slane %v601_v61, 3  ;;  %v406_v61 = vrot.slane %v6733_v55, 3  ;;  %v613_v21 = vsel %vm422_vm1, %v6720_v51, %v405_v13 }
 0x289   : > { %2094 = vst [vmem:[#allocation1 + $0x7] ss:$9 sm:$0xff] %v7575_v47  ;;  %v11218_v47 = vrot.slane %v6711_v58, 3  ;;  %v7607_v44 = vrot.slane %v598_v57, 2  ;;  %v610_v57 = vsel %vm418_vm0, %v6720_v51, %v405_v13 }
 0x28a   : > { %11804 = vst [vmem:[#allocation313_spill] sm:$0xff] %v7587_v7 }
 0x28b   : > { %11805 = vst [vmem:[#allocation314_spill] sm:$0xff] %v7591_v36  ;;  %v7618_v54 = vsel %vm414_vm3, %v6711_v58, %v11218_v47  ;;  %v616_v47 = vsel %vm426_vm2, %v6720_v51, %v405_v13  ;;  %v7653_v51 = vsel %vm414_vm3, %v6733_v55, %v406_v61 }
 0x28c   : > { %11806 = vst [vmem:[#allocation315_spill] sm:$0xff] %v7600_v15 }
 0x28d   : > { %11807 = vst [vmem:[#allocation316_spill] sm:$0xff] %v7602_v60 }
 0x28e   : > { %11809 = vst [vmem:[#allocation318_spill] sm:$0xff] %v7607_v44 }
 0x28f   : > { %11810 = vst [vmem:[#allocation319_spill] sm:$0xff] %v7610_v56 }
 0x290   : > { %v7604_v4 = vld [vmem:[#allocation1] sm:$0xff]  ;;  %11811 = vst [vmem:[#allocation320_spill] sm:$0xff] %v7618_v54 }
 0x291   : > { %11808 = vst [vmem:[#allocation317_spill] sm:$0xff] %v7604_v4  ;;  %v7636_v4 = vrot.slane %v610_v57, 1 }
 0x292   : > { %2096 = vst [vmem:[#allocation1] ss:$9 sm:$0xff] %v7587_v7 }
 0x293   : > { %2097 = vst [vmem:[#allocation1 + $0x1] ss:$9 sm:$0xff] %v7591_v36  ;;  %v11233_v36 = vrot.slane %v6741_v53, 3 }
 0x294   : > { %2098 = vst [vmem:[#allocation1 + $0x2] ss:$9 sm:$0xff] %v7600_v15 }
 0x295   : > { %2099 = vst [vmem:[#allocation1 + $0x3] ss:$9 sm:$0xff] %v7602_v60  ;;  %v628_v60 = vsel %vm426_vm2, %v6733_v55, %v406_v61 }
 0x296   : > { %11812 = vst [vmem:[#allocation321_spill] sm:$0xff] %v7623_v10  ;;  %v7661_v57 = vrot.slane %v628_v60, 3  ;;  %v409_v60 = vrot.slane %v6762_v45, 3 }
 0x297   : > { %2100 = vst [vmem:[#allocation1 + $0x4] ss:$9 sm:$0xff] %v7607_v44  ;;  %v7638_v44 = vrot.slane %v613_v21, 2 }
 0x298   : > { %2101 = vst [vmem:[#allocation1 + $0x5] ss:$9 sm:$0xff] %v7610_v56  ;;  %v7642_v56 = vrot.slane %v616_v47, 3 }
 0x299   : > { %2102 = vst [vmem:[#allocation1 + $0x6] ss:$9 sm:$0xff] %v7618_v54  ;;  %v622_v54 = vsel %vm418_vm0, %v6733_v55, %v406_v61 }
 0x29a   : > { %2103 = vst [vmem:[#allocation1 + $0x7] ss:$9 sm:$0xff] %v7623_v10  ;;  %v625_v10 = vsel %vm422_vm1, %v6733_v55, %v406_v61  ;;  %v7655_v13 = vrot.slane %v622_v54, 1  ;;  %v7669_v55 = vsel %vm414_vm3, %v6741_v53, %v11233_v36  ;;  %v408_v54 = vrot.slane %v6751_v50, 3 }
 0x29b   : > { %11813 = vst [vmem:[#allocation322_spill] sm:$0xff] %v7636_v4  ;;  %v7658_v47 = vrot.slane %v625_v10, 2 }
 0x29c   : > { %11814 = vst [vmem:[#allocation323_spill] sm:$0xff] %v7638_v44  ;;  %v637_v10 = vsel %vm418_vm0, %v6751_v50, %v408_v54  ;;  %v640_v61 = vsel %vm422_vm1, %v6751_v50, %v408_v54  ;;  %v643_v21 = vsel %vm426_vm2, %v6751_v50, %v408_v54  ;;  %v7685_v36 = vsel %vm414_vm3, %v6751_v50, %v408_v54 }
 0x29d   : > { %11815 = vst [vmem:[#allocation324_spill] sm:$0xff] %v7642_v56  ;;  %v7704_v50 = vsel %vm414_vm3, %v6762_v45, %v409_v60 }
 0x29e   : > { %11817 = vst [vmem:[#allocation326_spill] sm:$0xff] %v7653_v51 }
 0x29f   : > { %11818 = vst [vmem:[#allocation327_spill] sm:$0xff] %v7655_v13 }
 0x2a0   : > { %11819 = vst [vmem:[#allocation328_spill] sm:$0xff] %v7658_v47 }
 0x2a1   : > { %v7648_v15 = vld [vmem:[#allocation1] sm:$0xff]  ;;  %11820 = vst [vmem:[#allocation329_spill] sm:$0xff] %v7661_v57 }
 0x2a2   : > { %11816 = vst [vmem:[#allocation325_spill] sm:$0xff] %v7648_v15  ;;  %v7687_v15 = vrot.slane %v637_v10, 1 }
 0x2a3   : > { %2105 = vst [vmem:[#allocation1] ss:$9 sm:$0xff] %v7636_v4 }
 0x2a4   : > { %2106 = vst [vmem:[#allocation1 + $0x1] ss:$9 sm:$0xff] %v7638_v44 }
 0x2a5   : > { %2107 = vst [vmem:[#allocation1 + $0x2] ss:$9 sm:$0xff] %v7642_v56  ;;  %v655_v56 = vsel %vm426_vm2, %v6762_v45, %v409_v60 }
 0x2a6   : > { %2108 = vst [vmem:[#allocation1 + $0x3] ss:$9 sm:$0xff] %v7653_v51 }
 0x2a7   : > { %11821 = vst [vmem:[#allocation330_spill] sm:$0xff] %v7669_v55 }
 0x2a8   : > { %2109 = vst [vmem:[#allocation1 + $0x4] ss:$9 sm:$0xff] %v7655_v13  ;;  %v652_v13 = vsel %vm422_vm1, %v6762_v45, %v409_v60 }
 0x2a9   : > { %2110 = vst [vmem:[#allocation1 + $0x5] ss:$9 sm:$0xff] %v7658_v47  ;;  %v7693_v47 = vrot.slane %v643_v21, 3  ;;  %v7709_v10 = vrot.slane %v652_v13, 2  ;;  %v411_v21 = vrot.slane %v6781_v46, 3  ;;  %v412_v13 = vrot.slane %v6793_v41, 3 }
 0x2aa   : > { %2111 = vst [vmem:[#allocation1 + $0x6] ss:$9 sm:$0xff] %v7661_v57  ;;  %v7689_v57 = vrot.slane %v640_v61, 2  ;;  %v7712_v61 = vrot.slane %v655_v56, 3 }
 0x2ab   : > { %2112 = vst [vmem:[#allocation1 + $0x7] ss:$9 sm:$0xff] %v7669_v55  ;;  %v649_v55 = vsel %vm418_vm0, %v6762_v45, %v409_v60  ;;  %v11256_v45 = vrot.slane %v6771_v49, 3  ;;  %v664_v56 = vsel %vm418_vm0, %v6781_v46, %v411_v21 }
 0x2ac   : > { %11822 = vst [vmem:[#allocation331_spill] sm:$0xff] %v7685_v36  ;;  %v7706_v54 = vrot.slane %v649_v55, 1  ;;  %v667_v55 = vsel %vm422_vm1, %v6781_v46, %v411_v21 }
 0x2ad   : > { %11823 = vst [vmem:[#allocation332_spill] sm:$0xff] %v7687_v15  ;;  %v7730_v60 = vsel %vm414_vm3, %v6771_v49, %v11256_v45  ;;  %v679_v49 = vsel %vm422_vm1, %v6793_v41, %v412_v13 }
 0x2ae   : > { %11824 = vst [vmem:[#allocation333_spill] sm:$0xff] %v7689_v57 }
 0x2af   : > { %11825 = vst [vmem:[#allocation334_spill] sm:$0xff] %v7693_v47 }
 0x2b0   : > { %11827 = vst [vmem:[#allocation336_spill] sm:$0xff] %v7704_v50 }
 0x2b1   : > { %11828 = vst [vmem:[#allocation337_spill] sm:$0xff] %v7706_v54 }
 0x2b2   : > { %v7697_v51 = vld [vmem:[#allocation1] sm:$0xff]  ;;  %11829 = vst [vmem:[#allocation338_spill] sm:$0xff] %v7709_v10 }
 0x2b3   : > { %11826 = vst [vmem:[#allocation335_spill] sm:$0xff] %v7697_v51  ;;  %v670_v51 = vsel %vm426_vm2, %v6781_v46, %v411_v21 }
 0x2b4   : > { %2114 = vst [vmem:[#allocation1] ss:$9 sm:$0xff] %v7685_v36  ;;  %v7746_v45 = vrot.slane %v670_v51, 3  ;;  %v682_v51 = vsel %vm426_vm2, %v6793_v41, %v412_v13 }
 0x2b5   : > { %2115 = vst [vmem:[#allocation1 + $0x1] ss:$9 sm:$0xff] %v7687_v15 }
 0x2b6   : > { %2116 = vst [vmem:[#allocation1 + $0x2] ss:$9 sm:$0xff] %v7689_v57 }
 0x2b7   : > { %11830 = vst [vmem:[#allocation339_spill] sm:$0xff] %v7712_v61 }
 0x2b8   : > { %2117 = vst [vmem:[#allocation1 + $0x3] ss:$9 sm:$0xff] %v7693_v47 }
 0x2b9   : > { %2118 = vst [vmem:[#allocation1 + $0x4] ss:$9 sm:$0xff] %v7704_v50  ;;  %v676_v50 = vsel %vm418_vm0, %v6793_v41, %v412_v13 }
 0x2ba   : > { %2119 = vst [vmem:[#allocation1 + $0x5] ss:$9 sm:$0xff] %v7706_v54  ;;  %v7740_v54 = vrot.slane %v667_v55, 2 }
 0x2bb   : > { %2120 = vst [vmem:[#allocation1 + $0x6] ss:$9 sm:$0xff] %v7709_v10  ;;  %v7738_v10 = vrot.slane %v664_v56, 1  ;;  %v7759_v56 = vrot.slane %v679_v49, 2  ;;  %v11261_v49 = vrot.slane %v6801_v63, 3 }
 0x2bc   : > { %2121 = vst [vmem:[#allocation1 + $0x7] ss:$9 sm:$0xff] %v7712_v61  ;;  %v7736_v61 = vsel %vm414_vm3, %v6781_v46, %v411_v21  ;;  %v7754_v46 = vsel %vm414_vm3, %v6793_v41, %v412_v13  ;;  %v7756_v21 = vrot.slane %v676_v50, 1  ;;  %v7769_v50 = vrot.slane %v682_v51, 3 }
 0x2bd   : > { %11831 = vst [vmem:[#allocation340_spill] sm:$0xff] %v7730_v60  ;;  %v7775_v55 = vsel %vm414_vm3, %v6801_v63, %v11261_v49  ;;  %v733_v41 = vshrl.u32 %v7262_v40, 16  ;;  %v738_v13 = vshll.u32 %v7254_v34, 16  ;;  %v11843_v51 = vmov 0 }
 0x2be   : > { %11832 = vst [vmem:[#allocation341_spill] sm:$0xff] %v7736_v61  ;;  %v11844_v51 = vsel %vm7783_vm6, 4294967295, %v11843_v51  ;;  %v746_v49 = vshll.u32 %v7270_v42, 16  ;;  %v754_v63 = vshll.u32 %v7274_v30, 16 }
 0x2bf   : > { %11833 = vst [vmem:[#allocation342_spill] sm:$0xff] %v7738_v10  ;;  %v740_v40 = vsel %vm7783_vm6, %v733_v41, %v738_v13  ;;  %v788_v41 = vshrl.u32 %v7295_v29, 16  ;;  %v827_v13 = vshrl.u32 %v7328_v22, 16 }
 0x2c0   : > { %11834 = vst [vmem:[#allocation343_spill] sm:$0xff] %v7740_v54 }
 0x2c1   : > { %11836 = vst [vmem:[#allocation345_spill] sm:$0xff] %v7746_v45 }
 0x2c2   : > { %11837 = vst [vmem:[#allocation346_spill] sm:$0xff] %v7754_v46 }
 0x2c3   : > { %v7744_v47 = vld [vmem:[#allocation1] sm:$0xff]  ;;  %11838 = vst [vmem:[#allocation347_spill] sm:$0xff] %v7756_v21 }
 0x2c4   : > { %11835 = vst [vmem:[#allocation344_spill] sm:$0xff] %v7744_v47 }
 0x2c5   : > { %2123 = vst [vmem:[#allocation1] ss:$9 sm:$0xff] %v7730_v60 }
 0x2c6   : > { %2124 = vst [vmem:[#allocation1 + $0x1] ss:$9 sm:$0xff] %v7736_v61 }
 0x2c7   : > { %2125 = vst [vmem:[#allocation1 + $0x2] ss:$9 sm:$0xff] %v7738_v10  ;;  %v785_v10 = vshll.u32 %v7295_v29, 16 }
 0x2c8   : > { %11839 = vst [vmem:[#allocation348_spill] sm:$0xff] %v7759_v56 }
 0x2c9   : > { %2126 = vst [vmem:[#allocation1 + $0x3] ss:$9 sm:$0xff] %v7740_v54 }
 0x2ca   : > { %2127 = vst [vmem:[#allocation1 + $0x4] ss:$9 sm:$0xff] %v7746_v45  ;;  %v772_v45 = vshrl.u32 %v7289_v43, 16 }
 0x2cb   : > { %2128 = vst [vmem:[#allocation1 + $0x5] ss:$9 sm:$0xff] %v7754_v46  ;;  %v769_v46 = vshll.u32 %v7289_v43, 16 }
 0x2cc   : > { %2129 = vst [vmem:[#allocation1 + $0x6] ss:$9 sm:$0xff] %v7756_v21  ;;  %v764_v21 = vshrl.u32 %v7287_v39, 16 }
 0x2cd   : > { %2130 = vst [vmem:[#allocation1 + $0x7] ss:$9 sm:$0xff] %v7759_v56  ;;  %v741_v56 = vshrl.u32 %v7254_v34, 16 }
 0x2ce   : > { %11840 = vst [vmem:[#allocation349_spill] sm:$0xff] %v7769_v50  ;;  %v771_v43 = vsel %vm7783_vm6, %v764_v21, %v769_v46  ;;  %v795_v46 = vshrl.u32 %v7312_v31, 16 }
 0x2cf   : > { %11841 = vst [vmem:[#allocation350_spill] sm:$0xff] %v7775_v55  ;;  %v748_v34 = vsel %vm7783_vm6, %v741_v56, %v746_v49  ;;  %v792_v56 = vshll.u32 %v7312_v31, 16  ;;  %v803_v49 = vshrl.u32 %v7318_v62, 16  ;;  %v831_v31 = vshll.u32 %v7336_v5, 16 }
 0x2d0   : > { %11845 = vst [vmem:[#allocation352_spill] sm:$0xff] %v11844_v51 }
 0x2d1   : > { %v794_v29 = vsel %vm7783_vm6, %v788_v41, %v792_v56  ;;  %v847_v41 = vshll.u32 %v7341_v33, 16 }
 0x2d4   : > { %v7777_v47 = vld [vmem:[#allocation1] sm:$0xff] }
 0x2d5   : > { %11842 = vst [vmem:[#allocation351_spill] sm:$0xff] %v7777_v47  ;;  %v749_v47 = vshrl.u32 %v7270_v42, 16  ;;  %v777_v42 = vshll.u32 %v7292_v32, 16 }
 0x2d6   : > { %2132 = vst [vmem:[#allocation1] ss:$9 sm:$0xff] %v7769_v50  ;;  %v757_v50 = vshrl.u32 %v7274_v30, 16  ;;  %v780_v30 = vshrl.u32 %v7292_v32, 16 }
 0x2d7   : > { %2133 = vst [vmem:[#allocation1 + $0x1] ss:$9 sm:$0xff] %v7775_v55  ;;  %v761_v55 = vshll.u32 %v7287_v39, 16  ;;  %v756_v54 = vsel %vm7783_vm6, %v749_v47, %v754_v63  ;;  %v779_v63 = vsel %vm7783_vm6, %v772_v45, %v777_v42  ;;  %v690_v47 = vrot.slane %v6616_v38, 1 }
 0x2d8   : > { %v787_v32 = vsel %vm7783_vm6, %v780_v30, %v785_v10  ;;  %v811_v45 = vshrl.u32 %v7320_v27, 16  ;;  %v816_v10 = vshll.u32 %v7322_v25, 16  ;;  %v819_v38 = vshrl.u32 %v7322_v25, 16 }
 0x2d9   : > { %v763_v39 = vsel %vm7783_vm6, %v757_v50, %v761_v55  ;;  %v800_v21 = vshll.u32 %v690_v47, 16  ;;  %v824_v50 = vshll.u32 %v7328_v22, 16  ;;  %v839_v42 = vshll.u32 %v7338_v0, 16 }
 0x2da   : > { %v7839_v30 = vsel %vm7783_vm6, %v811_v45, %v816_v10  ;;  %v7852_v47 = vsel %vm7783_vm6, %v827_v13, %v831_v31  ;;  %v862_v10 = vshll.u32 %v7363_v19, 16  ;;  %v878_v13 = vshll.u32 %v7371_v24, 16 }
 0x2db   : > { %v802_v55 = vsel %vm7783_vm6, %v795_v46, %v800_v21  ;;  %11848 = vst [vmem:[#allocation355_spill] sm:$0xff] %v7839_v30  ;;  %v881_v31 = vshrl.u32 %v7371_v24, 16 }
 0x2dc   : > { %11850 = vst [vmem:[#allocation357_spill] sm:$0xff] %v7852_v47 }
 0x2de   : > { %v7805_v61 = vld [vmem:[#allocation1] sm:$0xff] }
 0x2df   : > { %11846 = vst [vmem:[#allocation353_spill] sm:$0xff] %v7805_v61  ;;  %v951_v61 = vshrl.u32 %v7424_v8, 16 }
 0x2e0   : > { %2136 = vst [vmem:[#allocation1] ss:$9 sm:$0xff] %v740_v40 }
 0x2e1   : > { %2139 = vst [vmem:[#allocation1 + $0x1] ss:$9 sm:$0xff] %v748_v34  ;;  %v834_v34 = vshrl.u32 %v7336_v5, 16 }
 0x2e2   : > { %2142 = vst [vmem:[#allocation1 + $0x2] ss:$9 sm:$0xff] %v756_v54  ;;  %v808_v54 = vshll.u32 %v7320_v27, 16 }
 0x2e3   : > { %2145 = vst [vmem:[#allocation1 + $0x3] ss:$9 sm:$0xff] %v763_v39  ;;  %v842_v39 = vshrl.u32 %v7338_v0, 16  ;;  %v7861_v21 = vsel %vm7783_vm6, %v834_v34, %v839_v42  ;;  %v886_v34 = vshll.u32 %v7375_v16, 16 }
 0x2e4   : > { %2148 = vst [vmem:[#allocation1 + $0x4] ss:$9 sm:$0xff] %v771_v43  ;;  %v7833_v40 = vsel %vm7783_vm6, %v803_v49, %v808_v54  ;;  %v7845_v43 = vsel %vm7783_vm6, %v819_v38, %v824_v50  ;;  %v865_v38 = vshrl.u32 %v7363_v19, 16 }
 0x2e5   : > { %2151 = vst [vmem:[#allocation1 + $0x5] ss:$9 sm:$0xff] %v779_v63  ;;  %v850_v63 = vshrl.u32 %v7341_v33, 16  ;;  %v7866_v49 = vsel %vm7783_vm6, %v842_v39, %v847_v41  ;;  %v889_v39 = vshrl.u32 %v7375_v16, 16  ;;  %v894_v41 = vshll.u32 %v7380_v59, 16 }
 0x2e6   : > { %2154 = vst [vmem:[#allocation1 + $0x6] ss:$9 sm:$0xff] %v787_v32  ;;  %v855_v32 = vshll.u32 %v7353_v2, 16 }
 0x2e7   : > { %2157 = vst [vmem:[#allocation1 + $0x7] ss:$9 sm:$0xff] %v794_v29  ;;  %v11851_v29 = vrot.slane %v6549_v12, 3 }
 0x2e8   : > { %11847 = vst [vmem:[#allocation354_spill] sm:$0xff] %v7833_v40  ;;  %v7871_v54 = vsel %vm7783_vm6, %v850_v63, %v855_v32  ;;  %v897_v63 = vshrl.u32 %v7380_v59, 16  ;;  %v901_v32 = vshll.u32 %v7386_v18, 16 }
 0x2e9   : > { %11849 = vst [vmem:[#allocation356_spill] sm:$0xff] %v7845_v43  ;;  %v691_v46 = vsel %vm418_vm0, %v6549_v12, %v11851_v29  ;;  %v858_v12 = vshrl.u32 %v7353_v2, 16 }
 0x2ea   : > { %11852 = vst [vmem:[#allocation358_spill] sm:$0xff] %v7861_v21  ;;  %v693_v45 = vrot.slane %v691_v46, 1  ;;  %v904_v46 = vshrl.u32 %v7386_v18, 16 }
 0x2eb   : > { %11853 = vst [vmem:[#allocation359_spill] sm:$0xff] %v7866_v49  ;;  %v7886_v42 = vsel %vm7783_vm6, %v858_v12, %v862_v10  ;;  %v7904_v10 = vsel %vm7783_vm6, %v881_v31, %v886_v34  ;;  %v11862_v34 = vrot.slane %v6584_v26, 3 }
 0x2ec   : > { %11854 = vst [vmem:[#allocation360_spill] sm:$0xff] %v7871_v54  ;;  %v870_v50 = vshll.u32 %v693_v45, 16  ;;  %v909_v45 = vshll.u32 %v7388_v23, 16 }
 0x2ed   : > { %11855 = vst [vmem:[#allocation361_spill] sm:$0xff] %v7886_v42 }
 0x2ee   : > { %v2158_v56 = vld [vmem:[#allocation1] sm:$0xff]  ;;  %11858 = vst [vmem:[#allocation364_spill] sm:$0xff] %v7904_v10  ;;  %v7922_v31 = vsel %vm7783_vm6, %v904_v46, %v909_v45  ;;  %v925_v46 = vshll.u32 %v7403_v14, 16  ;;  %v928_v45 = vshrl.u32 %v7403_v14, 16 }
 0x2ef   : > { %2346 = vrot.lane.b32.xlu0 %v2158_v56, %s6419_s16  ;;  %2161 = vst [vmem:[#allocation1] ss:$9 sm:$0xff] %v802_v55  ;;  %v873_v55 = vshrl.u32 %v7369_v1, 16  ;;  %v7892_v56 = vsel %vm7783_vm6, %v865_v38, %v870_v50  ;;  %v912_v38 = vshrl.u32 %v7388_v23, 16  ;;  %v917_v50 = vshll.u32 %v7401_v17, 16 }
 0x2f0   : > { %2163 = vst [vmem:[#allocation1 + $0x1] ss:$9 sm:$0xff] %v7833_v40 }
 0x2f1   : > { %2165 = vst [vmem:[#allocation1 + $0x2] ss:$9 sm:$0xff] %v7839_v30  ;;  %v7898_v29 = vsel %vm7783_vm6, %v873_v55, %v878_v13  ;;  %v7912_v55 = vsel %vm7783_vm6, %v889_v39, %v894_v41  ;;  %v7917_v13 = vsel %vm7783_vm6, %v897_v63, %v901_v32  ;;  %v694_v39 = vsel %vm418_vm0, %v6584_v26, %v11862_v34 }
 0x2f2   : > { %2167 = vst [vmem:[#allocation1 + $0x3] ss:$9 sm:$0xff] %v7845_v43  ;;  %v7931_v41 = vsel %vm7783_vm6, %v912_v38, %v917_v50  ;;  %v696_v63 = vrot.slane %v694_v39, 1  ;;  %v920_v32 = vshrl.u32 %v7401_v17, 16  ;;  %v932_v26 = vshll.u32 %v7413_v9, 16 }
 0x2f3   : > { %2169 = vst [vmem:[#allocation1 + $0x4] ss:$9 sm:$0xff] %v7852_v47  ;;  %v943_v50 = vshrl.u32 %v7422_v11, 16  ;;  %v948_v34 = vshll.u32 %v7424_v8, 16 }
 0x2f4   : > { %2171 = vst [vmem:[#allocation1 + $0x5] ss:$9 sm:$0xff] %v7861_v21  ;;  %v940_v38 = vshll.u32 %v696_v63, 16  ;;  %v7946_v39 = vsel %vm7783_vm6, %v920_v32, %v925_v46  ;;  %v11869_v32 = vld [vmem:[#allocation286_spill] sm:$0xff]  ;;  %v11883_v21 = vld [vmem:[#allocation293_spill] sm:$0xff] }
 0x2f5   : > { %2173 = vst [vmem:[#allocation1 + $0x6] ss:$9 sm:$0xff] %v7866_v49  ;;  %v971_v46 = vshll.u32 %v11869_v32, 16  ;;  %v1026_v47 = vshll.u32 %v11883_v21, 16 }
 0x2f6   : > { %2175 = vst [vmem:[#allocation1 + $0x7] ss:$9 sm:$0xff] %v7871_v54  ;;  %v7964_v54 = vsel %vm7783_vm6, %v943_v50, %v948_v34  ;;  %v11876_v34 = vld [vmem:[#allocation287_spill] sm:$0xff] }
 0x2f7   : > { %11856 = vst [vmem:[#allocation362_spill] sm:$0xff] %v7892_v56 }
 0x2f8   : > { %11857 = vst [vmem:[#allocation363_spill] sm:$0xff] %v7898_v29 }
 0x2f9   : > { %11859 = vst [vmem:[#allocation365_spill] sm:$0xff] %v7912_v55 }
 0x2fa   : > { %11860 = vst [vmem:[#allocation366_spill] sm:$0xff] %v7917_v13 }
 0x2fb   : > { %11861 = vst [vmem:[#allocation367_spill] sm:$0xff] %v7922_v31 }
 0x2fc   : > { %11863 = vst [vmem:[#allocation368_spill] sm:$0xff] %v7931_v41 }
 0x2fd   : > { %v2176_v12 = vld [vmem:[#allocation1] sm:$0xff]  ;;  %11864 = vst [vmem:[#allocation369_spill] sm:$0xff] %v7946_v39 }
 0x2fe   : > { %2179 = vst [vmem:[#allocation1] ss:$9 sm:$0xff] %v7886_v42  ;;  %2348 = vrot.lane.b32.xlu2 %v2176_v12, %s6419_s16  ;;  %v935_v12 = vshrl.u32 %v7413_v9, 16 }
 0x2ff   : > { %2181 = vst [vmem:[#allocation1 + $0x1] ss:$9 sm:$0xff] %v7892_v56 }
 0x300   : > { %2183 = vst [vmem:[#allocation1 + $0x2] ss:$9 sm:$0xff] %v7898_v29  ;;  %v7958_v29 = vsel %vm7783_vm6, %v935_v12, %v940_v38 }
 0x301   : > { %2185 = vst [vmem:[#allocation1 + $0x3] ss:$9 sm:$0xff] %v7904_v10  ;;  %v11867_v10 = vld [vmem:[#allocation285_spill] sm:$0xff] }
 0x302   : > { %2187 = vst [vmem:[#allocation1 + $0x4] ss:$9 sm:$0xff] %v7912_v55  ;;  %v964_v63 = vshll.u32 %v11867_v10, 16  ;;  %v967_v56 = vshrl.u32 %v11867_v10, 16 }
 0x303   : > { %2189 = vst [vmem:[#allocation1 + $0x5] ss:$9 sm:$0xff] %v7917_v13  ;;  %v7952_v13 = vsel %vm7783_vm6, %v928_v45, %v932_v26  ;;  %v974_v45 = vshrl.u32 %v11869_v32, 16  ;;  %v979_v26 = vshll.u32 %v7450_v6, 16 }
 0x304   : > { %2191 = vst [vmem:[#allocation1 + $0x6] ss:$9 sm:$0xff] %v7922_v31  ;;  %v7982_v50 = vsel %vm7783_vm6, %v967_v56, %v971_v46  ;;  %v982_v56 = vshrl.u32 %v7450_v6, 16  ;;  %v990_v46 = vshrl.u32 %v11876_v34, 16 }
 0x305   : > { %2193 = vst [vmem:[#allocation1 + $0x7] ss:$9 sm:$0xff] %v7931_v41  ;;  %v11865_v41 = vld [vmem:[#allocation284_spill] sm:$0xff] }
 0x306   : > { %v956_v31 = vshll.u32 %v11865_v41, 16  ;;  %11866 = vst [vmem:[#allocation284_spill] sm:$0xff] %v7952_v13  ;;  %v959_v55 = vshrl.u32 %v11865_v41, 16 }
 0x307   : > { %11868 = vst [vmem:[#allocation285_spill] sm:$0xff] %v7958_v29 }
 0x308   : > { %11870 = vst [vmem:[#allocation286_spill] sm:$0xff] %v7964_v54  ;;  %v7972_v12 = vsel %vm7783_vm6, %v951_v61, %v956_v31  ;;  %v7977_v38 = vsel %vm7783_vm6, %v959_v55, %v964_v63  ;;  %v7991_v31 = vsel %vm7783_vm6, %v974_v45, %v979_v26  ;;  %v987_v63 = vshll.u32 %v11876_v34, 16  ;;  %v11878_v26 = vld [vmem:[#allocation290_spill] sm:$0xff] }
 0x309   : > { %11871 = vst [vmem:[#allocation370_spill] sm:$0xff] %v7972_v12 }
 0x30a   : > { %11872 = vst [vmem:[#allocation371_spill] sm:$0xff] %v7977_v38 }
 0x30b   : > { %11873 = vst [vmem:[#allocation372_spill] sm:$0xff] %v7982_v50 }
 0x30c   : > { %v2194_v42 = vld [vmem:[#allocation1] sm:$0xff]  ;;  %11875 = vst [vmem:[#allocation373_spill] sm:$0xff] %v7991_v31 }
 0x30d   : > { %2197 = vst [vmem:[#allocation1] ss:$9 sm:$0xff] %v7946_v39  ;;  %2350 = vrot.lane.b32.xlu1 %v2194_v42, %s6419_s16  ;;  %v11874_v42 = vrot.slane %v6610_v37, 3 }
 0x30e   : > { %2199 = vst [vmem:[#allocation1 + $0x1] ss:$9 sm:$0xff] %v7952_v13 }
 0x30f   : > { %2201 = vst [vmem:[#allocation1 + $0x2] ss:$9 sm:$0xff] %v7958_v29  ;;  %v697_v61 = vsel %vm418_vm0, %v6610_v37, %v11874_v42  ;;  %v11877_v37 = vld [vmem:[#allocation288_spill] sm:$0xff] }
 0x310   : > { %2203 = vst [vmem:[#allocation1 + $0x3] ss:$9 sm:$0xff] %v7964_v54  ;;  %v699_v55 = vrot.slane %v697_v61, 1  ;;  %v995_v42 = vshll.u32 %v11877_v37, 16  ;;  %v998_v45 = vshrl.u32 %v11877_v37, 16  ;;  %v1002_v54 = vshll.u32 %v11878_v26, 16 }
 0x311   : > { %2205 = vst [vmem:[#allocation1 + $0x4] ss:$9 sm:$0xff] %v7972_v12  ;;  %v1005_v12 = vshrl.u32 %v11878_v26, 16  ;;  %v8006_v61 = vsel %vm7783_vm6, %v982_v56, %v987_v63  ;;  %v11881_v29 = vld [vmem:[#allocation292_spill] sm:$0xff]  ;;  %v11885_v56 = vld [vmem:[#allocation294_spill] sm:$0xff] }
 0x312   : > { %2207 = vst [vmem:[#allocation1 + $0x5] ss:$9 sm:$0xff] %v7977_v38  ;;  %v1010_v38 = vshll.u32 %v699_v55, 16  ;;  %v1018_v13 = vshll.u32 %v11881_v29, 16  ;;  %v8012_v39 = vsel %vm7783_vm6, %v990_v46, %v995_v42  ;;  %v1021_v49 = vshrl.u32 %v11881_v29, 16 }
 0x313   : > { %2209 = vst [vmem:[#allocation1 + $0x6] ss:$9 sm:$0xff] %v7982_v50  ;;  %v8018_v43 = vsel %vm7783_vm6, %v998_v45, %v1002_v54  ;;  %v1029_v55 = vshrl.u32 %v11883_v21, 16  ;;  %v1034_v63 = vshll.u32 %v11885_v56, 16  ;;  %v1037_v46 = vshrl.u32 %v11885_v56, 16  ;;  %v11900_v56 = vld [vmem:[#allocation303_spill] sm:$0xff] }
 0x314   : > { %2211 = vst [vmem:[#allocation1 + $0x7] ss:$9 sm:$0xff] %v7991_v31  ;;  %v11880_v31 = vld [vmem:[#allocation291_spill] sm:$0xff]  ;;  %v8024_v40 = vsel %vm7783_vm6, %v1005_v12, %v1010_v38  ;;  %v1041_v42 = vshll.u32 %v7499_v28, 16  ;;  %v8037_v45 = vsel %vm7783_vm6, %v1021_v49, %v1026_v47  ;;  %v1044_v38 = vshrl.u32 %v7499_v28, 16 }
 0x315   : > { %11879 = vst [vmem:[#allocation287_spill] sm:$0xff] %v8006_v61  ;;  %v1013_v50 = vshrl.u32 %v11880_v31, 16  ;;  %v8042_v12 = vsel %vm7783_vm6, %v1029_v55, %v1034_v63  ;;  %v1052_v55 = vshrl.u32 %v7501_v20, 16  ;;  %v11892_v63 = vld [vmem:[#allocation297_spill] sm:$0xff] }
 0x316   : > { %11882 = vst [vmem:[#allocation288_spill] sm:$0xff] %v8012_v39 }
 0x317   : > { %11884 = vst [vmem:[#allocation290_spill] sm:$0xff] %v8018_v43  ;;  %v8032_v54 = vsel %vm7783_vm6, %v1013_v50, %v1018_v13  ;;  %v11891_v13 = vrot.slane %v6651_v52, 3  ;;  %v1049_v50 = vshll.u32 %v7501_v20, 16 }
 0x318   : > { %11886 = vst [vmem:[#allocation291_spill] sm:$0xff] %v8024_v40 }
 0x319   : > { %11887 = vst [vmem:[#allocation292_spill] sm:$0xff] %v8032_v54  ;;  %v700_v47 = vsel %vm418_vm0, %v6651_v52, %v11891_v13  ;;  %v11894_v13 = vld [vmem:[#allocation300_spill] sm:$0xff] }
 0x31a   : > { %11888 = vst [vmem:[#allocation293_spill] sm:$0xff] %v8037_v45  ;;  %v702_v49 = vrot.slane %v700_v47, 1  ;;  %v1075_v47 = vshrl.u32 %v11894_v13, 16 }
 0x31b   : > { %v2212_v30 = vld [vmem:[#allocation1] sm:$0xff]  ;;  %11889 = vst [vmem:[#allocation374_spill] sm:$0xff] %v8042_v12 }
 0x31c   : > { %2352 = vrot.lane.b32.xlu0 %v2212_v30, %s6419_s16  ;;  %2215 = vst [vmem:[#allocation1] ss:$9 sm:$0xff] %v8006_v61  ;;  %v8047_v30 = vsel %vm7783_vm6, %v1037_v46, %v1041_v42  ;;  %v1057_v46 = vshll.u32 %v11892_v63, 16  ;;  %v1060_v42 = vshrl.u32 %v11892_v63, 16  ;;  %v11898_v63 = vld [vmem:[#allocation302_spill] sm:$0xff] }
 0x31d   : > { %2217 = vst [vmem:[#allocation1 + $0x1] ss:$9 sm:$0xff] %v8012_v39  ;;  %v11897_v39 = vld [vmem:[#allocation301_spill] sm:$0xff]  ;;  %v1088_v20 = vshll.u32 %v11898_v63, 16  ;;  %v1091_v28 = vshrl.u32 %v11898_v63, 16 }
 0x31e   : > { %2219 = vst [vmem:[#allocation1 + $0x2] ss:$9 sm:$0xff] %v8018_v43  ;;  %v8072_v43 = vsel %vm7783_vm6, %v1052_v55, %v1057_v46  ;;  %v1083_v61 = vshrl.u32 %v11897_v39, 16  ;;  %v1099_v55 = vshrl.u32 %v11900_v56, 16  ;;  %v1104_v46 = vshll.u32 %v7541_v3, 16 }
 0x31f   : > { %2221 = vst [vmem:[#allocation1 + $0x3] ss:$9 sm:$0xff] %v8024_v40 }
 0x320   : > { %11890 = vst [vmem:[#allocation375_spill] sm:$0xff] %v8047_v30 }
 0x321   : > { %2223 = vst [vmem:[#allocation1 + $0x4] ss:$9 sm:$0xff] %v8032_v54  ;;  %v11893_v54 = vld [vmem:[#allocation298_spill] sm:$0xff] }
 0x322   : > { %2225 = vst [vmem:[#allocation1 + $0x5] ss:$9 sm:$0xff] %v8037_v45  ;;  %v1065_v40 = vshll.u32 %v11893_v54, 16  ;;  %v1068_v52 = vshrl.u32 %v11893_v54, 16  ;;  %v1072_v45 = vshll.u32 %v11894_v13, 16 }
 0x323   : > { %2227 = vst [vmem:[#allocation1 + $0x6] ss:$9 sm:$0xff] %v8042_v12  ;;  %v1080_v12 = vshll.u32 %v702_v49, 16 }
 0x324   : > { %2229 = vst [vmem:[#allocation1 + $0x7] ss:$9 sm:$0xff] %v8047_v30  ;;  %v8067_v30 = vsel %vm7783_vm6, %v1044_v38, %v1049_v50  ;;  %v8078_v54 = vsel %vm7783_vm6, %v1060_v42, %v1065_v40  ;;  %v1096_v38 = vshll.u32 %v11900_v56, 16  ;;  %v8084_v49 = vsel %vm7783_vm6, %v1068_v52, %v1072_v45  ;;  %v11915_v56 = vld [vmem:[#allocation312_spill] sm:$0xff] }
 0x325   : > { %11895 = vst [vmem:[#allocation300_spill] sm:$0xff] %v8067_v30  ;;  %v8092_v40 = vsel %vm7783_vm6, %v1075_v47, %v1080_v12  ;;  %v8097_v42 = vsel %vm7783_vm6, %v1083_v61, %v1088_v20  ;;  %v8107_v52 = vsel %vm7783_vm6, %v1099_v55, %v1104_v46  ;;  %v11906_v12 = vrot.slane %v6680_v35, 3 }
 0x326   : > { %11896 = vst [vmem:[#allocation376_spill] sm:$0xff] %v8072_v43  ;;  %v8102_v45 = vsel %vm7783_vm6, %v1091_v28, %v1096_v38  ;;  %v1107_v28 = vshrl.u32 %v7541_v3, 16  ;;  %v1111_v61 = vshll.u32 %v7550_v48, 16  ;;  %v1114_v38 = vshrl.u32 %v7550_v48, 16  ;;  %v11914_v48 = vld [vmem:[#allocation311_spill] sm:$0xff] }
 0x327   : > { %11899 = vst [vmem:[#allocation301_spill] sm:$0xff] %v8078_v54  ;;  %v703_v20 = vsel %vm418_vm0, %v6680_v35, %v11906_v12  ;;  %v11909_v35 = vld [vmem:[#allocation309_spill] sm:$0xff]  ;;  %v1153_v3 = vshrl.u32 %v11914_v48, 16 }
 0x328   : > { %11901 = vst [vmem:[#allocation302_spill] sm:$0xff] %v8084_v49  ;;  %v705_v47 = vrot.slane %v703_v20, 1  ;;  %v1135_v12 = vshll.u32 %v11909_v35, 16 }
 0x329   : > { %11902 = vst [vmem:[#allocation377_spill] sm:$0xff] %v8092_v40 }
 0x32a   : > { %11903 = vst [vmem:[#allocation378_spill] sm:$0xff] %v8097_v42 }
 0x32b   : > { %v2230_v50 = vld [vmem:[#allocation1] sm:$0xff]  ;;  %11904 = vst [vmem:[#allocation379_spill] sm:$0xff] %v8102_v45 }
 0x32c   : > { %2233 = vst [vmem:[#allocation1] ss:$9 sm:$0xff] %v8067_v30  ;;  %2354 = vrot.lane.b32.xlu2 %v2230_v50, %s6419_s16  ;;  %v11907_v50 = vld [vmem:[#allocation306_spill] sm:$0xff] }
 0x32d   : > { %2235 = vst [vmem:[#allocation1 + $0x1] ss:$9 sm:$0xff] %v8072_v43  ;;  %v1119_v55 = vshll.u32 %v11907_v50, 16  ;;  %v1122_v46 = vshrl.u32 %v11907_v50, 16  ;;  %v1150_v50 = vshll.u32 %v705_v47, 16 }
 0x32e   : > { %2237 = vst [vmem:[#allocation1 + $0x2] ss:$9 sm:$0xff] %v8078_v54  ;;  %v11911_v54 = vld [vmem:[#allocation310_spill] sm:$0xff] }
 0x32f   : > { %2239 = vst [vmem:[#allocation1 + $0x3] ss:$9 sm:$0xff] %v8084_v49  ;;  %v1142_v20 = vshll.u32 %v11911_v54, 16  ;;  %v8133_v43 = vsel %vm7783_vm6, %v1114_v38, %v1119_v55  ;;  %v1145_v30 = vshrl.u32 %v11911_v54, 16  ;;  %v1161_v38 = vshrl.u32 %v11915_v56, 16 }
 0x330   : > { %11905 = vst [vmem:[#allocation380_spill] sm:$0xff] %v8107_v52  ;;  %v1166_v55 = vshll.u32 %v7587_v7, 16 }
 0x331   : > { %2241 = vst [vmem:[#allocation1 + $0x4] ss:$9 sm:$0xff] %v8092_v40  ;;  %v8158_v47 = vsel %vm7783_vm6, %v1145_v30, %v1150_v50  ;;  %v11922_v30 = vrot.slane %v6711_v58, 3  ;;  %v11923_v50 = vld [vmem:[#allocation314_spill] sm:$0xff] }
 0x332   : > { %2243 = vst [vmem:[#allocation1 + $0x5] ss:$9 sm:$0xff] %v8097_v42  ;;  %v11908_v42 = vld [vmem:[#allocation307_spill] sm:$0xff] }
 0x333   : > { %2245 = vst [vmem:[#allocation1 + $0x6] ss:$9 sm:$0xff] %v8102_v45  ;;  %v1127_v40 = vshll.u32 %v11908_v42, 16  ;;  %v1130_v49 = vshrl.u32 %v11908_v42, 16  ;;  %v1138_v45 = vshrl.u32 %v11909_v35, 16 }
 0x334   : > { %2247 = vst [vmem:[#allocation1 + $0x7] ss:$9 sm:$0xff] %v8107_v52  ;;  %v8127_v52 = vsel %vm7783_vm6, %v1107_v28, %v1111_v61  ;;  %v1158_v28 = vshll.u32 %v11915_v56, 16  ;;  %v11934_v56 = vld [vmem:[#allocation321_spill] sm:$0xff] }
 0x335   : > { %11910 = vst [vmem:[#allocation381_spill] sm:$0xff] %v8127_v52  ;;  %v8138_v42 = vsel %vm7783_vm6, %v1122_v46, %v1127_v40  ;;  %v8146_v35 = vsel %vm7783_vm6, %v1130_v49, %v1135_v12  ;;  %v8153_v40 = vsel %vm7783_vm6, %v1138_v45, %v1142_v20  ;;  %v8168_v46 = vsel %vm7783_vm6, %v1161_v38, %v1166_v55 }
 0x336   : > { %11912 = vst [vmem:[#allocation310_spill] sm:$0xff] %v8133_v43  ;;  %v8163_v49 = vsel %vm7783_vm6, %v1153_v3, %v1158_v28  ;;  %v706_v45 = vsel %vm418_vm0, %v6711_v58, %v11922_v30  ;;  %v1169_v3 = vshrl.u32 %v7587_v7, 16  ;;  %v1174_v12 = vshll.u32 %v11923_v50, 16  ;;  %v11924_v28 = vld [vmem:[#allocation315_spill] sm:$0xff] }
 0x337   : > { %11913 = vst [vmem:[#allocation382_spill] sm:$0xff] %v8138_v42  ;;  %v1177_v20 = vshrl.u32 %v11923_v50, 16  ;;  %v1181_v38 = vshll.u32 %v11924_v28, 16  ;;  %v708_v55 = vrot.slane %v706_v45, 1 }
 0x338   : > { %11917 = vst [vmem:[#allocation384_spill] sm:$0xff] %v8146_v35  ;;  %v8188_v58 = vsel %vm7783_vm6, %v1169_v3, %v1174_v12 }
 0x339   : > { %11918 = vst [vmem:[#allocation385_spill] sm:$0xff] %v8153_v40  ;;  %v1220_v3 = vshll.u32 %v708_v55, 16  ;;  %v1239_v55 = vshrl.u32 %v7638_v44, 16 }
 0x33a   : > { %11919 = vst [vmem:[#allocation386_spill] sm:$0xff] %v8158_v47 }
 0x33b   : > { %v8142_v61 = vld [vmem:[#allocation1] sm:$0xff]  ;;  %11920 = vst [vmem:[#allocation387_spill] sm:$0xff] %v8163_v49 }
 0x33c   : > { %11916 = vst [vmem:[#allocation383_spill] sm:$0xff] %v8142_v61  ;;  %v1184_v61 = vshrl.u32 %v11924_v28, 16  ;;  %v11930_v28 = vld [vmem:[#allocation320_spill] sm:$0xff] }
 0x33d   : > { %2251 = vst [vmem:[#allocation1] ss:$9 sm:$0xff] %v8127_v52  ;;  %v8194_v52 = vsel %vm7783_vm6, %v1177_v20, %v1181_v38  ;;  %v1212_v50 = vshll.u32 %v11930_v28, 16  ;;  %v1215_v7 = vshrl.u32 %v11930_v28, 16  ;;  %v1223_v20 = vshrl.u32 %v11934_v56, 16 }
 0x33e   : > { %2253 = vst [vmem:[#allocation1 + $0x1] ss:$9 sm:$0xff] %v8133_v43  ;;  %v1228_v38 = vshll.u32 %v7636_v4, 16 }
 0x33f   : > { %2255 = vst [vmem:[#allocation1 + $0x2] ss:$9 sm:$0xff] %v8138_v42 }
 0x340   : > { %2257 = vst [vmem:[#allocation1 + $0x3] ss:$9 sm:$0xff] %v8146_v35  ;;  %v11926_v35 = vld [vmem:[#allocation318_spill] sm:$0xff] }
 0x341   : > { %11921 = vst [vmem:[#allocation388_spill] sm:$0xff] %v8168_v46  ;;  %v1197_v42 = vshll.u32 %v11926_v35, 16  ;;  %v1200_v30 = vshrl.u32 %v11926_v35, 16 }
 0x342   : > { %2259 = vst [vmem:[#allocation1 + $0x4] ss:$9 sm:$0xff] %v8153_v40 }
 0x343   : > { %2261 = vst [vmem:[#allocation1 + $0x5] ss:$9 sm:$0xff] %v8158_v47  ;;  %v11925_v47 = vld [vmem:[#allocation316_spill] sm:$0xff] }
 0x344   : > { %2263 = vst [vmem:[#allocation1 + $0x6] ss:$9 sm:$0xff] %v8163_v49  ;;  %v1189_v49 = vshll.u32 %v11925_v47, 16  ;;  %v1192_v40 = vshrl.u32 %v11925_v47, 16 }
 0x345   : > { %2265 = vst [vmem:[#allocation1 + $0x7] ss:$9 sm:$0xff] %v8168_v46  ;;  %v11928_v46 = vld [vmem:[#allocation319_spill] sm:$0xff] }
 0x346   : > { %11927 = vst [vmem:[#allocation389_spill] sm:$0xff] %v8188_v58  ;;  %v1205_v43 = vshll.u32 %v11928_v46, 16  ;;  %v1208_v45 = vshrl.u32 %v11928_v46, 16  ;;  %v8200_v47 = vsel %vm7783_vm6, %v1184_v61, %v1189_v49  ;;  %v8207_v35 = vsel %vm7783_vm6, %v1192_v40, %v1197_v42 }
 0x347   : > { %11929 = vst [vmem:[#allocation390_spill] sm:$0xff] %v8194_v52  ;;  %v8224_v42 = vsel %vm7783_vm6, %v1215_v7, %v1220_v3  ;;  %v8229_v40 = vsel %vm7783_vm6, %v1223_v20, %v1228_v38  ;;  %v1231_v49 = vshrl.u32 %v7636_v4, 16  ;;  %v11941_v20 = vld [vmem:[#allocation326_spill] sm:$0xff] }
 0x348   : > { %11931 = vst [vmem:[#allocation391_spill] sm:$0xff] %v8200_v47  ;;  %v8214_v46 = vsel %vm7783_vm6, %v1200_v30, %v1205_v43  ;;  %v8219_v61 = vsel %vm7783_vm6, %v1208_v45, %v1212_v50  ;;  %v11939_v43 = vrot.slane %v6741_v53, 3  ;;  %v1236_v50 = vshll.u32 %v7638_v44, 16  ;;  %v11940_v30 = vld [vmem:[#allocation324_spill] sm:$0xff] }
 0x349   : > { %11933 = vst [vmem:[#allocation393_spill] sm:$0xff] %v8207_v35  ;;  %v1244_v45 = vshll.u32 %v11940_v30, 16  ;;  %v1247_v3 = vshrl.u32 %v11940_v30, 16  ;;  %v1251_v38 = vshll.u32 %v11941_v20, 16 }
 0x34a   : > { %11935 = vst [vmem:[#allocation394_spill] sm:$0xff] %v8214_v46  ;;  %v709_v7 = vsel %vm418_vm0, %v6741_v53, %v11939_v43  ;;  %v8249_v53 = vsel %vm7783_vm6, %v1231_v49, %v1236_v50  ;;  %v11948_v49 = vld [vmem:[#allocation330_spill] sm:$0xff] }
 0x34b   : > { %11936 = vst [vmem:[#allocation395_spill] sm:$0xff] %v8219_v61  ;;  %v1282_v50 = vshll.u32 %v11948_v49, 16 }
 0x34c   : > { %v8203_v12 = vld [vmem:[#allocation1] sm:$0xff]  ;;  %11937 = vst [vmem:[#allocation396_spill] sm:$0xff] %v8224_v42 }
 0x34d   : > { %11932 = vst [vmem:[#allocation392_spill] sm:$0xff] %v8203_v12  ;;  %v711_v12 = vrot.slane %v709_v7, 1 }
 0x34e   : > { %2269 = vst [vmem:[#allocation1] ss:$9 sm:$0xff] %v8188_v58  ;;  %v11946_v58 = vld [vmem:[#allocation329_spill] sm:$0xff] }
 0x34f   : > { %2271 = vst [vmem:[#allocation1 + $0x1] ss:$9 sm:$0xff] %v8194_v52  ;;  %v1275_v7 = vshll.u32 %v11946_v58, 16  ;;  %v1278_v30 = vshrl.u32 %v11946_v58, 16 }
 0x350   : > { %2273 = vst [vmem:[#allocation1 + $0x2] ss:$9 sm:$0xff] %v8200_v47  ;;  %v8255_v47 = vsel %vm7783_vm6, %v1239_v55, %v1244_v45  ;;  %v1285_v55 = vshrl.u32 %v11948_v49, 16  ;;  %v1290_v45 = vshll.u32 %v711_v12, 16 }
 0x351   : > { %2275 = vst [vmem:[#allocation1 + $0x3] ss:$9 sm:$0xff] %v8207_v35 }
 0x352   : > { %11938 = vst [vmem:[#allocation397_spill] sm:$0xff] %v8229_v40  ;;  %v8290_v12 = vsel %vm7783_vm6, %v1285_v55, %v1290_v45  ;;  %v11956_v55 = vld [vmem:[#allocation336_spill] sm:$0xff] }
 0x353   : > { %2277 = vst [vmem:[#allocation1 + $0x4] ss:$9 sm:$0xff] %v8214_v46  ;;  %v11944_v46 = vld [vmem:[#allocation328_spill] sm:$0xff]  ;;  %v1321_v45 = vshll.u32 %v11956_v55, 16 }
 0x354   : > { %2279 = vst [vmem:[#allocation1 + $0x5] ss:$9 sm:$0xff] %v8219_v61  ;;  %v1267_v35 = vshll.u32 %v11944_v46, 16  ;;  %v1270_v52 = vshrl.u32 %v11944_v46, 16 }
 0x355   : > { %2281 = vst [vmem:[#allocation1 + $0x6] ss:$9 sm:$0xff] %v8224_v42  ;;  %v11942_v42 = vld [vmem:[#allocation327_spill] sm:$0xff] }
 0x356   : > { %2283 = vst [vmem:[#allocation1 + $0x7] ss:$9 sm:$0xff] %v8229_v40  ;;  %v1254_v40 = vshrl.u32 %v11941_v20, 16  ;;  %v1259_v61 = vshll.u32 %v11942_v42, 16  ;;  %v1262_v43 = vshrl.u32 %v11942_v42, 16  ;;  %v8261_v20 = vsel %vm7783_vm6, %v1247_v3, %v1251_v38 }
 0x357   : > { %11943 = vst [vmem:[#allocation398_spill] sm:$0xff] %v8249_v53  ;;  %v8280_v3 = vsel %vm7783_vm6, %v1270_v52, %v1275_v7  ;;  %v1293_v52 = vshrl.u32 %v7685_v36, 16  ;;  %v1309_v38 = vshrl.u32 %v7689_v57, 16 }
 0x358   : > { %11945 = vst [vmem:[#allocation399_spill] sm:$0xff] %v8255_v47  ;;  %v8269_v42 = vsel %vm7783_vm6, %v1254_v40, %v1259_v61  ;;  %v8275_v46 = vsel %vm7783_vm6, %v1262_v43, %v1267_v35  ;;  %v8285_v61 = vsel %vm7783_vm6, %v1278_v30, %v1282_v50  ;;  %v1298_v35 = vshll.u32 %v7687_v15, 16  ;;  %v11955_v43 = vld [vmem:[#allocation334_spill] sm:$0xff] }
 0x359   : > { %11947 = vst [vmem:[#allocation400_spill] sm:$0xff] %v8261_v20  ;;  %v1301_v40 = vshrl.u32 %v7687_v15, 16  ;;  %v1306_v30 = vshll.u32 %v7689_v57, 16  ;;  %v1314_v7 = vshll.u32 %v11955_v43, 16  ;;  %v1317_v50 = vshrl.u32 %v11955_v43, 16 }
 0x35a   : > { %11950 = vst [vmem:[#allocation402_spill] sm:$0xff] %v8269_v42 }
 0x35b   : > { %11951 = vst [vmem:[#allocation403_spill] sm:$0xff] %v8275_v46 }
 0x35c   : > { %11952 = vst [vmem:[#allocation404_spill] sm:$0xff] %v8280_v3 }
 0x35d   : > { %v8265_v44 = vld [vmem:[#allocation1] sm:$0xff]  ;;  %11953 = vst [vmem:[#allocation405_spill] sm:$0xff] %v8285_v61 }
 0x35e   : > { %11949 = vst [vmem:[#allocation401_spill] sm:$0xff] %v8265_v44  ;;  %v8306_v44 = vsel %vm7783_vm6, %v1293_v52, %v1298_v35  ;;  %v11962_v52 = vld [vmem:[#allocation339_spill] sm:$0xff] }
 0x35f   : > { %2287 = vst [vmem:[#allocation1] ss:$9 sm:$0xff] %v8249_v53  ;;  %v8318_v53 = vsel %vm7783_vm6, %v1309_v38, %v1314_v7  ;;  %v1345_v35 = vshll.u32 %v11962_v52, 16 }
 0x360   : > { %2289 = vst [vmem:[#allocation1 + $0x1] ss:$9 sm:$0xff] %v8255_v47 }
 0x361   : > { %2291 = vst [vmem:[#allocation1 + $0x2] ss:$9 sm:$0xff] %v8261_v20  ;;  %v11960_v20 = vld [vmem:[#allocation338_spill] sm:$0xff] }
 0x362   : > { %2293 = vst [vmem:[#allocation1 + $0x3] ss:$9 sm:$0xff] %v8269_v42  ;;  %v1337_v47 = vshll.u32 %v11960_v20, 16  ;;  %v1340_v43 = vshrl.u32 %v11960_v20, 16 }
 0x363   : > { %11954 = vst [vmem:[#allocation406_spill] sm:$0xff] %v8290_v12 }
 0x364   : > { %2295 = vst [vmem:[#allocation1 + $0x4] ss:$9 sm:$0xff] %v8275_v46  ;;  %v8312_v46 = vsel %vm7783_vm6, %v1301_v40, %v1306_v30  ;;  %v1348_v40 = vshrl.u32 %v11962_v52, 16  ;;  %v1352_v30 = vshll.u32 %v7730_v60, 16 }
 0x365   : > { %2297 = vst [vmem:[#allocation1 + $0x5] ss:$9 sm:$0xff] %v8280_v3 }
 0x366   : > { %2299 = vst [vmem:[#allocation1 + $0x6] ss:$9 sm:$0xff] %v8285_v61  ;;  %v11958_v61 = vld [vmem:[#allocation337_spill] sm:$0xff] }
 0x367   : > { %2301 = vst [vmem:[#allocation1 + $0x7] ss:$9 sm:$0xff] %v8290_v12  ;;  %v1324_v12 = vshrl.u32 %v11956_v55, 16  ;;  %v1329_v3 = vshll.u32 %v11958_v61, 16  ;;  %v1332_v42 = vshrl.u32 %v11958_v61, 16  ;;  %v8326_v55 = vsel %vm7783_vm6, %v1317_v50, %v1321_v45  ;;  %v11965_v61 = vld [vmem:[#allocation75_spill] sm:$0xff] }
 0x368   : > { %11957 = vst [vmem:[#allocation407_spill] sm:$0xff] %v8306_v44  ;;  %v11966_v15 = vrot.slane %v11965_v61, 3  ;;  %v8347_v45 = vsel %vm7783_vm6, %v1340_v43, %v1345_v35 }
 0x369   : > { %11959 = vst [vmem:[#allocation408_spill] sm:$0xff] %v8312_v46  ;;  %v8337_v7 = vsel %vm7783_vm6, %v1324_v12, %v1329_v3  ;;  %v8342_v50 = vsel %vm7783_vm6, %v1332_v42, %v1337_v47  ;;  %v1355_v47 = vshrl.u32 %v7730_v60, 16  ;;  %v11971_v3 = vld [vmem:[#allocation341_spill] sm:$0xff]  ;;  %v11972_v12 = vld [vmem:[#allocation342_spill] sm:$0xff] }
 0x36a   : > { %11961 = vst [vmem:[#allocation409_spill] sm:$0xff] %v8318_v53  ;;  %v712_v38 = vsel %vm418_vm0, %v11965_v61, %v11966_v15  ;;  %v8352_v15 = vsel %vm7783_vm6, %v1348_v40, %v1352_v30  ;;  %v1363_v61 = vshrl.u32 %v11971_v3, 16  ;;  %v1368_v43 = vshll.u32 %v11972_v12, 16 }
 0x36b   : > { %11964 = vst [vmem:[#allocation411_spill] sm:$0xff] %v8326_v55  ;;  %v1371_v35 = vshrl.u32 %v11972_v12, 16 }
 0x36c   : > { %11967 = vst [vmem:[#allocation75_spill] sm:$0xff] %v8337_v7 }
 0x36d   : > { %11968 = vst [vmem:[#allocation412_spill] sm:$0xff] %v8342_v50 }
 0x36e   : > { %v8322_v57 = vld [vmem:[#allocation1] sm:$0xff]  ;;  %11969 = vst [vmem:[#allocation413_spill] sm:$0xff] %v8347_v45 }
 0x36f   : > { %11963 = vst [vmem:[#allocation410_spill] sm:$0xff] %v8322_v57  ;;  %v714_v57 = vrot.slane %v712_v38, 1  ;;  %v11973_v38 = vld [vmem:[#allocation343_spill] sm:$0xff] }
 0x370   : > { %2305 = vst [vmem:[#allocation1] ss:$9 sm:$0xff] %v8306_v44  ;;  %v1376_v40 = vshll.u32 %v11973_v38, 16  ;;  %v1379_v30 = vshrl.u32 %v11973_v38, 16  ;;  %v11978_v44 = vld [vmem:[#allocation347_spill] sm:$0xff] }
 0x371   : > { %2307 = vst [vmem:[#allocation1 + $0x1] ss:$9 sm:$0xff] %v8312_v46  ;;  %v1360_v42 = vshll.u32 %v714_v57, 16  ;;  %v1399_v12 = vshll.u32 %v11978_v44, 16  ;;  %v1402_v3 = vshrl.u32 %v11978_v44, 16 }
 0x372   : > { %2309 = vst [vmem:[#allocation1 + $0x2] ss:$9 sm:$0xff] %v8318_v53  ;;  %v8373_v53 = vsel %vm7783_vm6, %v1363_v61, %v1368_v43  ;;  %v8379_v38 = vsel %vm7783_vm6, %v1371_v35, %v1376_v40  ;;  %v11983_v43 = vld [vmem:[#allocation349_spill] sm:$0xff] }
 0x373   : > { %2311 = vst [vmem:[#allocation1 + $0x3] ss:$9 sm:$0xff] %v8326_v55  ;;  %v11985_v40 = vld [vmem:[#allocation85_spill] sm:$0xff] }
 0x374   : > { %11970 = vst [vmem:[#allocation414_spill] sm:$0xff] %v8352_v15  ;;  %v11986_v44 = vrot.slane %v11985_v40, 3 }
 0x375   : > { %2313 = vst [vmem:[#allocation1 + $0x4] ss:$9 sm:$0xff] %v8337_v7  ;;  %v11974_v7 = vld [vmem:[#allocation345_spill] sm:$0xff] }
 0x376   : > { %2315 = vst [vmem:[#allocation1 + $0x5] ss:$9 sm:$0xff] %v8342_v50  ;;  %v1384_v55 = vshll.u32 %v11974_v7, 16  ;;  %v11976_v50 = vld [vmem:[#allocation346_spill] sm:$0xff] }
 0x377   : > { %2317 = vst [vmem:[#allocation1 + $0x6] ss:$9 sm:$0xff] %v8347_v45  ;;  %v8367_v45 = vsel %vm7783_vm6, %v1355_v47, %v1360_v42  ;;  %v1391_v57 = vshll.u32 %v11976_v50, 16  ;;  %v1394_v46 = vshrl.u32 %v11976_v50, 16  ;;  %v11980_v47 = vld [vmem:[#allocation348_spill] sm:$0xff]  ;;  %v1415_v50 = vshll.u32 %v11983_v43, 16 }
 0x378   : > { %2319 = vst [vmem:[#allocation1 + $0x7] ss:$9 sm:$0xff] %v8352_v15  ;;  %v1387_v15 = vshrl.u32 %v11974_v7, 16  ;;  %v1407_v42 = vshll.u32 %v11980_v47, 16  ;;  %v8387_v7 = vsel %vm7783_vm6, %v1379_v30, %v1384_v55  ;;  %v1410_v61 = vshrl.u32 %v11980_v47, 16 }
 0x379   : > { %11975 = vst [vmem:[#allocation415_spill] sm:$0xff] %v8367_v45  ;;  %v8403_v55 = vsel %vm7783_vm6, %v1394_v46, %v1399_v12  ;;  %v11990_v46 = vld [vmem:[#allocation350_spill] sm:$0xff] }
 0x37a   : > { %11977 = vst [vmem:[#allocation416_spill] sm:$0xff] %v8373_v53  ;;  %v8394_v35 = vsel %vm7783_vm6, %v1387_v15, %v1391_v57  ;;  %v8408_v30 = vsel %vm7783_vm6, %v1402_v3, %v1407_v42  ;;  %v8413_v15 = vsel %vm7783_vm6, %v1410_v61, %v1415_v50  ;;  %v1422_v3 = vshll.u32 %v11990_v46, 16 }
 0x37b   : > { %11979 = vst [vmem:[#allocation417_spill] sm:$0xff] %v8379_v38  ;;  %v1425_v12 = vshrl.u32 %v11990_v46, 16 }
 0x37c   : > { %11982 = vst [vmem:[#allocation419_spill] sm:$0xff] %v8387_v7 }
 0x37d   : > { %11984 = vst [vmem:[#allocation420_spill] sm:$0xff] %v8394_v35 }
 0x37e   : > { %11987 = vst [vmem:[#allocation85_spill] sm:$0xff] %v8403_v55 }
 0x37f   : > { %v8383_v60 = vld [vmem:[#allocation1] sm:$0xff]  ;;  %11988 = vst [vmem:[#allocation421_spill] sm:$0xff] %v8408_v30 }
 0x380   : > { %11981 = vst [vmem:[#allocation418_spill] sm:$0xff] %v8383_v60  ;;  %v715_v60 = vsel %vm418_vm0, %v11985_v40, %v11986_v44  ;;  %v1418_v44 = vshrl.u32 %v11983_v43, 16 }
 0x381   : > { %2323 = vst [vmem:[#allocation1] ss:$9 sm:$0xff] %v8367_v45  ;;  %v717_v57 = vrot.slane %v715_v60, 1 }
 0x382   : > { %2325 = vst [vmem:[#allocation1 + $0x1] ss:$9 sm:$0xff] %v8373_v53  ;;  %v8424_v50 = vsel %vm7783_vm6, %v1418_v44, %v1422_v3  ;;  %v11998_v44 = vld [vmem:[#allocation6_spill] sm:$0xff]  ;;  %v11999_v3 = vld [vmem:[#allocation7_spill] sm:$0xff] }
 0x383   : > { %2327 = vst [vmem:[#allocation1 + $0x2] ss:$9 sm:$0xff] %v8379_v38  ;;  %v1430_v42 = vshll.u32 %v717_v57, 16  ;;  %v11997_v57 = vld [vmem:[#allocation5_spill] sm:$0xff] }
 0x384   : > { %2329 = vst [vmem:[#allocation1 + $0x3] ss:$9 sm:$0xff] %v8387_v7 }
 0x385   : > { %11989 = vst [vmem:[#allocation422_spill] sm:$0xff] %v8413_v15  ;;  %v8428_v60 = vsel %vm7783_vm6, %v1425_v12, %v1430_v42  ;;  %v12000_v12 = vld [vmem:[#allocation8_spill] sm:$0xff]  ;;  %v12001_v42 = vld [vmem:[#allocation9_spill] sm:$0xff] }
 0x386   : > { %2331 = vst [vmem:[#allocation1 + $0x4] ss:$9 sm:$0xff] %v8394_v35 }
 0x387   : > { %2333 = vst [vmem:[#allocation1 + $0x5] ss:$9 sm:$0xff] %v8403_v55 }
 0x388   : > { %2335 = vst [vmem:[#allocation1 + $0x6] ss:$9 sm:$0xff] %v8408_v30  ;;  %v11996_v30 = vld [vmem:[#allocation4_spill] sm:$0xff] }
 0x389   : > { %2337 = vst [vmem:[#allocation1 + $0x7] ss:$9 sm:$0xff] %v8413_v15  ;;  %v11995_v15 = vld [vmem:[#allocation3_spill] sm:$0xff] }
 0x38a   : > { %11991 = vst [vmem:[#allocation423_spill] sm:$0xff] %v8424_v50 }
 0x38b   : > { %11992 = vst [vmem:[#allocation424_spill] sm:$0xff] %v8428_v60 }
 0x390   : > { %v8430_v61 = vld [vmem:[#allocation1] sm:$0xff] }
 0x391   : > { %11993 = vst [vmem:[#allocation425_spill] sm:$0xff] %v8430_v61  ;;  %v12002_v61 = vld [vmem:[#allocation10_spill] sm:$0xff] }
 0x392   : > { %2341 = vst [vmem:[#allocation1] ss:$9 sm:$0xff] %v8424_v50 }
 0x393   : > { %2343 = vst [vmem:[#allocation1 + $0x1] ss:$9 sm:$0xff] %v8428_v60  ;;  %v12011_v60 = vld [vmem:[#allocation19_spill] sm:$0xff] }
 0x39a   : > { %v8434_v40 = vld [vmem:[#allocation1] sm:$0xff] }
 0x39b   : > { %11994 = vst [vmem:[#allocation426_spill] sm:$0xff] %v8434_v40  ;;  %v12003_v40 = vld [vmem:[#allocation11_spill] sm:$0xff] }
 0x39c   : > { %2370 = vst [vmem:[#allocation1] ss:$9 sm:$0xff] %v11995_v15  ;;  %v12004_v15 = vld [vmem:[#allocation12_spill] sm:$0xff] }
 0x39d   : > { %2372 = vst [vmem:[#allocation1 + $0x1] ss:$9 sm:$0xff] %v11996_v30  ;;  %v12005_v30 = vld [vmem:[#allocation13_spill] sm:$0xff] }
 0x39e   : > { %2374 = vst [vmem:[#allocation1 + $0x2] ss:$9 sm:$0xff] %v11997_v57  ;;  %v12006_v57 = vld [vmem:[#allocation14_spill] sm:$0xff] }
 0x39f   : > { %2376 = vst [vmem:[#allocation1 + $0x3] ss:$9 sm:$0xff] %v11998_v44  ;;  %v12007_v44 = vld [vmem:[#allocation15_spill] sm:$0xff] }
 0x3a0   : > { %2378 = vst [vmem:[#allocation1 + $0x4] ss:$9 sm:$0xff] %v11999_v3  ;;  %v12008_v3 = vld [vmem:[#allocation16_spill] sm:$0xff] }
 0x3a1   : > { %2380 = vst [vmem:[#allocation1 + $0x5] ss:$9 sm:$0xff] %v12000_v12  ;;  %v12009_v12 = vld [vmem:[#allocation17_spill] sm:$0xff] }
 0x3a2   : > { %2382 = vst [vmem:[#allocation1 + $0x6] ss:$9 sm:$0xff] %v12001_v42  ;;  %v12010_v42 = vld [vmem:[#allocation18_spill] sm:$0xff] }
 0x3a3   : > { %2384 = vst [vmem:[#allocation1 + $0x7] ss:$9 sm:$0xff] %v12002_v61 }
 0x3aa   : > { %v2385_v51 = vld [vmem:[#allocation1] sm:$0xff] }
 0x3ab   : > { %2491 = vrot.lane.b32.xlu0 %v2385_v51, %s6420_s17  ;;  %2387 = vst [vmem:[#allocation1] ss:$9 sm:$0xff] %v12003_v40  ;;  %v12012_v51 = vld [vmem:[#allocation20_spill] sm:$0xff]  ;;  %v12013_v40 = vld [vmem:[#allocation21_spill] sm:$0xff] }
 0x3ac   : > { %2388 = vst [vmem:[#allocation1 + $0x1] ss:$9 sm:$0xff] %v12004_v15  ;;  %v12014_v15 = vld [vmem:[#allocation22_spill] sm:$0xff] }
 0x3ad   : > { %2389 = vst [vmem:[#allocation1 + $0x2] ss:$9 sm:$0xff] %v12005_v30  ;;  %v12015_v30 = vld [vmem:[#allocation23_spill] sm:$0xff] }
 0x3ae   : > { %2390 = vst [vmem:[#allocation1 + $0x3] ss:$9 sm:$0xff] %v12006_v57  ;;  %v12016_v57 = vld [vmem:[#allocation24_spill] sm:$0xff] }
 0x3af   : > { %2391 = vst [vmem:[#allocation1 + $0x4] ss:$9 sm:$0xff] %v12007_v44  ;;  %v12017_v44 = vld [vmem:[#allocation25_spill] sm:$0xff] }
 0x3b0   : > { %2392 = vst [vmem:[#allocation1 + $0x5] ss:$9 sm:$0xff] %v12008_v3  ;;  %v12018_v3 = vld [vmem:[#allocation26_spill] sm:$0xff] }
 0x3b1   : > { %2393 = vst [vmem:[#allocation1 + $0x6] ss:$9 sm:$0xff] %v12009_v12 }
 0x3b2   : > { %2394 = vst [vmem:[#allocation1 + $0x7] ss:$9 sm:$0xff] %v12010_v42  ;;  %v12019_v42 = vld [vmem:[#allocation27_spill] sm:$0xff] }
 0x3b9   : > { %v2395_v61 = vld [vmem:[#allocation1] sm:$0xff] }
 0x3ba   : > { %2397 = vst [vmem:[#allocation1] ss:$9 sm:$0xff] %v12011_v60  ;;  %2493 = vrot.lane.b32.xlu0 %v2395_v61, %s6420_s17  ;;  %v12020_v60 = vld [vmem:[#allocation28_spill] sm:$0xff]  ;;  %v12021_v61 = vld [vmem:[#allocation29_spill] sm:$0xff] }
 0x3bb   : > { %2398 = vst [vmem:[#allocation1 + $0x1] ss:$9 sm:$0xff] %v12012_v51  ;;  %v12022_v51 = vld [vmem:[#allocation30_spill] sm:$0xff] }
 0x3bc   : > { %2399 = vst [vmem:[#allocation1 + $0x2] ss:$9 sm:$0xff] %v12013_v40  ;;  %v12023_v40 = vld [vmem:[#allocation31_spill] sm:$0xff] }
 0x3bd   : > { %2400 = vst [vmem:[#allocation1 + $0x3] ss:$9 sm:$0xff] %v12014_v15  ;;  %v12024_v15 = vld [vmem:[#allocation32_spill] sm:$0xff] }
 0x3be   : > { %2401 = vst [vmem:[#allocation1 + $0x4] ss:$9 sm:$0xff] %v12015_v30  ;;  %v12025_v30 = vld [vmem:[#allocation33_spill] sm:$0xff] }
 0x3bf   : > { %2402 = vst [vmem:[#allocation1 + $0x5] ss:$9 sm:$0xff] %v12016_v57  ;;  %v12026_v57 = vld [vmem:[#allocation34_spill] sm:$0xff] }
 0x3c0   : > { %2403 = vst [vmem:[#allocation1 + $0x6] ss:$9 sm:$0xff] %v12017_v44 }
 0x3c1   : > { %2404 = vst [vmem:[#allocation1 + $0x7] ss:$9 sm:$0xff] %v12018_v3  ;;  %v12027_v3 = vld [vmem:[#allocation35_spill] sm:$0xff] }
 0x3c8   : > { %v2405_v12 = vld [vmem:[#allocation1] sm:$0xff] }
 0x3c9   : > { %2407 = vst [vmem:[#allocation1] ss:$9 sm:$0xff] %v12019_v42  ;;  %2495 = vrot.lane.b32.xlu2 %v2405_v12, %s6420_s17  ;;  %v12028_v12 = vld [vmem:[#allocation36_spill] sm:$0xff]  ;;  %v12029_v42 = vld [vmem:[#allocation37_spill] sm:$0xff] }
 0x3ca   : > { %2408 = vst [vmem:[#allocation1 + $0x1] ss:$9 sm:$0xff] %v12020_v60  ;;  %v12030_v60 = vld [vmem:[#allocation38_spill] sm:$0xff] }
 0x3cb   : > { %2409 = vst [vmem:[#allocation1 + $0x2] ss:$9 sm:$0xff] %v12021_v61  ;;  %v12031_v61 = vld [vmem:[#allocation39_spill] sm:$0xff] }
 0x3cc   : > { %2410 = vst [vmem:[#allocation1 + $0x3] ss:$9 sm:$0xff] %v12022_v51  ;;  %v12032_v51 = vld [vmem:[#allocation40_spill] sm:$0xff] }
 0x3cd   : > { %2411 = vst [vmem:[#allocation1 + $0x4] ss:$9 sm:$0xff] %v12023_v40  ;;  %v12033_v40 = vld [vmem:[#allocation41_spill] sm:$0xff] }
 0x3ce   : > { %2412 = vst [vmem:[#allocation1 + $0x5] ss:$9 sm:$0xff] %v12024_v15  ;;  %v12034_v15 = vld [vmem:[#allocation42_spill] sm:$0xff] }
 0x3cf   : > { %2413 = vst [vmem:[#allocation1 + $0x6] ss:$9 sm:$0xff] %v12025_v30 }
 0x3d0   : > { %2414 = vst [vmem:[#allocation1 + $0x7] ss:$9 sm:$0xff] %v12026_v57  ;;  %v12035_v57 = vld [vmem:[#allocation43_spill] sm:$0xff] }
 0x3d7   : > { %v2415_v44 = vld [vmem:[#allocation1] sm:$0xff] }
 0x3d8   : > { %2497 = vrot.lane.b32.xlu1 %v2415_v44, %s6420_s17  ;;  %2417 = vst [vmem:[#allocation1] ss:$9 sm:$0xff] %v12027_v3  ;;  %v12036_v44 = vld [vmem:[#allocation44_spill] sm:$0xff]  ;;  %v12037_v3 = vld [vmem:[#allocation45_spill] sm:$0xff] }
 0x3d9   : > { %2418 = vst [vmem:[#allocation1 + $0x1] ss:$9 sm:$0xff] %v12028_v12  ;;  %v12038_v12 = vld [vmem:[#allocation46_spill] sm:$0xff] }
 0x3da   : > { %2419 = vst [vmem:[#allocation1 + $0x2] ss:$9 sm:$0xff] %v12029_v42  ;;  %v12039_v42 = vld [vmem:[#allocation47_spill] sm:$0xff] }
 0x3db   : > { %2420 = vst [vmem:[#allocation1 + $0x3] ss:$9 sm:$0xff] %v12030_v60  ;;  %v12040_v60 = vld [vmem:[#allocation48_spill] sm:$0xff] }
 0x3dc   : > { %2421 = vst [vmem:[#allocation1 + $0x4] ss:$9 sm:$0xff] %v12031_v61  ;;  %v12041_v61 = vld [vmem:[#allocation49_spill] sm:$0xff] }
 0x3dd   : > { %2422 = vst [vmem:[#allocation1 + $0x5] ss:$9 sm:$0xff] %v12032_v51  ;;  %v12042_v51 = vld [vmem:[#allocation50_spill] sm:$0xff] }
 0x3de   : > { %2423 = vst [vmem:[#allocation1 + $0x6] ss:$9 sm:$0xff] %v12033_v40 }
 0x3df   : > { %2424 = vst [vmem:[#allocation1 + $0x7] ss:$9 sm:$0xff] %v12034_v15  ;;  %v12044_v15 = vld [vmem:[#allocation51_spill] sm:$0xff] }
 0x3e6   : > { %v2425_v30 = vld [vmem:[#allocation1] sm:$0xff] }
 0x3e7   : > { %2427 = vst [vmem:[#allocation1] ss:$9 sm:$0xff] %v12035_v57  ;;  %2499 = vrot.lane.b32.xlu0 %v2425_v30, %s6420_s17  ;;  %v12045_v57 = vld [vmem:[#allocation52_spill] sm:$0xff]  ;;  %v12046_v30 = vld [vmem:[#allocation53_spill] sm:$0xff] }
 0x3e8   : > { %2428 = vst [vmem:[#allocation1 + $0x1] ss:$9 sm:$0xff] %v12036_v44  ;;  %v12047_v44 = vld [vmem:[#allocation54_spill] sm:$0xff] }
 0x3e9   : > { %2429 = vst [vmem:[#allocation1 + $0x2] ss:$9 sm:$0xff] %v12037_v3  ;;  %v12048_v3 = vld [vmem:[#allocation55_spill] sm:$0xff] }
 0x3ea   : > { %2430 = vst [vmem:[#allocation1 + $0x3] ss:$9 sm:$0xff] %v12038_v12  ;;  %v12049_v12 = vld [vmem:[#allocation56_spill] sm:$0xff] }
 0x3eb   : > { %2431 = vst [vmem:[#allocation1 + $0x4] ss:$9 sm:$0xff] %v12039_v42  ;;  %v12050_v42 = vld [vmem:[#allocation57_spill] sm:$0xff] }
 0x3ec   : > { %2432 = vst [vmem:[#allocation1 + $0x5] ss:$9 sm:$0xff] %v12040_v60  ;;  %v12051_v60 = vld [vmem:[#allocation58_spill] sm:$0xff] }
 0x3ed   : > { %2433 = vst [vmem:[#allocation1 + $0x6] ss:$9 sm:$0xff] %v12041_v61 }
 0x3ee   : > { %2434 = vst [vmem:[#allocation1 + $0x7] ss:$9 sm:$0xff] %v12042_v51  ;;  %v12053_v51 = vld [vmem:[#allocation59_spill] sm:$0xff] }
 0x3f5   : > { %v8489_v40 = vld [vmem:[#allocation1] sm:$0xff] }
 0x3f6   : > { %12043 = vst [vmem:[#allocation3_spill] sm:$0xff] %v8489_v40  ;;  %v12054_v40 = vld [vmem:[#allocation60_spill] sm:$0xff] }
 0x3f7   : > { %2437 = vst [vmem:[#allocation1] ss:$9 sm:$0xff] %v12044_v15  ;;  %v12055_v15 = vld [vmem:[#allocation61_spill] sm:$0xff] }
 0x3f8   : > { %2438 = vst [vmem:[#allocation1 + $0x1] ss:$9 sm:$0xff] %v12045_v57  ;;  %v12056_v57 = vld [vmem:[#allocation62_spill] sm:$0xff] }
 0x3f9   : > { %2439 = vst [vmem:[#allocation1 + $0x2] ss:$9 sm:$0xff] %v12046_v30  ;;  %v12057_v30 = vld [vmem:[#allocation63_spill] sm:$0xff] }
 0x3fa   : > { %2440 = vst [vmem:[#allocation1 + $0x3] ss:$9 sm:$0xff] %v12047_v44  ;;  %v12058_v44 = vld [vmem:[#allocation64_spill] sm:$0xff] }
 0x3fb   : > { %2441 = vst [vmem:[#allocation1 + $0x4] ss:$9 sm:$0xff] %v12048_v3  ;;  %v12059_v3 = vld [vmem:[#allocation65_spill] sm:$0xff] }
 0x3fc   : > { %2442 = vst [vmem:[#allocation1 + $0x5] ss:$9 sm:$0xff] %v12049_v12  ;;  %v12060_v12 = vld [vmem:[#allocation66_spill] sm:$0xff] }
 0x3fd   : > { %2443 = vst [vmem:[#allocation1 + $0x6] ss:$9 sm:$0xff] %v12050_v42 }
 0x3fe   : > { %2444 = vst [vmem:[#allocation1 + $0x7] ss:$9 sm:$0xff] %v12051_v60  ;;  %v12062_v60 = vld [vmem:[#allocation67_spill] sm:$0xff] }
 0x405   : > { %v8499_v61 = vld [vmem:[#allocation1] sm:$0xff] }
 0x406   : > { %12052 = vst [vmem:[#allocation4_spill] sm:$0xff] %v8499_v61  ;;  %v12063_v61 = vld [vmem:[#allocation68_spill] sm:$0xff] }
 0x407   : > { %2447 = vst [vmem:[#allocation1] ss:$9 sm:$0xff] %v12053_v51  ;;  %v12064_v51 = vld [vmem:[#allocation69_spill] sm:$0xff] }
 0x408   : > { %2448 = vst [vmem:[#allocation1 + $0x1] ss:$9 sm:$0xff] %v12054_v40  ;;  %v12065_v40 = vld [vmem:[#allocation70_spill] sm:$0xff] }
 0x409   : > { %2449 = vst [vmem:[#allocation1 + $0x2] ss:$9 sm:$0xff] %v12055_v15  ;;  %v12066_v15 = vld [vmem:[#allocation71_spill] sm:$0xff] }
 0x40a   : > { %2450 = vst [vmem:[#allocation1 + $0x3] ss:$9 sm:$0xff] %v12056_v57  ;;  %v12067_v57 = vld [vmem:[#allocation72_spill] sm:$0xff] }
 0x40b   : > { %2451 = vst [vmem:[#allocation1 + $0x4] ss:$9 sm:$0xff] %v12057_v30  ;;  %v12068_v30 = vld [vmem:[#allocation73_spill] sm:$0xff] }
 0x40c   : > { %2452 = vst [vmem:[#allocation1 + $0x5] ss:$9 sm:$0xff] %v12058_v44  ;;  %v12069_v44 = vld [vmem:[#allocation74_spill] sm:$0xff] }
 0x40d   : > { %2453 = vst [vmem:[#allocation1 + $0x6] ss:$9 sm:$0xff] %v12059_v3 }
 0x40e   : > { %2454 = vst [vmem:[#allocation1 + $0x7] ss:$9 sm:$0xff] %v12060_v12  ;;  %v12071_v12 = vld [vmem:[#allocation76_spill] sm:$0xff] }
 0x415   : > { %v8509_v42 = vld [vmem:[#allocation1] sm:$0xff] }
 0x416   : > { %12061 = vst [vmem:[#allocation5_spill] sm:$0xff] %v8509_v42  ;;  %v12072_v42 = vld [vmem:[#allocation77_spill] sm:$0xff] }
 0x417   : > { %2457 = vst [vmem:[#allocation1] ss:$9 sm:$0xff] %v12062_v60  ;;  %v12073_v60 = vld [vmem:[#allocation78_spill] sm:$0xff] }
 0x418   : > { %2458 = vst [vmem:[#allocation1 + $0x1] ss:$9 sm:$0xff] %v12063_v61  ;;  %v12074_v61 = vld [vmem:[#allocation79_spill] sm:$0xff] }
 0x419   : > { %2459 = vst [vmem:[#allocation1 + $0x2] ss:$9 sm:$0xff] %v12064_v51  ;;  %v12075_v51 = vld [vmem:[#allocation80_spill] sm:$0xff] }
 0x41a   : > { %2460 = vst [vmem:[#allocation1 + $0x3] ss:$9 sm:$0xff] %v12065_v40  ;;  %v12076_v40 = vld [vmem:[#allocation81_spill] sm:$0xff] }
 0x41b   : > { %2461 = vst [vmem:[#allocation1 + $0x4] ss:$9 sm:$0xff] %v12066_v15  ;;  %v12077_v15 = vld [vmem:[#allocation82_spill] sm:$0xff] }
 0x41c   : > { %2462 = vst [vmem:[#allocation1 + $0x5] ss:$9 sm:$0xff] %v12067_v57  ;;  %v12078_v57 = vld [vmem:[#allocation83_spill] sm:$0xff] }
 0x41d   : > { %2463 = vst [vmem:[#allocation1 + $0x6] ss:$9 sm:$0xff] %v12068_v30 }
 0x41e   : > { %2464 = vst [vmem:[#allocation1 + $0x7] ss:$9 sm:$0xff] %v12069_v44  ;;  %v12080_v44 = vld [vmem:[#allocation84_spill] sm:$0xff] }
 0x425   : > { %v8519_v3 = vld [vmem:[#allocation1] sm:$0xff] }
 0x426   : > { %12070 = vst [vmem:[#allocation6_spill] sm:$0xff] %v8519_v3  ;;  %v12081_v3 = vld [vmem:[#allocation86_spill] sm:$0xff] }
 0x427   : > { %2467 = vst [vmem:[#allocation1] ss:$9 sm:$0xff] %v12071_v12  ;;  %v12082_v12 = vld [vmem:[#allocation87_spill] sm:$0xff] }
 0x428   : > { %2468 = vst [vmem:[#allocation1 + $0x1] ss:$9 sm:$0xff] %v12072_v42  ;;  %v12083_v42 = vld [vmem:[#allocation88_spill] sm:$0xff] }
 0x429   : > { %2469 = vst [vmem:[#allocation1 + $0x2] ss:$9 sm:$0xff] %v12073_v60  ;;  %v12084_v60 = vld [vmem:[#allocation89_spill] sm:$0xff] }
 0x42a   : > { %2470 = vst [vmem:[#allocation1 + $0x3] ss:$9 sm:$0xff] %v12074_v61  ;;  %v12085_v61 = vld [vmem:[#allocation90_spill] sm:$0xff] }
 0x42b   : > { %2471 = vst [vmem:[#allocation1 + $0x4] ss:$9 sm:$0xff] %v12075_v51  ;;  %v12086_v51 = vld [vmem:[#allocation91_spill] sm:$0xff] }
 0x42c   : > { %2472 = vst [vmem:[#allocation1 + $0x5] ss:$9 sm:$0xff] %v12076_v40  ;;  %v12087_v40 = vld [vmem:[#allocation92_spill] sm:$0xff] }
 0x42d   : > { %2473 = vst [vmem:[#allocation1 + $0x6] ss:$9 sm:$0xff] %v12077_v15 }
 0x42e   : > { %2474 = vst [vmem:[#allocation1 + $0x7] ss:$9 sm:$0xff] %v12078_v57  ;;  %v12089_v57 = vld [vmem:[#allocation93_spill] sm:$0xff] }
 0x435   : > { %v8529_v30 = vld [vmem:[#allocation1] sm:$0xff] }
 0x436   : > { %12079 = vst [vmem:[#allocation7_spill] sm:$0xff] %v8529_v30  ;;  %v12090_v30 = vld [vmem:[#allocation94_spill] sm:$0xff] }
 0x437   : > { %2477 = vst [vmem:[#allocation1] ss:$9 sm:$0xff] %v12080_v44 }
 0x438   : > { %2478 = vst [vmem:[#allocation1 + $0x1] ss:$9 sm:$0xff] %v12081_v3 }
 0x439   : > { %2479 = vst [vmem:[#allocation1 + $0x2] ss:$9 sm:$0xff] %v12082_v12 }
 0x43a   : > { %2480 = vst [vmem:[#allocation1 + $0x3] ss:$9 sm:$0xff] %v12083_v42  ;;  %v12100_v42 = vld [vmem:[#allocation305_spill] sm:$0xff] }
 0x43b   : > { %2481 = vst [vmem:[#allocation1 + $0x4] ss:$9 sm:$0xff] %v12084_v60  ;;  %v12101_v60 = vld [vmem:[#allocation306_spill] sm:$0xff] }
 0x43c   : > { %2482 = vst [vmem:[#allocation1 + $0x5] ss:$9 sm:$0xff] %v12085_v61  ;;  %v12102_v61 = vld [vmem:[#allocation307_spill] sm:$0xff] }
 0x43d   : > { %2483 = vst [vmem:[#allocation1 + $0x6] ss:$9 sm:$0xff] %v12086_v51  ;;  %v12103_v51 = vld [vmem:[#allocation309_spill] sm:$0xff] }
 0x43e   : > { %2484 = vst [vmem:[#allocation1 + $0x7] ss:$9 sm:$0xff] %v12087_v40  ;;  %v12104_v40 = vld [vmem:[#allocation312_spill] sm:$0xff] }
 0x445   : > { %v8539_v15 = vld [vmem:[#allocation1] sm:$0xff] }
 0x446   : > { %12088 = vst [vmem:[#allocation8_spill] sm:$0xff] %v8539_v15  ;;  %v12111_v15 = vld [vmem:[#allocation319_spill] sm:$0xff] }
 0x447   : > { %2487 = vst [vmem:[#allocation1] ss:$9 sm:$0xff] %v12089_v57  ;;  %v12105_v57 = vld [vmem:[#allocation313_spill] sm:$0xff] }
 0x448   : > { %2488 = vst [vmem:[#allocation1 + $0x1] ss:$9 sm:$0xff] %v12090_v30  ;;  %v12098_v30 = vld [vmem:[#allocation304_spill] sm:$0xff] }
 0x44f   : > { %v8543_v44 = vld [vmem:[#allocation1] sm:$0xff] }
 0x450   : > { %12091 = vst [vmem:[#allocation9_spill] sm:$0xff] %v8543_v44  ;;  %v12110_v44 = vld [vmem:[#allocation318_spill] sm:$0xff] }
 0x451   : > { %2515 = vst [vmem:[#allocation1] ss:$9 sm:$0xff] %v7318_v62 }
 0x452   : > { %2517 = vst [vmem:[#allocation1 + $0x1] ss:$9 sm:$0xff] %v7320_v27  ;;  %v12093_v27 = vld [vmem:[#allocation295_spill] sm:$0xff] }
 0x453   : > { %2519 = vst [vmem:[#allocation1 + $0x2] ss:$9 sm:$0xff] %v7322_v25  ;;  %v12092_v25 = vld [vmem:[#allocation294_spill] sm:$0xff] }
 0x454   : > { %2521 = vst [vmem:[#allocation1 + $0x3] ss:$9 sm:$0xff] %v7328_v22 }
 0x455   : > { %2523 = vst [vmem:[#allocation1 + $0x4] ss:$9 sm:$0xff] %v7336_v5  ;;  %v12094_v5 = vld [vmem:[#allocation296_spill] sm:$0xff] }
 0x456   : > { %2525 = vst [vmem:[#allocation1 + $0x5] ss:$9 sm:$0xff] %v7338_v0  ;;  %v12095_v0 = vld [vmem:[#allocation297_spill] sm:$0xff] }
 0x457   : > { %2527 = vst [vmem:[#allocation1 + $0x6] ss:$9 sm:$0xff] %v7341_v33  ;;  %v12096_v33 = vld [vmem:[#allocation298_spill] sm:$0xff] }
 0x458   : > { %2529 = vst [vmem:[#allocation1 + $0x7] ss:$9 sm:$0xff] %v7353_v2  ;;  %v12097_v2 = vld [vmem:[#allocation303_spill] sm:$0xff] }
 0x45f   : > { %v2530_v3 = vld [vmem:[#allocation1] sm:$0xff] }
 0x460   : > { %2636 = vrot.lane.b32.xlu1 %v2530_v3, %s6421_s18  ;;  %2532 = vst [vmem:[#allocation1] ss:$9 sm:$0xff] %v7363_v19 }
 0x461   : > { %2533 = vst [vmem:[#allocation1 + $0x1] ss:$9 sm:$0xff] %v7369_v1 }
 0x462   : > { %2534 = vst [vmem:[#allocation1 + $0x2] ss:$9 sm:$0xff] %v7371_v24 }
 0x463   : > { %2535 = vst [vmem:[#allocation1 + $0x3] ss:$9 sm:$0xff] %v7375_v16 }
 0x464   : > { %2536 = vst [vmem:[#allocation1 + $0x4] ss:$9 sm:$0xff] %v7380_v59 }
 0x465   : > { %2537 = vst [vmem:[#allocation1 + $0x5] ss:$9 sm:$0xff] %v7386_v18 }
 0x466   : > { %2538 = vst [vmem:[#allocation1 + $0x6] ss:$9 sm:$0xff] %v7388_v23 }
 0x467   : > { %2539 = vst [vmem:[#allocation1 + $0x7] ss:$9 sm:$0xff] %v7401_v17 }
 0x46e   : > { %v2540_v22 = vld [vmem:[#allocation1] sm:$0xff] }
 0x46f   : > { %2638 = vrot.lane.b32.xlu1 %v2540_v22, %s6421_s18  ;;  %2542 = vst [vmem:[#allocation1] ss:$9 sm:$0xff] %v7403_v14  ;;  %v12107_v22 = vld [vmem:[#allocation314_spill] sm:$0xff] }
 0x470   : > { %2543 = vst [vmem:[#allocation1 + $0x1] ss:$9 sm:$0xff] %v7413_v9 }
 0x471   : > { %2544 = vst [vmem:[#allocation1 + $0x2] ss:$9 sm:$0xff] %v7422_v11 }
 0x472   : > { %2545 = vst [vmem:[#allocation1 + $0x3] ss:$9 sm:$0xff] %v7424_v8 }
 0x473   : > { %2546 = vst [vmem:[#allocation1 + $0x4] ss:$9 sm:$0xff] %v11865_v41 }
 0x474   : > { %2547 = vst [vmem:[#allocation1 + $0x5] ss:$9 sm:$0xff] %v11867_v10 }
 0x475   : > { %2548 = vst [vmem:[#allocation1 + $0x6] ss:$9 sm:$0xff] %v11869_v32 }
 0x476   : > { %2549 = vst [vmem:[#allocation1 + $0x7] ss:$9 sm:$0xff] %v7450_v6 }
 0x47d   : > { %v2550_v19 = vld [vmem:[#allocation1] sm:$0xff] }
 0x47e   : > { %2640 = vrot.lane.b32.xlu0 %v2550_v19, %s6421_s18  ;;  %2552 = vst [vmem:[#allocation1] ss:$9 sm:$0xff] %v11876_v34  ;;  %v12108_v19 = vld [vmem:[#allocation315_spill] sm:$0xff] }
 0x47f   : > { %2553 = vst [vmem:[#allocation1 + $0x1] ss:$9 sm:$0xff] %v11877_v37 }
 0x480   : > { %2554 = vst [vmem:[#allocation1 + $0x2] ss:$9 sm:$0xff] %v11878_v26 }
 0x481   : > { %2555 = vst [vmem:[#allocation1 + $0x3] ss:$9 sm:$0xff] %v11880_v31 }
 0x482   : > { %2556 = vst [vmem:[#allocation1 + $0x4] ss:$9 sm:$0xff] %v11881_v29 }
 0x483   : > { %2557 = vst [vmem:[#allocation1 + $0x5] ss:$9 sm:$0xff] %v11883_v21 }
 0x484   : > { %2558 = vst [vmem:[#allocation1 + $0x6] ss:$9 sm:$0xff] %v12092_v25 }
 0x485   : > { %2559 = vst [vmem:[#allocation1 + $0x7] ss:$9 sm:$0xff] %v12093_v27 }
 0x48c   : > { %v2560_v62 = vld [vmem:[#allocation1] sm:$0xff] }
 0x48d   : > { %2562 = vst [vmem:[#allocation1] ss:$9 sm:$0xff] %v12094_v5  ;;  %2642 = vrot.lane.b32.xlu2 %v2560_v62, %s6421_s18  ;;  %v12109_v62 = vld [vmem:[#allocation316_spill] sm:$0xff] }
 0x48e   : > { %2563 = vst [vmem:[#allocation1 + $0x1] ss:$9 sm:$0xff] %v12095_v0 }
 0x48f   : > { %2564 = vst [vmem:[#allocation1 + $0x2] ss:$9 sm:$0xff] %v12096_v33 }
 0x490   : > { %2565 = vst [vmem:[#allocation1 + $0x3] ss:$9 sm:$0xff] %v11894_v13 }
 0x491   : > { %2566 = vst [vmem:[#allocation1 + $0x4] ss:$9 sm:$0xff] %v11897_v39 }
 0x492   : > { %2567 = vst [vmem:[#allocation1 + $0x5] ss:$9 sm:$0xff] %v11898_v63 }
 0x493   : > { %2568 = vst [vmem:[#allocation1 + $0x6] ss:$9 sm:$0xff] %v12097_v2 }
 0x494   : > { %2569 = vst [vmem:[#allocation1 + $0x7] ss:$9 sm:$0xff] %v12098_v30 }
 0x49b   : > { %v8589_v12 = vld [vmem:[#allocation1] sm:$0xff] }
 0x49c   : > { %12099 = vst [vmem:[#allocation10_spill] sm:$0xff] %v8589_v12 }
 0x49d   : > { %2572 = vst [vmem:[#allocation1] ss:$9 sm:$0xff] %v12100_v42 }
 0x49e   : > { %2573 = vst [vmem:[#allocation1 + $0x1] ss:$9 sm:$0xff] %v12101_v60 }
 0x49f   : > { %2574 = vst [vmem:[#allocation1 + $0x2] ss:$9 sm:$0xff] %v12102_v61 }
 0x4a0   : > { %2575 = vst [vmem:[#allocation1 + $0x3] ss:$9 sm:$0xff] %v12103_v51 }
 0x4a1   : > { %2576 = vst [vmem:[#allocation1 + $0x4] ss:$9 sm:$0xff] %v11911_v54 }
 0x4a2   : > { %2577 = vst [vmem:[#allocation1 + $0x5] ss:$9 sm:$0xff] %v11914_v48  ;;  %v12154_v48 = vld [vmem:[#allocation284_spill] sm:$0xff] }
 0x4a3   : > { %2578 = vst [vmem:[#allocation1 + $0x6] ss:$9 sm:$0xff] %v12104_v40 }
 0x4a4   : > { %2579 = vst [vmem:[#allocation1 + $0x7] ss:$9 sm:$0xff] %v12105_v57  ;;  %v12113_v57 = vld [vmem:[#allocation323_spill] sm:$0xff] }
 0x4ab   : > { %v8599_v3 = vld [vmem:[#allocation1] sm:$0xff] }
 0x4ac   : > { %12106 = vst [vmem:[#allocation11_spill] sm:$0xff] %v8599_v3  ;;  %v12114_v3 = vld [vmem:[#allocation324_spill] sm:$0xff] }
 0x4ad   : > { %2582 = vst [vmem:[#allocation1] ss:$9 sm:$0xff] %v12107_v22  ;;  %v12115_v22 = vld [vmem:[#allocation326_spill] sm:$0xff] }
 0x4ae   : > { %2583 = vst [vmem:[#allocation1 + $0x1] ss:$9 sm:$0xff] %v12108_v19  ;;  %v12116_v19 = vld [vmem:[#allocation327_spill] sm:$0xff] }
 0x4af   : > { %2584 = vst [vmem:[#allocation1 + $0x2] ss:$9 sm:$0xff] %v12109_v62  ;;  %v12117_v62 = vld [vmem:[#allocation328_spill] sm:$0xff] }
 0x4b0   : > { %2585 = vst [vmem:[#allocation1 + $0x3] ss:$9 sm:$0xff] %v12110_v44  ;;  %v12144_v44 = vld [vmem:[#allocation360_spill] sm:$0xff] }
 0x4b1   : > { %2586 = vst [vmem:[#allocation1 + $0x4] ss:$9 sm:$0xff] %v12111_v15  ;;  %v12142_v15 = vld [vmem:[#allocation358_spill] sm:$0xff] }
 0x4b2   : > { %2587 = vst [vmem:[#allocation1 + $0x5] ss:$9 sm:$0xff] %v11930_v28  ;;  %v12138_v28 = vld [vmem:[#allocation354_spill] sm:$0xff] }
 0x4b3   : > { %2588 = vst [vmem:[#allocation1 + $0x6] ss:$9 sm:$0xff] %v11934_v56 }
 0x4b4   : > { %2589 = vst [vmem:[#allocation1 + $0x7] ss:$9 sm:$0xff] %v7636_v4  ;;  %v12119_v4 = vld [vmem:[#allocation332_spill] sm:$0xff] }
 0x4bb   : > { %v8609_v12 = vld [vmem:[#allocation1] sm:$0xff] }
 0x4bc   : > { %12112 = vst [vmem:[#allocation12_spill] sm:$0xff] %v8609_v12  ;;  %v12120_v12 = vld [vmem:[#allocation333_spill] sm:$0xff] }
 0x4bd   : > { %2592 = vst [vmem:[#allocation1] ss:$9 sm:$0xff] %v12113_v57  ;;  %v12121_v57 = vld [vmem:[#allocation334_spill] sm:$0xff] }
 0x4be   : > { %2593 = vst [vmem:[#allocation1 + $0x1] ss:$9 sm:$0xff] %v12114_v3  ;;  %v12122_v3 = vld [vmem:[#allocation336_spill] sm:$0xff] }
 0x4bf   : > { %2594 = vst [vmem:[#allocation1 + $0x2] ss:$9 sm:$0xff] %v12115_v22  ;;  %v12123_v22 = vld [vmem:[#allocation337_spill] sm:$0xff] }
 0x4c0   : > { %2595 = vst [vmem:[#allocation1 + $0x3] ss:$9 sm:$0xff] %v12116_v19 }
 0x4c1   : > { %2596 = vst [vmem:[#allocation1 + $0x4] ss:$9 sm:$0xff] %v12117_v62 }
 0x4c2   : > { %2597 = vst [vmem:[#allocation1 + $0x5] ss:$9 sm:$0xff] %v11946_v58  ;;  %v12124_v58 = vld [vmem:[#allocation340_spill] sm:$0xff] }
 0x4c3   : > { %2598 = vst [vmem:[#allocation1 + $0x6] ss:$9 sm:$0xff] %v11948_v49 }
 0x4c4   : > { %2599 = vst [vmem:[#allocation1 + $0x7] ss:$9 sm:$0xff] %v7685_v36  ;;  %v12126_v36 = vld [vmem:[#allocation341_spill] sm:$0xff] }
 0x4cb   : > { %v8619_v56 = vld [vmem:[#allocation1] sm:$0xff] }
 0x4cc   : > { %12118 = vst [vmem:[#allocation13_spill] sm:$0xff] %v8619_v56  ;;  %v12127_v56 = vld [vmem:[#allocation342_spill] sm:$0xff] }
 0x4cd   : > { %2602 = vst [vmem:[#allocation1] ss:$9 sm:$0xff] %v12119_v4  ;;  %v12128_v4 = vld [vmem:[#allocation343_spill] sm:$0xff] }
 0x4ce   : > { %2603 = vst [vmem:[#allocation1 + $0x1] ss:$9 sm:$0xff] %v12120_v12  ;;  %v12129_v12 = vld [vmem:[#allocation345_spill] sm:$0xff] }
 0x4cf   : > { %2604 = vst [vmem:[#allocation1 + $0x2] ss:$9 sm:$0xff] %v12121_v57  ;;  %v12130_v57 = vld [vmem:[#allocation346_spill] sm:$0xff] }
 0x4d0   : > { %2605 = vst [vmem:[#allocation1 + $0x3] ss:$9 sm:$0xff] %v12122_v3  ;;  %v12131_v3 = vld [vmem:[#allocation347_spill] sm:$0xff] }
 0x4d1   : > { %2606 = vst [vmem:[#allocation1 + $0x4] ss:$9 sm:$0xff] %v12123_v22  ;;  %v12132_v22 = vld [vmem:[#allocation170_spill] sm:$0xff] }
 0x4d2   : > { %2607 = vst [vmem:[#allocation1 + $0x5] ss:$9 sm:$0xff] %v11960_v20  ;;  %v1563_v20 = vrot.slane %v12132_v22, 3 }
 0x4d3   : > { %2608 = vst [vmem:[#allocation1 + $0x6] ss:$9 sm:$0xff] %v11962_v52 }
 0x4d4   : > { %2609 = vst [vmem:[#allocation1 + $0x7] ss:$9 sm:$0xff] %v12124_v58  ;;  %v12133_v58 = vld [vmem:[#allocation175_spill] sm:$0xff] }
 0x4db   : > { %v8629_v49 = vld [vmem:[#allocation1] sm:$0xff] }
 0x4dc   : > { %12125 = vst [vmem:[#allocation14_spill] sm:$0xff] %v8629_v49  ;;  %v1564_v49 = vrot.slane %v12133_v58, 3 }
 0x4dd   : > { %2612 = vst [vmem:[#allocation1] ss:$9 sm:$0xff] %v12126_v36  ;;  %v1569_v36 = vsel %vm418_vm0, %v12132_v22, %v1563_v20 }
 0x4de   : > { %2613 = vst [vmem:[#allocation1 + $0x1] ss:$9 sm:$0xff] %v12127_v56  ;;  %v1584_v62 = vsel %vm422_vm1, %v12133_v58, %v1564_v49 }
 0x4df   : > { %2614 = vst [vmem:[#allocation1 + $0x2] ss:$9 sm:$0xff] %v12128_v4  ;;  %v1572_v4 = vsel %vm422_vm1, %v12132_v22, %v1563_v20 }
 0x4e0   : > { %2615 = vst [vmem:[#allocation1 + $0x3] ss:$9 sm:$0xff] %v12129_v12  ;;  %v1575_v12 = vsel %vm426_vm2, %v12132_v22, %v1563_v20 }
 0x4e1   : > { %2616 = vst [vmem:[#allocation1 + $0x4] ss:$9 sm:$0xff] %v12130_v57  ;;  %v8651_v57 = vrot.slane %v1569_v36, 1  ;;  %v8659_v52 = vrot.slane %v1575_v12, 3  ;;  %v8667_v36 = vsel %vm414_vm3, %v12133_v58, %v1564_v49  ;;  %v1587_v12 = vsel %vm426_vm2, %v12133_v58, %v1564_v49 }
 0x4e2   : > { %2617 = vst [vmem:[#allocation1 + $0x5] ss:$9 sm:$0xff] %v12131_v3  ;;  %v8649_v3 = vsel %vm414_vm3, %v12132_v22, %v1563_v20  ;;  %v8672_v20 = vrot.slane %v1584_v62, 2  ;;  %v12135_v22 = vld [vmem:[#allocation178_spill] sm:$0xff] }
 0x4e3   : > { %2618 = vst [vmem:[#allocation1 + $0x6] ss:$9 sm:$0xff] %v11980_v47  ;;  %v8653_v47 = vrot.slane %v1572_v4, 2 }
 0x4e4   : > { %2619 = vst [vmem:[#allocation1 + $0x7] ss:$9 sm:$0xff] %v11983_v43  ;;  %v1581_v43 = vsel %vm418_vm0, %v12133_v58, %v1564_v49  ;;  %v12139_v58 = vld [vmem:[#allocation355_spill] sm:$0xff]  ;;  %v12140_v49 = vld [vmem:[#allocation356_spill] sm:$0xff] }
 0x4e5   : > { %v8669_v4 = vrot.slane %v1581_v43, 1  ;;  %v11475_v43 = vrot.slane %v12135_v22, 3 }
 0x4e7   : > { %v8688_v62 = vsel %vm414_vm3, %v12135_v22, %v11475_v43  ;;  %v12143_v43 = vld [vmem:[#allocation359_spill] sm:$0xff] }
 0x4eb   : > { %v8657_v56 = vld [vmem:[#allocation1] sm:$0xff] }
 0x4ec   : > { %12134 = vst [vmem:[#allocation15_spill] sm:$0xff] %v8657_v56  ;;  %v8682_v56 = vrot.slane %v1587_v12, 3  ;;  %v12141_v12 = vld [vmem:[#allocation357_spill] sm:$0xff] }
 0x4ed   : > { %2622 = vst [vmem:[#allocation1] ss:$9 sm:$0xff] %v11990_v46 }
 0x4ee   : > { %2623 = vst [vmem:[#allocation1 + $0x1] ss:$9 sm:$0xff] %v8649_v3 }
 0x4ef   : > { %2624 = vst [vmem:[#allocation1 + $0x2] ss:$9 sm:$0xff] %v8651_v57 }
 0x4f0   : > { %2625 = vst [vmem:[#allocation1 + $0x3] ss:$9 sm:$0xff] %v8653_v47 }
 0x4f1   : > { %2626 = vst [vmem:[#allocation1 + $0x4] ss:$9 sm:$0xff] %v8659_v52 }
 0x4f2   : > { %2627 = vst [vmem:[#allocation1 + $0x5] ss:$9 sm:$0xff] %v8667_v36 }
 0x4f3   : > { %2628 = vst [vmem:[#allocation1 + $0x6] ss:$9 sm:$0xff] %v8669_v4 }
 0x4f4   : > { %2629 = vst [vmem:[#allocation1 + $0x7] ss:$9 sm:$0xff] %v8672_v20 }
 0x4fb   : > { %v8690_v46 = vld [vmem:[#allocation1] sm:$0xff] }
 0x4fc   : > { %12136 = vst [vmem:[#allocation16_spill] sm:$0xff] %v8690_v46  ;;  %v12145_v46 = vld [vmem:[#allocation361_spill] sm:$0xff] }
 0x4fd   : > { %2632 = vst [vmem:[#allocation1] ss:$9 sm:$0xff] %v8682_v56 }
 0x4fe   : > { %2633 = vst [vmem:[#allocation1 + $0x1] ss:$9 sm:$0xff] %v8688_v62 }
 0x505   : > { %v8694_v19 = vld [vmem:[#allocation1] sm:$0xff] }
 0x506   : > { %12137 = vst [vmem:[#allocation17_spill] sm:$0xff] %v8694_v19  ;;  %v12146_v19 = vld [vmem:[#allocation362_spill] sm:$0xff] }
 0x507   : > { %2660 = vst [vmem:[#allocation1] ss:$9 sm:$0xff] %v12138_v28  ;;  %v12147_v28 = vld [vmem:[#allocation363_spill] sm:$0xff] }
 0x508   : > { %2662 = vst [vmem:[#allocation1 + $0x1] ss:$9 sm:$0xff] %v12139_v58  ;;  %v12148_v58 = vld [vmem:[#allocation364_spill] sm:$0xff] }
 0x509   : > { %2664 = vst [vmem:[#allocation1 + $0x2] ss:$9 sm:$0xff] %v12140_v49  ;;  %v12149_v49 = vld [vmem:[#allocation365_spill] sm:$0xff] }
 0x50a   : > { %2666 = vst [vmem:[#allocation1 + $0x3] ss:$9 sm:$0xff] %v12141_v12  ;;  %v12150_v12 = vld [vmem:[#allocation366_spill] sm:$0xff] }
 0x50b   : > { %2668 = vst [vmem:[#allocation1 + $0x4] ss:$9 sm:$0xff] %v12142_v15  ;;  %v12151_v15 = vld [vmem:[#allocation367_spill] sm:$0xff] }
 0x50c   : > { %2670 = vst [vmem:[#allocation1 + $0x5] ss:$9 sm:$0xff] %v12143_v43  ;;  %v12152_v43 = vld [vmem:[#allocation368_spill] sm:$0xff] }
 0x50d   : > { %2672 = vst [vmem:[#allocation1 + $0x6] ss:$9 sm:$0xff] %v12144_v44  ;;  %v12153_v44 = vld [vmem:[#allocation369_spill] sm:$0xff] }
 0x50e   : > { %2674 = vst [vmem:[#allocation1 + $0x7] ss:$9 sm:$0xff] %v12145_v46 }
 0x515   : > { %v2675_v40 = vld [vmem:[#allocation1] sm:$0xff] }
 0x516   : > { %2790 = vrot.lane.b32.xlu1 %v2675_v40, %s6422_s19  ;;  %2677 = vst [vmem:[#allocation1] ss:$9 sm:$0xff] %v12146_v19  ;;  %v12155_v40 = vld [vmem:[#allocation285_spill] sm:$0xff]  ;;  %v12156_v19 = vld [vmem:[#allocation286_spill] sm:$0xff] }
 0x517   : > { %2678 = vst [vmem:[#allocation1 + $0x1] ss:$9 sm:$0xff] %v12147_v28  ;;  %v12162_v28 = vld [vmem:[#allocation288_spill] sm:$0xff] }
 0x518   : > { %2679 = vst [vmem:[#allocation1 + $0x2] ss:$9 sm:$0xff] %v12148_v58  ;;  %v12157_v58 = vld [vmem:[#allocation370_spill] sm:$0xff] }
 0x519   : > { %2680 = vst [vmem:[#allocation1 + $0x3] ss:$9 sm:$0xff] %v12149_v49  ;;  %v12158_v49 = vld [vmem:[#allocation371_spill] sm:$0xff] }
 0x51a   : > { %2681 = vst [vmem:[#allocation1 + $0x4] ss:$9 sm:$0xff] %v12150_v12  ;;  %v12159_v12 = vld [vmem:[#allocation372_spill] sm:$0xff] }
 0x51b   : > { %2682 = vst [vmem:[#allocation1 + $0x5] ss:$9 sm:$0xff] %v12151_v15  ;;  %v12160_v15 = vld [vmem:[#allocation373_spill] sm:$0xff] }
 0x51c   : > { %2683 = vst [vmem:[#allocation1 + $0x6] ss:$9 sm:$0xff] %v12152_v43  ;;  %v12161_v43 = vld [vmem:[#allocation287_spill] sm:$0xff] }
 0x51d   : > { %2684 = vst [vmem:[#allocation1 + $0x7] ss:$9 sm:$0xff] %v12153_v44 }
 0x524   : > { %v2685_v46 = vld [vmem:[#allocation1] sm:$0xff] }
 0x525   : > { %2687 = vst [vmem:[#allocation1] ss:$9 sm:$0xff] %v12154_v48  ;;  %2792 = vrot.lane.b32.xlu2 %v2685_v46, %s6422_s19  ;;  %v12163_v46 = vld [vmem:[#allocation290_spill] sm:$0xff] }
 0x526   : > { %2688 = vst [vmem:[#allocation1 + $0x1] ss:$9 sm:$0xff] %v12155_v40  ;;  %v12164_v40 = vld [vmem:[#allocation291_spill] sm:$0xff]  ;;  %v12179_v48 = vld [vmem:[#allocation310_spill] sm:$0xff] }
 0x527   : > { %2689 = vst [vmem:[#allocation1 + $0x2] ss:$9 sm:$0xff] %v12156_v19  ;;  %v12165_v19 = vld [vmem:[#allocation292_spill] sm:$0xff] }
 0x528   : > { %2690 = vst [vmem:[#allocation1 + $0x3] ss:$9 sm:$0xff] %v12157_v58  ;;  %v12166_v58 = vld [vmem:[#allocation293_spill] sm:$0xff] }
 0x529   : > { %2691 = vst [vmem:[#allocation1 + $0x4] ss:$9 sm:$0xff] %v12158_v49  ;;  %v12167_v49 = vld [vmem:[#allocation374_spill] sm:$0xff] }
 0x52a   : > { %2692 = vst [vmem:[#allocation1 + $0x5] ss:$9 sm:$0xff] %v12159_v12  ;;  %v12168_v12 = vld [vmem:[#allocation375_spill] sm:$0xff] }
 0x52b   : > { %2693 = vst [vmem:[#allocation1 + $0x6] ss:$9 sm:$0xff] %v12160_v15  ;;  %v12169_v15 = vld [vmem:[#allocation300_spill] sm:$0xff] }
 0x52c   : > { %2694 = vst [vmem:[#allocation1 + $0x7] ss:$9 sm:$0xff] %v12161_v43 }
 0x533   : > { %v2695_v44 = vld [vmem:[#allocation1] sm:$0xff] }
 0x534   : > { %2697 = vst [vmem:[#allocation1] ss:$9 sm:$0xff] %v12162_v28  ;;  %2794 = vrot.lane.b32.xlu1 %v2695_v44, %s6422_s19  ;;  %v12170_v28 = vld [vmem:[#allocation376_spill] sm:$0xff]  ;;  %v12171_v44 = vld [vmem:[#allocation301_spill] sm:$0xff] }
 0x535   : > { %2698 = vst [vmem:[#allocation1 + $0x1] ss:$9 sm:$0xff] %v12163_v46  ;;  %v12172_v46 = vld [vmem:[#allocation302_spill] sm:$0xff] }
 0x536   : > { %2699 = vst [vmem:[#allocation1 + $0x2] ss:$9 sm:$0xff] %v12164_v40  ;;  %v12173_v40 = vld [vmem:[#allocation377_spill] sm:$0xff] }
 0x537   : > { %2700 = vst [vmem:[#allocation1 + $0x3] ss:$9 sm:$0xff] %v12165_v19  ;;  %v12174_v19 = vld [vmem:[#allocation378_spill] sm:$0xff] }
 0x538   : > { %2701 = vst [vmem:[#allocation1 + $0x4] ss:$9 sm:$0xff] %v12166_v58  ;;  %v12175_v58 = vld [vmem:[#allocation379_spill] sm:$0xff] }
 0x539   : > { %2702 = vst [vmem:[#allocation1 + $0x5] ss:$9 sm:$0xff] %v12167_v49  ;;  %v12176_v49 = vld [vmem:[#allocation380_spill] sm:$0xff] }
 0x53a   : > { %2703 = vst [vmem:[#allocation1 + $0x6] ss:$9 sm:$0xff] %v12168_v12  ;;  %v12177_v12 = vld [vmem:[#allocation381_spill] sm:$0xff] }
 0x53b   : > { %2704 = vst [vmem:[#allocation1 + $0x7] ss:$9 sm:$0xff] %v12169_v15 }
 0x542   : > { %v2705_v43 = vld [vmem:[#allocation1] sm:$0xff] }
 0x543   : > { %2796 = vrot.lane.b32.xlu0 %v2705_v43, %s6422_s19  ;;  %2707 = vst [vmem:[#allocation1] ss:$9 sm:$0xff] %v12170_v28  ;;  %v12180_v43 = vld [vmem:[#allocation382_spill] sm:$0xff]  ;;  %v12181_v28 = vld [vmem:[#allocation384_spill] sm:$0xff] }
 0x544   : > { %2708 = vst [vmem:[#allocation1 + $0x1] ss:$9 sm:$0xff] %v12171_v44  ;;  %v12182_v44 = vld [vmem:[#allocation385_spill] sm:$0xff] }
 0x545   : > { %2709 = vst [vmem:[#allocation1 + $0x2] ss:$9 sm:$0xff] %v12172_v46  ;;  %v12183_v46 = vld [vmem:[#allocation386_spill] sm:$0xff] }
 0x546   : > { %2710 = vst [vmem:[#allocation1 + $0x3] ss:$9 sm:$0xff] %v12173_v40  ;;  %v12184_v40 = vld [vmem:[#allocation387_spill] sm:$0xff] }
 0x547   : > { %2711 = vst [vmem:[#allocation1 + $0x4] ss:$9 sm:$0xff] %v12174_v19  ;;  %v12185_v19 = vld [vmem:[#allocation388_spill] sm:$0xff] }
 0x548   : > { %2712 = vst [vmem:[#allocation1 + $0x5] ss:$9 sm:$0xff] %v12175_v58  ;;  %v12186_v58 = vld [vmem:[#allocation389_spill] sm:$0xff] }
 0x549   : > { %2713 = vst [vmem:[#allocation1 + $0x6] ss:$9 sm:$0xff] %v12176_v49 }
 0x54a   : > { %2714 = vst [vmem:[#allocation1 + $0x7] ss:$9 sm:$0xff] %v12177_v12  ;;  %v12188_v12 = vld [vmem:[#allocation390_spill] sm:$0xff] }
 0x551   : > { %v8740_v15 = vld [vmem:[#allocation1] sm:$0xff] }
 0x552   : > { %12178 = vst [vmem:[#allocation18_spill] sm:$0xff] %v8740_v15  ;;  %v12189_v15 = vld [vmem:[#allocation391_spill] sm:$0xff] }
 0x553   : > { %2717 = vst [vmem:[#allocation1] ss:$9 sm:$0xff] %v12179_v48  ;;  %v12190_v48 = vld [vmem:[#allocation393_spill] sm:$0xff] }
 0x554   : > { %2718 = vst [vmem:[#allocation1 + $0x1] ss:$9 sm:$0xff] %v12180_v43  ;;  %v12191_v43 = vld [vmem:[#allocation394_spill] sm:$0xff] }
 0x555   : > { %2719 = vst [vmem:[#allocation1 + $0x2] ss:$9 sm:$0xff] %v12181_v28  ;;  %v12192_v28 = vld [vmem:[#allocation395_spill] sm:$0xff] }
 0x556   : > { %2720 = vst [vmem:[#allocation1 + $0x3] ss:$9 sm:$0xff] %v12182_v44  ;;  %v12193_v44 = vld [vmem:[#allocation396_spill] sm:$0xff] }
 0x557   : > { %2721 = vst [vmem:[#allocation1 + $0x4] ss:$9 sm:$0xff] %v12183_v46  ;;  %v12194_v46 = vld [vmem:[#allocation397_spill] sm:$0xff] }
 0x558   : > { %2722 = vst [vmem:[#allocation1 + $0x5] ss:$9 sm:$0xff] %v12184_v40  ;;  %v12195_v40 = vld [vmem:[#allocation398_spill] sm:$0xff] }
 0x559   : > { %2723 = vst [vmem:[#allocation1 + $0x6] ss:$9 sm:$0xff] %v12185_v19 }
 0x55a   : > { %2724 = vst [vmem:[#allocation1 + $0x7] ss:$9 sm:$0xff] %v12186_v58  ;;  %v12197_v58 = vld [vmem:[#allocation399_spill] sm:$0xff] }
 0x561   : > { %v8750_v49 = vld [vmem:[#allocation1] sm:$0xff] }
 0x562   : > { %12187 = vst [vmem:[#allocation19_spill] sm:$0xff] %v8750_v49  ;;  %v12198_v49 = vld [vmem:[#allocation400_spill] sm:$0xff] }
 0x563   : > { %2727 = vst [vmem:[#allocation1] ss:$9 sm:$0xff] %v12188_v12  ;;  %v12199_v12 = vld [vmem:[#allocation402_spill] sm:$0xff] }
 0x564   : > { %2728 = vst [vmem:[#allocation1 + $0x1] ss:$9 sm:$0xff] %v12189_v15  ;;  %v12200_v15 = vld [vmem:[#allocation403_spill] sm:$0xff] }
 0x565   : > { %2729 = vst [vmem:[#allocation1 + $0x2] ss:$9 sm:$0xff] %v12190_v48  ;;  %v12201_v48 = vld [vmem:[#allocation404_spill] sm:$0xff] }
 0x566   : > { %2730 = vst [vmem:[#allocation1 + $0x3] ss:$9 sm:$0xff] %v12191_v43  ;;  %v12202_v43 = vld [vmem:[#allocation405_spill] sm:$0xff] }
 0x567   : > { %2731 = vst [vmem:[#allocation1 + $0x4] ss:$9 sm:$0xff] %v12192_v28  ;;  %v12203_v28 = vld [vmem:[#allocation406_spill] sm:$0xff] }
 0x568   : > { %2732 = vst [vmem:[#allocation1 + $0x5] ss:$9 sm:$0xff] %v12193_v44  ;;  %v12204_v44 = vld [vmem:[#allocation407_spill] sm:$0xff] }
 0x569   : > { %2733 = vst [vmem:[#allocation1 + $0x6] ss:$9 sm:$0xff] %v12194_v46 }
 0x56a   : > { %2734 = vst [vmem:[#allocation1 + $0x7] ss:$9 sm:$0xff] %v12195_v40  ;;  %v12206_v40 = vld [vmem:[#allocation408_spill] sm:$0xff] }
 0x571   : > { %v8760_v19 = vld [vmem:[#allocation1] sm:$0xff] }
 0x572   : > { %12196 = vst [vmem:[#allocation20_spill] sm:$0xff] %v8760_v19  ;;  %v12207_v19 = vld [vmem:[#allocation409_spill] sm:$0xff] }
 0x573   : > { %2737 = vst [vmem:[#allocation1] ss:$9 sm:$0xff] %v12197_v58  ;;  %v12208_v58 = vld [vmem:[#allocation411_spill] sm:$0xff] }
 0x574   : > { %2738 = vst [vmem:[#allocation1 + $0x1] ss:$9 sm:$0xff] %v12198_v49  ;;  %v12209_v49 = vld [vmem:[#allocation75_spill] sm:$0xff] }
 0x575   : > { %2739 = vst [vmem:[#allocation1 + $0x2] ss:$9 sm:$0xff] %v12199_v12  ;;  %v12210_v12 = vld [vmem:[#allocation412_spill] sm:$0xff] }
 0x576   : > { %2740 = vst [vmem:[#allocation1 + $0x3] ss:$9 sm:$0xff] %v12200_v15  ;;  %v12211_v15 = vld [vmem:[#allocation413_spill] sm:$0xff] }
 0x577   : > { %2741 = vst [vmem:[#allocation1 + $0x4] ss:$9 sm:$0xff] %v12201_v48  ;;  %v12212_v48 = vld [vmem:[#allocation414_spill] sm:$0xff] }
 0x578   : > { %2742 = vst [vmem:[#allocation1 + $0x5] ss:$9 sm:$0xff] %v12202_v43  ;;  %v12218_v43 = vld [vmem:[#allocation424_spill] sm:$0xff] }
 0x579   : > { %2743 = vst [vmem:[#allocation1 + $0x6] ss:$9 sm:$0xff] %v12203_v28 }
 0x57a   : > { %2744 = vst [vmem:[#allocation1 + $0x7] ss:$9 sm:$0xff] %v12204_v44 }
 0x581   : > { %v8770_v46 = vld [vmem:[#allocation1] sm:$0xff] }
 0x582   : > { %12205 = vst [vmem:[#allocation21_spill] sm:$0xff] %v8770_v46  ;;  %v12214_v46 = vld [vmem:[#allocation421_spill] sm:$0xff] }
 0x583   : > { %2747 = vst [vmem:[#allocation1] ss:$9 sm:$0xff] %v12206_v40 }
 0x584   : > { %2748 = vst [vmem:[#allocation1 + $0x1] ss:$9 sm:$0xff] %v12207_v19  ;;  %v1640_v19 = vshll.u32 %v8672_v20, 16 }
 0x585   : > { %2749 = vst [vmem:[#allocation1 + $0x2] ss:$9 sm:$0xff] %v12208_v58  ;;  %v1635_v58 = vshrl.u32 %v8669_v4, 16 }
 0x586   : > { %2750 = vst [vmem:[#allocation1 + $0x3] ss:$9 sm:$0xff] %v12209_v49 }
 0x587   : > { %2751 = vst [vmem:[#allocation1 + $0x4] ss:$9 sm:$0xff] %v12210_v12  ;;  %v12215_v12 = vld [vmem:[#allocation422_spill] sm:$0xff] }
 0x588   : > { %2752 = vst [vmem:[#allocation1 + $0x5] ss:$9 sm:$0xff] %v12211_v15  ;;  %v1632_v15 = vshll.u32 %v8669_v4, 16 }
 0x589   : > { %2753 = vst [vmem:[#allocation1 + $0x6] ss:$9 sm:$0xff] %v12212_v48 }
 0x58a   : > { %2754 = vst [vmem:[#allocation1 + $0x7] ss:$9 sm:$0xff] %v8367_v45  ;;  %v1596_v45 = vshrl.u32 %v8649_v3, 16 }
 0x591   : > { %v8780_v28 = vld [vmem:[#allocation1] sm:$0xff] }
 0x592   : > { %12213 = vst [vmem:[#allocation22_spill] sm:$0xff] %v8780_v28  ;;  %v1601_v28 = vshll.u32 %v8651_v57, 16 }
 0x593   : > { %2757 = vst [vmem:[#allocation1] ss:$9 sm:$0xff] %v8373_v53  ;;  %v1604_v53 = vshrl.u32 %v8651_v57, 16 }
 0x594   : > { %2758 = vst [vmem:[#allocation1 + $0x1] ss:$9 sm:$0xff] %v8379_v38  ;;  %v1609_v38 = vshll.u32 %v8653_v47, 16 }
 0x595   : > { %2759 = vst [vmem:[#allocation1 + $0x2] ss:$9 sm:$0xff] %v8387_v7  ;;  %v1612_v7 = vshrl.u32 %v8653_v47, 16 }
 0x596   : > { %2760 = vst [vmem:[#allocation1 + $0x3] ss:$9 sm:$0xff] %v8394_v35  ;;  %v1617_v35 = vshll.u32 %v8659_v52, 16  ;;  %v8806_v49 = vsel %vm7783_vm6, %v1604_v53, %v1609_v38  ;;  %v12219_v38 = vrot.slane %v12135_v22, 3 }
 0x597   : > { %2761 = vst [vmem:[#allocation1 + $0x4] ss:$9 sm:$0xff] %v8403_v55  ;;  %v1620_v55 = vshrl.u32 %v8659_v52, 16 }
 0x598   : > { %2762 = vst [vmem:[#allocation1 + $0x5] ss:$9 sm:$0xff] %v12214_v46  ;;  %v1624_v46 = vshll.u32 %v8667_v36, 16  ;;  %v8814_v44 = vsel %vm7783_vm6, %v1612_v7, %v1617_v35  ;;  %v8835_v35 = vsel %vm7783_vm6, %v1635_v58, %v1640_v19  ;;  %v1658_v58 = vshrl.u32 %v8688_v62, 16 }
 0x599   : > { %2763 = vst [vmem:[#allocation1 + $0x6] ss:$9 sm:$0xff] %v12215_v12  ;;  %v8800_v12 = vsel %vm7783_vm6, %v1596_v45, %v1601_v28  ;;  %v1643_v45 = vshrl.u32 %v8672_v20, 16  ;;  %v1648_v28 = vshll.u32 %v8682_v56, 16 }
 0x59a   : > { %2764 = vst [vmem:[#allocation1 + $0x7] ss:$9 sm:$0xff] %v8424_v50  ;;  %v1627_v50 = vshrl.u32 %v8667_v36, 16  ;;  %v8821_v53 = vsel %vm7783_vm6, %v1620_v55, %v1624_v46 }
 0x59b   : > { %v8840_v55 = vsel %vm7783_vm6, %v1643_v45, %v1648_v28 }
 0x59c   : > { %v8830_v7 = vsel %vm7783_vm6, %v1627_v50, %v1632_v15  ;;  %12220 = vst [vmem:[#allocation24_spill] sm:$0xff] %v8840_v55  ;;  %v1651_v50 = vshrl.u32 %v8682_v56, 16 }
 0x5a1   : > { %v8810_v40 = vld [vmem:[#allocation1] sm:$0xff] }
 0x5a2   : > { %12217 = vst [vmem:[#allocation23_spill] sm:$0xff] %v8810_v40  ;;  %v1593_v40 = vsel %vm418_vm0, %v12135_v22, %v12219_v38  ;;  %v1655_v22 = vshll.u32 %v8688_v62, 16  ;;  %v12224_v38 = vld [vmem:[#allocation95_spill] sm:$0xff] }
 0x5a3   : > { %2767 = vst [vmem:[#allocation1] ss:$9 sm:$0xff] %v12218_v43  ;;  %v1595_v46 = vrot.slane %v1593_v40, 1 }
 0x5a4   : > { %2769 = vst [vmem:[#allocation1 + $0x1] ss:$9 sm:$0xff] %v8800_v12  ;;  %v8851_v19 = vsel %vm7783_vm6, %v1651_v50, %v1655_v22  ;;  %v12227_v50 = vld [vmem:[#allocation98_spill] sm:$0xff]  ;;  %v12228_v22 = vld [vmem:[#allocation99_spill] sm:$0xff] }
 0x5a5   : > { %2771 = vst [vmem:[#allocation1 + $0x2] ss:$9 sm:$0xff] %v8806_v49  ;;  %v1663_v15 = vshll.u32 %v1595_v46, 16  ;;  %v12226_v46 = vld [vmem:[#allocation97_spill] sm:$0xff] }
 0x5a6   : > { %2773 = vst [vmem:[#allocation1 + $0x3] ss:$9 sm:$0xff] %v8814_v44 }
 0x5a7   : > { %2775 = vst [vmem:[#allocation1 + $0x4] ss:$9 sm:$0xff] %v8821_v53  ;;  %v8855_v40 = vsel %vm7783_vm6, %v1658_v58, %v1663_v15  ;;  %v12229_v58 = vld [vmem:[#allocation100_spill] sm:$0xff]  ;;  %v12230_v15 = vld [vmem:[#allocation101_spill] sm:$0xff] }
 0x5a8   : > { %2777 = vst [vmem:[#allocation1 + $0x5] ss:$9 sm:$0xff] %v8830_v7 }
 0x5a9   : > { %2779 = vst [vmem:[#allocation1 + $0x6] ss:$9 sm:$0xff] %v8835_v35 }
 0x5aa   : > { %2781 = vst [vmem:[#allocation1 + $0x7] ss:$9 sm:$0xff] %v8840_v55  ;;  %v12225_v55 = vld [vmem:[#allocation96_spill] sm:$0xff] }
 0x5ab   : > { %12221 = vst [vmem:[#allocation25_spill] sm:$0xff] %v8855_v40 }
 0x5b1   : > { %v8857_v45 = vld [vmem:[#allocation1] sm:$0xff] }
 0x5b2   : > { %12222 = vst [vmem:[#allocation26_spill] sm:$0xff] %v8857_v45  ;;  %v12231_v45 = vld [vmem:[#allocation102_spill] sm:$0xff] }
 0x5b3   : > { %2785 = vst [vmem:[#allocation1] ss:$9 sm:$0xff] %v8851_v19 }
 0x5b4   : > { %2787 = vst [vmem:[#allocation1 + $0x1] ss:$9 sm:$0xff] %v8855_v40  ;;  %v12232_v40 = vld [vmem:[#allocation103_spill] sm:$0xff] }
 0x5bb   : > { %v8861_v28 = vld [vmem:[#allocation1] sm:$0xff] }
 0x5bc   : > { %12223 = vst [vmem:[#allocation27_spill] sm:$0xff] %v8861_v28  ;;  %v12248_v28 = vld [vmem:[#allocation119_spill] sm:$0xff] }
 0x5bd   : > { %2814 = vst [vmem:[#allocation1] ss:$9 sm:$0xff] %v12224_v38  ;;  %v12233_v38 = vld [vmem:[#allocation104_spill] sm:$0xff] }
 0x5be   : > { %2816 = vst [vmem:[#allocation1 + $0x1] ss:$9 sm:$0xff] %v12225_v55  ;;  %v12234_v55 = vld [vmem:[#allocation105_spill] sm:$0xff] }
 0x5bf   : > { %2818 = vst [vmem:[#allocation1 + $0x2] ss:$9 sm:$0xff] %v12226_v46  ;;  %v12235_v46 = vld [vmem:[#allocation106_spill] sm:$0xff] }
 0x5c0   : > { %2820 = vst [vmem:[#allocation1 + $0x3] ss:$9 sm:$0xff] %v12227_v50  ;;  %v12236_v50 = vld [vmem:[#allocation107_spill] sm:$0xff] }
 0x5c1   : > { %2822 = vst [vmem:[#allocation1 + $0x4] ss:$9 sm:$0xff] %v12228_v22  ;;  %v12237_v22 = vld [vmem:[#allocation108_spill] sm:$0xff] }
 0x5c2   : > { %2824 = vst [vmem:[#allocation1 + $0x5] ss:$9 sm:$0xff] %v12229_v58  ;;  %v12238_v58 = vld [vmem:[#allocation109_spill] sm:$0xff] }
 0x5c3   : > { %2826 = vst [vmem:[#allocation1 + $0x6] ss:$9 sm:$0xff] %v12230_v15  ;;  %v12239_v15 = vld [vmem:[#allocation110_spill] sm:$0xff] }
 0x5c4   : > { %2828 = vst [vmem:[#allocation1 + $0x7] ss:$9 sm:$0xff] %v12231_v45 }
 0x5cb   : > { %v2829_v48 = vld [vmem:[#allocation1] sm:$0xff] }
 0x5cc   : > { %2831 = vst [vmem:[#allocation1] ss:$9 sm:$0xff] %v12232_v40  ;;  %2935 = vrot.lane.b32.xlu2 %v2829_v48, %s6423_s20  ;;  %v12240_v40 = vld [vmem:[#allocation111_spill] sm:$0xff]  ;;  %v12241_v48 = vld [vmem:[#allocation112_spill] sm:$0xff] }
 0x5cd   : > { %2832 = vst [vmem:[#allocation1 + $0x1] ss:$9 sm:$0xff] %v12233_v38  ;;  %v12242_v38 = vld [vmem:[#allocation113_spill] sm:$0xff] }
 0x5ce   : > { %2833 = vst [vmem:[#allocation1 + $0x2] ss:$9 sm:$0xff] %v12234_v55  ;;  %v12243_v55 = vld [vmem:[#allocation114_spill] sm:$0xff] }
 0x5cf   : > { %2834 = vst [vmem:[#allocation1 + $0x3] ss:$9 sm:$0xff] %v12235_v46  ;;  %v12244_v46 = vld [vmem:[#allocation115_spill] sm:$0xff] }
 0x5d0   : > { %2835 = vst [vmem:[#allocation1 + $0x4] ss:$9 sm:$0xff] %v12236_v50  ;;  %v12245_v50 = vld [vmem:[#allocation116_spill] sm:$0xff] }
 0x5d1   : > { %2836 = vst [vmem:[#allocation1 + $0x5] ss:$9 sm:$0xff] %v12237_v22  ;;  %v12246_v22 = vld [vmem:[#allocation117_spill] sm:$0xff] }
 0x5d2   : > { %2837 = vst [vmem:[#allocation1 + $0x6] ss:$9 sm:$0xff] %v12238_v58  ;;  %v12247_v58 = vld [vmem:[#allocation118_spill] sm:$0xff] }
 0x5d3   : > { %2838 = vst [vmem:[#allocation1 + $0x7] ss:$9 sm:$0xff] %v12239_v15 }
 0x5da   : > { %v2839_v45 = vld [vmem:[#allocation1] sm:$0xff] }
 0x5db   : > { %2937 = vrot.lane.b32.xlu0 %v2839_v45, %s6423_s20  ;;  %2841 = vst [vmem:[#allocation1] ss:$9 sm:$0xff] %v12240_v40  ;;  %v12249_v45 = vld [vmem:[#allocation120_spill] sm:$0xff]  ;;  %v12250_v40 = vld [vmem:[#allocation121_spill] sm:$0xff] }
 0x5dc   : > { %2842 = vst [vmem:[#allocation1 + $0x1] ss:$9 sm:$0xff] %v12241_v48  ;;  %v12251_v48 = vld [vmem:[#allocation122_spill] sm:$0xff] }
 0x5dd   : > { %2843 = vst [vmem:[#allocation1 + $0x2] ss:$9 sm:$0xff] %v12242_v38  ;;  %v12252_v38 = vld [vmem:[#allocation123_spill] sm:$0xff] }
 0x5de   : > { %2844 = vst [vmem:[#allocation1 + $0x3] ss:$9 sm:$0xff] %v12243_v55  ;;  %v12253_v55 = vld [vmem:[#allocation124_spill] sm:$0xff] }
 0x5df   : > { %2845 = vst [vmem:[#allocation1 + $0x4] ss:$9 sm:$0xff] %v12244_v46  ;;  %v12254_v46 = vld [vmem:[#allocation125_spill] sm:$0xff] }
 0x5e0   : > { %2846 = vst [vmem:[#allocation1 + $0x5] ss:$9 sm:$0xff] %v12245_v50  ;;  %v12255_v50 = vld [vmem:[#allocation126_spill] sm:$0xff] }
 0x5e1   : > { %2847 = vst [vmem:[#allocation1 + $0x6] ss:$9 sm:$0xff] %v12246_v22 }
 0x5e2   : > { %2848 = vst [vmem:[#allocation1 + $0x7] ss:$9 sm:$0xff] %v12247_v58  ;;  %v12257_v58 = vld [vmem:[#allocation128_spill] sm:$0xff] }
 0x5e9   : > { %v2849_v15 = vld [vmem:[#allocation1] sm:$0xff] }
 0x5ea   : > { %2851 = vst [vmem:[#allocation1] ss:$9 sm:$0xff] %v12248_v28  ;;  %2939 = vrot.lane.b32.xlu2 %v2849_v15, %s6423_s20  ;;  %v12256_v28 = vld [vmem:[#allocation127_spill] sm:$0xff]  ;;  %v12258_v15 = vld [vmem:[#allocation129_spill] sm:$0xff] }
 0x5eb   : > { %2852 = vst [vmem:[#allocation1 + $0x1] ss:$9 sm:$0xff] %v12249_v45  ;;  %v12259_v45 = vld [vmem:[#allocation130_spill] sm:$0xff] }
 0x5ec   : > { %2853 = vst [vmem:[#allocation1 + $0x2] ss:$9 sm:$0xff] %v12250_v40  ;;  %v12260_v40 = vld [vmem:[#allocation131_spill] sm:$0xff] }
 0x5ed   : > { %2854 = vst [vmem:[#allocation1 + $0x3] ss:$9 sm:$0xff] %v12251_v48  ;;  %v12261_v48 = vld [vmem:[#allocation132_spill] sm:$0xff] }
 0x5ee   : > { %2855 = vst [vmem:[#allocation1 + $0x4] ss:$9 sm:$0xff] %v12252_v38  ;;  %v12262_v38 = vld [vmem:[#allocation133_spill] sm:$0xff] }
 0x5ef   : > { %2856 = vst [vmem:[#allocation1 + $0x5] ss:$9 sm:$0xff] %v12253_v55  ;;  %v12263_v55 = vld [vmem:[#allocation134_spill] sm:$0xff] }
 0x5f0   : > { %2857 = vst [vmem:[#allocation1 + $0x6] ss:$9 sm:$0xff] %v12254_v46 }
 0x5f1   : > { %2858 = vst [vmem:[#allocation1 + $0x7] ss:$9 sm:$0xff] %v12255_v50  ;;  %v12265_v50 = vld [vmem:[#allocation135_spill] sm:$0xff] }
 0x5f8   : > { %v2859_v22 = vld [vmem:[#allocation1] sm:$0xff] }
 0x5f9   : > { %2941 = vrot.lane.b32.xlu1 %v2859_v22, %s6423_s20  ;;  %2861 = vst [vmem:[#allocation1] ss:$9 sm:$0xff] %v12256_v28  ;;  %v12266_v22 = vld [vmem:[#allocation136_spill] sm:$0xff]  ;;  %v12267_v28 = vld [vmem:[#allocation137_spill] sm:$0xff] }
 0x5fa   : > { %2862 = vst [vmem:[#allocation1 + $0x1] ss:$9 sm:$0xff] %v12257_v58  ;;  %v12268_v58 = vld [vmem:[#allocation138_spill] sm:$0xff] }
 0x5fb   : > { %2863 = vst [vmem:[#allocation1 + $0x2] ss:$9 sm:$0xff] %v12258_v15  ;;  %v12269_v15 = vld [vmem:[#allocation139_spill] sm:$0xff] }
 0x5fc   : > { %2864 = vst [vmem:[#allocation1 + $0x3] ss:$9 sm:$0xff] %v12259_v45  ;;  %v12270_v45 = vld [vmem:[#allocation140_spill] sm:$0xff] }
 0x5fd   : > { %2865 = vst [vmem:[#allocation1 + $0x4] ss:$9 sm:$0xff] %v12260_v40  ;;  %v12271_v40 = vld [vmem:[#allocation141_spill] sm:$0xff] }
 0x5fe   : > { %2866 = vst [vmem:[#allocation1 + $0x5] ss:$9 sm:$0xff] %v12261_v48  ;;  %v12272_v48 = vld [vmem:[#allocation142_spill] sm:$0xff] }
 0x5ff   : > { %2867 = vst [vmem:[#allocation1 + $0x6] ss:$9 sm:$0xff] %v12262_v38 }
 0x600   : > { %2868 = vst [vmem:[#allocation1 + $0x7] ss:$9 sm:$0xff] %v12263_v55  ;;  %v12274_v55 = vld [vmem:[#allocation143_spill] sm:$0xff] }
 0x607   : > { %v8907_v46 = vld [vmem:[#allocation1] sm:$0xff] }
 0x608   : > { %12264 = vst [vmem:[#allocation28_spill] sm:$0xff] %v8907_v46  ;;  %v12275_v46 = vld [vmem:[#allocation144_spill] sm:$0xff] }
 0x609   : > { %2871 = vst [vmem:[#allocation1] ss:$9 sm:$0xff] %v12265_v50  ;;  %v12276_v50 = vld [vmem:[#allocation145_spill] sm:$0xff] }
 0x60a   : > { %2872 = vst [vmem:[#allocation1 + $0x1] ss:$9 sm:$0xff] %v12266_v22  ;;  %v12277_v22 = vld [vmem:[#allocation146_spill] sm:$0xff] }
 0x60b   : > { %2873 = vst [vmem:[#allocation1 + $0x2] ss:$9 sm:$0xff] %v12267_v28  ;;  %v12278_v28 = vld [vmem:[#allocation147_spill] sm:$0xff] }
 0x60c   : > { %2874 = vst [vmem:[#allocation1 + $0x3] ss:$9 sm:$0xff] %v12268_v58  ;;  %v12279_v58 = vld [vmem:[#allocation148_spill] sm:$0xff] }
 0x60d   : > { %2875 = vst [vmem:[#allocation1 + $0x4] ss:$9 sm:$0xff] %v12269_v15  ;;  %v12280_v15 = vld [vmem:[#allocation149_spill] sm:$0xff] }
 0x60e   : > { %2876 = vst [vmem:[#allocation1 + $0x5] ss:$9 sm:$0xff] %v12270_v45  ;;  %v12281_v45 = vld [vmem:[#allocation150_spill] sm:$0xff] }
 0x60f   : > { %2877 = vst [vmem:[#allocation1 + $0x6] ss:$9 sm:$0xff] %v12271_v40 }
 0x610   : > { %2878 = vst [vmem:[#allocation1 + $0x7] ss:$9 sm:$0xff] %v12272_v48  ;;  %v12283_v48 = vld [vmem:[#allocation151_spill] sm:$0xff] }
 0x617   : > { %v8917_v38 = vld [vmem:[#allocation1] sm:$0xff] }
 0x618   : > { %12273 = vst [vmem:[#allocation29_spill] sm:$0xff] %v8917_v38  ;;  %v12284_v38 = vld [vmem:[#allocation152_spill] sm:$0xff] }
 0x619   : > { %2881 = vst [vmem:[#allocation1] ss:$9 sm:$0xff] %v12274_v55  ;;  %v12285_v55 = vld [vmem:[#allocation153_spill] sm:$0xff] }
 0x61a   : > { %2882 = vst [vmem:[#allocation1 + $0x1] ss:$9 sm:$0xff] %v12275_v46  ;;  %v12286_v46 = vld [vmem:[#allocation154_spill] sm:$0xff] }
 0x61b   : > { %2883 = vst [vmem:[#allocation1 + $0x2] ss:$9 sm:$0xff] %v12276_v50  ;;  %v12287_v50 = vld [vmem:[#allocation155_spill] sm:$0xff] }
 0x61c   : > { %2884 = vst [vmem:[#allocation1 + $0x3] ss:$9 sm:$0xff] %v12277_v22  ;;  %v12288_v22 = vld [vmem:[#allocation156_spill] sm:$0xff] }
 0x61d   : > { %2885 = vst [vmem:[#allocation1 + $0x4] ss:$9 sm:$0xff] %v12278_v28  ;;  %v12289_v28 = vld [vmem:[#allocation157_spill] sm:$0xff] }
 0x61e   : > { %2886 = vst [vmem:[#allocation1 + $0x5] ss:$9 sm:$0xff] %v12279_v58  ;;  %v12290_v58 = vld [vmem:[#allocation158_spill] sm:$0xff] }
 0x61f   : > { %2887 = vst [vmem:[#allocation1 + $0x6] ss:$9 sm:$0xff] %v12280_v15 }
 0x620   : > { %2888 = vst [vmem:[#allocation1 + $0x7] ss:$9 sm:$0xff] %v12281_v45  ;;  %v12292_v45 = vld [vmem:[#allocation159_spill] sm:$0xff] }
 0x627   : > { %v8927_v40 = vld [vmem:[#allocation1] sm:$0xff] }
 0x628   : > { %12282 = vst [vmem:[#allocation30_spill] sm:$0xff] %v8927_v40  ;;  %v12293_v40 = vld [vmem:[#allocation160_spill] sm:$0xff] }
 0x629   : > { %2891 = vst [vmem:[#allocation1] ss:$9 sm:$0xff] %v12283_v48  ;;  %v12294_v48 = vld [vmem:[#allocation161_spill] sm:$0xff] }
 0x62a   : > { %2892 = vst [vmem:[#allocation1 + $0x1] ss:$9 sm:$0xff] %v12284_v38  ;;  %v12295_v38 = vld [vmem:[#allocation162_spill] sm:$0xff] }
 0x62b   : > { %2893 = vst [vmem:[#allocation1 + $0x2] ss:$9 sm:$0xff] %v12285_v55  ;;  %v12296_v55 = vld [vmem:[#allocation163_spill] sm:$0xff] }
 0x62c   : > { %2894 = vst [vmem:[#allocation1 + $0x3] ss:$9 sm:$0xff] %v12286_v46  ;;  %v12297_v46 = vld [vmem:[#allocation164_spill] sm:$0xff] }
 0x62d   : > { %2895 = vst [vmem:[#allocation1 + $0x4] ss:$9 sm:$0xff] %v12287_v50  ;;  %v12298_v50 = vld [vmem:[#allocation165_spill] sm:$0xff] }
 0x62e   : > { %2896 = vst [vmem:[#allocation1 + $0x5] ss:$9 sm:$0xff] %v12288_v22  ;;  %v12299_v22 = vld [vmem:[#allocation166_spill] sm:$0xff] }
 0x62f   : > { %2897 = vst [vmem:[#allocation1 + $0x6] ss:$9 sm:$0xff] %v12289_v28 }
 0x630   : > { %2898 = vst [vmem:[#allocation1 + $0x7] ss:$9 sm:$0xff] %v12290_v58  ;;  %v12301_v58 = vld [vmem:[#allocation167_spill] sm:$0xff] }
 0x637   : > { %v8937_v15 = vld [vmem:[#allocation1] sm:$0xff] }
 0x638   : > { %12291 = vst [vmem:[#allocation31_spill] sm:$0xff] %v8937_v15  ;;  %v12302_v15 = vld [vmem:[#allocation168_spill] sm:$0xff] }
 0x639   : > { %2901 = vst [vmem:[#allocation1] ss:$9 sm:$0xff] %v12292_v45  ;;  %v12303_v45 = vld [vmem:[#allocation169_spill] sm:$0xff] }
 0x63a   : > { %2902 = vst [vmem:[#allocation1 + $0x1] ss:$9 sm:$0xff] %v12293_v40  ;;  %v12304_v40 = vld [vmem:[#allocation171_spill] sm:$0xff] }
 0x63b   : > { %2903 = vst [vmem:[#allocation1 + $0x2] ss:$9 sm:$0xff] %v12294_v48  ;;  %v12305_v48 = vld [vmem:[#allocation172_spill] sm:$0xff] }
 0x63c   : > { %2904 = vst [vmem:[#allocation1 + $0x3] ss:$9 sm:$0xff] %v12295_v38  ;;  %v12306_v38 = vld [vmem:[#allocation173_spill] sm:$0xff] }
 0x63d   : > { %2905 = vst [vmem:[#allocation1 + $0x4] ss:$9 sm:$0xff] %v12296_v55  ;;  %v12307_v55 = vld [vmem:[#allocation174_spill] sm:$0xff] }
 0x63e   : > { %2906 = vst [vmem:[#allocation1 + $0x5] ss:$9 sm:$0xff] %v12297_v46  ;;  %v12308_v46 = vld [vmem:[#allocation176_spill] sm:$0xff] }
 0x63f   : > { %2907 = vst [vmem:[#allocation1 + $0x6] ss:$9 sm:$0xff] %v12298_v50 }
 0x640   : > { %2908 = vst [vmem:[#allocation1 + $0x7] ss:$9 sm:$0xff] %v12299_v22  ;;  %v12310_v22 = vld [vmem:[#allocation177_spill] sm:$0xff] }
 0x647   : > { %v8947_v28 = vld [vmem:[#allocation1] sm:$0xff] }
 0x648   : > { %12300 = vst [vmem:[#allocation32_spill] sm:$0xff] %v8947_v28  ;;  %v12311_v28 = vld [vmem:[#allocation179_spill] sm:$0xff] }
 0x649   : > { %2911 = vst [vmem:[#allocation1] ss:$9 sm:$0xff] %v12301_v58  ;;  %v12312_v58 = vld [vmem:[#allocation180_spill] sm:$0xff] }
 0x64a   : > { %2912 = vst [vmem:[#allocation1 + $0x1] ss:$9 sm:$0xff] %v12302_v15  ;;  %v12313_v15 = vld [vmem:[#allocation181_spill] sm:$0xff] }
 0x64b   : > { %2913 = vst [vmem:[#allocation1 + $0x2] ss:$9 sm:$0xff] %v12303_v45  ;;  %v12314_v45 = vld [vmem:[#allocation182_spill] sm:$0xff] }
 0x64c   : > { %2914 = vst [vmem:[#allocation1 + $0x3] ss:$9 sm:$0xff] %v12304_v40  ;;  %v12315_v40 = vld [vmem:[#allocation183_spill] sm:$0xff] }
 0x64d   : > { %2915 = vst [vmem:[#allocation1 + $0x4] ss:$9 sm:$0xff] %v12305_v48  ;;  %v12316_v48 = vld [vmem:[#allocation184_spill] sm:$0xff] }
 0x64e   : > { %2916 = vst [vmem:[#allocation1 + $0x5] ss:$9 sm:$0xff] %v12306_v38  ;;  %v12317_v38 = vld [vmem:[#allocation185_spill] sm:$0xff] }
 0x64f   : > { %2917 = vst [vmem:[#allocation1 + $0x6] ss:$9 sm:$0xff] %v12307_v55 }
 0x650   : > { %2918 = vst [vmem:[#allocation1 + $0x7] ss:$9 sm:$0xff] %v12308_v46  ;;  %v12318_v46 = vld [vmem:[#allocation186_spill] sm:$0xff] }
 0x657   : > { %v8957_v50 = vld [vmem:[#allocation1] sm:$0xff] }
 0x658   : > { %12309 = vst [vmem:[#allocation33_spill] sm:$0xff] %v8957_v50  ;;  %v12319_v50 = vld [vmem:[#allocation187_spill] sm:$0xff] }
 0x659   : > { %2921 = vst [vmem:[#allocation1] ss:$9 sm:$0xff] %v12310_v22 }
 0x65a   : > { %2922 = vst [vmem:[#allocation1 + $0x1] ss:$9 sm:$0xff] %v12311_v28 }
 0x65b   : > { %2923 = vst [vmem:[#allocation1 + $0x2] ss:$9 sm:$0xff] %v12312_v58  ;;  %v12350_v58 = vld [vmem:[#allocation345_spill] sm:$0xff] }
 0x65c   : > { %2924 = vst [vmem:[#allocation1 + $0x3] ss:$9 sm:$0xff] %v12313_v15  ;;  %v12351_v15 = vld [vmem:[#allocation346_spill] sm:$0xff] }
 0x65d   : > { %2925 = vst [vmem:[#allocation1 + $0x4] ss:$9 sm:$0xff] %v12314_v45  ;;  %v12352_v45 = vld [vmem:[#allocation347_spill] sm:$0xff] }
 0x65e   : > { %2926 = vst [vmem:[#allocation1 + $0x5] ss:$9 sm:$0xff] %v12315_v40  ;;  %v12353_v40 = vld [vmem:[#allocation348_spill] sm:$0xff] }
 0x65f   : > { %2927 = vst [vmem:[#allocation1 + $0x6] ss:$9 sm:$0xff] %v12316_v48  ;;  %v12354_v48 = vld [vmem:[#allocation349_spill] sm:$0xff] }
 0x660   : > { %2928 = vst [vmem:[#allocation1 + $0x7] ss:$9 sm:$0xff] %v12317_v38  ;;  %v12355_v38 = vld [vmem:[#allocation350_spill] sm:$0xff] }
 0x667   : > { %v8967_v55 = vld [vmem:[#allocation1] sm:$0xff] }
 0x668   : > { %2931 = vst [vmem:[#allocation1] ss:$9 sm:$0xff] %v12318_v46 }
 0x669   : > { %2932 = vst [vmem:[#allocation1 + $0x1] ss:$9 sm:$0xff] %v12319_v50  ;;  %v12349_v50 = vld [vmem:[#allocation343_spill] sm:$0xff] }
 0x670   : > { %v8971_v22 = vld [vmem:[#allocation1] sm:$0xff] }
 0x671   : > { %2959 = vst [vmem:[#allocation1] ss:$9 sm:$0xff] %v7369_v1 }
 0x672   : > { %2961 = vst [vmem:[#allocation1 + $0x1] ss:$9 sm:$0xff] %v7371_v24  ;;  %v12324_v24 = vld [vmem:[#allocation315_spill] sm:$0xff] }
 0x673   : > { %2963 = vst [vmem:[#allocation1 + $0x2] ss:$9 sm:$0xff] %v7375_v16  ;;  %v12321_v16 = vld [vmem:[#allocation312_spill] sm:$0xff] }
 0x674   : > { %2965 = vst [vmem:[#allocation1 + $0x3] ss:$9 sm:$0xff] %v7380_v59  ;;  %v12323_v59 = vld [vmem:[#allocation314_spill] sm:$0xff] }
 0x675   : > { %2967 = vst [vmem:[#allocation1 + $0x4] ss:$9 sm:$0xff] %v7386_v18  ;;  %v12325_v18 = vld [vmem:[#allocation316_spill] sm:$0xff] }
 0x676   : > { %2969 = vst [vmem:[#allocation1 + $0x5] ss:$9 sm:$0xff] %v7388_v23  ;;  %v12326_v23 = vld [vmem:[#allocation318_spill] sm:$0xff] }
 0x677   : > { %2971 = vst [vmem:[#allocation1 + $0x6] ss:$9 sm:$0xff] %v7401_v17  ;;  %v12322_v17 = vld [vmem:[#allocation313_spill] sm:$0xff] }
 0x678   : > { %2973 = vst [vmem:[#allocation1 + $0x7] ss:$9 sm:$0xff] %v7403_v14 }
 0x67f   : > { %v2974_v28 = vld [vmem:[#allocation1] sm:$0xff] }
 0x680   : > { %2976 = vst [vmem:[#allocation1] ss:$9 sm:$0xff] %v7413_v9  ;;  %3080 = vrot.lane.b32.xlu2 %v2974_v28, %s6424_s21  ;;  %v12320_v9 = vld [vmem:[#allocation311_spill] sm:$0xff] }
 0x681   : > { %2977 = vst [vmem:[#allocation1 + $0x1] ss:$9 sm:$0xff] %v7422_v11  ;;  %v12327_v11 = vld [vmem:[#allocation319_spill] sm:$0xff] }
 0x682   : > { %2978 = vst [vmem:[#allocation1 + $0x2] ss:$9 sm:$0xff] %v7424_v8  ;;  %v12356_v28 = vld [vmem:[#allocation263_spill] sm:$0xff] }
 0x683   : > { %2979 = vst [vmem:[#allocation1 + $0x3] ss:$9 sm:$0xff] %v11865_v41  ;;  %v12331_v41 = vld [vmem:[#allocation323_spill] sm:$0xff] }
 0x684   : > { %2980 = vst [vmem:[#allocation1 + $0x4] ss:$9 sm:$0xff] %v11867_v10  ;;  %v12330_v10 = vld [vmem:[#allocation322_spill] sm:$0xff] }
 0x685   : > { %2981 = vst [vmem:[#allocation1 + $0x5] ss:$9 sm:$0xff] %v11869_v32  ;;  %v12332_v32 = vld [vmem:[#allocation324_spill] sm:$0xff] }
 0x686   : > { %2982 = vst [vmem:[#allocation1 + $0x6] ss:$9 sm:$0xff] %v7450_v6 }
 0x687   : > { %2983 = vst [vmem:[#allocation1 + $0x7] ss:$9 sm:$0xff] %v11876_v34  ;;  %v12334_v34 = vld [vmem:[#allocation327_spill] sm:$0xff] }
 0x68e   : > { %v2984_v14 = vld [vmem:[#allocation1] sm:$0xff] }
 0x68f   : > { %2986 = vst [vmem:[#allocation1] ss:$9 sm:$0xff] %v11877_v37  ;;  %3082 = vrot.lane.b32.xlu1 %v2984_v14, %s6424_s21  ;;  %v12335_v37 = vld [vmem:[#allocation328_spill] sm:$0xff]  ;;  %v1796_v14 = vrot.slane %v12356_v28, 3 }
 0x690   : > { %2987 = vst [vmem:[#allocation1 + $0x1] ss:$9 sm:$0xff] %v11878_v26  ;;  %v12336_v26 = vld [vmem:[#allocation329_spill] sm:$0xff] }
 0x691   : > { %2988 = vst [vmem:[#allocation1 + $0x2] ss:$9 sm:$0xff] %v11880_v31  ;;  %v12333_v31 = vld [vmem:[#allocation326_spill] sm:$0xff] }
 0x692   : > { %2989 = vst [vmem:[#allocation1 + $0x3] ss:$9 sm:$0xff] %v11881_v29  ;;  %v12329_v29 = vld [vmem:[#allocation321_spill] sm:$0xff] }
 0x693   : > { %2990 = vst [vmem:[#allocation1 + $0x4] ss:$9 sm:$0xff] %v11883_v21  ;;  %v12328_v21 = vld [vmem:[#allocation320_spill] sm:$0xff] }
 0x694   : > { %2991 = vst [vmem:[#allocation1 + $0x5] ss:$9 sm:$0xff] %v12092_v25 }
 0x695   : > { %2992 = vst [vmem:[#allocation1 + $0x6] ss:$9 sm:$0xff] %v12093_v27  ;;  %v12340_v27 = vld [vmem:[#allocation333_spill] sm:$0xff] }
 0x696   : > { %2993 = vst [vmem:[#allocation1 + $0x7] ss:$9 sm:$0xff] %v12094_v5  ;;  %v12341_v5 = vld [vmem:[#allocation334_spill] sm:$0xff] }
 0x69d   : > { %v2994_v6 = vld [vmem:[#allocation1] sm:$0xff] }
 0x69e   : > { %3084 = vrot.lane.b32.xlu0 %v2994_v6, %s6424_s21  ;;  %2996 = vst [vmem:[#allocation1] ss:$9 sm:$0xff] %v12095_v0  ;;  %v12342_v0 = vld [vmem:[#allocation336_spill] sm:$0xff] }
 0x69f   : > { %2997 = vst [vmem:[#allocation1 + $0x1] ss:$9 sm:$0xff] %v12096_v33  ;;  %v12343_v33 = vld [vmem:[#allocation337_spill] sm:$0xff]  ;;  %v12357_v6 = vld [vmem:[#allocation268_spill] sm:$0xff] }
 0x6a0   : > { %2998 = vst [vmem:[#allocation1 + $0x2] ss:$9 sm:$0xff] %v11894_v13  ;;  %v12339_v13 = vld [vmem:[#allocation332_spill] sm:$0xff] }
 0x6a1   : > { %2999 = vst [vmem:[#allocation1 + $0x3] ss:$9 sm:$0xff] %v11897_v39 }
 0x6a2   : > { %3000 = vst [vmem:[#allocation1 + $0x4] ss:$9 sm:$0xff] %v11898_v63  ;;  %v12338_v63 = vld [vmem:[#allocation331_spill] sm:$0xff] }
 0x6a3   : > { %3001 = vst [vmem:[#allocation1 + $0x5] ss:$9 sm:$0xff] %v12097_v2  ;;  %v12344_v2 = vld [vmem:[#allocation338_spill] sm:$0xff] }
 0x6a4   : > { %3002 = vst [vmem:[#allocation1 + $0x6] ss:$9 sm:$0xff] %v12098_v30  ;;  %v12345_v30 = vld [vmem:[#allocation339_spill] sm:$0xff] }
 0x6a5   : > { %3003 = vst [vmem:[#allocation1 + $0x7] ss:$9 sm:$0xff] %v12100_v42  ;;  %v12346_v42 = vld [vmem:[#allocation340_spill] sm:$0xff] }
 0x6ac   : > { %v3004_v8 = vld [vmem:[#allocation1] sm:$0xff] }
 0x6ad   : > { %3006 = vst [vmem:[#allocation1] ss:$9 sm:$0xff] %v12101_v60  ;;  %3086 = vrot.lane.b32.xlu2 %v3004_v8, %s6424_s21  ;;  %v12347_v60 = vld [vmem:[#allocation341_spill] sm:$0xff]  ;;  %v1797_v8 = vrot.slane %v12357_v6, 3 }
 0x6ae   : > { %3007 = vst [vmem:[#allocation1 + $0x1] ss:$9 sm:$0xff] %v12102_v61 }
 0x6af   : > { %3008 = vst [vmem:[#allocation1 + $0x2] ss:$9 sm:$0xff] %v12103_v51  ;;  %v12348_v51 = vld [vmem:[#allocation342_spill] sm:$0xff] }
 0x6b0   : > { %3009 = vst [vmem:[#allocation1 + $0x3] ss:$9 sm:$0xff] %v11911_v54  ;;  %v12337_v54 = vld [vmem:[#allocation330_spill] sm:$0xff] }
 0x6b1   : > { %3010 = vst [vmem:[#allocation1 + $0x4] ss:$9 sm:$0xff] %v12320_v9 }
 0x6b2   : > { %3011 = vst [vmem:[#allocation1 + $0x5] ss:$9 sm:$0xff] %v12321_v16  ;;  %v1817_v16 = vsel %vm422_vm1, %v12357_v6, %v1797_v8 }
 0x6b3   : > { %3012 = vst [vmem:[#allocation1 + $0x6] ss:$9 sm:$0xff] %v12322_v17  ;;  %v9095_v17 = vsel %vm414_vm3, %v12357_v6, %v1797_v8 }
 0x6b4   : > { %3013 = vst [vmem:[#allocation1 + $0x7] ss:$9 sm:$0xff] %v12323_v59 }
 0x6bb   : > { %v9017_v1 = vld [vmem:[#allocation1] sm:$0xff] }
 0x6bc   : > { %3016 = vst [vmem:[#allocation1] ss:$9 sm:$0xff] %v12324_v24  ;;  %v9100_v24 = vrot.slane %v1817_v16, 2  ;;  %v12389_v16 = vld [vmem:[#allocation380_spill] sm:$0xff] }
 0x6bd   : > { %3017 = vst [vmem:[#allocation1 + $0x1] ss:$9 sm:$0xff] %v12325_v18  ;;  %v12358_v18 = vld [vmem:[#allocation271_spill] sm:$0xff] }
 0x6be   : > { %3018 = vst [vmem:[#allocation1 + $0x2] ss:$9 sm:$0xff] %v12326_v23  ;;  %v1798_v23 = vrot.slane %v12358_v18, 3 }
 0x6bf   : > { %3019 = vst [vmem:[#allocation1 + $0x3] ss:$9 sm:$0xff] %v12327_v11 }
 0x6c0   : > { %3020 = vst [vmem:[#allocation1 + $0x4] ss:$9 sm:$0xff] %v12328_v21  ;;  %v9116_v21 = vsel %vm414_vm3, %v12358_v18, %v1798_v23 }
 0x6c1   : > { %3021 = vst [vmem:[#allocation1 + $0x5] ss:$9 sm:$0xff] %v12329_v29 }
 0x6c2   : > { %3022 = vst [vmem:[#allocation1 + $0x6] ss:$9 sm:$0xff] %v12330_v10 }
 0x6c3   : > { %3023 = vst [vmem:[#allocation1 + $0x7] ss:$9 sm:$0xff] %v12331_v41  ;;  %v12359_v41 = vld [vmem:[#allocation363_spill] sm:$0xff] }
 0x6ca   : > { %v9027_v39 = vld [vmem:[#allocation1] sm:$0xff] }
 0x6cb   : > { %3026 = vst [vmem:[#allocation1] ss:$9 sm:$0xff] %v12332_v32  ;;  %v12360_v32 = vld [vmem:[#allocation364_spill] sm:$0xff] }
 0x6cc   : > { %3027 = vst [vmem:[#allocation1 + $0x1] ss:$9 sm:$0xff] %v12333_v31  ;;  %v12361_v31 = vld [vmem:[#allocation365_spill] sm:$0xff] }
 0x6cd   : > { %3028 = vst [vmem:[#allocation1 + $0x2] ss:$9 sm:$0xff] %v12334_v34  ;;  %v12362_v34 = vld [vmem:[#allocation366_spill] sm:$0xff] }
 0x6ce   : > { %3029 = vst [vmem:[#allocation1 + $0x3] ss:$9 sm:$0xff] %v12335_v37  ;;  %v12363_v37 = vld [vmem:[#allocation367_spill] sm:$0xff] }
 0x6cf   : > { %3030 = vst [vmem:[#allocation1 + $0x4] ss:$9 sm:$0xff] %v12336_v26  ;;  %v12364_v26 = vld [vmem:[#allocation368_spill] sm:$0xff] }
 0x6d0   : > { %3031 = vst [vmem:[#allocation1 + $0x5] ss:$9 sm:$0xff] %v12337_v54  ;;  %v12365_v54 = vld [vmem:[#allocation369_spill] sm:$0xff] }
 0x6d1   : > { %3032 = vst [vmem:[#allocation1 + $0x6] ss:$9 sm:$0xff] %v12338_v63  ;;  %v12366_v63 = vld [vmem:[#allocation284_spill] sm:$0xff] }
 0x6d2   : > { %3033 = vst [vmem:[#allocation1 + $0x7] ss:$9 sm:$0xff] %v12339_v13 }
 0x6d9   : > { %v9037_v25 = vld [vmem:[#allocation1] sm:$0xff] }
 0x6da   : > { %3036 = vst [vmem:[#allocation1] ss:$9 sm:$0xff] %v12340_v27  ;;  %v12367_v27 = vld [vmem:[#allocation285_spill] sm:$0xff] }
 0x6db   : > { %3037 = vst [vmem:[#allocation1 + $0x1] ss:$9 sm:$0xff] %v12341_v5  ;;  %v12368_v5 = vld [vmem:[#allocation286_spill] sm:$0xff] }
 0x6dc   : > { %3038 = vst [vmem:[#allocation1 + $0x2] ss:$9 sm:$0xff] %v12342_v0  ;;  %v12369_v0 = vld [vmem:[#allocation370_spill] sm:$0xff] }
 0x6dd   : > { %3039 = vst [vmem:[#allocation1 + $0x3] ss:$9 sm:$0xff] %v12343_v33  ;;  %v12370_v33 = vld [vmem:[#allocation371_spill] sm:$0xff] }
 0x6de   : > { %3040 = vst [vmem:[#allocation1 + $0x4] ss:$9 sm:$0xff] %v12344_v2  ;;  %v12371_v2 = vld [vmem:[#allocation372_spill] sm:$0xff] }
 0x6df   : > { %3041 = vst [vmem:[#allocation1 + $0x5] ss:$9 sm:$0xff] %v12345_v30  ;;  %v12372_v30 = vld [vmem:[#allocation373_spill] sm:$0xff] }
 0x6e0   : > { %3042 = vst [vmem:[#allocation1 + $0x6] ss:$9 sm:$0xff] %v12346_v42  ;;  %v12373_v42 = vld [vmem:[#allocation287_spill] sm:$0xff] }
 0x6e1   : > { %3043 = vst [vmem:[#allocation1 + $0x7] ss:$9 sm:$0xff] %v12347_v60  ;;  %v12374_v60 = vld [vmem:[#allocation288_spill] sm:$0xff] }
 0x6e8   : > { %v9047_v61 = vld [vmem:[#allocation1] sm:$0xff] }
 0x6e9   : > { %3046 = vst [vmem:[#allocation1] ss:$9 sm:$0xff] %v12348_v51 }
 0x6ea   : > { %3047 = vst [vmem:[#allocation1 + $0x1] ss:$9 sm:$0xff] %v12349_v50  ;;  %v12375_v50 = vld [vmem:[#allocation290_spill] sm:$0xff] }
 0x6eb   : > { %3048 = vst [vmem:[#allocation1 + $0x2] ss:$9 sm:$0xff] %v12350_v58  ;;  %v12376_v58 = vld [vmem:[#allocation291_spill] sm:$0xff] }
 0x6ec   : > { %3049 = vst [vmem:[#allocation1 + $0x3] ss:$9 sm:$0xff] %v12351_v15  ;;  %v12377_v15 = vld [vmem:[#allocation292_spill] sm:$0xff] }
 0x6ed   : > { %3050 = vst [vmem:[#allocation1 + $0x4] ss:$9 sm:$0xff] %v12352_v45  ;;  %v12378_v45 = vld [vmem:[#allocation293_spill] sm:$0xff] }
 0x6ee   : > { %3051 = vst [vmem:[#allocation1 + $0x5] ss:$9 sm:$0xff] %v12353_v40  ;;  %v12379_v40 = vld [vmem:[#allocation374_spill] sm:$0xff] }
 0x6ef   : > { %3052 = vst [vmem:[#allocation1 + $0x6] ss:$9 sm:$0xff] %v12354_v48  ;;  %v12380_v48 = vld [vmem:[#allocation375_spill] sm:$0xff] }
 0x6f0   : > { %3053 = vst [vmem:[#allocation1 + $0x7] ss:$9 sm:$0xff] %v12355_v38  ;;  %v12381_v38 = vld [vmem:[#allocation300_spill] sm:$0xff] }
 0x6f7   : > { %v9057_v46 = vld [vmem:[#allocation1] sm:$0xff] }
 0x6f8   : > { %3056 = vst [vmem:[#allocation1] ss:$9 sm:$0xff] %v8649_v3  ;;  %v1802_v3 = vsel %vm418_vm0, %v12356_v28, %v1796_v14 }
 0x6f9   : > { %3057 = vst [vmem:[#allocation1 + $0x1] ss:$9 sm:$0xff] %v8651_v57  ;;  %v9077_v57 = vsel %vm414_vm3, %v12356_v28, %v1796_v14  ;;  %vm11487_vm3 = vcmask 48128  }
 0x6fa   : > { %3058 = vst [vmem:[#allocation1 + $0x2] ss:$9 sm:$0xff] %v8653_v47  ;;  %v1805_v47 = vsel %vm422_vm1, %v12356_v28, %v1796_v14  ;;  %vm3648_vm1 = vcmask 1045504  }
 0x6fb   : > { %3059 = vst [vmem:[#allocation1 + $0x3] ss:$9 sm:$0xff] %v8659_v52  ;;  %v1808_v52 = vsel %vm426_vm2, %v12356_v28, %v1796_v14  ;;  %v12382_v28 = vld [vmem:[#allocation376_spill] sm:$0xff]  ;;  %v12383_v14 = vld [vmem:[#allocation18_spill] sm:$0xff] }
 0x6fc   : > { %3060 = vst [vmem:[#allocation1 + $0x4] ss:$9 sm:$0xff] %v8667_v36  ;;  %v9079_v36 = vrot.slane %v1802_v3, 1  ;;  %v9087_v9 = vrot.slane %v1808_v52, 3  ;;  %v12385_v3 = vld [vmem:[#allocation302_spill] sm:$0xff] }
 0x6fd   : > { %3061 = vst [vmem:[#allocation1 + $0x5] ss:$9 sm:$0xff] %v8669_v4  ;;  %v9081_v4 = vrot.slane %v1805_v47, 2  ;;  %v12386_v47 = vld [vmem:[#allocation377_spill] sm:$0xff]  ;;  %v12387_v52 = vld [vmem:[#allocation378_spill] sm:$0xff] }
 0x6fe   : > { %3062 = vst [vmem:[#allocation1 + $0x6] ss:$9 sm:$0xff] %v8672_v20 }
 0x6ff   : > { %3063 = vst [vmem:[#allocation1 + $0x7] ss:$9 sm:$0xff] %v8682_v56  ;;  %v1814_v56 = vsel %vm418_vm0, %v12357_v6, %v1797_v8 }
 0x700   : > { %v9097_v59 = vrot.slane %v1814_v56, 1  ;;  %v12388_v56 = vld [vmem:[#allocation379_spill] sm:$0xff] }
 0x706   : > { %v9085_v20 = vld [vmem:[#allocation1] sm:$0xff] }
 0x707   : > { %3066 = vst [vmem:[#allocation1] ss:$9 sm:$0xff] %v8688_v62  ;;  %v1820_v62 = vsel %vm426_vm2, %v12357_v6, %v1797_v8  ;;  %v12384_v8 = vld [vmem:[#allocation301_spill] sm:$0xff]  ;;  %vm11488_vm2 = vcmask 23552  }
 0x708   : > { %3067 = vst [vmem:[#allocation1 + $0x1] ss:$9 sm:$0xff] %v9077_v57  ;;  %v9110_v11 = vrot.slane %v1820_v62, 3  ;;  %v12390_v62 = vld [vmem:[#allocation381_spill] sm:$0xff] }
 0x709   : > { %3068 = vst [vmem:[#allocation1 + $0x2] ss:$9 sm:$0xff] %v9079_v36 }
 0x70a   : > { %3069 = vst [vmem:[#allocation1 + $0x3] ss:$9 sm:$0xff] %v9081_v4 }
 0x70b   : > { %3070 = vst [vmem:[#allocation1 + $0x4] ss:$9 sm:$0xff] %v9087_v9 }
 0x70c   : > { %3071 = vst [vmem:[#allocation1 + $0x5] ss:$9 sm:$0xff] %v9095_v17 }
 0x70d   : > { %3072 = vst [vmem:[#allocation1 + $0x6] ss:$9 sm:$0xff] %v9097_v59 }
 0x70e   : > { %3073 = vst [vmem:[#allocation1 + $0x7] ss:$9 sm:$0xff] %v9100_v24 }
 0x715   : > { %v9118_v29 = vld [vmem:[#allocation1] sm:$0xff] }
 0x716   : > { %3076 = vst [vmem:[#allocation1] ss:$9 sm:$0xff] %v9110_v11 }
 0x717   : > { %3077 = vst [vmem:[#allocation1 + $0x1] ss:$9 sm:$0xff] %v9116_v21 }
 0x71e   : > { %v9122_v10 = vld [vmem:[#allocation1] sm:$0xff] }
 0x71f   : > { %3104 = vst [vmem:[#allocation1] ss:$9 sm:$0xff] %v12359_v41  ;;  %v12391_v41 = vld [vmem:[#allocation310_spill] sm:$0xff] }
 0x720   : > { %3106 = vst [vmem:[#allocation1 + $0x1] ss:$9 sm:$0xff] %v12360_v32 }
 0x721   : > { %3108 = vst [vmem:[#allocation1 + $0x2] ss:$9 sm:$0xff] %v12361_v31  ;;  %v12392_v31 = vld [vmem:[#allocation382_spill] sm:$0xff] }
 0x722   : > { %3110 = vst [vmem:[#allocation1 + $0x3] ss:$9 sm:$0xff] %v12362_v34  ;;  %v12393_v34 = vld [vmem:[#allocation384_spill] sm:$0xff] }
 0x723   : > { %3112 = vst [vmem:[#allocation1 + $0x4] ss:$9 sm:$0xff] %v12363_v37  ;;  %v12394_v37 = vld [vmem:[#allocation385_spill] sm:$0xff] }
 0x724   : > { %3114 = vst [vmem:[#allocation1 + $0x5] ss:$9 sm:$0xff] %v12364_v26  ;;  %v12395_v26 = vld [vmem:[#allocation386_spill] sm:$0xff] }
 0x725   : > { %3116 = vst [vmem:[#allocation1 + $0x6] ss:$9 sm:$0xff] %v12365_v54  ;;  %v12396_v54 = vld [vmem:[#allocation387_spill] sm:$0xff] }
 0x726   : > { %3118 = vst [vmem:[#allocation1 + $0x7] ss:$9 sm:$0xff] %v12366_v63  ;;  %v12397_v63 = vld [vmem:[#allocation388_spill] sm:$0xff] }
 0x72d   : > { %v3119_v13 = vld [vmem:[#allocation1] sm:$0xff] }
 0x72e   : > { %3234 = vrot.lane.b32.xlu0 %v3119_v13, %s6425_s22  ;;  %3121 = vst [vmem:[#allocation1] ss:$9 sm:$0xff] %v12367_v27  ;;  %v12398_v13 = vld [vmem:[#allocation389_spill] sm:$0xff]  ;;  %v12399_v27 = vld [vmem:[#allocation390_spill] sm:$0xff] }
 0x72f   : > { %3122 = vst [vmem:[#allocation1 + $0x1] ss:$9 sm:$0xff] %v12368_v5 }
 0x730   : > { %3123 = vst [vmem:[#allocation1 + $0x2] ss:$9 sm:$0xff] %v12369_v0  ;;  %v12400_v0 = vld [vmem:[#allocation391_spill] sm:$0xff] }
 0x731   : > { %3124 = vst [vmem:[#allocation1 + $0x3] ss:$9 sm:$0xff] %v12370_v33  ;;  %v12401_v33 = vld [vmem:[#allocation393_spill] sm:$0xff] }
 0x732   : > { %3125 = vst [vmem:[#allocation1 + $0x4] ss:$9 sm:$0xff] %v12371_v2  ;;  %v12402_v2 = vld [vmem:[#allocation394_spill] sm:$0xff] }
 0x733   : > { %3126 = vst [vmem:[#allocation1 + $0x5] ss:$9 sm:$0xff] %v12372_v30  ;;  %v12403_v30 = vld [vmem:[#allocation395_spill] sm:$0xff] }
 0x734   : > { %3127 = vst [vmem:[#allocation1 + $0x6] ss:$9 sm:$0xff] %v12373_v42  ;;  %v12404_v42 = vld [vmem:[#allocation396_spill] sm:$0xff] }
 0x735   : > { %3128 = vst [vmem:[#allocation1 + $0x7] ss:$9 sm:$0xff] %v12374_v60  ;;  %v12405_v60 = vld [vmem:[#allocation397_spill] sm:$0xff] }
 0x73c   : > { %v3129_v51 = vld [vmem:[#allocation1] sm:$0xff] }
 0x73d   : > { %3131 = vst [vmem:[#allocation1] ss:$9 sm:$0xff] %v12375_v50  ;;  %3236 = vrot.lane.b32.xlu2 %v3129_v51, %s6425_s22  ;;  %v12406_v51 = vld [vmem:[#allocation398_spill] sm:$0xff]  ;;  %v12407_v50 = vld [vmem:[#allocation399_spill] sm:$0xff] }
 0x73e   : > { %3132 = vst [vmem:[#allocation1 + $0x1] ss:$9 sm:$0xff] %v12376_v58  ;;  %v12408_v58 = vld [vmem:[#allocation3_spill] sm:$0xff] }
 0x73f   : > { %3133 = vst [vmem:[#allocation1 + $0x2] ss:$9 sm:$0xff] %v12377_v15 }
 0x740   : > { %3134 = vst [vmem:[#allocation1 + $0x3] ss:$9 sm:$0xff] %v12378_v45  ;;  %v12409_v45 = vld [vmem:[#allocation400_spill] sm:$0xff] }
 0x741   : > { %3135 = vst [vmem:[#allocation1 + $0x4] ss:$9 sm:$0xff] %v12379_v40  ;;  %v12410_v40 = vld [vmem:[#allocation402_spill] sm:$0xff] }
 0x742   : > { %3136 = vst [vmem:[#allocation1 + $0x5] ss:$9 sm:$0xff] %v12380_v48  ;;  %v12411_v48 = vld [vmem:[#allocation403_spill] sm:$0xff] }
 0x743   : > { %3137 = vst [vmem:[#allocation1 + $0x6] ss:$9 sm:$0xff] %v12381_v38  ;;  %v12412_v38 = vld [vmem:[#allocation404_spill] sm:$0xff] }
 0x744   : > { %3138 = vst [vmem:[#allocation1 + $0x7] ss:$9 sm:$0xff] %v12382_v28  ;;  %v12413_v28 = vld [vmem:[#allocation405_spill] sm:$0xff] }
 0x745   : > { %2798 = vrot.lane.b32.xlu2 %v12383_v14, %s6422_s19  ;;  %v12414_v14 = vld [vmem:[#allocation406_spill] sm:$0xff] }
 0x74b   : > { %v3139_v6 = vld [vmem:[#allocation1] sm:$0xff] }
 0x74c   : > { %3238 = vrot.lane.b32.xlu1 %v3139_v6, %s6425_s22  ;;  %3141 = vst [vmem:[#allocation1] ss:$9 sm:$0xff] %v12384_v8  ;;  %v12415_v6 = vld [vmem:[#allocation407_spill] sm:$0xff]  ;;  %v12416_v8 = vld [vmem:[#allocation408_spill] sm:$0xff] }
 0x74d   : > { %3142 = vst [vmem:[#allocation1 + $0x1] ss:$9 sm:$0xff] %v12385_v3 }
 0x74e   : > { %3143 = vst [vmem:[#allocation1 + $0x2] ss:$9 sm:$0xff] %v12386_v47  ;;  %v12417_v47 = vld [vmem:[#allocation409_spill] sm:$0xff] }
 0x74f   : > { %3144 = vst [vmem:[#allocation1 + $0x3] ss:$9 sm:$0xff] %v12387_v52  ;;  %v12418_v52 = vld [vmem:[#allocation411_spill] sm:$0xff] }
 0x750   : > { %3145 = vst [vmem:[#allocation1 + $0x4] ss:$9 sm:$0xff] %v12388_v56  ;;  %v12419_v56 = vld [vmem:[#allocation75_spill] sm:$0xff] }
 0x751   : > { %3146 = vst [vmem:[#allocation1 + $0x5] ss:$9 sm:$0xff] %v12389_v16  ;;  %v12420_v16 = vld [vmem:[#allocation412_spill] sm:$0xff] }
 0x752   : > { %3147 = vst [vmem:[#allocation1 + $0x6] ss:$9 sm:$0xff] %v12390_v62  ;;  %v12421_v62 = vld [vmem:[#allocation413_spill] sm:$0xff] }
 0x753   : > { %3148 = vst [vmem:[#allocation1 + $0x7] ss:$9 sm:$0xff] %v12391_v41  ;;  %v12422_v41 = vld [vmem:[#allocation414_spill] sm:$0xff] }
 0x75a   : > { %v3149_v32 = vld [vmem:[#allocation1] sm:$0xff] }
 0x75b   : > { %3240 = vrot.lane.b32.xlu0 %v3149_v32, %s6425_s22  ;;  %3151 = vst [vmem:[#allocation1] ss:$9 sm:$0xff] %v12392_v31  ;;  %v12423_v32 = vld [vmem:[#allocation415_spill] sm:$0xff]  ;;  %v12424_v31 = vld [vmem:[#allocation416_spill] sm:$0xff] }
 0x75c   : > { %3152 = vst [vmem:[#allocation1 + $0x1] ss:$9 sm:$0xff] %v12393_v34 }
 0x75d   : > { %3153 = vst [vmem:[#allocation1 + $0x2] ss:$9 sm:$0xff] %v12394_v37  ;;  %v12425_v37 = vld [vmem:[#allocation417_spill] sm:$0xff] }
 0x75e   : > { %3154 = vst [vmem:[#allocation1 + $0x3] ss:$9 sm:$0xff] %v12395_v26  ;;  %v12426_v26 = vld [vmem:[#allocation419_spill] sm:$0xff] }
 0x75f   : > { %3155 = vst [vmem:[#allocation1 + $0x4] ss:$9 sm:$0xff] %v12396_v54  ;;  %v12427_v54 = vld [vmem:[#allocation420_spill] sm:$0xff] }
 0x760   : > { %3156 = vst [vmem:[#allocation1 + $0x5] ss:$9 sm:$0xff] %v12397_v63  ;;  %v12428_v63 = vld [vmem:[#allocation85_spill] sm:$0xff] }
 0x761   : > { %3157 = vst [vmem:[#allocation1 + $0x6] ss:$9 sm:$0xff] %v12398_v13  ;;  %v12429_v13 = vld [vmem:[#allocation421_spill] sm:$0xff] }
 0x762   : > { %3158 = vst [vmem:[#allocation1 + $0x7] ss:$9 sm:$0xff] %v12399_v27  ;;  %v12430_v27 = vld [vmem:[#allocation422_spill] sm:$0xff] }
 0x769   : > { %v3159_v5 = vld [vmem:[#allocation1] sm:$0xff] }
 0x76a   : > { %3242 = vrot.lane.b32.xlu2 %v3159_v5, %s6425_s22  ;;  %3161 = vst [vmem:[#allocation1] ss:$9 sm:$0xff] %v12400_v0  ;;  %v12431_v5 = vld [vmem:[#allocation423_spill] sm:$0xff] }
 0x76b   : > { %3162 = vst [vmem:[#allocation1 + $0x1] ss:$9 sm:$0xff] %v12401_v33  ;;  %v12432_v33 = vld [vmem:[#allocation24_spill] sm:$0xff] }
 0x76c   : > { %3163 = vst [vmem:[#allocation1 + $0x2] ss:$9 sm:$0xff] %v12402_v2  ;;  %v1834_v2 = vshll.u32 %v9079_v36, 16 }
 0x76d   : > { %3164 = vst [vmem:[#allocation1 + $0x3] ss:$9 sm:$0xff] %v12403_v30  ;;  %v12454_v30 = vld [vmem:[#allocation206_spill] sm:$0xff] }
 0x76e   : > { %3165 = vst [vmem:[#allocation1 + $0x4] ss:$9 sm:$0xff] %v12404_v42 }
 0x76f   : > { %3166 = vst [vmem:[#allocation1 + $0x5] ss:$9 sm:$0xff] %v12405_v60  ;;  %v1868_v60 = vshrl.u32 %v9097_v59, 16 }
 0x770   : > { %3167 = vst [vmem:[#allocation1 + $0x6] ss:$9 sm:$0xff] %v12406_v51 }
 0x771   : > { %3168 = vst [vmem:[#allocation1 + $0x7] ss:$9 sm:$0xff] %v12407_v50  ;;  %v1876_v50 = vshrl.u32 %v9100_v24, 16 }
 0x772   : > { %2501 = vrot.lane.b32.xlu2 %v12408_v58, %s6420_s17  ;;  %v1881_v58 = vshll.u32 %v9110_v11, 16 }
 0x778   : > { %v9181_v15 = vld [vmem:[#allocation1] sm:$0xff] }
 0x779   : > { %3171 = vst [vmem:[#allocation1] ss:$9 sm:$0xff] %v12409_v45  ;;  %v12434_v45 = vld [vmem:[#allocation25_spill] sm:$0xff] }
 0x77a   : > { %3172 = vst [vmem:[#allocation1 + $0x1] ss:$9 sm:$0xff] %v12410_v40 }
 0x77b   : > { %3173 = vst [vmem:[#allocation1 + $0x2] ss:$9 sm:$0xff] %v12411_v48  ;;  %v1883_v48 = vsel %vm7783_vm6, %v1876_v50, %v1881_v58  ;;  %v12460_v50 = vld [vmem:[#allocation28_spill] sm:$0xff]  ;;  %v9311_v58 = vpop.permute.xlu1 %2350 }
 0x77c   : > { %3174 = vst [vmem:[#allocation1 + $0x3] ss:$9 sm:$0xff] %v12412_v38 }
 0x77d   : > { %3175 = vst [vmem:[#allocation1 + $0x4] ss:$9 sm:$0xff] %v12413_v28  ;;  %v1884_v28 = vshrl.u32 %v9110_v11, 16  ;;  %v12436_v11 = vld [vmem:[#allocation189_spill] sm:$0xff] }
 0x77e   : > { %3176 = vst [vmem:[#allocation1 + $0x5] ss:$9 sm:$0xff] %v12414_v14 }
 0x77f   : > { %3177 = vst [vmem:[#allocation1 + $0x6] ss:$9 sm:$0xff] %v12415_v6 }
 0x780   : > { %3178 = vst [vmem:[#allocation1 + $0x7] ss:$9 sm:$0xff] %v12416_v8 }
 0x787   : > { %v9191_v3 = vld [vmem:[#allocation1] sm:$0xff] }
 0x788   : > { %3181 = vst [vmem:[#allocation1] ss:$9 sm:$0xff] %v12417_v47 }
 0x789   : > { %3182 = vst [vmem:[#allocation1 + $0x1] ss:$9 sm:$0xff] %v12418_v52 }
 0x78a   : > { %3183 = vst [vmem:[#allocation1 + $0x2] ss:$9 sm:$0xff] %v12419_v56  ;;  %v12435_v56 = vld [vmem:[#allocation188_spill] sm:$0xff] }
 0x78b   : > { %3184 = vst [vmem:[#allocation1 + $0x3] ss:$9 sm:$0xff] %v12420_v16  ;;  %v12437_v16 = vld [vmem:[#allocation190_spill] sm:$0xff] }
 0x78c   : > { %3185 = vst [vmem:[#allocation1 + $0x4] ss:$9 sm:$0xff] %v12421_v62  ;;  %v12439_v62 = vld [vmem:[#allocation192_spill] sm:$0xff] }
 0x78d   : > { %3186 = vst [vmem:[#allocation1 + $0x5] ss:$9 sm:$0xff] %v12422_v41  ;;  %v12440_v41 = vld [vmem:[#allocation193_spill] sm:$0xff] }
 0x78e   : > { %3187 = vst [vmem:[#allocation1 + $0x6] ss:$9 sm:$0xff] %v12423_v32  ;;  %v12441_v32 = vld [vmem:[#allocation194_spill] sm:$0xff] }
 0x78f   : > { %3188 = vst [vmem:[#allocation1 + $0x7] ss:$9 sm:$0xff] %v12424_v31  ;;  %v9274_v31 = vpop.permute.xlu2 %2348 }
 0x796   : > { %v9201_v34 = vld [vmem:[#allocation1] sm:$0xff] }
 0x797   : > { %3191 = vst [vmem:[#allocation1] ss:$9 sm:$0xff] %v12425_v37  ;;  %v12442_v37 = vld [vmem:[#allocation195_spill] sm:$0xff] }
 0x798   : > { %3192 = vst [vmem:[#allocation1 + $0x1] ss:$9 sm:$0xff] %v12426_v26 }
 0x799   : > { %3193 = vst [vmem:[#allocation1 + $0x2] ss:$9 sm:$0xff] %v12427_v54  ;;  %v12443_v54 = vld [vmem:[#allocation196_spill] sm:$0xff] }
 0x79a   : > { %3194 = vst [vmem:[#allocation1 + $0x3] ss:$9 sm:$0xff] %v12428_v63  ;;  %v12444_v63 = vld [vmem:[#allocation197_spill] sm:$0xff] }
 0x79b   : > { %3195 = vst [vmem:[#allocation1 + $0x4] ss:$9 sm:$0xff] %v12429_v13  ;;  %v9280_v13 = vpop.permute.xlu2 %2354 }
 0x79c   : > { %3196 = vst [vmem:[#allocation1 + $0x5] ss:$9 sm:$0xff] %v12430_v27  ;;  %v12445_v27 = vld [vmem:[#allocation198_spill] sm:$0xff] }
 0x79d   : > { %3197 = vst [vmem:[#allocation1 + $0x6] ss:$9 sm:$0xff] %v12431_v5  ;;  %v12446_v5 = vld [vmem:[#allocation199_spill] sm:$0xff] }
 0x79e   : > { %3198 = vst [vmem:[#allocation1 + $0x7] ss:$9 sm:$0xff] %v12218_v43  ;;  %v1829_v43 = vshrl.u32 %v9077_v57, 16  ;;  %v1865_v57 = vshll.u32 %v9097_v59, 16  ;;  %v1826_v59 = vsel %vm418_vm0, %v12358_v18, %v1798_v23  ;;  %v1888_v18 = vshll.u32 %v9116_v21, 16 }
 0x79f   : > { %v1828_v38 = vrot.slane %v1826_v59, 1  ;;  %v1891_v23 = vshrl.u32 %v9116_v21, 16  ;;  %v12438_v21 = vld [vmem:[#allocation191_spill] sm:$0xff]  ;;  %vm3647_vm0 = vcmask 1044480  }
 0x7a0   : > { %v1836_v42 = vsel %vm7783_vm6, %v1829_v43, %v1834_v2  ;;  %v1890_v6 = vsel %vm7783_vm6, %v1884_v28, %v1888_v18  ;;  %v12448_v43 = vld [vmem:[#allocation201_spill] sm:$0xff]  ;;  %v12449_v2 = vld [vmem:[#allocation202_spill] sm:$0xff]  ;;  %v12466_v28 = vld [vmem:[#allocation19_spill] sm:$0xff] }
 0x7a1   : > { %v1896_v14 = vshll.u32 %v1828_v38, 16  ;;  %v12465_v38 = vld [vmem:[#allocation214_spill] sm:$0xff]  ;;  %v12467_v18 = vld [vmem:[#allocation215_spill] sm:$0xff] }
 0x7a3   : > { %v1898_v8 = vsel %vm7783_vm6, %v1891_v23, %v1896_v14  ;;  %v12468_v23 = vld [vmem:[#allocation216_spill] sm:$0xff]  ;;  %v12469_v14 = vld [vmem:[#allocation217_spill] sm:$0xff] }
 0x7a5   : > { %v9211_v0 = vld [vmem:[#allocation1] sm:$0xff] }
 0x7a6   : > { %3201 = vst [vmem:[#allocation1] ss:$9 sm:$0xff] %v8800_v12  ;;  %v1837_v12 = vshrl.u32 %v9079_v36, 16 }
 0x7a7   : > { %3202 = vst [vmem:[#allocation1 + $0x1] ss:$9 sm:$0xff] %v8806_v49  ;;  %v1842_v49 = vshll.u32 %v9081_v4, 16 }
 0x7a8   : > { %3203 = vst [vmem:[#allocation1 + $0x2] ss:$9 sm:$0xff] %v8814_v44  ;;  %v1845_v44 = vshrl.u32 %v9081_v4, 16  ;;  %v1873_v4 = vshll.u32 %v9100_v24, 16 }
 0x7a9   : > { %3204 = vst [vmem:[#allocation1 + $0x3] ss:$9 sm:$0xff] %v8821_v53  ;;  %v1850_v53 = vshll.u32 %v9087_v9, 16  ;;  %v1844_v36 = vsel %vm7783_vm6, %v1837_v12, %v1842_v49  ;;  %v12450_v12 = vld [vmem:[#allocation203_spill] sm:$0xff]  ;;  %v12451_v49 = vld [vmem:[#allocation10_spill] sm:$0xff] }
 0x7aa   : > { %3205 = vst [vmem:[#allocation1 + $0x4] ss:$9 sm:$0xff] %v8830_v7  ;;  %v1853_v7 = vshrl.u32 %v9087_v9, 16  ;;  %v1875_v24 = vsel %vm7783_vm6, %v1868_v60, %v1873_v4  ;;  %v12458_v60 = vld [vmem:[#allocation210_spill] sm:$0xff] }
 0x7ab   : > { %3206 = vst [vmem:[#allocation1 + $0x5] ss:$9 sm:$0xff] %v8835_v35  ;;  %v1857_v35 = vshll.u32 %v9095_v17, 16  ;;  %v1852_v9 = vsel %vm7783_vm6, %v1845_v44, %v1850_v53  ;;  %v9290_v44 = vpop.permute.xlu2 %2495 }
 0x7ac   : > { %3207 = vst [vmem:[#allocation1 + $0x6] ss:$9 sm:$0xff] %v12432_v33  ;;  %v12447_v33 = vld [vmem:[#allocation200_spill] sm:$0xff] }
 0x7ad   : > { %3208 = vst [vmem:[#allocation1 + $0x7] ss:$9 sm:$0xff] %v8851_v19  ;;  %v1860_v19 = vshrl.u32 %v9095_v17, 16  ;;  %v1859_v17 = vsel %vm7783_vm6, %v1853_v7, %v1857_v35  ;;  %v12452_v7 = vld [vmem:[#allocation204_spill] sm:$0xff]  ;;  %v12453_v35 = vld [vmem:[#allocation205_spill] sm:$0xff] }
 0x7af   : > { %v1867_v40 = vsel %vm7783_vm6, %v1860_v19, %v1865_v57  ;;  %v12456_v19 = vld [vmem:[#allocation208_spill] sm:$0xff]  ;;  %v12457_v57 = vld [vmem:[#allocation209_spill] sm:$0xff] }
 0x7b3   : > { %v9304_v4 = vpop.permute.xlu2 %2642 }
 0x7b4   : > { %v9237_v51 = vld [vmem:[#allocation1] sm:$0xff] }
 0x7b5   : > { %3211 = vst [vmem:[#allocation1] ss:$9 sm:$0xff] %v12434_v45 }
 0x7b6   : > { %3213 = vst [vmem:[#allocation1 + $0x1] ss:$9 sm:$0xff] %v1836_v42  ;;  %v12455_v42 = vld [vmem:[#allocation207_spill] sm:$0xff] }
 0x7b7   : > { %3215 = vst [vmem:[#allocation1 + $0x2] ss:$9 sm:$0xff] %v1844_v36  ;;  %v9301_v36 = vpop.permute.xlu0 %2346 }
 0x7b8   : > { %3217 = vst [vmem:[#allocation1 + $0x3] ss:$9 sm:$0xff] %v1852_v9  ;;  %v12459_v9 = vld [vmem:[#allocation211_spill] sm:$0xff] }
 0x7b9   : > { %3219 = vst [vmem:[#allocation1 + $0x4] ss:$9 sm:$0xff] %v1859_v17  ;;  %v12462_v17 = vld [vmem:[#allocation212_spill] sm:$0xff] }
 0x7ba   : > { %3221 = vst [vmem:[#allocation1 + $0x5] ss:$9 sm:$0xff] %v1867_v40  ;;  %v12463_v40 = vld [vmem:[#allocation213_spill] sm:$0xff] }
 0x7bb   : > { %3223 = vst [vmem:[#allocation1 + $0x6] ss:$9 sm:$0xff] %v1875_v24  ;;  %v12464_v24 = vld [vmem:[#allocation11_spill] sm:$0xff] }
 0x7bc   : > { %3225 = vst [vmem:[#allocation1 + $0x7] ss:$9 sm:$0xff] %v1883_v48  ;;  %v9320_v48 = vpop.permute.xlu2 %2792 }
 0x7bf   : > { %v9315_v59 = vpop.permute.xlu0 %2352 }
 0x7c3   : > { %v9263_v47 = vld [vmem:[#allocation1] sm:$0xff] }
 0x7c4   : > { %3229 = vst [vmem:[#allocation1] ss:$9 sm:$0xff] %v1890_v6  ;;  %v9328_v6 = vpop.permute.xlu1 %2497 }
 0x7c5   : > { %3231 = vst [vmem:[#allocation1 + $0x1] ss:$9 sm:$0xff] %v1898_v8  ;;  %v12470_v8 = vld [vmem:[#allocation218_spill] sm:$0xff] }
 0x7cc   : > { %v9265_v52 = vld [vmem:[#allocation1] sm:$0xff] }
 0x7cd   : > { %3258 = vst [vmem:[#allocation1] ss:$9 sm:$0xff] %v12435_v56  ;;  %v12471_v56 = vld [vmem:[#allocation219_spill] sm:$0xff] }
 0x7ce   : > { %3260 = vst [vmem:[#allocation1 + $0x1] ss:$9 sm:$0xff] %v12436_v11  ;;  %v12472_v11 = vld [vmem:[#allocation29_spill] sm:$0xff] }
 0x7cf   : > { %3262 = vst [vmem:[#allocation1 + $0x2] ss:$9 sm:$0xff] %v12437_v16  ;;  %v9338_v16 = vpop.permute.xlu0 %2491 }
 0x7d0   : > { %3264 = vst [vmem:[#allocation1 + $0x3] ss:$9 sm:$0xff] %v12438_v21  ;;  %v9340_v21 = vpop.permute.xlu2 %2935 }
 0x7d1   : > { %3266 = vst [vmem:[#allocation1 + $0x4] ss:$9 sm:$0xff] %v12439_v62 }
 0x7d2   : > { %3268 = vst [vmem:[#allocation1 + $0x5] ss:$9 sm:$0xff] %v12440_v41  ;;  %v12473_v41 = vld [vmem:[#allocation220_spill] sm:$0xff] }
 0x7d3   : > { %3270 = vst [vmem:[#allocation1 + $0x6] ss:$9 sm:$0xff] %v12441_v32  ;;  %v9343_v32 = vpop.permute.xlu1 %2636 }
 0x7d4   : > { %3272 = vst [vmem:[#allocation1 + $0x7] ss:$9 sm:$0xff] %v12442_v37  ;;  %v12474_v37 = vld [vmem:[#allocation12_spill] sm:$0xff] }
 0x7db   : > { %v3273_v26 = vld [vmem:[#allocation1] sm:$0xff] }
 0x7dc   : > { %3379 = vrot.lane.b32.xlu1 %v3273_v26, %s6426_s23  ;;  %3275 = vst [vmem:[#allocation1] ss:$9 sm:$0xff] %v12443_v54  ;;  %v12475_v26 = vld [vmem:[#allocation221_spill] sm:$0xff]  ;;  %v12476_v54 = vld [vmem:[#allocation392_spill] sm:$0xff] }
 0x7dd   : > { %3276 = vst [vmem:[#allocation1 + $0x1] ss:$9 sm:$0xff] %v12444_v63  ;;  %v12479_v63 = vld [vmem:[#allocation224_spill] sm:$0xff] }
 0x7de   : > { %3277 = vst [vmem:[#allocation1 + $0x2] ss:$9 sm:$0xff] %v12445_v27  ;;  %v12480_v27 = vld [vmem:[#allocation225_spill] sm:$0xff] }
 0x7df   : > { %3278 = vst [vmem:[#allocation1 + $0x3] ss:$9 sm:$0xff] %v12446_v5  ;;  %v9355_v5 = vpop.permute.xlu0 %2493 }
 0x7e0   : > { %3279 = vst [vmem:[#allocation1 + $0x4] ss:$9 sm:$0xff] %v12447_v33  ;;  %v12481_v33 = vld [vmem:[#allocation226_spill] sm:$0xff] }
 0x7e1   : > { %3280 = vst [vmem:[#allocation1 + $0x5] ss:$9 sm:$0xff] %v12448_v43  ;;  %v9358_v43 = vpop.permute.xlu2 %2939 }
 0x7e2   : > { %3281 = vst [vmem:[#allocation1 + $0x6] ss:$9 sm:$0xff] %v12449_v2  ;;  %v12482_v2 = vld [vmem:[#allocation227_spill] sm:$0xff] }
 0x7e3   : > { %3282 = vst [vmem:[#allocation1 + $0x7] ss:$9 sm:$0xff] %v12450_v12  ;;  %v12483_v12 = vld [vmem:[#allocation20_spill] sm:$0xff] }
 0x7e4   : > { %2644 = vrot.lane.b32.xlu1 %v12451_v49, %s6421_s18  ;;  %v9365_v49 = vpop.permute.xlu1 %2638 }
 0x7ea   : > { %v3283_v53 = vld [vmem:[#allocation1] sm:$0xff] }
 0x7eb   : > { %3381 = vrot.lane.b32.xlu0 %v3283_v53, %s6426_s23  ;;  %3285 = vst [vmem:[#allocation1] ss:$9 sm:$0xff] %v12452_v7  ;;  %v12484_v53 = vld [vmem:[#allocation4_spill] sm:$0xff] }
 0x7ec   : > { %3286 = vst [vmem:[#allocation1 + $0x1] ss:$9 sm:$0xff] %v12453_v35  ;;  %3088 = vrot.lane.b32.xlu1 %v9017_v1, %s6424_s21  ;;  %v12461_v1 = vld [vmem:[#allocation383_spill] sm:$0xff]  ;;  %v12485_v35 = vld [vmem:[#allocation228_spill] sm:$0xff] }
 0x7ed   : > { %3287 = vst [vmem:[#allocation1 + $0x2] ss:$9 sm:$0xff] %v12454_v30  ;;  %v9370_v30 = vpop.permute.xlu0 %2499 }
 0x7ee   : > { %3288 = vst [vmem:[#allocation1 + $0x3] ss:$9 sm:$0xff] %v12455_v42  ;;  %v12486_v42 = vld [vmem:[#allocation229_spill] sm:$0xff] }
 0x7ef   : > { %3289 = vst [vmem:[#allocation1 + $0x4] ss:$9 sm:$0xff] %v12456_v19  ;;  %v9373_v19 = vpop.permute.xlu2 %3080 }
 0x7f0   : > { %3290 = vst [vmem:[#allocation1 + $0x5] ss:$9 sm:$0xff] %v12457_v57  ;;  %v12487_v57 = vld [vmem:[#allocation401_spill] sm:$0xff] }
 0x7f1   : > { %3291 = vst [vmem:[#allocation1 + $0x6] ss:$9 sm:$0xff] %v12458_v60  ;;  %v12489_v60 = vld [vmem:[#allocation231_spill] sm:$0xff] }
 0x7f2   : > { %3292 = vst [vmem:[#allocation1 + $0x7] ss:$9 sm:$0xff] %v12459_v9  ;;  %v12490_v9 = vld [vmem:[#allocation232_spill] sm:$0xff] }
 0x7f3   : > { %2943 = vrot.lane.b32.xlu0 %v12460_v50, %s6423_s20  ;;  %v12491_v50 = vld [vmem:[#allocation30_spill] sm:$0xff] }
 0x7f4   : > { %2356 = vrot.lane.b32.xlu1 %v12461_v1, %s6419_s16  ;;  %v12492_v1 = vld [vmem:[#allocation233_spill] sm:$0xff] }
 0x7f9   : > { %v3293_v45 = vld [vmem:[#allocation1] sm:$0xff] }
 0x7fa   : > { %3383 = vrot.lane.b32.xlu2 %v3293_v45, %s6426_s23  ;;  %3295 = vst [vmem:[#allocation1] ss:$9 sm:$0xff] %v12462_v17  ;;  %v9384_v45 = vpop.permute.xlu1 %2790  ;;  %v12493_v17 = vld [vmem:[#allocation234_spill] sm:$0xff] }
 0x7fb   : > { %3296 = vst [vmem:[#allocation1 + $0x1] ss:$9 sm:$0xff] %v12463_v40  ;;  %2646 = vrot.lane.b32.xlu0 %v12464_v24, %s6421_s18  ;;  %v12494_v40 = vld [vmem:[#allocation235_spill] sm:$0xff]  ;;  %v12495_v24 = vld [vmem:[#allocation21_spill] sm:$0xff] }
 0x7fc   : > { %3297 = vst [vmem:[#allocation1 + $0x2] ss:$9 sm:$0xff] %v12465_v38  ;;  %2800 = vrot.lane.b32.xlu1 %v12466_v28, %s6422_s19  ;;  %v9390_v38 = vpop.permute.xlu0 %2640  ;;  %v9394_v28 = vpop.permute.xlu2 %3086 }
 0x7fd   : > { %3298 = vst [vmem:[#allocation1 + $0x3] ss:$9 sm:$0xff] %v12467_v18  ;;  %v12496_v18 = vld [vmem:[#allocation13_spill] sm:$0xff] }
 0x7fe   : > { %3299 = vst [vmem:[#allocation1 + $0x4] ss:$9 sm:$0xff] %v12468_v23 }
 0x7ff   : > { %3300 = vst [vmem:[#allocation1 + $0x5] ss:$9 sm:$0xff] %v12469_v14  ;;  %v12497_v14 = vld [vmem:[#allocation236_spill] sm:$0xff] }
 0x800   : > { %3301 = vst [vmem:[#allocation1 + $0x6] ss:$9 sm:$0xff] %v12470_v8 }
 0x801   : > { %3302 = vst [vmem:[#allocation1 + $0x7] ss:$9 sm:$0xff] %v12471_v56  ;;  %v12498_v56 = vld [vmem:[#allocation237_spill] sm:$0xff] }
 0x802   : > { %2945 = vrot.lane.b32.xlu2 %v12472_v11, %s6423_s20  ;;  %v9399_v8 = vpop.permute.xlu1 %2794  ;;  %v12499_v11 = vld [vmem:[#allocation238_spill] sm:$0xff] }
 0x803   : > { %3090 = vrot.lane.b32.xlu0 %v9027_v39, %s6424_s21  ;;  %v12477_v39 = vld [vmem:[#allocation222_spill] sm:$0xff] }
 0x804   : > { %3244 = vrot.lane.b32.xlu1 %v9181_v15, %s6425_s22  ;;  %v12478_v15 = vld [vmem:[#allocation223_spill] sm:$0xff] }
 0x808   : > { %v3303_v62 = vld [vmem:[#allocation1] sm:$0xff] }
 0x809   : > { %3305 = vst [vmem:[#allocation1] ss:$9 sm:$0xff] %v12473_v41  ;;  %v12501_v41 = vld [vmem:[#allocation240_spill] sm:$0xff] }
 0x80a   : > { %2648 = vrot.lane.b32.xlu2 %v12474_v37, %s6421_s18  ;;  %3306 = vst [vmem:[#allocation1 + $0x1] ss:$9 sm:$0xff] %v12475_v26  ;;  %v12503_v37 = vld [vmem:[#allocation241_spill] sm:$0xff]  ;;  %v9411_v26 = vpop.permute.xlu0 %2796 }
 0x80b   : > { %2358 = vrot.lane.b32.xlu0 %v12476_v54, %s6419_s16  ;;  %3307 = vst [vmem:[#allocation1 + $0x2] ss:$9 sm:$0xff] %v12477_v39  ;;  %v12504_v54 = vld [vmem:[#allocation242_spill] sm:$0xff]  ;;  %v9414_v39 = vpop.permute.xlu2 %3236 }
 0x80c   : > { %3385 = vrot.lane.b32.xlu1 %v3303_v62, %s6426_s23  ;;  %3308 = vst [vmem:[#allocation1 + $0x3] ss:$9 sm:$0xff] %v12478_v15  ;;  %v12500_v62 = vld [vmem:[#allocation239_spill] sm:$0xff] }
 0x80d   : > { %3309 = vst [vmem:[#allocation1 + $0x4] ss:$9 sm:$0xff] %v12479_v63  ;;  %v12505_v15 = vld [vmem:[#allocation243_spill] sm:$0xff]  ;;  %v9417_v63 = vpop.permute.xlu1 %2941 }
 0x80e   : > { %3310 = vst [vmem:[#allocation1 + $0x5] ss:$9 sm:$0xff] %v12480_v27  ;;  %v6077_v27 = vld [vmem:[%s11149_s1 + $0x8] sm:$0xf] }
 0x80f   : > { %3311 = vst [vmem:[#allocation1 + $0x6] ss:$9 sm:$0xff] %v12481_v33  ;;  %v12506_v33 = vld [vmem:[#allocation31_spill] sm:$0xff] }
 0x810   : > { %3312 = vst [vmem:[#allocation1 + $0x7] ss:$9 sm:$0xff] %v12482_v2 }
 0x812   : > { %3092 = vrot.lane.b32.xlu2 %v9037_v25, %s6424_s21  ;;  %v12488_v25 = vld [vmem:[#allocation230_spill] sm:$0xff] }
 0x813   : > { %2802 = vrot.lane.b32.xlu0 %v12483_v12, %s6422_s19  ;;  %v6427_v12 = vmov 65535  }
 0x814   : > { %2503 = vrot.lane.b32.xlu1 %v12484_v53, %s6420_s17  ;;  %v3649_v53 = vsel %vm3647_vm0, 4294967295, %v6427_v12  ;;  %v12523_v12 = vld [vmem:[#allocation254_spill] sm:$0xff] }
 0x817   : > { %v3313_v7 = vld [vmem:[#allocation1] sm:$0xff] }
 0x818   : > { %3315 = vst [vmem:[#allocation1] ss:$9 sm:$0xff] %v12485_v35 }
 0x819   : > { %3316 = vst [vmem:[#allocation1 + $0x1] ss:$9 sm:$0xff] %v12486_v42 }
 0x81a   : > { %2360 = vrot.lane.b32.xlu2 %v12487_v57, %s6419_s16  ;;  %3317 = vst [vmem:[#allocation1 + $0x2] ss:$9 sm:$0xff] %v12488_v25  ;;  %v9432_v57 = vpop.permute.xlu2 %2798  ;;  %v12508_v25 = vld [vmem:[#allocation244_spill] sm:$0xff] }
 0x81b   : > { %3387 = vrot.lane.b32.xlu0 %v3313_v7, %s6426_s23  ;;  %3318 = vst [vmem:[#allocation1 + $0x3] ss:$9 sm:$0xff] %v12489_v60  ;;  %v12507_v7 = vld [vmem:[#allocation410_spill] sm:$0xff]  ;;  %v9435_v60 = vpop.permute.xlu0 %2937 }
 0x81c   : > { %3319 = vst [vmem:[#allocation1 + $0x4] ss:$9 sm:$0xff] %v12490_v9  ;;  %2947 = vrot.lane.b32.xlu1 %v12491_v50, %s6423_s20  ;;  %v12509_v9 = vld [vmem:[#allocation245_spill] sm:$0xff]  ;;  %v6249_v50 = vld [vmem:[%s11149_s1] sm:$0xff] }
 0x81d   : > { %3320 = vst [vmem:[#allocation1 + $0x5] ss:$9 sm:$0xff] %v12492_v1  ;;  %v12510_v1 = vld [vmem:[#allocation246_spill] sm:$0xff] }
 0x81e   : > { %3321 = vst [vmem:[#allocation1 + $0x6] ss:$9 sm:$0xff] %v12493_v17  ;;  %v12511_v17 = vld [vmem:[#allocation247_spill] sm:$0xff] }
 0x81f   : > { %3322 = vst [vmem:[#allocation1 + $0x7] ss:$9 sm:$0xff] %v12494_v40  ;;  %v12512_v40 = vld [vmem:[#allocation248_spill] sm:$0xff] }
 0x822   : > { %2804 = vrot.lane.b32.xlu2 %v12495_v24, %s6422_s19  ;;  %v12513_v24 = vld [vmem:[#allocation6_spill] sm:$0xff] }
 0x823   : > { %3246 = vrot.lane.b32.xlu0 %v9191_v3, %s6425_s22  ;;  %v12502_v3 = vld [vmem:[#allocation5_spill] sm:$0xff] }
 0x824   : > { %2650 = vrot.lane.b32.xlu1 %v12496_v18, %s6421_s18  ;;  %v12514_v18 = vld [vmem:[#allocation14_spill] sm:$0xff] }
 0x826   : > { %v3323_v23 = vld [vmem:[#allocation1] sm:$0xff] }
 0x827   : > { %3325 = vst [vmem:[#allocation1] ss:$9 sm:$0xff] %v12497_v14  ;;  %v12516_v14 = vld [vmem:[#allocation281_spill] sm:$0xff] }
 0x828   : > { %3326 = vst [vmem:[#allocation1 + $0x1] ss:$9 sm:$0xff] %v12498_v56  ;;  %v3405_v56 = vsel %vm11488_vm2, %v12516_v14, %v9301_v36  ;;  %v12519_v36 = vld [vmem:[#allocation32_spill] sm:$0xff]  ;;  %v12532_v14 = vld [vmem:[#allocation7_spill] sm:$0xff] }
 0x829   : > { %3327 = vst [vmem:[#allocation1 + $0x2] ss:$9 sm:$0xff] %v12499_v11  ;;  %v3083_v11 = vpop.permute.xlu1 %3082 }
 0x82a   : > { %3389 = vrot.lane.b32.xlu2 %v3323_v23, %s6426_s23  ;;  %3328 = vst [vmem:[#allocation1 + $0x3] ss:$9 sm:$0xff] %v12500_v62  ;;  %v12515_v23 = vld [vmem:[#allocation249_spill] sm:$0xff]  ;;  %v12517_v62 = vld [vmem:[#allocation250_spill] sm:$0xff] }
 0x82b   : > { %3329 = vst [vmem:[#allocation1 + $0x4] ss:$9 sm:$0xff] %v12501_v41  ;;  %2505 = vrot.lane.b32.xlu0 %v12502_v3, %s6420_s17  ;;  %v12518_v41 = vld [vmem:[#allocation251_spill] sm:$0xff]  ;;  %v3430_v3 = vsel %vm11487_vm3, %v3405_v56, %v9338_v16  ;;  %v12533_v56 = vld [vmem:[#allocation260_spill] sm:$0xff] }
 0x82c   : > { %3330 = vst [vmem:[#allocation1 + $0x5] ss:$9 sm:$0xff] %v12503_v37  ;;  %3094 = vrot.lane.b32.xlu1 %v9047_v61, %s6424_s21  ;;  %v6250_v61 = vld [vmem:[%s11149_s1 + $0x8] sm:$0x30]  ;;  %v9457_v37 = vpop.permute.xlu2 %3242 }
 0x82d   : > { %3331 = vst [vmem:[#allocation1 + $0x6] ss:$9 sm:$0xff] %v12504_v54  ;;  %v6078_v2 = vor.u32 %v6250_v61, %v6077_v27  ;;  %v9459_v54 = vpop.permute.xlu0 %3084  ;;  %v12520_v27 = vld [vmem:[#allocation22_spill] sm:$0xff] }
 0x82e   : > { %3332 = vst [vmem:[#allocation1 + $0x7] ss:$9 sm:$0xff] %v12505_v15  ;;  %v3455_v15 = vsel %vm11489_vm7, %v3430_v3, %v9343_v32  ;;  %v12522_v32 = vld [vmem:[#allocation253_spill] sm:$0xff]  ;;  %v12536_v3 = vld [vmem:[#allocation264_spill] sm:$0xff] }
 0x82f   : > { %v3480_v16 = vsel %vm11490_vm8, %v3455_v15, %v9384_v45  ;;  %v12526_v45 = vld [vmem:[#allocation257_spill] sm:$0xff] }
 0x832   : > { %3248 = vrot.lane.b32.xlu2 %v9201_v34, %s6425_s22  ;;  %v3650_v34 = vsel %vm3648_vm1, %v3649_v53, 0  ;;  %v3505_v53 = vsel %vm11492_vm9, %v3480_v16, %v9340_v21  ;;  %v12528_v21 = vld [vmem:[#allocation258_spill] sm:$0xff]  ;;  %v12540_v16 = vld [vmem:[#allocation23_spill] sm:$0xff] }
 0x833   : > { %2949 = vrot.lane.b32.xlu0 %v12506_v33, %s6423_s20  ;;  %v3652_v42 = vand.u32 %v6078_v2, %v3650_v34  ;;  %v12521_v33 = vld [vmem:[#allocation252_spill] sm:$0xff]  ;;  %v9472_v2 = vpop.permute.xlu1 %3238 }
 0x834   : > { %2362 = vrot.lane.b32.xlu1 %v12507_v7, %s6419_s16  ;;  %v12525_v7 = vld [vmem:[#allocation256_spill] sm:$0xff]  ;;  %v9480_v34 = vpop.permute.xlu2 %2501 }
 0x835   : > { %v3333_v35 = vld [vmem:[#allocation1] sm:$0xff]  ;;  %3660 = vmatpush.bf16.msra.mxu0 %v3652_v42  ;;  %v3530_v42 = vsel %vm3528_vm10, %v3505_v53, %v9373_v19  ;;  %v12543_v53 = vld [vmem:[#allocation33_spill] sm:$0xff] }
 0x836   : > { %3335 = vst [vmem:[#allocation1] ss:$9 sm:$0xff] %v12508_v25  ;;  %v3235_v25 = vpop.permute.xlu0 %3234 }
 0x837   : > { %3336 = vst [vmem:[#allocation1 + $0x1] ss:$9 sm:$0xff] %v12509_v9  ;;  %v12529_v9 = vld [vmem:[#allocation282_spill] sm:$0xff] }
 0x838   : > { %3337 = vst [vmem:[#allocation1 + $0x2] ss:$9 sm:$0xff] %v12510_v1  ;;  %v12530_v1 = vld [vmem:[#allocation259_spill] sm:$0xff] }
 0x839   : > { %3338 = vst [vmem:[#allocation1 + $0x3] ss:$9 sm:$0xff] %v12511_v17  ;;  %3661 = vmatpush.bf16.msra.mxu0 %v6249_v50  ;;  %v3407_v50 = vsel %vm11488_vm2, %v12529_v9, %v9274_v31  ;;  %v3555_v17 = vsel %vm3553_vm11, %v3530_v42, %v3235_v25  ;;  %v12544_v25 = vld [vmem:[#allocation425_spill] sm:$0xff]  ;;  %v12547_v9 = vld [vmem:[#allocation272_spill] sm:$0xff] }
 0x83a   : > { %3339 = vst [vmem:[#allocation1 + $0x4] ss:$9 sm:$0xff] %v12512_v40  ;;  %2507 = vrot.lane.b32.xlu2 %v12513_v24, %s6420_s17  ;;  %v3432_v19 = vsel %vm11487_vm3, %v3407_v50, %v9355_v5 }
 0x83b   : > { %2652 = vrot.lane.b32.xlu0 %v12514_v18, %s6421_s18  ;;  %3340 = vst [vmem:[#allocation1 + $0x5] ss:$9 sm:$0xff] %v12515_v23  ;;  %v3457_v31 = vsel %vm11489_vm7, %v3432_v19, %v9365_v49  ;;  %v12550_v19 = vld [vmem:[#allocation275_spill] sm:$0xff] }
 0x83c   : > { %3391 = vrot.lane.b32.xlu1 %v3333_v35, %s6426_s23  ;;  %3341 = vst [vmem:[#allocation1 + $0x6] ss:$9 sm:$0xff] %v12517_v62  ;;  %v12527_v35 = vld [vmem:[#allocation15_spill] sm:$0xff]  ;;  %v3482_v5 = vsel %vm11490_vm8, %v3457_v31, %v9320_v48  ;;  %v12552_v31 = vld [vmem:[#allocation277_spill] sm:$0xff] }
 0x83d   : > { %3342 = vst [vmem:[#allocation1 + $0x7] ss:$9 sm:$0xff] %v12518_v41  ;;  %v12534_v41 = vld [vmem:[#allocation261_spill] sm:$0xff]  ;;  %v3507_v15 = vsel %vm11492_vm9, %v3482_v5, %v9435_v60  ;;  %v12539_v48 = vld [vmem:[#allocation267_spill] sm:$0xff] }
 0x83e   : > { %v9511_v62 = vpop.permute.xlu0 %3240 }
 0x842   : > { %2951 = vrot.lane.b32.xlu2 %v12519_v36, %s6423_s20  ;;  %v12537_v36 = vld [vmem:[#allocation265_spill] sm:$0xff] }
 0x843   : > { %3096 = vrot.lane.b32.xlu0 %v9057_v46, %s6424_s21  ;;  %v12524_v46 = vld [vmem:[#allocation255_spill] sm:$0xff] }
 0x844   : > { %2806 = vrot.lane.b32.xlu1 %v12520_v27, %s6422_s19  ;;  %v3343_v61 = vld [vmem:[#allocation1] sm:$0xff]  ;;  %v12538_v27 = vld [vmem:[#allocation266_spill] sm:$0xff] }
 0x845   : > { %3345 = vst [vmem:[#allocation1] ss:$9 sm:$0xff] %v12521_v33  ;;  %v12541_v33 = vld [vmem:[#allocation269_spill] sm:$0xff] }
 0x846   : > { %3346 = vst [vmem:[#allocation1 + $0x1] ss:$9 sm:$0xff] %v12522_v32  ;;  %v12542_v32 = vld [vmem:[#allocation283_spill] sm:$0xff] }
 0x847   : > { %3347 = vst [vmem:[#allocation1 + $0x2] ss:$9 sm:$0xff] %v12523_v12  ;;  %v3409_v12 = vsel %vm11488_vm2, %v12542_v32, %v9311_v58 }
 0x848   : > { %3348 = vst [vmem:[#allocation1 + $0x3] ss:$9 sm:$0xff] %v12524_v46 }
 0x849   : > { %3349 = vst [vmem:[#allocation1 + $0x4] ss:$9 sm:$0xff] %v12525_v7 }
 0x84a   : > { %3350 = vst [vmem:[#allocation1 + $0x5] ss:$9 sm:$0xff] %v12526_v45  ;;  %2654 = vrot.lane.b32.xlu2 %v12527_v35, %s6421_s18 }
 0x84b   : > { %3393 = vrot.lane.b32.xlu0 %v3343_v61, %s6426_s23  ;;  %3351 = vst [vmem:[#allocation1 + $0x6] ss:$9 sm:$0xff] %v12528_v21  ;;  %v3532_v61 = vsel %vm3528_vm10, %v3507_v15, %v3083_v11  ;;  %v3434_v11 = vsel %vm11487_vm3, %v3409_v12, %v9290_v44  ;;  %v12546_v44 = vld [vmem:[#allocation16_spill] sm:$0xff] }
 0x84c   : > { %3352 = vst [vmem:[#allocation1 + $0x7] ss:$9 sm:$0xff] %v12530_v1  ;;  %3250 = vrot.lane.b32.xlu1 %v9211_v0, %s6425_s22  ;;  %v12531_v0 = vld [vmem:[#allocation418_spill] sm:$0xff]  ;;  %v3557_v7 = vsel %vm3553_vm11, %v3532_v61, %v9414_v39  ;;  %v3459_v58 = vsel %vm11489_vm7, %v3434_v11, %v9390_v38  ;;  %v12548_v1 = vld [vmem:[#allocation273_spill] sm:$0xff] }
 0x84d   : > { %v12545_v39 = vld [vmem:[#allocation270_spill] sm:$0xff]  ;;  %v3484_v50 = vsel %vm11490_vm8, %v3459_v58, %v9399_v8 }
 0x84e   : > { %v3380_v40 = vpop.permute.xlu1 %3379 }
 0x84f   : > { %v3580_v24 = vsel %vm3578_vm13, %v3555_v17, %v3380_v40  ;;  %v12549_v40 = vld [vmem:[#allocation274_spill] sm:$0xff] }
 0x850   : > { %6079 = vmatmul.msk.bf16.vlgmr.msra.gmra.mxu0 %vm3622_vm12, %v3580_v24  ;;  %v12551_v24 = vld [vmem:[#allocation276_spill] sm:$0xff] }
 0x852   : > { %3098 = vrot.lane.b32.xlu2 %v9085_v20, %s6424_s21  ;;  %v12535_v20 = vld [vmem:[#allocation262_spill] sm:$0xff] }
 0x853   : > { %2364 = vrot.lane.b32.xlu0 %v12531_v0, %s6419_s16  ;;  %v3353_v18 = vld [vmem:[#allocation1] sm:$0xff]  ;;  %v12553_v0 = vld [vmem:[#allocation278_spill] sm:$0xff] }
 0x854   : > { %v3384_v23 = vpop.permute.xlu2 %3383  ;;  %2509 = vrot.lane.b32.xlu1 %v12532_v14, %s6420_s17  ;;  %3355 = vst [vmem:[#allocation1] ss:$9 sm:$0xff] %v12533_v56  ;;  %v12555_v14 = vld [vmem:[#allocation8_spill] sm:$0xff]  ;;  %v12556_v56 = vld [vmem:[#allocation289_spill] sm:$0xff] }
 0x855   : > { %3356 = vst [vmem:[#allocation1 + $0x1] ss:$9 sm:$0xff] %v12534_v41  ;;  %v3411_v5 = vsel %vm11488_vm2, %v12556_v56, %v9315_v59 }
 0x856   : > { %v9514_v49 = vpop.permute.xlu1 %2644  ;;  %3357 = vst [vmem:[#allocation1 + $0x2] ss:$9 sm:$0xff] %v12535_v20  ;;  %v3436_v15 = vsel %vm11487_vm3, %v3411_v5, %v9328_v6 }
 0x857   : > { %3358 = vst [vmem:[#allocation1 + $0x3] ss:$9 sm:$0xff] %v12536_v3  ;;  %v3461_v59 = vsel %vm11489_vm7, %v3436_v15, %v9304_v4 }
 0x858   : > { %3359 = vst [vmem:[#allocation1 + $0x4] ss:$9 sm:$0xff] %v12537_v36  ;;  %v3486_v6 = vsel %vm11490_vm8, %v3461_v59, %v9411_v26  ;;  %v12566_v59 = vld [vmem:[#allocation325_spill] sm:$0xff] }
 0x859   : > { %3360 = vst [vmem:[#allocation1 + $0x5] ss:$9 sm:$0xff] %v12538_v27  ;;  %v12557_v27 = vld [vmem:[#allocation279_spill] sm:$0xff]  ;;  %v3511_v61 = vsel %vm11492_vm9, %v3486_v6, %v9417_v63 }
 0x85a   : > { %3395 = vrot.lane.b32.xlu2 %v3353_v18, %s6426_s23  ;;  %3361 = vst [vmem:[#allocation1 + $0x6] ss:$9 sm:$0xff] %v12539_v48  ;;  %v12554_v18 = vld [vmem:[#allocation26_spill] sm:$0xff]  ;;  %v12561_v63 = vld [vmem:[#allocation299_spill] sm:$0xff] }
 0x85b   : > { %2808 = vrot.lane.b32.xlu0 %v12540_v16, %s6422_s19  ;;  %3362 = vst [vmem:[#allocation1 + $0x7] ss:$9 sm:$0xff] %v12541_v33  ;;  %v3413_v12 = vsel %vm11488_vm2, %v12561_v63, %v9280_v13 }
 0x85c   : > { %v9531_v60 = vpop.permute.xlu2 %2945  ;;  %2953 = vrot.lane.b32.xlu1 %v12543_v53, %s6423_s20 }
 0x85d   : > { %v3382_v46 = vpop.permute.xlu0 %3381 }
 0x85e   : > { %v9537_v45 = vpop.permute.xlu1 %3088  ;;  %v3582_v35 = vsel %vm3578_vm13, %v3557_v7, %v3382_v46  ;;  %v12562_v46 = vld [vmem:[#allocation17_spill] sm:$0xff]  ;;  %v12563_v7 = vld [vmem:[#allocation27_spill] sm:$0xff] }
 0x860   : > { %6080 = vmatmul.msk.bf16.gmra.mxu0 %vm3622_vm12, %v3582_v35 }
 0x862   : > { %v3363_v42 = vld [vmem:[#allocation1] sm:$0xff]  ;;  %2366 = vrot.lane.b32.xlu2 %v12544_v25, %s6419_s16  ;;  %v12564_v25 = vld [vmem:[#allocation308_spill] sm:$0xff] }
 0x863   : > { %3252 = vrot.lane.b32.xlu0 %v9237_v51, %s6425_s22  ;;  %3365 = vst [vmem:[#allocation1] ss:$9 sm:$0xff] %v12545_v39  ;;  %v3509_v51 = vsel %vm11492_vm9, %v3484_v50, %v9358_v43 }
 0x864   : > { %v9550_v21 = vpop.permute.xlu2 %2648  ;;  %2656 = vrot.lane.b32.xlu1 %v12546_v44, %s6421_s18  ;;  %3366 = vst [vmem:[#allocation1 + $0x1] ss:$9 sm:$0xff] %v12547_v9  ;;  %v3534_v8 = vsel %vm3528_vm10, %v3509_v51, %v9459_v54 }
 0x865   : > { %v2944_v38 = vpop.permute.xlu0 %2943  ;;  %3367 = vst [vmem:[#allocation1 + $0x2] ss:$9 sm:$0xff] %v12548_v1  ;;  %v3559_v20 = vsel %vm3553_vm11, %v3534_v8, %v9472_v2  ;;  %v12558_v2 = vld [vmem:[#allocation280_spill] sm:$0xff] }
 0x866   : > { %v2357_v17 = vpop.permute.xlu1 %2356  ;;  %3368 = vst [vmem:[#allocation1 + $0x3] ss:$9 sm:$0xff] %v12549_v40  ;;  %v3584_v54 = vsel %vm3578_vm13, %v3559_v20, %v3384_v23 }
 0x867   : > { %3369 = vst [vmem:[#allocation1 + $0x4] ss:$9 sm:$0xff] %v12550_v19  ;;  %v3415_v39 = vsel %vm11488_vm2, %v12564_v25, %v2357_v17 }
 0x868   : > { %3370 = vst [vmem:[#allocation1 + $0x5] ss:$9 sm:$0xff] %v12551_v24 }
 0x869   : > { %3371 = vst [vmem:[#allocation1 + $0x6] ss:$9 sm:$0xff] %v12552_v31 }
 0x86a   : > { %3372 = vst [vmem:[#allocation1 + $0x7] ss:$9 sm:$0xff] %v12553_v0  ;;  %2810 = vrot.lane.b32.xlu2 %v12554_v18, %s6422_s19 }
 0x86b   : > { %2511 = vrot.lane.b32.xlu0 %v12555_v14, %s6420_s17 }
 0x86c   : > { %v9574_v43 = vpop.permute.xlu2 %3092  ;;  %3397 = vrot.lane.b32.xlu1 %v3363_v42, %s6426_s23 }
 0x86d   : > { %v2647_v41 = vpop.permute.xlu0 %2646 }
 0x86e   : > { %v2801_v3 = vpop.permute.xlu1 %2800 }
 0x870   : > { %6081 = vmatmul.msk.bf16.gmra.mxu0 %vm3622_vm12, %v3584_v54 }
 0x871   : > { %v3373_v36 = vld [vmem:[#allocation1] sm:$0xff] }
 0x872   : > { %3375 = vst [vmem:[#allocation1] ss:$9 sm:$0xff] %v12557_v27  ;;  %3254 = vrot.lane.b32.xlu2 %v9263_v47, %s6425_s22  ;;  %v12559_v47 = vld [vmem:[#allocation9_spill] sm:$0xff] }
 0x873   : > { %2955 = vrot.lane.b32.xlu0 %v8967_v55, %s6423_s20  ;;  %3376 = vst [vmem:[#allocation1 + $0x1] ss:$9 sm:$0xff] %v12558_v2  ;;  %v3536_v55 = vsel %vm3528_vm10, %v3511_v61, %v9394_v28  ;;  %v3438_v28 = vsel %vm11487_vm3, %v3413_v12, %v9370_v30 }
 0x874   : > { %3100 = vrot.lane.b32.xlu1 %v9118_v29, %s6424_s21  ;;  %v9595_v48 = vpop.permute.xlu2 %2360  ;;  %v12560_v29 = vld [vmem:[#allocation426_spill] sm:$0xff]  ;;  %v3561_v26 = vsel %vm3553_vm11, %v3536_v55, %v9511_v62  ;;  %v3463_v62 = vsel %vm11489_vm7, %v3438_v28, %v9514_v49  ;;  %v3745_v28 = vlaneseq }
 0x875   : > { %v3091_v23 = vpop.permute.xlu0 %3090  ;;  %v3488_v35 = vsel %vm11490_vm8, %v3463_v62, %v9432_v57 }
 0x876   : > { %v3245_v4 = vpop.permute.xlu1 %3244 }
 0x87a   : > { %2513 = vrot.lane.b32.xlu2 %v12559_v47, %s6420_s17  ;;  %v3377_v58 = vld [vmem:[#allocation1] sm:$0xff] }
 0x87b   : > { %3399 = vrot.lane.b32.xlu0 %v3373_v36, %s6426_s23 }
 0x87c   : > { %2368 = vrot.lane.b32.xlu1 %v12560_v29, %s6419_s16  ;;  %v2805_v53 = vpop.permute.xlu2 %2804  ;;  %v12569_v29 = vld [vmem:[#allocation335_spill] sm:$0xff] }
 0x87d   : > { %v2359_v16 = vpop.permute.xlu0 %2358 }
 0x87e   : > { %v3386_v33 = vpop.permute.xlu1 %3385 }
 0x87f   : > { %v3586_v32 = vsel %vm3578_vm13, %v3561_v26, %v3386_v33 }
 0x880   : > { %6082 = vmatmul.msk.bf16.gmra.mxu0 %vm3622_vm12, %v3586_v32 }
 0x882   : > { %2957 = vrot.lane.b32.xlu2 %v8971_v22, %s6423_s20  ;;  %v3513_v22 = vsel %vm11492_vm9, %v3488_v35, %v2944_v38  ;;  %s6429_s20 = smov 32  }
 0x883   : > { %2658 = vrot.lane.b32.xlu0 %v12562_v46, %s6421_s18  ;;  %v3538_v30 = vsel %vm3528_vm10, %v3513_v22, %v9537_v45  ;;  %v3440_v45 = vsel %vm11487_vm3, %v3415_v39, %v9480_v34  ;;  %v12565_v34 = vld [vmem:[#allocation317_spill] sm:$0xff] }
 0x884   : > { %2812 = vrot.lane.b32.xlu1 %v12563_v7, %s6422_s19  ;;  %v3390_v42 = vpop.permute.xlu2 %3389  ;;  %v3563_v44 = vsel %vm3553_vm11, %v3538_v30, %v9457_v37  ;;  %v3417_v0 = vsel %vm11488_vm2, %v12565_v34, %v2359_v16  ;;  %s6428_s19 = smov 64  }
 0x885   : > { %v2803_v11 = vpop.permute.xlu0 %2802 }
 0x886   : > { %v2504_v13 = vpop.permute.xlu1 %2503 }
 0x887   : > { %v3442_v18 = vsel %vm11487_vm3, %v3417_v0, %v2504_v13  ;;  %v9695_v13 = vshrl.u32 %v3745_v28, 7 }
 0x888   : > { %v3467_v8 = vsel %vm11489_vm7, %v3442_v18, %v9550_v21  ;;  %v3419_v21 = vsel %vm11488_vm2, %v12566_v59, %v9595_v48 }
 0x889   : > { %v3492_v5 = vsel %vm11490_vm8, %v3467_v8, %v2803_v11  ;;  %vm3749_vm14 = vcmp.ge.s32.totalorder %v9695_v13, 1  ;;  %v9727_v18 = vadd.s32 16, %v9695_v13 }
 0x88a   : > { %3401 = vrot.lane.b32.xlu2 %v3377_v58, %s6426_s23  ;;  %v9700_v58 = vld [vmem:[%s11150_s2] ss:$0 sm:$0xff]  ;;  %s9857_s23 = scalar_select %p3864_p4, 0, 1 }
 0x88b   : > { %3102 = vrot.lane.b32.xlu0 %v9122_v10, %s6424_s21  ;;  %v3465_v10 = vsel %vm11489_vm7, %v3440_v45, %v2647_v41  ;;  %s6091_s21 = scalar_select %p3761_p9, 0, 1  ;;  %vm3754_vm6 = vcmp.le.s32.totalorder %v9727_v18, 16 }
 0x88c   : > { %3256 = vrot.lane.b32.xlu1 %v9265_v52, %s6425_s22  ;;  %v3249_v50 = vpop.permute.xlu2 %3248  ;;  %v3490_v52 = vsel %vm11490_vm8, %v3465_v10, %v2801_v3  ;;  %p10172_p4 = scmp.lt.s32.totalorder %s4038_s8, 16 }
 0x88d   : > { %v3388_v49 = vpop.permute.xlu0 %3387  ;;  %v3515_v17 = vsel %vm11492_vm9, %v3490_v52, %v9531_v60  ;;  %v3764_v35 = vstv %s6091_s21 }
 0x88e   : > { %v2948_v57 = vpop.permute.xlu1 %2947  ;;  %v3588_v9 = vsel %vm3578_vm13, %v3563_v44, %v3388_v49  ;;  %v3540_v40 = vsel %vm3528_vm10, %v3515_v17, %v3091_v23  ;;  %vm9705_vm15 = vcmp.eq.s32.totalorder %v3764_v35, 1  ;;  %p4041_p5 = pnand %p10172_p4, %p10168_p3 }
 0x88f   : > { %v3565_v37 = vsel %vm3553_vm11, %v3540_v40, %v3245_v4  ;;  %v3517_v41 = vsel %vm11492_vm9, %v3492_v5, %v2948_v57  ;;  %v12572_v57 = vld [vmem:[#allocation344_spill] sm:$0xff]  ;;  %vm3766_vm4 = vmand %vm9705_vm15, %vm3749_vm14 }
 0x890   : > { %6083 = vmatmul.msk.bf16.gmra.mxu0 %vm3622_vm12, %v3588_v9  ;;  %v3590_v31 = vsel %vm3578_vm13, %v3565_v37, %v3390_v42  ;;  %v3542_v20 = vsel %vm3528_vm10, %v3517_v41, %v9574_v43  ;;  %vm3768_vm0 = vmand %vm9705_vm15, %vm3754_vm6  ;;  %s10225_s11 = scalar_select %p4041_p5, 0, 1 }
 0x894   : > { %v2508_v19 = vpop.permute.xlu2 %2507 }
 0x895   : > { %v3247_v38 = vpop.permute.xlu0 %3246 }
 0x896   : > { %v2651_v1 = vpop.permute.xlu1 %2650  ;;  %v3567_v15 = vsel %vm3553_vm11, %v3542_v20, %v3247_v38 }
 0x89c   : > { %v2952_v56 = vpop.permute.xlu2 %2951 }
 0x89d   : > { %v2506_v51 = vpop.permute.xlu0 %2505 }
 0x89e   : > { %v3095_v24 = vpop.permute.xlu1 %3094  ;;  %v3444_v2 = vsel %vm11487_vm3, %v3419_v21, %v2506_v51 }
 0x89f   : > { %v3469_v6 = vsel %vm11489_vm7, %v3444_v2, %v2651_v1 }
 0x8a0   : > { %6084 = vmatmul.msk.bf16.gmra.mxu0 %vm3622_vm12, %v3590_v31  ;;  %v3494_v43 = vsel %vm11490_vm8, %v3469_v6, %v2805_v53 }
 0x8a4   : > { %v2655_v27 = vpop.permute.xlu2 %2654 }
 0x8a5   : > { %v2950_v60 = vpop.permute.xlu0 %2949 }
 0x8a6   : > { %v2363_v14 = vpop.permute.xlu1 %2362  ;;  %v3519_v61 = vsel %vm11492_vm9, %v3494_v43, %v2950_v60  ;;  %v9751_v43 = vstv %s6092_s9  ;;  %s6430_s9 = smov 96  }
 0x8a7   : > { %v3544_v48 = vsel %vm3528_vm10, %v3519_v61, %v3095_v24  ;;  %v3421_v16 = vsel %vm11488_vm2, %v12569_v29, %v2363_v14 }
 0x8a8   : > { %v3569_v33 = vsel %vm3553_vm11, %v3544_v48, %v3249_v50  ;;  %v3446_v63 = vsel %vm11487_vm3, %v3421_v16, %v2508_v19 }
 0x8ac   : > { %v3099_v47 = vpop.permute.xlu2 %3098 }
 0x8ad   : > { %v2653_v3 = vpop.permute.xlu0 %2652 }
 0x8ae   : > { %v3392_v54 = vpop.permute.xlu1 %3391  ;;  %v3471_v12 = vsel %vm11489_vm7, %v3446_v63, %v2653_v3  ;;  %v12574_v3 = vld [vmem:[#allocation351_spill] sm:$0xff] }
 0x8af   : > { %v3592_v36 = vsel %vm3578_vm13, %v3567_v15, %v3392_v54 }
 0x8b0   : > { %6085 = vmatmul.msk.bf16.gmra.mxu0 %vm3622_vm12, %v3592_v36 }
 0x8b4   : > { %v3396_v53 = vpop.permute.xlu2 %3395 }
 0x8b5   : > { %v3097_v23 = vpop.permute.xlu0 %3096 }
 0x8b6   : > { %v2807_v4 = vpop.permute.xlu1 %2806 }
 0x8b7   : > { %v3496_v46 = vsel %vm11490_vm8, %v3471_v12, %v2807_v4 }
 0x8b8   : > { %v3521_v11 = vsel %vm11492_vm9, %v3496_v46, %v2952_v56 }
 0x8b9   : > { %v3546_v22 = vsel %vm3528_vm10, %v3521_v11, %v3097_v23 }
 0x8bc   : > { %v2367_v49 = vpop.permute.xlu2 %2366 }
 0x8bd   : > { %v3394_v55 = vpop.permute.xlu0 %3393  ;;  %v3425_v15 = vsel %vm11488_vm2, %v12574_v3, %v2367_v49  ;;  %v12581_v3 = vld [vmem:[#allocation353_spill] sm:$0xff] }
 0x8be   : > { %v3251_v26 = vpop.permute.xlu1 %3250  ;;  %v3594_v32 = vsel %vm3578_vm13, %v3569_v33, %v3394_v55 }
 0x8bf   : > { %v3571_v42 = vsel %vm3553_vm11, %v3546_v22, %v3251_v26 }
 0x8c0   : > { %6086 = vmatmul.msk.bf16.gmra.mxu0 %vm3622_vm12, %v3594_v32  ;;  %v3596_v50 = vsel %vm3578_vm13, %v3571_v42, %v3396_v53 }
 0x8c4   : > { %v2811_v24 = vpop.permute.xlu2 %2810 }
 0x8c5   : > { %v2365_v62 = vpop.permute.xlu0 %2364 }
 0x8c6   : > { %v2510_v7 = vpop.permute.xlu1 %2509  ;;  %v3423_v44 = vsel %vm11488_vm2, %v12572_v57, %v2365_v62  ;;  %vm4133_vm2 = vsmask.f32 3328 }
 0x8c7   : > { %v3448_v52 = vsel %vm11487_vm3, %v3423_v44, %v2510_v7 }
 0x8c8   : > { %v3473_v17 = vsel %vm11489_vm7, %v3448_v52, %v2655_v27 }
 0x8cc   : > { %v3255_v59 = vpop.permute.xlu2 %3254 }
 0x8cd   : > { %v2809_v25 = vpop.permute.xlu0 %2808  ;;  %v3663_v39 = vpop.f32.mrf.mxu0 }
 0x8ce   : > { %v3664_v9 = vadd.f32 %v9700_v58, %v3663_v39  ;;  %v2954_v45 = vpop.permute.xlu1 %2953  ;;  %v3498_v31 = vsel %vm11490_vm8, %v3473_v17, %v2809_v25 }
 0x8cf   : > { %v3523_v34 = vsel %vm11492_vm9, %v3498_v31, %v2954_v45 }
 0x8d0   : > { %v3722_v10 = vmax.f32 %v3664_v9, 0.0  ;;  %6087 = vmatmul.msk.bf16.gmra.mxu0 %vm3622_vm12, %v3596_v50  ;;  %v3548_v60 = vsel %vm3528_vm10, %v3523_v34, %v3099_v47 }
 0x8d2   : > { %v3775_v38 = vsel %vm3766_vm4, %v3722_v10, 0.0  ;;  %vm11491_vm4 = vcmask 253952  }
 0x8d3   : > { %v3778_v1 = vpack.c.bf16 %v3775_v38, %v3775_v38 }
 0x8d4   : > { %v2514_v35 = vpop.permute.xlu2 %2513 }
 0x8d5   : > { %3782 = vst.msk [vmem:[#allocation2] sm:$0xf] %vm3781_vm5, %v3778_v1  ;;  %v3253_v40 = vpop.permute.xlu0 %3252  ;;  %v3665_v37 = vpop.f32.mrf.mxu0 }
 0x8d6   : > { %v3666_v19 = vadd.f32 %v9700_v58, %v3665_v37  ;;  %v2657_v51 = vpop.permute.xlu1 %2656  ;;  %v3573_v20 = vsel %vm3553_vm11, %v3548_v60, %v3253_v40 }
 0x8d8   : > { %v3723_v0 = vmax.f32 %v3666_v19, 0.0 }
 0x8da   : > { %v3776_v8 = vsel %vm9705_vm15, %v3723_v0, 0.0  ;;  %vm3792_vm15 = vcmp.eq.s32.totalorder %v9751_v43, 1 }
 0x8db   : > { %v3779_v14 = vpack.c.bf16 %v3776_v8, %v3776_v8 }
 0x8dc   : > { %v4103_v56 = vld [vmem:[#allocation2] sm:$0xf] }
 0x8dd   : > { %3783 = vst.msk [vmem:[#allocation2 + $0x4] sm:$0xf] %vm3781_vm5, %v3779_v14  ;;  %v2512_v5 = vpop.permute.xlu0 %2511  ;;  %v3668_v41 = vpop.f32.mrf.mxu0  ;;  %v4137_v27 = vshrl.u32 %v4103_v56, 16  ;;  %v4140_v2 = vshll.u32 %v4103_v56, 16  ;;  %v6101_v57 = vrot.slane %v4103_v56, 9 }
 0x8de   : > { %v3669_v54 = vadd.f32 %v9700_v58, %v3668_v41  ;;  %v3398_v36 = vpop.permute.xlu1 %3397  ;;  %v3450_v23 = vsel %vm11487_vm3, %v3425_v15, %v2512_v5  ;;  %vm4353_vm3 = vcmask 1046532  }
 0x8df   : > { %v3598_v21 = vsel %vm3578_vm13, %v3573_v20, %v3398_v36  ;;  %v4139_v47 = vrot.slane %v4137_v27, 4  ;;  %v4142_v48 = vrot.slane %v4140_v2, 5  ;;  %v3475_v55 = vsel %vm11489_vm7, %v3450_v23, %v2657_v51  ;;  %v2958_v2 = vpop.permute.xlu2 %2957 }
 0x8e0   : > { %v3724_v6 = vmax.f32 %v3669_v54, 0.0  ;;  %6088 = vmatmul.msk.bf16.gmra.mxu0 %vm3622_vm12, %v3598_v21  ;;  %v3500_v53 = vsel %vm11490_vm8, %v3475_v55, %v2811_v24  ;;  %vm4134_vm7 = vsmask.f32 7440 }
 0x8e1   : > { %v4143_v46 = vor.u32 %v4142_v48, %v4139_v47 }
 0x8e2   : > { %v3777_v4 = vsel %vm3768_vm0, %v3724_v6, 0.0  ;;  %vm4352_vm0 = vcmask 1042432   ;;  %v3805_v25 = vrot.slane %v3724_v6, 2  ;;  %v3829_v6 = vstv %s9803_s13  ;;  %s3926_s13 = sadd.s32 4, %s9668_s14 }
 0x8e3   : > { %v3780_v61 = vpack.c.bf16 %v3777_v4, %v3777_v4  ;;  %vm9770_vm8 = vmor %vm4352_vm0, %vm4353_vm3  ;;  %v4144_v38 = vrot.slane %v4143_v46, 4  ;;  %vm12582_vm3 = vcmask 23552   ;;  %vm9834_vm0 = vcmp.eq.s32.totalorder %v3829_v6, 1  ;;  %p9971_p8 = scmp.ge.s32.totalorder %s3926_s13, 0  ;;  %p9975_p9 = scmp.lt.s32.totalorder %s3926_s13, 16 }
 0x8e4   : > { %v4104_v29 = vld [vmem:[#allocation2 + $0x4] sm:$0xf] }
 0x8e5   : > { %3785 = vst.msk [vmem:[#allocation2 + $0x8] sm:$0x1] %vm11491_vm4, %v3780_v61  ;;  %v2956_v16 = vpop.permute.xlu0 %2955  ;;  %v3670_v26 = vpop.f32.mrf.mxu0  ;;  %v4146_v33 = vshll.u32 %v4104_v29, 16  ;;  %v4150_v32 = vshrl.u32 %v4104_v29, 16  ;;  %v4357_v22 = vrot.slane %v4104_v29, 5  ;;  %vm3793_vm4 = vmand %vm3792_vm15, %vm3749_vm14  ;;  %p3929_p10 = pnand %p9975_p9, %p9971_p8 }
 0x8e6   : > { %v3671_v63 = vadd.f32 %v9700_v58, %v3670_v26  ;;  %v3101_v12 = vpop.permute.xlu1 %3100  ;;  %v3525_v7 = vsel %vm11492_vm9, %v3500_v53, %v2956_v16  ;;  %vm9784_vm9 = vmor %vm4133_vm2, %vm4134_vm7  ;;  %vm12583_vm7 = vcmask 48128  }
 0x8e7   : > { %v4148_v62 = vrot.slane %v4146_v33, 5  ;;  %v4152_v42 = vrot.slane %v4150_v32, 4  ;;  %v3550_v30 = vsel %vm3528_vm10, %v3525_v7, %v3101_v12  ;;  %v4358_v52 = vsel %vm9770_vm8, %v6101_v57, %v4357_v22  ;;  %vm3795_vm2 = vmand %vm3792_vm15, %vm3754_vm6  ;;  %s6096_s22 = scalar_select %p3929_p10, 0, 1 }
 0x8e8   : > { %v3725_v11 = vmax.f32 %v3671_v63, 0.0  ;;  %v3575_v50 = vsel %vm3553_vm11, %v3550_v30, %v3255_v59  ;;  %v4359_v37 = vrot.slane %v4357_v22, 4  ;;  %v4543_v41 = vunpack.c.l.b16 %v4358_v52  ;;  %v3402_v30 = vpop.permute.xlu2 %3401 }
 0x8e9   : > { %v4153_v9 = vor.u32 %v4152_v42, %v4148_v62  ;;  %v4149_v0 = vsel %vm9784_vm9, %v4144_v38, %v4148_v62 }
 0x8ea   : > { %v3806_v39 = vrot.slane %v3725_v11, 2  ;;  %v4503_v21 = vunpack.c.l.b16 %v4149_v0 }
 0x8eb   : > { %v4154_v14 = vrot.slane %v4153_v9, 4 }
 0x8ec   : > { %v3807_v45 = vsel %vm3648_vm1, %v3805_v25, %v3806_v39  ;;  %v4105_v10 = vld [vmem:[#allocation2 + $0x8] sm:$0x1] }
 0x8ed   : > { %v3813_v1 = vsel %vm3793_vm4, %v3807_v45, 0.0  ;;  %v3400_v17 = vpop.permute.xlu0 %3399  ;;  %v3673_v40 = vpop.f32.mrf.mxu0  ;;  %v4360_v19 = vrot.slane %v4105_v10, 5  ;;  %v4156_v51 = vshll.u32 %v4105_v10, 16  ;;  %vm12586_vm4 = vcmask 253952  }
 0x8ee   : > { %v3816_v24 = vpack.c.bf16 %v3813_v1, %v3813_v1  ;;  %v3674_v31 = vadd.f32 %v9700_v58, %v3673_v40  ;;  %v2369_v34 = vpop.permute.xlu1 %2368  ;;  %v3600_v8 = vsel %vm3578_vm13, %v3575_v50, %v3400_v17 }
 0x8ef   : > { %v4361_v60 = vsel %vm9770_vm8, %v4359_v37, %v4360_v19  ;;  %v4158_v56 = vrot.slane %v4156_v51, 5  ;;  %v3427_v15 = vsel %vm12582_vm3, %v12581_v3, %v2369_v34  ;;  %vm3842_vm3 = vcmask 1043456  }
 0x8f0   : > { %3820 = vst.msk [vmem:[#allocation2 + $0xc] sm:$0xf] %vm3781_vm5, %v3816_v24  ;;  %v3726_v5 = vmax.f32 %v3674_v31, 0.0  ;;  %6089 = vmatmul.msk.bf16.gmra.mxu0 %vm3622_vm12, %v3600_v8  ;;  %v4544_v20 = vunpack.c.l.b16 %v4361_v60  ;;  %v3452_v61 = vsel %vm12583_vm7, %v3427_v15, %v2514_v35  ;;  %vm3831_vm7 = vmand %vm9834_vm0, %vm3749_vm14 }
 0x8f1   : > { %v4159_v54 = vsel %vm9784_vm9, %v4154_v14, %v4158_v56 }
 0x8f2   : > { %v3808_v36 = vrot.slane %v3726_v5, 2  ;;  %v4559_v59 = vpack.c.b16 %v4544_v20, %v4543_v41  ;;  %v4504_v27 = vunpack.c.l.b16 %v4159_v54  ;;  %v3843_v62 = vrot.slane %v3726_v5, 4 }
 0x8f3   : > { %v3867_v41 = vstv %s9857_s23  ;;  %s3964_s23 = sadd.s32 5, %s9668_s14 }
 0x8f4   : > { %v3809_v23 = vsel %vm3648_vm1, %v3806_v39, %v3808_v36  ;;  %v3815_v4 = vsel %vm3795_vm2, %v3808_v36, 0.0  ;;  %4567 = vrot.lane.b32.xlu1 %v4559_v59, %s6428_s19  ;;  %v4519_v47 = vpack.c.b16 %v4504_v27, %v4503_v21  ;;  %vm12590_vm2 = vcmask 97280   ;;  %p10029_p11 = scmp.ge.s32.totalorder %s3964_s23, 0  ;;  %p10033_p12 = scmp.lt.s32.totalorder %s3964_s23, 16 }
 0x8f5   : > { %v3814_v48 = vsel %vm3792_vm15, %v3809_v23, 0.0  ;;  %v3818_v55 = vpack.c.bf16 %v3815_v4, %v3815_v4  ;;  %v2659_v29 = vpop.permute.xlu0 %2658  ;;  %v3675_v16 = vpop.f32.mrf.mxu0  ;;  %vm12587_vm15 = vcmask 72704   ;;  %s4065_s23 = sadd.s32 8, %s9668_s14 }
 0x8f6   : > { %v3817_v26 = vpack.c.bf16 %v3814_v48, %v3814_v48  ;;  %v3676_v33 = vadd.f32 %v9700_v58, %v3675_v16  ;;  %v2813_v32 = vpop.permute.xlu1 %2812  ;;  %4527 = vrot.lane.b32.xlu0 %v4519_v47, %s6429_s20  ;;  %v3477_v43 = vsel %vm12587_vm15, %v3452_v61, %v2659_v29  ;;  %p3967_p13 = pnand %p10033_p12, %p10029_p11  ;;  %p10305_p6 = scmp.ge.s32.totalorder %s4065_s23, 0 }
 0x8f7   : > { %3822 = vst.msk [vmem:[#allocation2 + $0x14] sm:$0x1] %vm12586_vm4, %v3818_v55  ;;  %v4106_v12 = vld [vmem:[#allocation2 + $0xc] sm:$0xf]  ;;  %v3502_v46 = vsel %vm12590_vm2, %v3477_v43, %v2813_v32  ;;  %vm12591_vm4 = vcmask 121856   ;;  %p10309_p7 = scmp.lt.s32.totalorder %s4065_s23, 16 }
 0x8f8   : > { %3821 = vst.msk [vmem:[#allocation2 + $0x10] sm:$0xf] %vm3781_vm5, %v3817_v26  ;;  %v3727_v53 = vmax.f32 %v3676_v33, 0.0  ;;  %v4161_v11 = vshrl.u32 %v4106_v12, 16  ;;  %v3527_v35 = vsel %vm12591_vm4, %v3502_v46, %v2958_v2  ;;  %v4164_v22 = vshll.u32 %v4106_v12, 16 }
 0x8f9   : > { %v6102_v9 = vrot.slane %v4106_v12, 9  ;;  %s6097_s21 = scalar_select %p3967_p13, 0, 1 }
 0x8fa   : > { %v3844_v7 = vrot.slane %v3727_v53, 4  ;;  %v4163_v38 = vrot.slane %v4161_v11, 4  ;;  %v4166_v19 = vrot.slane %v4164_v22, 5  ;;  %p4068_p8 = pnand %p10309_p7, %p10305_p6 }
 0x8fc   : > { %v3845_v42 = vsel %vm3842_vm3, %v3843_v62, %v3844_v7  ;;  %v4167_v20 = vor.u32 %v4166_v19, %v4163_v38 }
 0x8fd   : > { %v3851_v25 = vsel %vm3831_vm7, %v3845_v42, 0.0  ;;  %v3103_v39 = vpop.permute.xlu0 %3102  ;;  %v3678_v57 = vpop.f32.mrf.mxu0 }
 0x8fe   : > { %v3854_v45 = vpack.c.bf16 %v3851_v25, %v3851_v25  ;;  %v3552_v50 = vsel %vm3528_vm10, %v3527_v35, %v3103_v39  ;;  %v3679_v10 = vadd.f32 %v9700_v58, %v3678_v57  ;;  %v3257_v52 = vpop.permute.xlu1 %3256  ;;  %v4108_v37 = vld [vmem:[#allocation2 + $0x14] sm:$0x1]  ;;  %vm9867_vm10 = vmand %vm9834_vm0, %vm3754_vm6  ;;  %v4168_v16 = vrot.slane %v4167_v20, 4 }
 0x8ff   : > { %v3577_v1 = vsel %vm3553_vm11, %v3552_v50, %v3257_v52  ;;  %v6252_v17 = vld [vmem:[#allocation2 + $0xc] sm:$0xff]  ;;  %v4367_v5 = vrot.slane %v4108_v37, 5  ;;  %v4180_v21 = vshll.u32 %v4108_v37, 16  ;;  %vm12596_vm11 = vcmask 253952  }
 0x900   : > { %v4107_v40 = vld [vmem:[#allocation2 + $0x10] sm:$0xf]  ;;  %3858 = vst.msk [vmem:[#allocation2 + $0x18] sm:$0xf] %vm3781_vm5, %v3854_v45  ;;  %v3728_v51 = vmax.f32 %v3679_v10, 0.0  ;;  %v3602_v24 = vsel %vm3578_vm13, %v3577_v1, %v3402_v30  ;;  %4586 = vrot.lane.b32.xlu2 %v6252_v17, %s6430_s9  ;;  %vm3880_vm13 = vcmask 1041408   ;;  %v3905_v52 = vstv %s6095_s12  ;;  %vm12601_vm7 = vmmov %vm12596_vm11 }
 0x901   : > { %v4364_v31 = vrot.slane %v4107_v40, 5  ;;  %v4170_v34 = vshll.u32 %v4107_v40, 16  ;;  %6090 = vmatmul.msk.bf16.gmra.mxu0 %vm3622_vm12, %v3602_v24  ;;  %v4174_v8 = vshrl.u32 %v4107_v40, 16  ;;  %vm9895_vm12 = vcmp.eq.s32.totalorder %v3867_v41, 1 }
 0x902   : > { %v3846_v60 = vrot.slane %v3728_v51, 4  ;;  %v4182_v43 = vrot.slane %v4180_v21, 5  ;;  %v3881_v53 = vrot.slane %v3728_v51, 6  ;;  %vm3869_vm15 = vmand %vm9895_vm12, %vm3749_vm14  ;;  %vm9936_vm2 = vcmp.eq.s32.totalorder %v3905_v52, 1 }
 0x903   : > { %v4365_v14 = vsel %vm9770_vm8, %v6102_v9, %v4364_v31  ;;  %v4366_v56 = vrot.slane %v4364_v31, 4  ;;  %v4172_v3 = vrot.slane %v4170_v34, 5  ;;  %v4176_v15 = vrot.slane %v4174_v8, 4  ;;  %vm3907_vm4 = vmand %vm9936_vm2, %vm3749_vm14 }
 0x904   : > { %v3847_v54 = vsel %vm3842_vm3, %v3844_v7, %v3846_v60  ;;  %v3853_v36 = vsel %vm9867_vm10, %v3846_v60, 0.0  ;;  %v4545_v23 = vunpack.c.l.b16 %v4365_v14  ;;  %vm3909_vm10 = vmand %vm9936_vm2, %vm3754_vm6 }
 0x905   : > { %v4368_v59 = vsel %vm9770_vm8, %v4366_v56, %v4367_v5  ;;  %v3852_v27 = vsel %vm9834_vm0, %v3847_v54, 0.0  ;;  %v3856_v2 = vpack.c.bf16 %v3853_v36, %v3853_v36  ;;  %v3680_v6 = vpop.f32.mrf.mxu0  ;;  %v4177_v48 = vor.u32 %v4176_v15, %v4172_v3  ;;  %vm3871_vm0 = vmand %vm9895_vm12, %vm3754_vm6 }
 0x906   : > { %v4546_v4 = vunpack.c.l.b16 %v4368_v59  ;;  %v3855_v61 = vpack.c.bf16 %v3852_v27, %v3852_v27  ;;  %v3681_v47 = vadd.f32 %v9700_v58, %v3680_v6  ;;  %v4173_v62 = vsel %vm9784_vm9, %v4168_v16, %v4172_v3 }
 0x907   : > { %3860 = vst.msk [vmem:[#allocation2 + $0x20] sm:$0x1] %vm12596_vm11, %v3856_v2  ;;  %v4109_v26 = vld [vmem:[#allocation2 + $0x18] sm:$0xf]  ;;  %v4178_v32 = vrot.slane %v4177_v48, 4  ;;  %v4505_v39 = vunpack.c.l.b16 %v4173_v62  ;;  %vm12604_vm11 = vmmov %vm12601_vm7 }
 0x908   : > { %v9893_v55 = vpack.c.b16 %v4546_v4, %v4545_v23  ;;  %3859 = vst.msk [vmem:[#allocation2 + $0x1c] sm:$0xf] %vm3781_vm5, %v3855_v61  ;;  %v3729_v33 = vmax.f32 %v3681_v47, 0.0  ;;  %v4185_v63 = vshrl.u32 %v4109_v26, 16  ;;  %v4188_v12 = vshll.u32 %v4109_v26, 16 }
 0x909   : > { %v4183_v7 = vsel %vm9784_vm9, %v4178_v32, %v4182_v43  ;;  %v6103_v1 = vrot.slane %v4109_v26, 9 }
 0x90a   : > { %4608 = vrot.lane.b32.xlu0 %v9893_v55, %s6429_s20  ;;  %v3882_v46 = vrot.slane %v3729_v33, 6  ;;  %v4506_v11 = vunpack.c.l.b16 %v4183_v7  ;;  %v4187_v35 = vrot.slane %v4185_v63, 4  ;;  %v4190_v22 = vrot.slane %v4188_v12, 5 }
 0x90c   : > { %v3883_v42 = vsel %vm3880_vm13, %v3881_v53, %v3882_v46  ;;  %v9921_v50 = vpack.c.b16 %v4506_v11, %v4505_v39  ;;  %v4191_v17 = vor.u32 %v4190_v22, %v4187_v35 }
 0x90d   : > { %v3683_v30 = vpop.f32.mrf.mxu0  ;;  %v3889_v25 = vsel %vm3869_vm15, %v3883_v42, 0.0 }
 0x90e   : > { %v3684_v57 = vadd.f32 %v9700_v58, %v3683_v30  ;;  %v3892_v9 = vpack.c.bf16 %v3889_v25, %v3889_v25  ;;  %v4111_v45 = vld [vmem:[#allocation2 + $0x20] sm:$0x1]  ;;  %v4192_v14 = vrot.slane %v4191_v17, 4 }
 0x90f   : > { %v9923_v10 = vld [vmem:[#allocation2 + $0x18] sm:$0xff]  ;;  %v4374_v24 = vrot.slane %v4111_v45, 5  ;;  %v4204_v5 = vshll.u32 %v4111_v45, 16 }
 0x910   : > { %v4110_v38 = vld [vmem:[#allocation2 + $0x1c] sm:$0xf]  ;;  %v3730_v40 = vmax.f32 %v3684_v57, 0.0  ;;  %3896 = vst.msk [vmem:[#allocation2 + $0x24] sm:$0xf] %vm3781_vm5, %v3892_v9  ;;  %4627 = vrot.lane.b32.xlu1 %v9923_v10, %s6428_s19 }
 0x911   : > { %v4371_v37 = vrot.slane %v4110_v38, 5  ;;  %v4194_v19 = vshll.u32 %v4110_v38, 16  ;;  %v4198_v51 = vshrl.u32 %v4110_v38, 16  ;;  %v4206_v47 = vrot.slane %v4204_v5, 5  ;;  %v6378_v49 = vld [vmem:[#allocation2 + $0x18] sm:$0xff] }
 0x912   : > { %4529 = vrot.lane.b32.xlu0 %v9921_v50, %s6429_s20  ;;  %v3884_v31 = vrot.slane %v3730_v40, 6 }
 0x913   : > { %v4372_v34 = vsel %vm9770_vm8, %v6103_v1, %v4371_v37  ;;  %v4373_v0 = vrot.slane %v4371_v37, 4  ;;  %v4196_v8 = vrot.slane %v4194_v19, 5  ;;  %v4200_v56 = vrot.slane %v4198_v51, 4 }
 0x914   : > { %v3885_v41 = vsel %vm3880_vm13, %v3882_v46, %v3884_v31  ;;  %v3891_v20 = vsel %vm3871_vm0, %v3884_v31, 0.0  ;;  %v4547_v15 = vunpack.c.l.b16 %v4372_v34 }
 0x915   : > { %v4375_v3 = vsel %vm9770_vm8, %v4373_v0, %v4374_v24  ;;  %v3890_v54 = vsel %vm9895_vm12, %v3885_v41, 0.0  ;;  %v3894_v36 = vpack.c.bf16 %v3891_v20, %v3891_v20  ;;  %v3685_v59 = vpop.f32.mrf.mxu0  ;;  %v4201_v27 = vor.u32 %v4200_v56, %v4196_v8 }
 0x916   : > { %v4548_v21 = vunpack.c.l.b16 %v4375_v3  ;;  %v3893_v2 = vpack.c.bf16 %v3890_v54, %v3890_v54  ;;  %v3686_v6 = vadd.f32 %v9700_v58, %v3685_v59  ;;  %v4197_v4 = vsel %vm9784_vm9, %v4192_v14, %v4196_v8 }
 0x917   : > { %3898 = vst.msk [vmem:[#allocation2 + $0x2c] sm:$0x1] %vm12601_vm7, %v3894_v36  ;;  %v4202_v61 = vrot.slane %v4201_v27, 4  ;;  %v4112_v48 = vld [vmem:[#allocation2 + $0x24] sm:$0xf]  ;;  %v4507_v43 = vunpack.c.l.b16 %v4197_v4 }
 0x918   : > { %v9951_v23 = vpack.c.b16 %v4548_v21, %v4547_v15  ;;  %3897 = vst.msk [vmem:[#allocation2 + $0x28] sm:$0xf] %vm3781_vm5, %v3893_v2  ;;  %v3731_v29 = vmax.f32 %v3686_v6, 0.0  ;;  %4569 = vrot.lane.b32.xlu1 %v9893_v55, %s6428_s19  ;;  %v4209_v26 = vshrl.u32 %v4112_v48, 16  ;;  %v4212_v33 = vshll.u32 %v4112_v48, 16 }
 0x919   : > { %v4207_v16 = vsel %vm9784_vm9, %v4202_v61, %v4206_v47  ;;  %v6104_v42 = vrot.slane %v4112_v48, 9  ;;  %v3932_v2 = vstv %s6096_s22  ;;  %s4001_s22 = sadd.s32 6, %s9668_s14 }
 0x91a   : > { %4610 = vrot.lane.b32.xlu0 %v9951_v23, %s6429_s20  ;;  %v3916_v32 = vsel %vm3907_vm4, %v3731_v29, 0.0  ;;  %v4508_v63 = vunpack.c.l.b16 %v4207_v16  ;;  %v4211_v62 = vrot.slane %v4209_v26, 4  ;;  %v4214_v7 = vrot.slane %v4212_v33, 5  ;;  %p10089_p0 = scmp.ge.s32.totalorder %s4001_s22, 0  ;;  %p10093_p1 = scmp.lt.s32.totalorder %s4001_s22, 16 }
 0x91b   : > { %v3919_v12 = vpack.c.bf16 %v3916_v32, %v3916_v32  ;;  %vm10023_vm12 = vcmp.eq.s32.totalorder %v3932_v2, 1 }
 0x91c   : > { %v9962_v53 = vpack.c.b16 %v4508_v63, %v4507_v43  ;;  %v4215_v45 = vor.u32 %v4214_v7, %v4211_v62  ;;  %vm3934_vm15 = vmand %vm10023_vm12, %vm3749_vm14  ;;  %p4004_p2 = pnand %p10093_p1, %p10089_p0 }
 0x91d   : > { %3923 = vst.msk [vmem:[#allocation2 + $0x30] sm:$0xf] %vm3781_vm5, %v3919_v12  ;;  %v3688_v46 = vpop.f32.mrf.mxu0  ;;  %vm3936_vm0 = vmand %vm10023_vm12, %vm3754_vm6 }
 0x91e   : > { %v3689_v11 = vadd.f32 %v9700_v58, %v3688_v46  ;;  %4646 = vrot.lane.b32.xlu2 %v9962_v53, %s6430_s9  ;;  %v4114_v55 = vld [vmem:[#allocation2 + $0x2c] sm:$0x1]  ;;  %v4216_v0 = vrot.slane %v4215_v45, 4  ;;  %s10134_s22 = scalar_select %p4004_p2, 0, 1 }
 0x91f   : > { %v9969_v35 = vld [vmem:[#allocation2 + $0x24] sm:$0xff]  ;;  %v4381_v9 = vrot.slane %v4114_v55, 5  ;;  %v4228_v19 = vshll.u32 %v4114_v55, 16 }
 0x920   : > { %v4113_v22 = vld [vmem:[#allocation2 + $0x28] sm:$0xf]  ;;  %v3732_v30 = vmax.f32 %v3689_v11, 0.0  ;;  %4629 = vrot.lane.b32.xlu1 %v9969_v35, %s6428_s19 }
 0x921   : > { %v4378_v25 = vrot.slane %v4113_v22, 5  ;;  %v4218_v39 = vshll.u32 %v4113_v22, 16  ;;  %v4222_v57 = vshrl.u32 %v4113_v22, 16  ;;  %v4230_v3 = vrot.slane %v4228_v19, 5 }
 0x922   : > { %4531 = vrot.lane.b32.xlu0 %v9962_v53, %s6429_s20  ;;  %v3917_v52 = vsel %vm9936_vm2, %v3732_v30, 0.0  ;;  %vm12611_vm2 = vmmov %vm12601_vm7 }
 0x923   : > { %v4379_v38 = vsel %vm9770_vm8, %v6104_v42, %v4378_v25  ;;  %v4380_v1 = vrot.slane %v4378_v25, 4  ;;  %v4220_v17 = vrot.slane %v4218_v39, 5  ;;  %v3920_v40 = vpack.c.bf16 %v3917_v52, %v3917_v52 }
 0x924   : > { %v4224_v37 = vrot.slane %v4222_v57, 4  ;;  %v4549_v31 = vunpack.c.l.b16 %v4379_v38  ;;  %v4115_v14 = vld [vmem:[#allocation2 + $0x30] sm:$0xf] }
 0x925   : > { %v4382_v51 = vsel %vm9770_vm8, %v4380_v1, %v4381_v9  ;;  %3924 = vst.msk [vmem:[#allocation2 + $0x34] sm:$0xf] %vm3781_vm5, %v3920_v40  ;;  %v3690_v24 = vpop.f32.mrf.mxu0  ;;  %v4221_v41 = vsel %vm9784_vm9, %v4216_v0, %v4220_v17  ;;  %v4233_v54 = vshrl.u32 %v4115_v14, 16  ;;  %v6105_v55 = vrot.slane %v4115_v14, 9  ;;  %v6268_v57 = vld [vmem:[%s11151_s3 + $0x38] sm:$0xff] }
 0x926   : > { %v4550_v34 = vunpack.c.l.b16 %v4382_v51  ;;  %v4225_v8 = vor.u32 %v4224_v37, %v4220_v17  ;;  %v3691_v56 = vadd.f32 %v9700_v58, %v3690_v24  ;;  %4588 = vrot.lane.b32.xlu2 %v9923_v10, %s6430_s9  ;;  %v4236_v10 = vshll.u32 %v4115_v14, 16  ;;  %4968 = vmatpush.bf16.msra.mxu1 %v6268_v57  ;;  %v6267_v37 = vld [vmem:[%s11151_s3 + $0x30] sm:$0xff] }
 0x927   : > { %v4509_v59 = vunpack.c.l.b16 %v4221_v41  ;;  %v4235_v61 = vrot.slane %v4233_v54, 4 }
 0x928   : > { %v10001_v5 = vpack.c.b16 %v4550_v34, %v4549_v31  ;;  %v4226_v20 = vrot.slane %v4225_v8, 4  ;;  %v3733_v15 = vmax.f32 %v3691_v56, 0.0  ;;  %4571 = vrot.lane.b32.xlu1 %v9951_v23, %s6428_s19  ;;  %v4238_v47 = vrot.slane %v4236_v10, 5 }
 0x929   : > { %v3970_v10 = vstv %s6097_s21  ;;  %s6432_s21 = smov 122  }
 0x92a   : > { %4612 = vrot.lane.b32.xlu0 %v10001_v5, %s6429_s20  ;;  %v4231_v60 = vsel %vm9784_vm9, %v4226_v20, %v4230_v3  ;;  %v3918_v36 = vsel %vm3909_vm10, %v3733_v15, 0.0  ;;  %v4239_v62 = vor.u32 %v4238_v47, %v4235_v61  ;;  %v3946_v7 = vrot.slane %v3733_v15, 2  ;;  %4969 = vmatpush.bf16.msra.mxu1 %v6267_v37 }
 0x92b   : > { %v4510_v21 = vunpack.c.l.b16 %v4231_v60  ;;  %v3921_v27 = vpack.c.bf16 %v3918_v36, %v3918_v36  ;;  %vm10101_vm7 = vcmp.eq.s32.totalorder %v3970_v10, 1 }
 0x92c   : > { %v4116_v4 = vld [vmem:[#allocation2 + $0x34] sm:$0xf]  ;;  %v4240_v39 = vrot.slane %v4239_v62, 4  ;;  %vm3972_vm4 = vmand %vm10101_vm7, %vm3749_vm14 }
 0x92d   : > { %v10016_v6 = vpack.c.b16 %v4510_v21, %v4509_v59  ;;  %3925 = vst.msk [vmem:[#allocation2 + $0x38] sm:$0x1] %vm12604_vm11, %v3921_v27  ;;  %v3693_v48 = vpop.f32.mrf.mxu0  ;;  %v4242_v29 = vshll.u32 %v4116_v4, 16  ;;  %v4246_v16 = vshrl.u32 %v4116_v4, 16  ;;  %v10027_v32 = vld [vmem:[#allocation2 + $0x30] sm:$0xff]  ;;  %v4385_v46 = vrot.slane %v4116_v4, 5  ;;  %vm10156_vm10 = vmand %vm10101_vm7, %vm3754_vm6 }
 0x92e   : > { %v3694_v26 = vadd.f32 %v9700_v58, %v3693_v48  ;;  %v6266_v48 = vld [vmem:[%s11151_s3 + $0x28] sm:$0xff] }
 0x92f   : > { %4648 = vrot.lane.b32.xlu2 %v10016_v6, %s6430_s9  ;;  %v4244_v43 = vrot.slane %v4242_v29, 5  ;;  %v4248_v63 = vrot.slane %v4246_v16, 4  ;;  %v4386_v25 = vsel %vm9770_vm8, %v6105_v55, %v4385_v46  ;;  %v4387_v52 = vrot.slane %v4385_v46, 4  ;;  %4970 = vmatpush.bf16.msra.mxu1 %v6266_v48  ;;  %v10139_v55 = vld [vmem:[%s11151_s3 + $0x80] sm:$0xff]  ;;  %v6262_v4 = vld [vmem:[%s11151_s3 + $0x8] sm:$0xff] }
 0x930   : > { %v3734_v12 = vmax.f32 %v3694_v26, 0.0  ;;  %4631 = vrot.lane.b32.xlu1 %v10027_v32, %s6428_s19  ;;  %v4551_v0 = vunpack.c.l.b16 %v4386_v25  ;;  %v10116_v26 = vld [vmem:[%s11151_s3 + $0x88] sm:$0xff] }
 0x931   : > { %v4249_v22 = vor.u32 %v4248_v63, %v4244_v43  ;;  %v4245_v51 = vsel %vm9784_vm9, %v4240_v39, %v4244_v43  ;;  %v6265_v63 = vld [vmem:[%s11151_s3 + $0x20] sm:$0xff]  ;;  %6282 = vmatpush.bf16.msra.mxu3 %v10116_v26 }
 0x932   : > { %4533 = vrot.lane.b32.xlu0 %v10016_v6, %s6429_s20  ;;  %v3947_v11 = vrot.slane %v3734_v12, 2  ;;  %v4511_v20 = vunpack.c.l.b16 %v4245_v51 }
 0x933   : > { %v4250_v24 = vrot.slane %v4249_v22, 4  ;;  %4971 = vmatpush.bf16.msra.mxu1 %v6265_v63 }
 0x934   : > { %v3948_v42 = vsel %vm3648_vm1, %v3946_v7, %v3947_v11  ;;  %v4117_v30 = vld [vmem:[#allocation2 + $0x38] sm:$0x1] }
 0x935   : > { %v3954_v9 = vsel %vm3934_vm15, %v3948_v42, 0.0  ;;  %v3695_v45 = vpop.f32.mrf.mxu0  ;;  %v4388_v38 = vrot.slane %v4117_v30, 5  ;;  %v4252_v1 = vshll.u32 %v4117_v30, 16  ;;  %v6264_v30 = vld [vmem:[%s11151_s3 + $0x18] sm:$0xff]  ;;  %6284 = vmatpush.bf16.msra.mxu3 %v10139_v55 }
 0x936   : > { %v3957_v17 = vpack.c.bf16 %v3954_v9, %v3954_v9  ;;  %v3696_v40 = vadd.f32 %v9700_v58, %v3695_v45 }
 0x937   : > { %4590 = vrot.lane.b32.xlu2 %v9969_v35, %s6430_s9  ;;  %v4389_v19 = vsel %vm9770_vm8, %v4387_v52, %v4388_v38  ;;  %v4254_v31 = vrot.slane %v4252_v1, 5  ;;  %4972 = vmatpush.bf16.msra.mxu1 %v6264_v30 }
 0x938   : > { %3961 = vst.msk [vmem:[#allocation2 + $0x3c] sm:$0xf] %vm3781_vm5, %v3957_v17  ;;  %v3735_v34 = vmax.f32 %v3696_v40, 0.0  ;;  %v4552_v8 = vunpack.c.l.b16 %v4389_v19  ;;  %4573 = vrot.lane.b32.xlu1 %v10001_v5, %s6428_s19  ;;  %v4007_v40 = vstv %s10134_s22  ;;  %v6274_v17 = vld [vmem:[%s11151_s3 + $0x68] sm:$0xff]  ;;  %s5357_s22 = scvt.s32.f32 %s9668_s14 }
 0x939   : > { %v4255_v14 = vsel %vm9784_vm9, %v4250_v24, %v4254_v31  ;;  %vm10181_vm11 = vcmp.eq.s32.totalorder %v4007_v40, 1  ;;  %v10236_v40 = vld [vmem:[%s11150_s2] ss:$0 sm:$0xff] }
 0x93a   : > { %v3949_v56 = vrot.slane %v3735_v34, 2  ;;  %v10079_v41 = vpack.c.b16 %v4552_v8, %v4551_v0  ;;  %v4512_v3 = vunpack.c.l.b16 %v4255_v14  ;;  %v3983_v33 = vrot.slane %v3735_v34, 4  ;;  %v6263_v34 = vld [vmem:[%s11151_s3 + $0x10] sm:$0xff]  ;;  %vm4011_vm15 = vmand %vm10181_vm11, %vm3754_vm6 }
 0x93b   : > { %4973 = vmatpush.bf16.msra.mxu1 %v6263_v34 }
 0x93c   : > { %v3950_v15 = vsel %vm3648_vm1, %v3947_v11, %v3949_v56  ;;  %v3956_v54 = vsel %vm3936_vm0, %v3949_v56, 0.0  ;;  %4614 = vrot.lane.b32.xlu0 %v10079_v41, %s6429_s20  ;;  %v10085_v60 = vpack.c.b16 %v4512_v3, %v4511_v20 }
 0x93d   : > { %v3955_v36 = vsel %vm10023_vm12, %v3950_v15, 0.0  ;;  %v3959_v59 = vpack.c.bf16 %v3956_v54, %v3956_v54  ;;  %v3698_v21 = vpop.f32.mrf.mxu0  ;;  %vm4009_vm12 = vmand %vm10181_vm11, %vm3749_vm14 }
 0x93e   : > { %v3958_v27 = vpack.c.bf16 %v3955_v36, %v3955_v36  ;;  %v3699_v2 = vadd.f32 %v9700_v58, %v3698_v21 }
 0x93f   : > { %4650 = vrot.lane.b32.xlu2 %v10085_v60, %s6430_s9  ;;  %3963 = vst.msk [vmem:[#allocation2 + $0x44] sm:$0x1] %vm12611_vm2, %v3959_v59  ;;  %v4118_v61 = vld [vmem:[#allocation2 + $0x3c] sm:$0xf]  ;;  %4974 = vmatpush.bf16.msra.mxu1 %v6262_v4 }
 0x940   : > { %3962 = vst.msk [vmem:[#allocation2 + $0x40] sm:$0xf] %vm3781_vm5, %v3958_v27  ;;  %v3736_v47 = vmax.f32 %v3699_v2, 0.0  ;;  %v4257_v29 = vshrl.u32 %v4118_v61, 16  ;;  %v4260_v16 = vshll.u32 %v4118_v61, 16  ;;  %v6106_v9 = vrot.slane %v4118_v61, 9 }
 0x941   : > { %v6276_v27 = vld [vmem:[%s11151_s3 + $0x78] sm:$0xff] }
 0x942   : > { %v3984_v43 = vrot.slane %v3736_v47, 4  ;;  %v4259_v7 = vrot.slane %v4257_v29, 4  ;;  %v4262_v11 = vrot.slane %v4260_v16, 5  ;;  %5017 = vmatpush.bf16.msra.mxu2 %v6276_v27 }
 0x944   : > { %v3985_v12 = vsel %vm3842_vm3, %v3983_v33, %v3984_v43  ;;  %4535 = vrot.lane.b32.xlu0 %v10085_v60, %s6429_s20  ;;  %v4263_v37 = vor.u32 %v4262_v11, %v4259_v7 }
 0x945   : > { %v3991_v46 = vsel %vm3972_vm4, %v3985_v12, 0.0  ;;  %v3700_v62 = vpop.f32.mrf.mxu0  ;;  %vm4690_vm4 = vcmask 523264  }
 0x946   : > { %v3994_v22 = vpack.c.bf16 %v3991_v46, %v3991_v46  ;;  %v3701_v42 = vadd.f32 %v9700_v58, %v3700_v62  ;;  %v4120_v57 = vld [vmem:[#allocation2 + $0x44] sm:$0x1]  ;;  %v4264_v47 = vrot.slane %v4263_v37, 4 }
 0x947   : > { %4592 = vrot.lane.b32.xlu2 %v10027_v32, %s6430_s9  ;;  %v10148_v25 = vld [vmem:[#allocation2 + $0x3c] sm:$0xff]  ;;  %v4395_v31 = vrot.slane %v4120_v57, 5  ;;  %v4276_v14 = vshll.u32 %v4120_v57, 16 }
 0x948   : > { %v4119_v39 = vld [vmem:[#allocation2 + $0x40] sm:$0xf]  ;;  %3998 = vst.msk [vmem:[#allocation2 + $0x48] sm:$0xf] %vm3781_vm5, %v3994_v22  ;;  %v3737_v45 = vmax.f32 %v3701_v42, 0.0  ;;  %4633 = vrot.lane.b32.xlu1 %v10148_v25, %s6428_s19  ;;  %v6261_v42 = vld [vmem:[%s11151_s3] sm:$0xff] }
 0x949   : > { %v4392_v52 = vrot.slane %v4119_v39, 5  ;;  %v4266_v38 = vshll.u32 %v4119_v39, 16  ;;  %v4270_v1 = vshrl.u32 %v4119_v39, 16  ;;  %v4278_v16 = vrot.slane %v4276_v14, 5  ;;  %4975 = vmatpush.bf16.msra.mxu1 %v6261_v42  ;;  %v6273_v14 = vld [vmem:[%s11151_s3 + $0x60] sm:$0xff] }
 0x94a   : > { %v3986_v19 = vrot.slane %v3737_v45, 4  ;;  %v4020_v7 = vrot.slane %v3737_v45, 6 }
 0x94b   : > { %v4393_v51 = vsel %vm9770_vm8, %v6106_v9, %v4392_v52  ;;  %v4394_v24 = vrot.slane %v4392_v52, 4  ;;  %v4268_v0 = vrot.slane %v4266_v38, 5  ;;  %v4272_v8 = vrot.slane %v4270_v1, 4 }
 0x94c   : > { %v3987_v56 = vsel %vm3842_vm3, %v3984_v43, %v3986_v19  ;;  %v3993_v20 = vsel %vm10156_vm10, %v3986_v19, 0.0  ;;  %v4553_v59 = vunpack.c.l.b16 %v4393_v51  ;;  %vm12620_vm3 = vmmov %vm12611_vm2  ;;  %vm4707_vm10 = vcmask 785408  }
 0x94d   : > { %v4396_v3 = vsel %vm9770_vm8, %v4394_v24, %v4395_v31  ;;  %v3992_v54 = vsel %vm10101_vm7, %v3987_v56, 0.0  ;;  %v3996_v10 = vpack.c.bf16 %v3993_v20, %v3993_v20  ;;  %v3703_v36 = vpop.f32.mrf.mxu0  ;;  %v4273_v48 = vor.u32 %v4272_v8, %v4268_v0  ;;  %5072 = vmatpush.bf16.msrb.mxu1 %v10116_v26 }
 0x94e   : > { %v4554_v21 = vunpack.c.l.b16 %v4396_v3  ;;  %v3995_v2 = vpack.c.bf16 %v3992_v54, %v3992_v54  ;;  %v3704_v61 = vadd.f32 %v9700_v58, %v3703_v36  ;;  %v6275_v58 = vld [vmem:[%s11151_s3 + $0x70] sm:$0xff]  ;;  %v4269_v63 = vsel %vm9784_vm9, %v4264_v47, %v4268_v0 }
 0x94f   : > { %4000 = vst.msk [vmem:[#allocation2 + $0x50] sm:$0x1] %vm12620_vm3, %v3996_v10  ;;  %v4121_v33 = vld [vmem:[#allocation2 + $0x48] sm:$0xf]  ;;  %v4274_v12 = vrot.slane %v4273_v48, 4  ;;  %v4513_v30 = vunpack.c.l.b16 %v4269_v63  ;;  %5018 = vmatpush.bf16.msra.mxu2 %v6275_v58  ;;  %v4044_v31 = vstv %s10225_s11  ;;  %vm12625_vm3 = vmmov %vm12611_vm2 }
 0x950   : > { %v10195_v29 = vpack.c.b16 %v4554_v21, %v4553_v59  ;;  %3999 = vst.msk [vmem:[#allocation2 + $0x4c] sm:$0xf] %vm3781_vm5, %v3995_v2  ;;  %v3738_v43 = vmax.f32 %v3704_v61, 0.0  ;;  %v4281_v46 = vshrl.u32 %v4121_v33, 16  ;;  %4575 = vrot.lane.b32.xlu1 %v10079_v41, %s6428_s19  ;;  %v4284_v62 = vshll.u32 %v4121_v33, 16 }
 0x951   : > { %v4279_v22 = vsel %vm9784_vm9, %v4274_v12, %v4278_v16  ;;  %v6107_v0 = vrot.slane %v4121_v33, 9  ;;  %vm10259_vm0 = vcmp.eq.s32.totalorder %v4044_v31, 1  ;;  %5073 = vmatpush.bf16.msrb.mxu1 %v10139_v55  ;;  %s6100_s11 = scalar_select %p4068_p8, 0, 1 }
 0x952   : > { %4616 = vrot.lane.b32.xlu0 %v10195_v29, %s6429_s20  ;;  %v4021_v11 = vrot.slane %v3738_v43, 6  ;;  %v4514_v39 = vunpack.c.l.b16 %v4279_v22  ;;  %v4283_v57 = vrot.slane %v4281_v46, 4  ;;  %v4286_v9 = vrot.slane %v4284_v62, 5  ;;  %v6272_v43 = vld [vmem:[%s11151_s3 + $0x58] sm:$0xff]  ;;  %vm4046_vm7 = vmand %vm10259_vm0, %vm3749_vm14 }
 0x953   : > { %5019 = vmatpush.bf16.msra.mxu2 %v6274_v17 }
 0x954   : > { %v4022_v45 = vsel %vm3880_vm13, %v4020_v7, %v4021_v11  ;;  %v10228_v1 = vpack.c.b16 %v4514_v39, %v4513_v30  ;;  %v4287_v8 = vor.u32 %v4286_v9, %v4283_v57  ;;  %v6271_v9 = vld [vmem:[%s11151_s3 + $0x50] sm:$0xff] }
 0x955   : > { %v3705_v52 = vpop.f32.mrf.mxu0  ;;  %v4028_v38 = vsel %vm4009_vm12, %v4022_v45, 0.0 }
 0x956   : > { %v3706_v37 = vadd.f32 %v10236_v40, %v3705_v52  ;;  %v4031_v19 = vpack.c.bf16 %v4028_v38, %v4028_v38  ;;  %v4123_v51 = vld [vmem:[#allocation2 + $0x50] sm:$0x1]  ;;  %4652 = vrot.lane.b32.xlu2 %v10228_v1, %s6430_s9  ;;  %v4288_v47 = vrot.slane %v4287_v8, 4 }
 0x957   : > { %v10241_v24 = vld [vmem:[#allocation2 + $0x48] sm:$0xff]  ;;  %v4402_v10 = vrot.slane %v4123_v51, 5  ;;  %v4300_v36 = vshll.u32 %v4123_v51, 16  ;;  %5020 = vmatpush.bf16.msra.mxu2 %v6273_v14 }
 0x958   : > { %v4122_v34 = vld [vmem:[#allocation2 + $0x4c] sm:$0xf]  ;;  %v3739_v56 = vmax.f32 %v3706_v37, 0.0  ;;  %4035 = vst.msk [vmem:[#allocation2 + $0x54] sm:$0xf] %vm3781_vm5, %v4031_v19  ;;  %4635 = vrot.lane.b32.xlu1 %v10241_v24, %s6428_s19 }
 0x959   : > { %v4399_v20 = vrot.slane %v4122_v34, 5  ;;  %v4290_v3 = vshll.u32 %v4122_v34, 16  ;;  %v4294_v54 = vshrl.u32 %v4122_v34, 16  ;;  %v4302_v42 = vrot.slane %v4300_v36, 5 }
 0x95a   : > { %4537 = vrot.lane.b32.xlu0 %v10228_v1, %s6429_s20  ;;  %v4023_v59 = vrot.slane %v3739_v56, 6 }
 0x95b   : > { %v4400_v21 = vsel %vm9770_vm8, %v6107_v0, %v4399_v20  ;;  %v4401_v27 = vrot.slane %v4399_v20, 4  ;;  %v4292_v2 = vrot.slane %v4290_v3, 5  ;;  %v4296_v48 = vrot.slane %v4294_v54, 4  ;;  %5021 = vmatpush.bf16.msra.mxu2 %v6272_v43  ;;  %v6251_v20 = vld [vmem:[#allocation2] sm:$0xff]  ;;  %v4587_v43 = vpop.permute.xlu2 %4586 }
 0x95c   : > { %v4024_v4 = vsel %vm3880_vm13, %v4021_v11, %v4023_v59  ;;  %v4030_v16 = vsel %vm4011_vm15, %v4023_v59, 0.0  ;;  %v4555_v58 = vunpack.c.l.b16 %v4400_v21  ;;  %vm4665_vm13 = vcmask 261120  }
 0x95d   : > { %v4403_v33 = vsel %vm9770_vm8, %v4401_v27, %v4402_v10  ;;  %v4029_v63 = vsel %vm10181_vm11, %v4024_v4, 0.0  ;;  %v4033_v12 = vpack.c.bf16 %v4030_v16, %v4030_v16  ;;  %v3708_v46 = vpop.f32.mrf.mxu0  ;;  %v4297_v7 = vor.u32 %v4296_v48, %v4292_v2  ;;  %vm4048_vm11 = vmand %vm10259_vm0, %vm3754_vm6 }
 0x95e   : > { %v4556_v62 = vunpack.c.l.b16 %v4403_v33  ;;  %v4032_v22 = vpack.c.bf16 %v4029_v63, %v4029_v63  ;;  %v3709_v11 = vadd.f32 %v10236_v40, %v3708_v46  ;;  %4594 = vrot.lane.b32.xlu2 %v10148_v25, %s6430_s9  ;;  %v4293_v30 = vsel %vm9784_vm9, %v4288_v47, %v4292_v2 }
 0x95f   : > { %4037 = vst.msk [vmem:[#allocation2 + $0x5c] sm:$0x1] %vm12611_vm2, %v4033_v12  ;;  %v4298_v39 = vrot.slane %v4297_v7, 4  ;;  %v4124_v57 = vld [vmem:[#allocation2 + $0x54] sm:$0xf]  ;;  %v4515_v19 = vunpack.c.l.b16 %v4293_v30  ;;  %5022 = vmatpush.bf16.msra.mxu2 %v6271_v9  ;;  %v6269_v30 = vld [vmem:[%s11151_s3 + $0x40] sm:$0xff] }
 0x960   : > { %v10280_v15 = vpack.c.b16 %v4556_v62, %v4555_v58  ;;  %4036 = vst.msk [vmem:[#allocation2 + $0x58] sm:$0xf] %vm3781_vm5, %v4032_v22  ;;  %v3740_v45 = vmax.f32 %v3709_v11, 0.0  ;;  %v4305_v38 = vshrl.u32 %v4124_v57, 16  ;;  %v4308_v17 = vshll.u32 %v4124_v57, 16  ;;  %4577 = vrot.lane.b32.xlu1 %v10195_v29, %s6428_s19  ;;  %v6270_v58 = vld [vmem:[%s11151_s3 + $0x48] sm:$0xff] }
 0x961   : > { %v4303_v52 = vsel %vm9784_vm9, %v4298_v39, %v4302_v42  ;;  %v6108_v36 = vrot.slane %v4124_v57, 9 }
 0x962   : > { %6227 = vmatmul.msk.bf16.vlgmr.msra.gmra.mxu3 %vm4665_vm13, %v10280_v15  ;;  %4618 = vrot.lane.b32.xlu0 %v10280_v15, %s6429_s20  ;;  %v4055_v37 = vsel %vm4046_vm7, %v3740_v45, 0.0  ;;  %v4516_v51 = vunpack.c.l.b16 %v4303_v52  ;;  %v4307_v8 = vrot.slane %v4305_v38, 4  ;;  %v4310_v14 = vrot.slane %v4308_v17, 5 }
 0x963   : > { %v4058_v31 = vpack.c.bf16 %v4055_v37, %v4055_v37  ;;  %5023 = vmatpush.bf16.msra.mxu2 %v6270_v58 }
 0x964   : > { %v10296_v34 = vpack.c.b16 %v4516_v51, %v4515_v19  ;;  %v4311_v33 = vor.u32 %v4310_v14, %v4307_v8 }
 0x965   : > { %4062 = vst.msk [vmem:[#allocation2 + $0x60] sm:$0xf] %vm3781_vm5, %v4058_v31  ;;  %v3710_v0 = vpop.f32.mrf.mxu0 }
 0x966   : > { %v3711_v56 = vadd.f32 %v10236_v40, %v3710_v0  ;;  %v4126_v3 = vld [vmem:[#allocation2 + $0x5c] sm:$0x1]  ;;  %4654 = vrot.lane.b32.xlu2 %v10296_v34, %s6430_s9  ;;  %v4568_v48 = vpop.permute.xlu1 %4567  ;;  %v4312_v38 = vrot.slane %v4311_v33, 4 }
 0x967   : > { %v10303_v54 = vld [vmem:[#allocation2 + $0x54] sm:$0xff]  ;;  %v4409_v16 = vrot.slane %v4126_v3, 5  ;;  %v4324_v42 = vshll.u32 %v4126_v3, 16  ;;  %5024 = vmatpush.bf16.msra.mxu2 %v6269_v30 }
 0x968   : > { %v4125_v10 = vld [vmem:[#allocation2 + $0x58] sm:$0xf]  ;;  %v3741_v59 = vmax.f32 %v3711_v56, 0.0  ;;  %v4528_v21 = vpop.permute.xlu0 %4527  ;;  %4637 = vrot.lane.b32.xlu1 %v10303_v54, %s6428_s19 }
 0x969   : > { %v4406_v27 = vrot.slane %v4125_v10, 5  ;;  %v4314_v2 = vshll.u32 %v4125_v10, 16  ;;  %v4318_v47 = vshrl.u32 %v4125_v10, 16  ;;  %v4668_v4 = vsel %vm4665_vm13, %v6251_v20, %v4528_v21 }
 0x96a   : > { %4539 = vrot.lane.b32.xlu0 %v10296_v34, %s6429_s20  ;;  %v4056_v63 = vsel %vm10259_vm0, %v3741_v59, 0.0  ;;  %v4692_v12 = vsel %vm4690_vm4, %v4668_v4, %v4568_v48  ;;  %v4326_v0 = vrot.slane %v4324_v42, 5  ;;  %v4071_v21 = vstv %s6100_s11 }
 0x96b   : > { %v4407_v46 = vsel %vm9770_vm8, %v6108_v36, %v4406_v27  ;;  %v4408_v62 = vrot.slane %v4406_v27, 4  ;;  %v4059_v7 = vpack.c.bf16 %v4056_v63, %v4056_v63  ;;  %v4709_v22 = vsel %vm4707_vm10, %v4692_v12, %v4587_v43  ;;  %6281 = vmatpush.bf16.msrb.mxu2 %v10116_v26 }
 0x96c   : > { %v4316_v11 = vrot.slane %v4314_v2, 5  ;;  %4976 = vmatmul.bf16.vlgmr.msra.gmra.mxu1 %v4709_v22  ;;  %v4320_v57 = vrot.slane %v4318_v47, 4  ;;  %v4557_v45 = vunpack.c.l.b16 %v4407_v46  ;;  %v4127_v17 = vld [vmem:[#allocation2 + $0x60] sm:$0xf]  ;;  %vm10369_vm12 = vcmp.eq.s32.totalorder %v4071_v21, 1 }
 0x96d   : > { %v4410_v39 = vsel %vm9770_vm8, %v4408_v62, %v4409_v16  ;;  %4063 = vst.msk [vmem:[#allocation2 + $0x64] sm:$0xf] %vm3781_vm5, %v4059_v7  ;;  %v3713_v9 = vpop.f32.mrf.mxu0  ;;  %v4412_v56 = vshrl.u32 %v4127_v17, 16  ;;  %v4415_v20 = vshll.u32 %v4127_v17, 16  ;;  %vm4073_vm15 = vmand %vm10369_vm12, %vm3749_vm14 }
 0x96e   : > { %v4558_v52 = vunpack.c.l.b16 %v4410_v39  ;;  %v3714_v37 = vadd.f32 %v10236_v40, %v3713_v9  ;;  %v4321_v19 = vor.u32 %v4320_v57, %v4316_v11  ;;  %4596 = vrot.lane.b32.xlu2 %v10241_v24, %s6430_s9  ;;  %v4317_v31 = vsel %vm9784_vm9, %v4312_v38, %v4316_v11  ;;  %vm4075_vm14 = vmand %vm10369_vm12, %vm3754_vm6 }
 0x96f   : > { %v4517_v36 = vunpack.c.l.b16 %v4317_v31  ;;  %v4414_v2 = vrot.slane %v4412_v56, 4  ;;  %v4417_v26 = vrot.slane %v4415_v20, 5  ;;  %6283 = vmatpush.bf16.msrb.mxu2 %v10139_v55  ;;  %v6109_v11 = vrot.slane %v4127_v17, 9  ;;  %vm12628_vm6 = vmmov %vm12611_vm2 }
 0x970   : > { %v10344_v51 = vpack.c.b16 %v4558_v52, %v4557_v45  ;;  %v3742_v8 = vmax.f32 %v3714_v37, 0.0  ;;  %v4322_v14 = vrot.slane %v4321_v19, 4  ;;  %4579 = vrot.lane.b32.xlu1 %v10280_v15, %s6428_s19 }
 0x971   : > { %v4418_v62 = vor.u32 %v4417_v26, %v4414_v2 }
 0x972   : > { %6228 = vmatmul.msk.bf16.gmra.mxu3 %vm4665_vm13, %v10344_v51  ;;  %4620 = vrot.lane.b32.xlu0 %v10344_v51, %s6429_s20  ;;  %v4057_v61 = vsel %vm4048_vm11, %v3742_v8, 0.0  ;;  %v4327_v3 = vsel %vm9784_vm9, %v4322_v14, %v4326_v0  ;;  %v4085_v7 = vrot.slane %v3742_v8, 2  ;;  %vm12631_vm11 = vcmask 121856  }
 0x973   : > { %v4060_v10 = vpack.c.bf16 %v4057_v61, %v4057_v61  ;;  %v4518_v59 = vunpack.c.l.b16 %v4327_v3  ;;  %v4419_v45 = vrot.slane %v4418_v62, 4 }
 0x974   : > { %v4128_v27 = vld [vmem:[#allocation2 + $0x64] sm:$0xf] }
 0x975   : > { %4064 = vst.msk [vmem:[#allocation2 + $0x68] sm:$0x1] %vm12625_vm3, %v4060_v10  ;;  %v3715_v47 = vpop.f32.mrf.mxu0  ;;  %v10364_v48 = vpack.c.b16 %v4518_v59, %v4517_v36  ;;  %v4421_v4 = vshll.u32 %v4128_v27, 16  ;;  %v4425_v16 = vshrl.u32 %v4128_v27, 16  ;;  %v10373_v12 = vld [vmem:[#allocation2 + $0x60] sm:$0xff]  ;;  %v4440_v46 = vrot.slane %v4128_v27, 5 }
 0x976   : > { %v3716_v15 = vadd.f32 %v10236_v40, %v3715_v47 }
 0x977   : > { %4656 = vrot.lane.b32.xlu2 %v10364_v48, %s6430_s9  ;;  %v4423_v58 = vrot.slane %v4421_v4, 5  ;;  %v4427_v43 = vrot.slane %v4425_v16, 4  ;;  %v4441_v9 = vsel %vm9770_vm8, %v6109_v11, %v4440_v46  ;;  %v4442_v38 = vrot.slane %v4440_v46, 4 }
 0x978   : > { %v3743_v63 = vmax.f32 %v3716_v15, 0.0  ;;  %v4647_v55 = vpop.permute.xlu2 %4646  ;;  %4639 = vrot.lane.b32.xlu1 %v10373_v12, %s6428_s19  ;;  %v4605_v3 = vunpack.c.l.b16 %v4441_v9 }
 0x979   : > { %v4428_v30 = vor.u32 %v4427_v43, %v4423_v58  ;;  %v4424_v8 = vsel %vm9784_vm9, %v4419_v45, %v4423_v58 }
 0x97a   : > { %4541 = vrot.lane.b32.xlu0 %v10364_v48, %s6429_s20  ;;  %v4086_v22 = vrot.slane %v3743_v63, 2  ;;  %v4602_v21 = vunpack.c.l.b16 %v4424_v8 }
 0x97b   : > { %v4429_v56 = vrot.slane %v4428_v30, 4  ;;  %v6377_v30 = vld [vmem:[#allocation2 + $0xc] sm:$0xff] }
 0x97c   : > { %v4609_v42 = vpop.permute.xlu0 %4608  ;;  %v4087_v39 = vsel %vm3648_vm1, %v4085_v7, %v4086_v22  ;;  %v4129_v57 = vld [vmem:[#allocation2 + $0x68] sm:$0x1] }
 0x97d   : > { %v4093_v52 = vsel %vm4073_vm15, %v4087_v39, 0.0  ;;  %v4443_v37 = vrot.slane %v4129_v57, 5  ;;  %v4431_v19 = vshll.u32 %v4129_v57, 16  ;;  %v4734_v2 = vsel %vm4665_vm13, %v9921_v50, %v4609_v42  ;;  %vm12634_vm15 = vmmov %vm12631_vm11 }
 0x97e   : > { %v3718_v31 = vpop.f32.mrf.mxu0  ;;  %v4096_v0 = vpack.c.bf16 %v4093_v52, %v4093_v52 }
 0x97f   : > { %4598 = vrot.lane.b32.xlu2 %v10303_v54, %s6430_s9  ;;  %v3719_v17 = vadd.f32 %v10236_v40, %v3718_v31  ;;  %v4444_v14 = vsel %vm9770_vm8, %v4442_v38, %v4443_v37  ;;  %v4433_v20 = vrot.slane %v4431_v19, 5 }
 0x980   : > { %4100 = vst.msk [vmem:[#allocation2 + $0x6c] sm:$0xf] %vm3781_vm5, %v4096_v0  ;;  %v4589_v61 = vpop.permute.xlu2 %4588  ;;  %v4606_v10 = vunpack.c.l.b16 %v4444_v14  ;;  %4581 = vrot.lane.b32.xlu1 %v10344_v51, %s6428_s19 }
 0x981   : > { %v3744_v36 = vmax.f32 %v3719_v17, 0.0  ;;  %v4434_v59 = vsel %vm9784_vm9, %v4429_v56, %v4433_v20 }
 0x982   : > { %v4607_v40 = vpack.c.b16 %v4606_v10, %v4605_v3  ;;  %v4603_v27 = vunpack.c.l.b16 %v4434_v59  ;;  %v4628_v4 = vpop.permute.xlu1 %4627 }
 0x983   : > { %v4088_v26 = vrot.slane %v3744_v36, 2  ;;  %v4757_v16 = vsel %vm4690_vm4, %v4734_v2, %v4628_v4 }
 0x984   : > { %v4530_v47 = vpop.permute.xlu0 %4529  ;;  %4622 = vrot.lane.b32.xlu0 %v4607_v40, %s6429_s20  ;;  %6229 = vmatmul.msk.bf16.gmra.mxu3 %vm4665_vm13, %v4607_v40  ;;  %v10407_v15 = vpack.c.b16 %v4603_v27, %v4602_v21  ;;  %v4773_v43 = vsel %vm4707_vm10, %v4757_v16, %v4647_v55 }
 0x985   : > { %v4089_v58 = vsel %vm3648_vm1, %v4086_v22, %v4088_v26  ;;  %v4095_v51 = vsel %vm4075_vm14, %v4088_v26, 0.0  ;;  %5025 = vmatmul.bf16.vlgmr.msra.gmra.mxu2 %v4773_v43  ;;  %v4671_v55 = vsel %vm4665_vm13, %v6377_v30, %v4530_v47 }
 0x986   : > { %v4094_v63 = vsel %vm10369_vm12, %v4089_v58, 0.0  ;;  %v4098_v50 = vpack.c.bf16 %v4095_v51, %v4095_v51  ;;  %v3720_v46 = vpop.f32.mrf.mxu0 }
 0x987   : > { %v4097_v62 = vpack.c.bf16 %v4094_v63, %v4094_v63  ;;  %4658 = vrot.lane.b32.xlu2 %v10407_v15, %s6430_s9  ;;  %v4130_v7 = vld [vmem:[#allocation2 + $0x6c] sm:$0xf] }
 0x988   : > { %4102 = vst.msk [vmem:[#allocation2 + $0x74] sm:$0x1] %vm12628_vm6, %v4098_v50  ;;  %v4446_v11 = vshrl.u32 %v4130_v7, 16  ;;  %v4449_v22 = vshll.u32 %v4130_v7, 16  ;;  %v6110_v31 = vrot.slane %v4130_v7, 9 }
 0x989   : > { %4101 = vst.msk [vmem:[#allocation2 + $0x70] sm:$0xf] %vm3781_vm5, %v4097_v62  ;;  %v4649_v42 = vpop.permute.xlu2 %4648 }
 0x98a   : > { %v4570_v39 = vpop.permute.xlu1 %4569  ;;  %v4448_v45 = vrot.slane %v4446_v11, 4  ;;  %v4451_v52 = vrot.slane %v4449_v22, 5 }
 0x98b   : > { %v4694_v57 = vsel %vm4690_vm4, %v4671_v55, %v4570_v39 }
 0x98c   : > { %v4611_v33 = vpop.permute.xlu0 %4610  ;;  %v4712_v9 = vsel %vm4707_vm10, %v4694_v57, %v4589_v61  ;;  %v4452_v8 = vor.u32 %v4451_v52, %v4448_v45 }
 0x98d   : > { %4981 = vmatmul.bf16.gmra.mxu1 %v4712_v9  ;;  %v4737_v56 = vsel %vm4665_vm13, %v9962_v53, %v4611_v33 }
 0x98e   : > { %v4453_v26 = vrot.slane %v4452_v8, 4 }
 0x98f   : > { %4600 = vrot.lane.b32.xlu2 %v10373_v12, %s6430_s9  ;;  %v4132_v38 = vld [vmem:[#allocation2 + $0x74] sm:$0x1] }
 0x990   : > { %v6260_v37 = vld [vmem:[#allocation2 + $0x6c] sm:$0xff]  ;;  %v4477_v20 = vrot.slane %v4132_v38, 5  ;;  %v4465_v61 = vshll.u32 %v4132_v38, 16 }
 0x991   : > { %v4131_v19 = vld [vmem:[#allocation2 + $0x70] sm:$0xf]  ;;  %4641 = vrot.lane.b32.xlu1 %v6260_v37, %s6428_s19  ;;  %v4591_v27 = vpop.permute.xlu2 %4590 }
 0x992   : > { %v4474_v0 = vrot.slane %v4131_v19, 5  ;;  %v4455_v17 = vshll.u32 %v4131_v19, 16  ;;  %v4459_v14 = vshrl.u32 %v4131_v19, 16  ;;  %v4630_v3 = vpop.permute.xlu1 %4629  ;;  %v4467_v43 = vrot.slane %v4465_v61, 5 }
 0x993   : > { %v4759_v21 = vsel %vm4690_vm4, %v4737_v56, %v4630_v3 }
 0x994   : > { %v4475_v10 = vsel %vm9770_vm8, %v6110_v31, %v4474_v0  ;;  %v4476_v12 = vrot.slane %v4474_v0, 4  ;;  %v4457_v36 = vrot.slane %v4455_v17, 5  ;;  %v4461_v59 = vrot.slane %v4459_v14, 4  ;;  %v4532_v40 = vpop.permute.xlu0 %4531 }
 0x995   : > { %v4776_v2 = vsel %vm4707_vm10, %v4759_v21, %v4649_v42  ;;  %v4662_v4 = vunpack.c.l.b16 %v4475_v10  ;;  %v4674_v7 = vsel %vm4665_vm13, %v6378_v49, %v4532_v40 }
 0x996   : > { %v4478_v53 = vsel %vm9770_vm8, %v4476_v12, %v4477_v20  ;;  %v4462_v47 = vor.u32 %v4461_v59, %v4457_v36  ;;  %5030 = vmatmul.bf16.gmra.mxu2 %v4776_v2  ;;  %v4458_v58 = vsel %vm9784_vm9, %v4453_v26, %v4457_v36 }
 0x997   : > { %v4663_v16 = vunpack.c.l.b16 %v4478_v53  ;;  %v4643_v46 = vunpack.c.l.b16 %v4458_v58 }
 0x998   : > { %v4463_v51 = vrot.slane %v4462_v47, 4 }
 0x999   : > { %v4664_v63 = vpack.c.b16 %v4663_v16, %v4662_v4  ;;  %v4651_v33 = vpop.permute.xlu2 %4650 }
 0x99a   : > { %v4468_v50 = vsel %vm9784_vm9, %v4463_v51, %v4467_v43  ;;  %v4572_v11 = vpop.permute.xlu1 %4571 }
 0x99b   : > { %6230 = vmatmul.msk.bf16.gmra.mxu3 %vm4665_vm13, %v4664_v63  ;;  %v4644_v62 = vunpack.c.l.b16 %v4468_v50  ;;  %v4696_v22 = vsel %vm4690_vm4, %v4674_v7, %v4572_v11 }
 0x99c   : > { %v4715_v30 = vsel %vm4707_vm10, %v4696_v22, %v4591_v27  ;;  %v4613_v55 = vpop.permute.xlu0 %4612 }
 0x99d   : > { %v4645_v42 = vpack.c.b16 %v4644_v62, %v4643_v46  ;;  %4986 = vmatmul.bf16.gmra.mxu1 %v4715_v30  ;;  %v4740_v44 = vsel %vm4665_vm13, %v10016_v6, %v4613_v55 }
 0x99f   : > { %4660 = vrot.lane.b32.xlu2 %v4645_v42, %s6430_s9 }
 0x9a1   : > { %v4593_v52 = vpop.permute.xlu2 %4592 }
 0x9a2   : > { %v4632_v39 = vpop.permute.xlu1 %4631 }
 0x9a3   : > { %v4761_v57 = vsel %vm4690_vm4, %v4740_v44, %v4632_v39 }
 0x9a4   : > { %v4779_v9 = vsel %vm4707_vm10, %v4761_v57, %v4651_v33  ;;  %v4534_v45 = vpop.permute.xlu0 %4533 }
 0x9a5   : > { %v4677_v38 = vsel %vm4665_vm13, %v9969_v35, %v4534_v45 }
 0x9a6   : > { %5035 = vmatmul.bf16.gmra.mxu2 %v4779_v9 }
 0x9aa   : > { %v4574_v37 = vpop.permute.xlu1 %4573 }
 0x9ab   : > { %v4698_v19 = vsel %vm4690_vm4, %v4677_v38, %v4574_v37  ;;  %v10483_v38 = vld [vmem:[%s11152_s4] ss:$0 sm:$0xff] }
 0x9ac   : > { %v4718_v31 = vsel %vm4707_vm10, %v4698_v19, %v4593_v52 }
 0x9ad   : > { %4991 = vmatmul.bf16.gmra.mxu1 %v4718_v31 }
 0x9ae   : > { %v4615_v0 = vpop.permute.xlu0 %4614 }
 0x9af   : > { %v4743_v17 = vsel %vm4665_vm13, %v10085_v60, %v4615_v0 }
 0x9b0   : > { %v4653_v8 = vpop.permute.xlu2 %4652 }
 0x9b6   : > { %v4536_v14 = vpop.permute.xlu0 %4535 }
 0x9b7   : > { %v4680_v3 = vsel %vm4665_vm13, %v10027_v32, %v4536_v14 }
 0x9b8   : > { %v4595_v6 = vpop.permute.xlu2 %4594 }
 0x9ba   : > { %v4634_v56 = vpop.permute.xlu1 %4633 }
 0x9bb   : > { %v4763_v20 = vsel %vm4690_vm4, %v4743_v17, %v4634_v56 }
 0x9bc   : > { %v4782_v61 = vsel %vm4707_vm10, %v4763_v20, %v4653_v8 }
 0x9bd   : > { %5040 = vmatmul.bf16.gmra.mxu2 %v4782_v61 }
 0x9c0   : > { %v4655_v35 = vpop.permute.xlu2 %4654 }
 0x9c2   : > { %v4576_v12 = vpop.permute.xlu1 %4575 }
 0x9c3   : > { %v4700_v36 = vsel %vm4690_vm4, %v4680_v3, %v4576_v12 }
 0x9c4   : > { %v4617_v10 = vpop.permute.xlu0 %4616  ;;  %v4721_v59 = vsel %vm4707_vm10, %v4700_v36, %v4595_v6 }
 0x9c5   : > { %4996 = vmatmul.bf16.gmra.mxu1 %v4721_v59  ;;  %v4746_v60 = vsel %vm4665_vm13, %v10228_v1, %v4617_v10 }
 0x9c8   : > { %v4597_v2 = vpop.permute.xlu2 %4596 }
 0x9ca   : > { %v4636_v21 = vpop.permute.xlu1 %4635 }
 0x9cb   : > { %v4765_v27 = vsel %vm4690_vm4, %v4746_v60, %v4636_v21 }
 0x9cc   : > { %v4538_v40 = vpop.permute.xlu0 %4537  ;;  %v4785_v53 = vsel %vm4707_vm10, %v4765_v27, %v4655_v35 }
 0x9cd   : > { %5045 = vmatmul.bf16.gmra.mxu2 %v4785_v53  ;;  %v4683_v32 = vsel %vm4665_vm13, %v10148_v25, %v4538_v40 }
 0x9d1   : > { %v4657_v58 = vpop.permute.xlu2 %4656 }
 0x9d2   : > { %v4578_v47 = vpop.permute.xlu1 %4577 }
 0x9d3   : > { %v4702_v4 = vsel %vm4690_vm4, %v4683_v32, %v4578_v47  ;;  %v6280_v47 = vld [vmem:[%s11153_s5 + $0x8] sm:$0xff] }
 0x9d4   : > { %v4619_v26 = vpop.permute.xlu0 %4618  ;;  %v4724_v16 = vsel %vm4707_vm10, %v4702_v4, %v4597_v2  ;;  %5189 = vmatpush.bf16.msrb.mxu3 %v6280_v47 }
 0x9d5   : > { %5001 = vmatmul.bf16.gmra.mxu1 %v4724_v16  ;;  %v4749_v1 = vsel %vm4665_vm13, %v10296_v34, %v4619_v26 }
 0x9d9   : > { %v4599_v46 = vpop.permute.xlu2 %4598 }
 0x9da   : > { %v4638_v51 = vpop.permute.xlu1 %4637 }
 0x9db   : > { %v4767_v63 = vsel %vm4690_vm4, %v4749_v1, %v4638_v51 }
 0x9dc   : > { %v4540_v43 = vpop.permute.xlu0 %4539  ;;  %v4788_v50 = vsel %vm4707_vm10, %v4767_v63, %v4657_v58 }
 0x9dd   : > { %5050 = vmatmul.bf16.gmra.mxu2 %v4788_v50  ;;  %v4686_v25 = vsel %vm4665_vm13, %v10241_v24, %v4540_v43 }
 0x9e1   : > { %v4659_v22 = vpop.permute.xlu2 %4658 }
 0x9e2   : > { %v4580_v62 = vpop.permute.xlu1 %4579 }
 0x9e3   : > { %v4704_v49 = vsel %vm4690_vm4, %v4686_v25, %v4580_v62 }
 0x9e4   : > { %v4727_v7 = vsel %vm4707_vm10, %v4704_v49, %v4599_v46  ;;  %v4621_v11 = vpop.permute.xlu0 %4620 }
 0x9e5   : > { %5006 = vmatmul.bf16.gmra.mxu1 %v4727_v7  ;;  %v4752_v34 = vsel %vm4665_vm13, %v10364_v48, %v4621_v11  ;;  %v5095_v50 = vpop.f32.mrf.mxu3 }
 0x9e9   : > { %v4601_v39 = vpop.permute.xlu2 %4600  ;;  %v4977_v45 = vpop.f32.mrf.mxu1 }
 0x9ea   : > { %v4640_v42 = vpop.permute.xlu1 %4639  ;;  %v4978_v8 = vadd.f32 %v10483_v38, %v4977_v45 }
 0x9eb   : > { %v4769_v30 = vsel %vm4690_vm4, %v4752_v34, %v4640_v42 }
 0x9ec   : > { %v4791_v55 = vsel %vm4707_vm10, %v4769_v30, %v4659_v22  ;;  %v4542_v33 = vpop.permute.xlu0 %4541 }
 0x9ed   : > { %5055 = vmatmul.bf16.gmra.mxu2 %v4791_v55  ;;  %v4689_v24 = vsel %vm4665_vm13, %v10303_v54, %v4542_v33  ;;  %v5097_v49 = vpop.f32.mrf.mxu3 }
 0x9f1   : > { %v4979_v48 = vpop.f32.mrf.mxu1 }
 0x9f2   : > { %v4582_v44 = vpop.permute.xlu1 %4581  ;;  %v4980_v56 = vadd.f32 %v10483_v38, %v4979_v48 }
 0x9f3   : > { %v4706_v57 = vsel %vm4690_vm4, %v4689_v24, %v4582_v44  ;;  %v6279_v24 = vld [vmem:[%s11153_s5] sm:$0xff] }
 0x9f4   : > { %v4730_v9 = vsel %vm4707_vm10, %v4706_v57, %v4601_v39  ;;  %5190 = vmatpush.bf16.msrb.mxu3 %v6279_v24 }
 0x9f5   : > { %5011 = vmatmul.bf16.gmra.mxu1 %v4730_v9  ;;  %v5100_v44 = vpop.f32.mrf.mxu3 }
 0x9f6   : > { %v4623_v52 = vpop.permute.xlu0 %4622 }
 0x9f7   : > { %v4755_v37 = vsel %vm4665_vm13, %v10407_v15, %v4623_v52 }
 0x9f9   : > { %v4661_v54 = vpop.permute.xlu2 %4660 }
 0xa03   : > { %v4642_v19 = vpop.permute.xlu1 %4641 }
 0xa04   : > { %v4771_v31 = vsel %vm4690_vm4, %v4755_v37, %v4642_v19  ;;  %v5102_v37 = vpop.f32.mrf.mxu3  ;;  %vm5843_vm4 = vcmask 130048  }
 0xa05   : > { %v4794_v0 = vsel %vm4707_vm10, %v4771_v31, %v4661_v54  ;;  %6223 = vmatmul.msk.bf16.vlgmr.msrb.gmra.mxu1 %vm4665_vm13, %v9951_v23  ;;  %vm12630_vm10 = vcmask 72704  }
 0xa06   : > { %5060 = vmatmul.bf16.gmra.mxu2 %v4794_v0  ;;  %vm12633_vm12 = vmmov %vm12630_vm10 }
 0xa07   : > { %vm12636_vm6 = vmmov %vm12630_vm10 }
 0xa08   : > { %v5026_v6 = vpop.f32.mrf.mxu2 }
 0xa09   : > { %v10492_v17 = vadd.f32 %v5026_v6, %v4978_v8 }
 0xa0a   : > { %v4982_v14 = vpop.f32.mrf.mxu1 }
 0xa0b   : > { %v4983_v35 = vadd.f32 %v10483_v38, %v4982_v14 }
 0xa10   : > { %v5028_v20 = vpop.f32.mrf.mxu2 }
 0xa11   : > { %v10495_v15 = vadd.f32 %v5028_v20, %v4980_v56 }
 0xa12   : > { %v4984_v61 = vpop.f32.mrf.mxu1 }
 0xa13   : > { %v4985_v12 = vadd.f32 %v10483_v38, %v4984_v61  ;;  %v5105_v61 = vpop.f32.mrf.mxu3 }
 0xa16   : > { %6224 = vmatmul.msk.bf16.vlgmr.msrb.gmra.mxu2 %vm4665_vm13, %v10001_v5 }
 0xa19   : > { %v5031_v3 = vpop.f32.mrf.mxu2 }
 0xa1a   : > { %v10500_v23 = vadd.f32 %v5031_v3, %v4983_v35  ;;  %v4987_v10 = vpop.f32.mrf.mxu1 }
 0xa1b   : > { %v4988_v40 = vadd.f32 %v10483_v38, %v4987_v10 }
 0xa21   : > { %v5033_v36 = vpop.f32.mrf.mxu2 }
 0xa22   : > { %v10503_v59 = vadd.f32 %v5033_v36, %v4985_v12  ;;  %v4989_v60 = vpop.f32.mrf.mxu1 }
 0xa23   : > { %v4990_v5 = vadd.f32 %v10483_v38, %v4989_v60 }
 0xa26   : > { %6225 = vmatmul.msk.bf16.gmra.mxu2 %vm4665_vm13, %v10079_v41 }
 0xa29   : > { %v5036_v21 = vpop.f32.mrf.mxu2 }
 0xa2a   : > { %v10508_v27 = vadd.f32 %v5036_v21, %v4988_v40  ;;  %v4992_v2 = vpop.f32.mrf.mxu1  ;;  %v5107_v21 = vpop.f32.mrf.mxu3 }
 0xa2b   : > { %v4993_v41 = vadd.f32 %v10483_v38, %v4992_v2 }
 0xa31   : > { %v5038_v53 = vpop.f32.mrf.mxu2 }
 0xa32   : > { %v10511_v26 = vadd.f32 %v5038_v53, %v4990_v5  ;;  %v4994_v32 = vpop.f32.mrf.mxu1  ;;  %v5261_v53 = vcvt.s32.f32 %v9695_v13 }
 0xa33   : > { %v4995_v1 = vadd.f32 %v10483_v38, %v4994_v32 }
 0xa36   : > { %6226 = vmatmul.msk.bf16.gmra.mxu2 %vm4665_vm13, %v10195_v29 }
 0xa40   : > { %v5041_v4 = vpop.f32.mrf.mxu2 }
 0xa41   : > { %v10519_v16 = vadd.f32 %v5041_v4, %v4993_v41  ;;  %v5277_v41 = vadd.f32 0.5, %v5261_v53 }
 0xa42   : > { %v4997_v58 = vpop.f32.mrf.mxu1 }
 0xa43   : > { %v4998_v29 = vadd.f32 %v10483_v38, %v4997_v58  ;;  %v5293_v4 = vmul.f32 0.0625, %v5277_v41  ;;  %v3747_v41 = vadd.s32 8, %v9695_v13 }
 0xa48   : > { %v5043_v51 = vpop.f32.mrf.mxu2 }
 0xa49   : > { %v10522_v43 = vadd.f32 %v5043_v51, %v4995_v1  ;;  %v10541_v1 = vstv %s5357_s22  ;;  %v10544_v51 = vand.u32 127, %v3745_v28  ;;  %v5248_v28 = vadd.s32 24, %v9695_v13 }
 0xa4a   : > { %v4999_v63 = vpop.f32.mrf.mxu1 }
 0xa4b   : > { %v5000_v7 = vadd.f32 %v10483_v38, %v4999_v63  ;;  %v5309_v63 = vfloor.f32 %v5293_v4  ;;  %vm5377_vm1 = vcmp.lt.s32.totalorder %v10544_v51, 3  ;;  %vm5396_vm8 = vcmp.eq.s32.totalorder %v10544_v51, 1 }
 0xa4c   : > { %vm5397_vm9 = vcmp.eq.s32.totalorder %v10544_v51, 4  ;;  %vm5400_vm0 = vcmp.eq.s32.totalorder %v10544_v51, 2  ;;  %vm5401_vm2 = vcmp.eq.s32.totalorder %v10544_v51, 5 }
 0xa4d   : > { %vm5398_vm5 = vmor %vm5396_vm8, %vm5397_vm9 }
 0xa4e   : > { %vm5402_vm7 = vmor %vm5400_vm0, %vm5401_vm2 }
 0xa4f   : > { %vm12638_vm8 = vmmov %vm12631_vm11 }
 0xa50   : > { %v5046_v46 = vpop.f32.mrf.mxu2  ;;  %vm12639_vm9 = vmmov %vm12636_vm6 }
 0xa51   : > { %v5047_v25 = vadd.f32 %v5046_v46, %v4998_v29  ;;  %v5325_v29 = vmul.f32 16.0, %v5309_v63  ;;  %v5359_v46 = vadd.f32 %v10541_v1, %v5309_v63  ;;  %vm12642_vm2 = vmmov %vm12636_vm6 }
 0xa52   : > { %v5002_v62 = vpop.f32.mrf.mxu1 }
 0xa53   : > { %v5096_v22 = vadd.f32 %v5095_v50, %v5047_v25  ;;  %v5003_v57 = vadd.f32 %v10483_v38, %v5002_v62  ;;  %v5341_v25 = vsub.f32 %v5261_v53, %v5325_v29 }
 0xa55   : > { %v5123_v55 = vmax.f32 %v5096_v22, 0.0  ;;  %v5110_v22 = vpop.f32.mrf.mxu3 }
 0xa58   : > { %v5048_v11 = vpop.f32.mrf.mxu2 }
 0xa59   : > { %v5049_v34 = vadd.f32 %v5048_v11, %v5000_v7  ;;  %v6431_v7 = vmov 4.0  }
 0xa5a   : > { %v5004_v30 = vpop.f32.mrf.mxu1  ;;  %v5399_v11 = vsel %vm5398_vm5, 8.0, %v6431_v7  ;;  %vm12640_vm5 = vmmov %vm12638_vm8 }
 0xa5b   : > { %v5098_v42 = vadd.f32 %v5097_v49, %v5049_v34  ;;  %v5005_v48 = vadd.f32 %v10483_v38, %v5004_v30  ;;  %v5380_v49 = vsel %vm5377_vm1, %v5341_v25, %v5359_v46  ;;  %v5264_v30 = vcvt.s32.f32 %v5248_v28 }
 0xa5c   : > { %5440 = vrot.lane.b32.xlu1 %v5380_v49, %s6419_s16 }
 0xa5d   : > { %v5124_v33 = vmax.f32 %v5098_v42, 0.0  ;;  %v5403_v42 = vsel %vm5402_vm7, 16.0, %v5399_v11  ;;  %vm12643_vm7 = vmmov %vm12640_vm5 }
 0xa5e   : > { %5405 = vrot.lane.b32.xlu0 %v5403_v42, %s6419_s16 }
 0xa5f   : > { %v10529_v39 = vpack.c.bf16 %v5124_v33, %v5123_v55 }
 0xa60   : > { %v5051_v9 = vpop.f32.mrf.mxu2 }
 0xa61   : > { %v5052_v45 = vadd.f32 %v5051_v9, %v5003_v57 }
 0xa62   : > { %v5007_v52 = vpop.f32.mrf.mxu1 }
 0xa63   : > { %v5101_v54 = vadd.f32 %v5100_v44, %v5052_v45  ;;  %v5008_v56 = vadd.f32 %v10483_v38, %v5007_v52  ;;  %v5280_v44 = vadd.f32 0.5, %v5264_v30 }
 0xa65   : > { %v5125_v6 = vmax.f32 %v5101_v54, 0.0  ;;  %v5296_v9 = vmul.f32 0.0625, %v5280_v44 }
 0xa68   : > { %v5053_v19 = vpop.f32.mrf.mxu2 }
 0xa69   : > { %v5054_v31 = vadd.f32 %v5053_v19, %v5005_v48  ;;  %v5312_v48 = vfloor.f32 %v5296_v9 }
 0xa6a   : > { %v5009_v0 = vpop.f32.mrf.mxu1 }
 0xa6b   : > { %v5103_v8 = vadd.f32 %v5102_v37, %v5054_v31  ;;  %v5010_v12 = vadd.f32 %v10483_v38, %v5009_v0  ;;  %v5328_v31 = vmul.f32 16.0, %v5312_v48  ;;  %v5362_v0 = vadd.f32 %v10541_v1, %v5312_v48 }
 0xa6c   : > { %v5249_v48 = vadd.s32 32, %v9695_v13 }
 0xa6d   : > { %v5126_v14 = vmax.f32 %v5103_v8, 0.0 }
 0xa6f   : > { %v10534_v20 = vpack.c.bf16 %v5126_v14, %v5125_v6  ;;  %v5112_v6 = vpop.f32.mrf.mxu3  ;;  %v5344_v14 = vsub.f32 %v5264_v30, %v5328_v31 }
 0xa70   : > { %v5056_v35 = vpop.f32.mrf.mxu2 }
 0xa71   : > { %v5057_v3 = vadd.f32 %v5056_v35, %v5008_v56 }
 0xa72   : > { %v5012_v10 = vpop.f32.mrf.mxu1 }
 0xa73   : > { %v5106_v60 = vadd.f32 %v5105_v61, %v5057_v3  ;;  %v5013_v62 = vadd.f32 %v10483_v38, %v5012_v10  ;;  %v5263_v10 = vcvt.s32.f32 %v9727_v18  ;;  %v5262_v18 = vcvt.s32.f32 %v3747_v41 }
 0xa75   : > { %v5127_v32 = vmax.f32 %v5106_v60, 0.0 }
 0xa78   : > { %v5058_v36 = vpop.f32.mrf.mxu2 }
 0xa79   : > { %v5059_v40 = vadd.f32 %v5058_v36, %v5010_v12  ;;  %v5279_v12 = vadd.f32 0.5, %v5263_v10 }
 0xa7a   : > { %v5014_v5 = vpop.f32.mrf.mxu1 }
 0xa7b   : > { %v5108_v2 = vadd.f32 %v5107_v21, %v5059_v40  ;;  %v5015_v37 = vadd.f32 %v10483_v38, %v5014_v5  ;;  %v5295_v60 = vmul.f32 0.0625, %v5279_v12 }
 0xa7d   : > { %v5128_v47 = vmax.f32 %v5108_v2, 0.0  ;;  %v5311_v5 = vfloor.f32 %v5295_v60 }
 0xa7f   : > { %v10539_v58 = vpack.c.bf16 %v5128_v47, %v5127_v32  ;;  %v5327_v32 = vmul.f32 16.0, %v5311_v5  ;;  %v5361_v47 = vadd.f32 %v10541_v1, %v5311_v5 }
 0xa81   : > { %v5343_v63 = vsub.f32 %v5263_v10, %v5327_v32 }
 0xa82   : > { %v5075_v50 = vpop.f32.mrf.mxu1 }
 0xa83   : > { %v5076_v55 = vadd.f32 %v5075_v50, %v10492_v17  ;;  %v5250_v50 = vadd.s32 40, %v9695_v13 }
 0xa85   : > { %v5115_v45 = vmax.f32 %v5076_v55, 0.0  ;;  %v5266_v46 = vcvt.s32.f32 %v5250_v50 }
 0xa87   : > { %v5282_v28 = vadd.f32 0.5, %v5266_v46 }
 0xa89   : > { %v5061_v34 = vpop.f32.mrf.mxu2  ;;  %v5298_v49 = vmul.f32 0.0625, %v5282_v28 }
 0xa8a   : > { %v5062_v33 = vadd.f32 %v5061_v34, %v5013_v62  ;;  %v5077_v24 = vpop.f32.mrf.mxu1 }
 0xa8b   : > { %v5078_v57 = vadd.f32 %v5077_v24, %v10495_v15  ;;  %v5383_v15 = vsel %vm5377_vm1, %v5344_v14, %v5362_v0  ;;  %v5314_v34 = vfloor.f32 %v5298_v49 }
 0xa8c   : > { %v5111_v8 = vadd.f32 %v5110_v22, %v5062_v33  ;;  %5446 = vrot.lane.b32.xlu1 %v5383_v15, %s6419_s16 }
 0xa8d   : > { %v5116_v52 = vmax.f32 %v5078_v57, 0.0  ;;  %v5330_v33 = vmul.f32 16.0, %v5314_v34  ;;  %v5364_v24 = vadd.f32 %v10541_v1, %v5314_v34 }
 0xa8e   : > { %v5129_v61 = vmax.f32 %v5111_v8, 0.0 }
 0xa8f   : > { %v5131_v19 = vpack.c.bf16 %v5116_v52, %v5115_v45  ;;  %v5346_v45 = vsub.f32 %v5266_v46, %v5330_v33 }
 0xa91   : > { %v5063_v54 = vpop.f32.mrf.mxu2  ;;  %6239 = vmatmul.msk.bf16.vlgmr.msrb.gmra.mxu3 %vm4665_vm13, %v5131_v19 }
 0xa92   : > { %v5064_v17 = vadd.f32 %v5063_v54, %v5015_v37  ;;  %v5265_v54 = vcvt.s32.f32 %v5249_v48 }
 0xa94   : > { %v5113_v56 = vadd.f32 %v5112_v6, %v5064_v17  ;;  %5536 = vrot.lane.b32.xlu1 %v5403_v42, %s6421_s18  ;;  %v5281_v0 = vadd.f32 0.5, %v5265_v54 }
 0xa96   : > { %v5130_v35 = vmax.f32 %v5113_v56, 0.0  ;;  %v5297_v17 = vmul.f32 0.0625, %v5281_v0 }
 0xa98   : > { %v10566_v38 = vpack.c.bf16 %v5130_v35, %v5129_v61  ;;  %v5313_v56 = vfloor.f32 %v5297_v17 }
 0xa99   : > { %v5080_v3 = vpop.f32.mrf.mxu2 }
 0xa9a   : > { %v5081_v36 = vadd.f32 %v5080_v3, %v10500_v23  ;;  %v5382_v23 = vsel %vm5377_vm1, %v5343_v63, %v5361_v47  ;;  %v5329_v10 = vmul.f32 16.0, %v5313_v56  ;;  %v5363_v12 = vadd.f32 %v10541_v1, %v5313_v56 }
 0xa9b   : > { %5444 = vrot.lane.b32.xlu0 %v5382_v23, %s6419_s16  ;;  %v5258_v56 = vadd.s32 104, %v9695_v13 }
 0xa9c   : > { %v5117_v2 = vmax.f32 %v5081_v36, 0.0 }
 0xaa1   : > { %v5082_v40 = vpop.f32.mrf.mxu2 }
 0xaa2   : > { %v5083_v21 = vadd.f32 %v5082_v40, %v10503_v59  ;;  %v5278_v59 = vadd.f32 0.5, %v5262_v18 }
 0xaa4   : > { %v5118_v53 = vmax.f32 %v5083_v21, 0.0  ;;  %v5294_v25 = vmul.f32 0.0625, %v5278_v59  ;;  %v5345_v21 = vsub.f32 %v5265_v54, %v5329_v10  ;;  %v5259_v10 = vadd.s32 112, %v9695_v13 }
 0xaa6   : > { %v5132_v4 = vpack.c.bf16 %v5118_v53, %v5117_v2  ;;  %v5310_v62 = vfloor.f32 %v5294_v25  ;;  %v5251_v53 = vadd.s32 48, %v9695_v13 }
 0xaa8   : > { %6240 = vmatmul.msk.bf16.gmra.mxu3 %vm4665_vm13, %v5132_v4  ;;  %v5326_v7 = vmul.f32 16.0, %v5310_v62  ;;  %v5360_v11 = vadd.f32 %v10541_v1, %v5310_v62  ;;  %v5267_v47 = vcvt.s32.f32 %v5251_v53 }
 0xaa9   : > { %v5085_v29 = vpop.f32.mrf.mxu2 }
 0xaaa   : > { %v5086_v22 = vadd.f32 %v5085_v29, %v10508_v27  ;;  %v5342_v30 = vsub.f32 %v5262_v18, %v5326_v7  ;;  %v5385_v27 = vsel %vm5377_vm1, %v5346_v45, %v5364_v24  ;;  %v5283_v4 = vadd.f32 0.5, %v5267_v47 }
 0xaab   : > { %5450 = vrot.lane.b32.xlu0 %v5385_v27, %s6419_s16 }
 0xaac   : > { %v5381_v44 = vsel %vm5377_vm1, %v5342_v30, %v5360_v11  ;;  %v5119_v57 = vmax.f32 %v5086_v22, 0.0  ;;  %v5299_v18 = vmul.f32 0.0625, %v5283_v4  ;;  %v5255_v11 = vadd.s32 80, %v9695_v13 }
 0xaad   : > { %5442 = vrot.lane.b32.xlu2 %v5381_v44, %s6419_s16  ;;  %v5256_v22 = vadd.s32 88, %v9695_v13 }
 0xaae   : > { %v5315_v50 = vfloor.f32 %v5299_v18  ;;  %v5271_v34 = vcvt.s32.f32 %v5255_v11 }
 0xab0   : > { %v5331_v46 = vmul.f32 16.0, %v5315_v50  ;;  %v5365_v25 = vadd.f32 %v10541_v1, %v5315_v50  ;;  %v5287_v30 = vadd.f32 0.5, %v5271_v34 }
 0xab1   : > { %v5087_v42 = vpop.f32.mrf.mxu2 }
 0xab2   : > { %v5088_v55 = vadd.f32 %v5087_v42, %v10511_v26  ;;  %v5252_v26 = vadd.s32 56, %v9695_v13  ;;  %v5347_v62 = vsub.f32 %v5267_v47, %v5331_v46  ;;  %v5272_v42 = vcvt.s32.f32 %v5256_v22  ;;  %v10653_v46 = vld [vmem:[%s11154_s6] ss:$0 sm:$0xff] }
 0xab3   : > { %v5303_v33 = vmul.f32 0.0625, %v5287_v30 }
 0xab4   : > { %v5120_v9 = vmax.f32 %v5088_v55, 0.0  ;;  %v5268_v19 = vcvt.s32.f32 %v5252_v26  ;;  %v5386_v7 = vsel %vm5377_vm1, %v5347_v62, %v5365_v25  ;;  %v5288_v55 = vadd.f32 0.5, %v5272_v42 }
 0xab5   : > { %v5319_v44 = vfloor.f32 %v5303_v33  ;;  %v5260_v25 = vadd.s32 120, %v9695_v13 }
 0xab6   : > { %v5133_v52 = vpack.c.bf16 %v5120_v9, %v5119_v57  ;;  %v5284_v31 = vadd.f32 0.5, %v5268_v19  ;;  %v5304_v24 = vmul.f32 0.0625, %v5288_v55 }
 0xab7   : > { %v5335_v9 = vmul.f32 16.0, %v5319_v44  ;;  %v5369_v45 = vadd.f32 %v10541_v1, %v5319_v44 }
 0xab8   : > { %6241 = vmatmul.msk.bf16.gmra.mxu3 %vm4665_vm13, %v5133_v52  ;;  %v5300_v8 = vmul.f32 0.0625, %v5284_v31  ;;  %v5320_v57 = vfloor.f32 %v5304_v24 }
 0xab9   : > { %v5090_v37 = vpop.f32.mrf.mxu2  ;;  %v5351_v26 = vsub.f32 %v5271_v34, %v5335_v9 }
 0xaba   : > { %v5091_v6 = vadd.f32 %v5090_v37, %v10519_v16  ;;  %v5316_v14 = vfloor.f32 %v5300_v8  ;;  %v5384_v16 = vsel %vm5377_vm1, %v5345_v21, %v5363_v12  ;;  %v5336_v52 = vmul.f32 16.0, %v5320_v57 }
 0xabb   : > { %5448 = vrot.lane.b32.xlu2 %v5384_v16, %s6419_s16  ;;  %v5370_v27 = vadd.f32 %v10541_v1, %v5320_v57  ;;  %v5390_v48 = vsel %vm5377_vm1, %v5351_v26, %v5369_v45 }
 0xabc   : > { %v5332_v35 = vmul.f32 16.0, %v5316_v14  ;;  %v5366_v3 = vadd.f32 %v10541_v1, %v5316_v14  ;;  %v5121_v36 = vmax.f32 %v5091_v6, 0.0 }
 0xabe   : > { %v5348_v40 = vsub.f32 %v5268_v19, %v5332_v35  ;;  %v5254_v19 = vadd.s32 72, %v9695_v13 }
 0xac0   : > { %v5387_v2 = vsel %vm5377_vm1, %v5348_v40, %v5366_v3  ;;  %v5270_v54 = vcvt.s32.f32 %v5254_v19 }
 0xac1   : > { %v5092_v15 = vpop.f32.mrf.mxu2  ;;  %5454 = vrot.lane.b32.xlu0 %v5387_v2, %s6419_s16 }
 0xac2   : > { %v5093_v61 = vadd.f32 %v5092_v15, %v10522_v43  ;;  %v5253_v43 = vadd.s32 64, %v9695_v13  ;;  %v5286_v31 = vadd.f32 0.5, %v5270_v54 }
 0xac3   : > { %5452 = vrot.lane.b32.xlu2 %v5386_v7, %s6419_s16  ;;  %v5276_v7 = vcvt.s32.f32 %v5260_v25 }
 0xac4   : > { %v5122_v60 = vmax.f32 %v5093_v61, 0.0  ;;  %v5269_v32 = vcvt.s32.f32 %v5253_v43  ;;  %v5302_v0 = vmul.f32 0.0625, %v5286_v31  ;;  %v5274_v61 = vcvt.s32.f32 %v5258_v56 }
 0xac5   : > { %v5292_v22 = vadd.f32 0.5, %v5276_v7 }
 0xac6   : > { %v5134_v5 = vpack.c.bf16 %v5122_v60, %v5121_v36  ;;  %v5285_v41 = vadd.f32 0.5, %v5269_v32  ;;  %v5318_v8 = vfloor.f32 %v5302_v0  ;;  %v5275_v60 = vcvt.s32.f32 %v5259_v10 }
 0xac8   : > { %6242 = vmatmul.msk.bf16.gmra.mxu3 %vm4665_vm13, %v5134_v5  ;;  %v5301_v63 = vmul.f32 0.0625, %v5285_v41  ;;  %v5334_v17 = vmul.f32 16.0, %v5318_v8  ;;  %v5368_v6 = vadd.f32 %v10541_v1, %v5318_v8  ;;  %v5291_v21 = vadd.f32 0.5, %v5275_v60 }
 0xac9   : > { %5460 = vrot.lane.b32.xlu0 %v5390_v48, %s6419_s16 }
 0xaca   : > { %v5317_v23 = vfloor.f32 %v5301_v63  ;;  %v5350_v14 = vsub.f32 %v5270_v54, %v5334_v17  ;;  %v5307_v2 = vmul.f32 0.0625, %v5291_v21 }
 0xacc   : > { %v5333_v29 = vmul.f32 16.0, %v5317_v23  ;;  %v5367_v59 = vadd.f32 %v10541_v1, %v5317_v23  ;;  %v5389_v15 = vsel %vm5377_vm1, %v5350_v14, %v5368_v6  ;;  %v5323_v16 = vfloor.f32 %v5307_v2 }
 0xacd   : > { %5458 = vrot.lane.b32.xlu2 %v5389_v15, %s6419_s16 }
 0xace   : > { %v5349_v28 = vsub.f32 %v5269_v32, %v5333_v29  ;;  %v5339_v43 = vmul.f32 16.0, %v5323_v16  ;;  %v5373_v53 = vadd.f32 %v10541_v1, %v5323_v16  ;;  %v10647_v18 = vpop.permute.xlu1 %5440 }
 0xad0   : > { %v5388_v49 = vsel %vm5377_vm1, %v5349_v28, %v5367_v59  ;;  %v5355_v47 = vsub.f32 %v5275_v60, %v5339_v43 }
 0xad1   : > { %5456 = vrot.lane.b32.xlu1 %v5388_v49, %s6419_s16 }
 0xad2   : > { %v5394_v4 = vsel %vm5377_vm1, %v5355_v47, %v5373_v53 }
 0xad8   : > { %6243 = vmatmul.msk.bf16.gmra.mxu3 %vm4665_vm13, %v10529_v39  ;;  %v5352_v39 = vsub.f32 %v5272_v42, %v5336_v52  ;;  %v5308_v42 = vmul.f32 0.0625, %v5292_v22 }
 0xada   : > { %v5391_v37 = vsel %vm5377_vm1, %v5352_v39, %v5370_v27  ;;  %v5324_v30 = vfloor.f32 %v5308_v42 }
 0xadb   : > { %5462 = vrot.lane.b32.xlu1 %v5391_v37, %s6419_s16 }
 0xadc   : > { %v5340_v24 = vmul.f32 16.0, %v5324_v30 }
 0xade   : > { %v5356_v9 = vsub.f32 %v5276_v7, %v5340_v24 }
 0xae3   : > { %5468 = vrot.lane.b32.xlu1 %v5394_v4, %s6419_s16 }
 0xae8   : > { %6244 = vmatmul.msk.bf16.gmra.mxu3 %vm4665_vm13, %v10534_v20  ;;  %v5290_v20 = vadd.f32 0.5, %v5274_v61 }
 0xaea   : > { %v5306_v35 = vmul.f32 0.0625, %v5290_v20 }
 0xaec   : > { %v5322_v3 = vfloor.f32 %v5306_v35 }
 0xaee   : > { %v5338_v12 = vmul.f32 16.0, %v5322_v3  ;;  %v5372_v36 = vadd.f32 %v10541_v1, %v5322_v3 }
 0xaf0   : > { %v5354_v40 = vsub.f32 %v5274_v61, %v5338_v12 }
 0xaf2   : > { %v5393_v5 = vsel %vm5377_vm1, %v5354_v40, %v5372_v36 }
 0xaf3   : > { %5466 = vrot.lane.b32.xlu0 %v5393_v5, %s6419_s16 }
 0xaf8   : > { %6245 = vmatmul.msk.bf16.gmra.mxu3 %vm4665_vm13, %v10539_v58  ;;  %v5257_v58 = vadd.s32 96, %v9695_v13  ;;  %v5374_v13 = vadd.f32 %v10541_v1, %v5324_v30 }
 0xafa   : > { %v5273_v32 = vcvt.s32.f32 %v5257_v58  ;;  %v5395_v27 = vsel %vm5377_vm1, %v5356_v9, %v5374_v13 }
 0xafc   : > { %v5289_v41 = vadd.f32 0.5, %v5273_v32 }
 0xafe   : > { %v5305_v63 = vmul.f32 0.0625, %v5289_v41  ;;  %v10662_v49 = vpop.permute.xlu1 %5446 }
 0xb00   : > { %v5321_v23 = vfloor.f32 %v5305_v63 }
 0xb02   : > { %v5337_v50 = vmul.f32 16.0, %v5321_v23  ;;  %v5371_v29 = vadd.f32 %v10541_v1, %v5321_v23 }
 0xb04   : > { %v5353_v59 = vsub.f32 %v5273_v32, %v5337_v50 }
 0xb06   : > { %v10670_v57 = vpop.permute.xlu1 %5536 }
 0xb08   : > { %6246 = vmatmul.msk.bf16.gmra.mxu3 %vm4665_vm13, %v10566_v38  ;;  %v5392_v38 = vsel %vm5377_vm1, %v5353_v59, %v5371_v29  ;;  %vm12629_vm13 = vcmask 23552  }
 0xb09   : > { %5464 = vrot.lane.b32.xlu2 %v5392_v38, %s6419_s16  ;;  %vm12632_vm3 = vmmov %vm12629_vm13 }
 0xb0a   : > { %vm12635_vm14 = vmmov %vm12632_vm3 }
 0xb0b   : > { %vm12637_vm1 = vmmov %vm12632_vm3 }
 0xb0c   : > { %vm12641_vm0 = vmmov %vm12637_vm1 }
 0xb11   : > { %5470 = vrot.lane.b32.xlu2 %v5395_v27, %s6419_s16  ;;  %v10725_v27 = vpop.permute.xlu0 %5405  ;;  %s5959_s16 = sshll.u32 %s6401_s24, 4  ;;  %s5960_s24 = sshll.u32 %s12688_s25, 5 }
 0xb12   : > { %p309_p9 = scmp.lt.s32.totalorder %s5959_s16, 31 }
 0xb14   : > { %v5192_v28 = vpop.f32.mrf.mxu3  ;;  %s12690_s16 = smov (!%p309_p9, %s5959_s16), 31 }
 0xb15   : > { %v10660_v62 = vadd.f32 %v10653_v46, %v5192_v28  ;;  %s312_s13 = sadd.s32 %s5960_s24, %s12690_s16 }
 0xb16   : > { %s5961_s15 = sshll.u32 %s312_s13, 3 }
 0xb17   : > { %v5232_v11 = vmin.f32 %v10660_v62, 4.1351666  ;;  %s10967_s11 = scalar_lea.vmem %s11155_s7, %s5961_s15 }
 0xb19   : > { %v5504_v34 = vmul.f32 1.442695, %v5232_v11 }
 0xb1b   : > { %6344 = vpow2.f32 %v5504_v34 }
 0xb1c   : > { %v5194_v55 = vpop.f32.mrf.mxu3 }
 0xb1d   : > { %v10666_v33 = vadd.f32 %v10653_v46, %v5194_v55 }
 0xb1f   : > { %v5233_v44 = vmin.f32 %v10666_v33, 4.1351666 }
 0xb21   : > { %v6345_v45 = vpop.eup %6344  ;;  %v5506_v52 = vmul.f32 1.442695, %v5233_v44  ;;  %v10721_v44 = vpop.permute.xlu2 %5442 }
 0xb22   : > { %v5539_v26 = vmul.f32 %v6345_v45, %v10670_v57 }
 0xb23   : > { %6346 = vpow2.f32 %v5506_v52 }
 0xb24   : > { %v5555_v39 = vmul.f32 0.5, %v5539_v26 }
 0xb26   : > { %5587 = vrot.lane.b32.xlu0 %v5555_v39, %s6432_s21 }
 0xb29   : > { %v6347_v1 = vpop.eup %6346 }
 0xb2a   : > { %v5540_v37 = vmul.f32 %v6347_v1, %v10670_v57 }
 0xb2b   : > { %v5197_v48 = vpop.f32.mrf.mxu3 }
 0xb2c   : > { %v10679_v19 = vadd.f32 %v10653_v46, %v5197_v48  ;;  %v5556_v54 = vmul.f32 0.5, %v5540_v37  ;;  %v10731_v37 = vpop.permute.xlu2 %5448 }
 0xb2e   : > { %v5234_v51 = vmin.f32 %v10679_v19, 4.1351666  ;;  %5589 = vrot.lane.b32.xlu1 %v5556_v54, %s6432_s21 }
 0xb30   : > { %v5508_v31 = vmul.f32 1.442695, %v5234_v51 }
 0xb32   : > { %6348 = vpow2.f32 %v5508_v31 }
 0xb33   : > { %v5199_v0 = vpop.f32.mrf.mxu3 }
 0xb34   : > { %v10684_v8 = vadd.f32 %v10653_v46, %v5199_v0  ;;  %v5445_v0 = vpop.permute.xlu0 %5444 }
 0xb36   : > { %v5235_v17 = vmin.f32 %v10684_v8, 4.1351666 }
 0xb38   : > { %v6349_v6 = vpop.eup %6348  ;;  %v5510_v14 = vmul.f32 1.442695, %v5235_v17 }
 0xb39   : > { %v5541_v56 = vmul.f32 %v6349_v6, %v10670_v57 }
 0xb3a   : > { %6350 = vpow2.f32 %v5510_v14 }
 0xb3b   : > { %v5202_v15 = vpop.f32.mrf.mxu3  ;;  %v5557_v61 = vmul.f32 0.5, %v5541_v56 }
 0xb3c   : > { %v10689_v20 = vadd.f32 %v10653_v46, %v5202_v15  ;;  %v10739_v15 = vpop.permute.xlu2 %5452 }
 0xb3d   : > { %5591 = vrot.lane.b32.xlu2 %v5557_v61, %s6432_s21 }
 0xb3e   : > { %v5236_v35 = vmin.f32 %v10689_v20, 4.1351666 }
 0xb40   : > { %v6351_v3 = vpop.eup %6350  ;;  %v5512_v10 = vmul.f32 1.442695, %v5236_v35 }
 0xb41   : > { %v5542_v12 = vmul.f32 %v6351_v3, %v10670_v57 }
 0xb42   : > { %6352 = vpow2.f32 %v5512_v10  ;;  %v10743_v10 = vpop.permute.xlu0 %5450 }
 0xb43   : > { %v5204_v36 = vpop.f32.mrf.mxu3  ;;  %v5558_v60 = vmul.f32 0.5, %v5542_v12 }
 0xb44   : > { %v10695_v40 = vadd.f32 %v10653_v46, %v5204_v36 }
 0xb45   : > { %5593 = vrot.lane.b32.xlu0 %v5558_v60, %s6432_s21 }
 0xb46   : > { %v5237_v21 = vmin.f32 %v10695_v40, 4.1351666 }
 0xb48   : > { %v6353_v5 = vpop.eup %6352  ;;  %v5514_v2 = vmul.f32 1.442695, %v5237_v21 }
 0xb49   : > { %v5543_v16 = vmul.f32 %v6353_v5, %v10670_v57  ;;  %v10749_v5 = vpop.permute.xlu2 %5458 }
 0xb4a   : > { %6354 = vpow2.f32 %v5514_v2 }
 0xb4b   : > { %v5207_v58 = vpop.f32.mrf.mxu3  ;;  %v5559_v43 = vmul.f32 0.5, %v5543_v16 }
 0xb4c   : > { %v10701_v53 = vadd.f32 %v10653_v46, %v5207_v58 }
 0xb4d   : > { %5595 = vrot.lane.b32.xlu1 %v5559_v43, %s6432_s21  ;;  %v10753_v43 = vpop.permute.xlu0 %5454 }
 0xb4e   : > { %v5238_v32 = vmin.f32 %v10701_v53, 4.1351666 }
 0xb50   : > { %v6355_v47 = vpop.eup %6354  ;;  %v5516_v41 = vmul.f32 1.442695, %v5238_v32 }
 0xb51   : > { %v5544_v4 = vmul.f32 %v6355_v47, %v10670_v57 }
 0xb52   : > { %6356 = vpow2.f32 %v5516_v41 }
 0xb53   : > { %v5209_v63 = vpop.f32.mrf.mxu3  ;;  %v5560_v23 = vmul.f32 0.5, %v5544_v4 }
 0xb54   : > { %v10707_v50 = vadd.f32 %v10653_v46, %v5209_v63 }
 0xb55   : > { %5597 = vrot.lane.b32.xlu2 %v5560_v23, %s6432_s21 }
 0xb56   : > { %v5239_v29 = vmin.f32 %v10707_v50, 4.1351666 }
 0xb58   : > { %v6357_v59 = vpop.eup %6356  ;;  %v5518_v38 = vmul.f32 1.442695, %v5239_v29 }
 0xb59   : > { %v5545_v25 = vmul.f32 %v6357_v59, %v10670_v57 }
 0xb5a   : > { %6358 = vpow2.f32 %v5518_v38  ;;  %v10763_v38 = vpop.permute.xlu1 %5456 }
 0xb5b   : > { %v5212_v28 = vpop.f32.mrf.mxu3  ;;  %v5561_v7 = vmul.f32 0.5, %v5545_v25  ;;  %v10765_v25 = vpop.permute.xlu0 %5460 }
 0xb5c   : > { %v10713_v11 = vadd.f32 %v10653_v46, %v5212_v28 }
 0xb5d   : > { %5599 = vrot.lane.b32.xlu0 %v5561_v7, %s6432_s21 }
 0xb5e   : > { %v5240_v22 = vmin.f32 %v10713_v11, 4.1351666 }
 0xb60   : > { %v6359_v34 = vpop.eup %6358  ;;  %v5520_v42 = vmul.f32 1.442695, %v5240_v22 }
 0xb61   : > { %v5546_v30 = vmul.f32 %v6359_v34, %v10670_v57 }
 0xb62   : > { %6360 = vpow2.f32 %v5520_v42 }
 0xb63   : > { %v5214_v55 = vpop.f32.mrf.mxu3  ;;  %v5562_v24 = vmul.f32 0.5, %v5546_v30  ;;  %v10759_v63 = vpop.permute.xlu2 %5464 }
 0xb64   : > { %v10719_v13 = vadd.f32 %v10653_v46, %v5214_v55 }
 0xb65   : > { %5601 = vrot.lane.b32.xlu1 %v5562_v24, %s6432_s21 }
 0xb66   : > { %v5241_v9 = vmin.f32 %v10719_v13, 4.1351666 }
 0xb68   : > { %v6361_v45 = vpop.eup %6360  ;;  %v5522_v52 = vmul.f32 1.442695, %v5241_v9  ;;  %v10775_v9 = vpop.permute.xlu1 %5462 }
 0xb69   : > { %v5547_v26 = vmul.f32 %v6361_v45, %v10670_v57  ;;  %v10777_v45 = vpop.permute.xlu0 %5466 }
 0xb6a   : > { %6362 = vpow2.f32 %v5522_v52 }
 0xb6b   : > { %v5217_v39 = vpop.f32.mrf.mxu3  ;;  %v5563_v1 = vmul.f32 0.5, %v5547_v26  ;;  %v10772_v42 = vpop.permute.xlu2 %5470  ;;  %v5410_v26 = vmul.f32 %v10725_v27, %v10679_v19 }
 0xb6c   : > { %v10729_v48 = vadd.f32 %v10653_v46, %v5217_v39 }
 0xb6d   : > { %5603 = vrot.lane.b32.xlu2 %v5563_v1, %s6432_s21 }
 0xb6e   : > { %v5242_v54 = vmin.f32 %v10729_v48, 4.1351666 }
 0xb70   : > { %v6363_v51 = vpop.eup %6362  ;;  %v5524_v31 = vmul.f32 1.442695, %v5242_v54 }
 0xb71   : > { %v5548_v17 = vmul.f32 %v6363_v51, %v10670_v57  ;;  %v5408_v51 = vmul.f32 %v10725_v27, %v10660_v62 }
 0xb72   : > { %6364 = vpow2.f32 %v5524_v31  ;;  %v10788_v31 = vadd.f32 %v5445_v0, %v5410_v26 }
 0xb73   : > { %v5219_v6 = vpop.f32.mrf.mxu3  ;;  %v5564_v14 = vmul.f32 0.5, %v5548_v17 }
 0xb74   : > { %v10737_v56 = vadd.f32 %v10653_v46, %v5219_v6 }
 0xb75   : > { %5605 = vrot.lane.b32.xlu0 %v5564_v14, %s6432_s21 }
 0xb76   : > { %v5243_v61 = vmin.f32 %v10737_v56, 4.1351666 }
 0xb78   : > { %v6365_v35 = vpop.eup %6364  ;;  %v5526_v3 = vmul.f32 1.442695, %v5243_v61 }
 0xb79   : > { %v5549_v12 = vmul.f32 %v6365_v35, %v10670_v57 }
 0xb7a   : > { %6366 = vpow2.f32 %v5526_v3  ;;  %v10796_v3 = vadd.f32 %v10647_v18, %v5408_v51 }
 0xb7b   : > { %v5222_v36 = vpop.f32.mrf.mxu3  ;;  %v5565_v60 = vmul.f32 0.5, %v5549_v12 }
 0xb7c   : > { %v10747_v21 = vadd.f32 %v10653_v46, %v5222_v36 }
 0xb7d   : > { %5607 = vrot.lane.b32.xlu1 %v5565_v60, %s6432_s21 }
 0xb7e   : > { %v5244_v2 = vmin.f32 %v10747_v21, 4.1351666 }
 0xb80   : > { %v6367_v16 = vpop.eup %6366  ;;  %v5528_v58 = vmul.f32 1.442695, %v5244_v2 }
 0xb81   : > { %v5550_v32 = vmul.f32 %v6367_v16, %v10670_v57  ;;  %v5409_v16 = vmul.f32 %v10725_v27, %v10666_v33 }
 0xb82   : > { %6368 = vpow2.f32 %v5528_v58 }
 0xb83   : > { %v5224_v47 = vpop.f32.mrf.mxu3  ;;  %v5566_v41 = vmul.f32 0.5, %v5550_v32 }
 0xb84   : > { %v10757_v4 = vadd.f32 %v10653_v46, %v5224_v47  ;;  %v10811_v47 = vadd.f32 %v10721_v44, %v5409_v16 }
 0xb85   : > { %5609 = vrot.lane.b32.xlu2 %v5566_v41, %s6432_s21 }
 0xb86   : > { %v5245_v23 = vmin.f32 %v10757_v4, 4.1351666 }
 0xb88   : > { %v6369_v29 = vpop.eup %6368  ;;  %v5530_v59 = vmul.f32 1.442695, %v5245_v23 }
 0xb89   : > { %v5551_v28 = vmul.f32 %v6369_v29, %v10670_v57 }
 0xb8a   : > { %6370 = vpow2.f32 %v5530_v59 }
 0xb8b   : > { %v5227_v7 = vpop.f32.mrf.mxu3  ;;  %v5567_v22 = vmul.f32 0.5, %v5551_v28 }
 0xb8c   : > { %v10769_v34 = vadd.f32 %v10653_v46, %v5227_v7 }
 0xb8d   : > { %5611 = vrot.lane.b32.xlu0 %v5567_v22, %s6432_s21 }
 0xb8e   : > { %v5246_v30 = vmin.f32 %v10769_v34, 4.1351666 }
 0xb90   : > { %v6371_v55 = vpop.eup %6370  ;;  %v5532_v24 = vmul.f32 1.442695, %v5246_v30 }
 0xb91   : > { %v5552_v52 = vmul.f32 %v6371_v55, %v10670_v57 }
 0xb92   : > { %6372 = vpow2.f32 %v5532_v24 }
 0xb93   : > { %v5229_v39 = vpop.f32.mrf.mxu3  ;;  %v5568_v1 = vmul.f32 0.5, %v5552_v52 }
 0xb94   : > { %v10783_v54 = vadd.f32 %v10653_v46, %v5229_v39  ;;  %v10798_v46 = vpop.permute.xlu1 %5468 }
 0xb95   : > { %5613 = vrot.lane.b32.xlu1 %v5568_v1, %s6432_s21  ;;  %v5411_v1 = vmul.f32 %v10725_v27, %v10684_v8 }
 0xb96   : > { %v5247_v17 = vmin.f32 %v10783_v54, 4.1351666 }
 0xb97   : > { %v10791_v6 = vpop.permute.xlu2 %5591 }
 0xb98   : > { %v6373_v14 = vpop.eup %6372  ;;  %v5534_v61 = vmul.f32 1.442695, %v5247_v17  ;;  %v5637_v35 = vsub.f32 %v10788_v31, %v10791_v6  ;;  %v10800_v12 = vpop.permute.xlu0 %5587  ;;  %v5685_v28 = vadd.f32 %v10791_v6, %v10788_v31 }
 0xb99   : > { %v5553_v36 = vmul.f32 %v6373_v14, %v10670_v57  ;;  %v5635_v0 = vsub.f32 %v10796_v3, %v10800_v12  ;;  %v5683_v60 = vadd.f32 %v10800_v12, %v10796_v3  ;;  %v10841_v14 = vadd.f32 %v10662_v49, %v5411_v1 }
 0xb9a   : > { %6374 = vpow2.f32 %v5534_v61  ;;  %v5701_v30 = vmax.f32 %v5685_v28, 0.0  ;;  %v5653_v12 = vmax.f32 %v5637_v35, 0.0 }
 0xb9b   : > { %v5569_v2 = vmul.f32 0.5, %v5553_v36  ;;  %v5699_v58 = vmax.f32 %v5683_v60, 0.0  ;;  %v5412_v60 = vmul.f32 %v10725_v27, %v10689_v20 }
 0xb9c   : > { %v5717_v55 = vmin.f32 %v5701_v30, 16.0  ;;  %v5414_v30 = vmul.f32 %v10725_v27, %v10701_v53 }
 0xb9d   : > { %5615 = vrot.lane.b32.xlu2 %v5569_v2, %s6432_s21  ;;  %v5715_v18 = vmin.f32 %v5699_v58, 16.0  ;;  %v10852_v58 = vadd.f32 %v10731_v37, %v5412_v60 }
 0xb9f   : > { %5747 = vrot.lane.b32.xlu1 %v5715_v18, %s6420_s17 }
 0xba0   : > { %v6375_v32 = vpop.eup %6374  ;;  %v10814_v41 = vpop.permute.xlu1 %5589 }
 0xba1   : > { %v5554_v23 = vmul.f32 %v6375_v32, %v10670_v57  ;;  %v5636_v29 = vsub.f32 %v10811_v47, %v10814_v41  ;;  %v5684_v59 = vadd.f32 %v10814_v41, %v10811_v47  ;;  %v5413_v57 = vmul.f32 %v10725_v27, %v10695_v40 }
 0xba2   : > { %v5421_v47 = vmul.f32 %v10725_v27, %v10757_v4 }
 0xba3   : > { %v5570_v7 = vmul.f32 0.5, %v5554_v23  ;;  %v5700_v22 = vmax.f32 %v5684_v59, 0.0  ;;  %v10829_v24 = vadd.f32 %v10743_v10, %v5413_v57  ;;  %v5416_v23 = vmul.f32 %v10725_v27, %v10713_v11 }
 0xba5   : > { %5617 = vrot.lane.b32.xlu0 %v5570_v7, %s6432_s21  ;;  %v5716_v44 = vmin.f32 %v5700_v22, 16.0  ;;  %v10864_v7 = vadd.f32 %v10763_v38, %v5416_v23  ;;  %v5419_v23 = vmul.f32 %v10725_v27, %v10737_v56 }
 0xba7   : > { %5749 = vrot.lane.b32.xlu2 %v5716_v44, %s6420_s17 }
 0xbad   : > { %5751 = vrot.lane.b32.xlu0 %v5717_v55, %s6420_s17 }
 0xbaf   : > { %v10831_v52 = vpop.permute.xlu2 %5597 }
 0xbb0   : > { %v5640_v26 = vsub.f32 %v10829_v24, %v10831_v52  ;;  %v5688_v39 = vadd.f32 %v10831_v52, %v10829_v24 }
 0xbb2   : > { %v5704_v51 = vmax.f32 %v5688_v39, 0.0  ;;  %v10876_v39 = vadd.f32 %v10739_v15, %v5414_v30  ;;  %v5656_v35 = vmax.f32 %v5640_v26, 0.0 }
 0xbb4   : > { %v5720_v17 = vmin.f32 %v5704_v51, 16.0  ;;  %v5672_v24 = vmin.f32 %v5656_v35, 16.0 }
 0xbb6   : > { %5757 = vrot.lane.b32.xlu0 %v5720_v17, %s6420_s17  ;;  %v5415_v17 = vmul.f32 %v10725_v27, %v10707_v50 }
 0xbb7   : > { %v10843_v10 = vpop.permute.xlu0 %5593 }
 0xbb8   : > { %v5638_v61 = vsub.f32 %v10841_v14, %v10843_v10  ;;  %v5686_v36 = vadd.f32 %v10843_v10, %v10841_v14 }
 0xbba   : > { %v5702_v2 = vmax.f32 %v5686_v36, 0.0  ;;  %v5654_v52 = vmax.f32 %v5638_v61, 0.0 }
 0xbbc   : > { %v5718_v16 = vmin.f32 %v5702_v2, 16.0  ;;  %v10888_v2 = vadd.f32 %v10753_v43, %v5415_v17 }
 0xbbe   : > { %5753 = vrot.lane.b32.xlu1 %v5718_v16, %s6420_s17 }
 0xbbf   : > { %v10855_v49 = vpop.permute.xlu1 %5595 }
 0xbc0   : > { %v5639_v18 = vsub.f32 %v10852_v58, %v10855_v49  ;;  %v5687_v32 = vadd.f32 %v10855_v49, %v10852_v58 }
 0xbc2   : > { %v5703_v59 = vmax.f32 %v5687_v32, 0.0 }
 0xbc4   : > { %v5719_v28 = vmin.f32 %v5703_v59, 16.0 }
 0xbc6   : > { %5755 = vrot.lane.b32.xlu2 %v5719_v28, %s6420_s17 }
 0xbc7   : > { %v10867_v37 = vpop.permute.xlu2 %5603 }
 0xbc8   : > { %v5643_v22 = vsub.f32 %v10864_v7, %v10867_v37  ;;  %v5691_v44 = vadd.f32 %v10867_v37, %v10864_v7 }
 0xbca   : > { %v5707_v57 = vmax.f32 %v5691_v44, 0.0  ;;  %v10900_v44 = vadd.f32 %v10775_v9, %v5419_v23  ;;  %v5418_v23 = vmul.f32 %v10725_v27, %v10729_v48 }
 0xbcc   : > { %v5723_v55 = vmin.f32 %v5707_v57, 16.0 }
 0xbce   : > { %5763 = vrot.lane.b32.xlu0 %v5723_v55, %s6420_s17  ;;  %v5417_v55 = vmul.f32 %v10725_v27, %v10719_v13 }
 0xbcf   : > { %v10879_v38 = vpop.permute.xlu0 %5599 }
 0xbd0   : > { %v5689_v51 = vadd.f32 %v10879_v38, %v10876_v39 }
 0xbd2   : > { %v5705_v36 = vmax.f32 %v5689_v51, 0.0 }
 0xbd4   : > { %v5721_v60 = vmin.f32 %v5705_v36, 16.0  ;;  %v10912_v36 = vadd.f32 %v10749_v5, %v5417_v55 }
 0xbd6   : > { %5759 = vrot.lane.b32.xlu1 %v5721_v60, %s6420_s17 }
 0xbd7   : > { %v10891_v15 = vpop.permute.xlu1 %5601 }
 0xbd8   : > { %v5642_v16 = vsub.f32 %v10888_v2, %v10891_v15  ;;  %v5690_v32 = vadd.f32 %v10891_v15, %v10888_v2 }
 0xbda   : > { %v5706_v59 = vmax.f32 %v5690_v32, 0.0 }
 0xbdc   : > { %v5722_v28 = vmin.f32 %v5706_v59, 16.0 }
 0xbde   : > { %5761 = vrot.lane.b32.xlu2 %v5722_v28, %s6420_s17 }
 0xbdf   : > { %v10903_v43 = vpop.permute.xlu2 %5609 }
 0xbe0   : > { %v5694_v57 = vadd.f32 %v10903_v43, %v10900_v44 }
 0xbe2   : > { %v5710_v51 = vmax.f32 %v5694_v57, 0.0  ;;  %v10924_v57 = vadd.f32 %v10765_v25, %v5418_v23 }
 0xbe4   : > { %v5726_v17 = vmin.f32 %v5710_v51, 16.0 }
 0xbe6   : > { %5769 = vrot.lane.b32.xlu0 %v5726_v17, %s6420_s17  ;;  %v5422_v17 = vmul.f32 %v10725_v27, %v10769_v34 }
 0xbe7   : > { %v10915_v9 = vpop.permute.xlu0 %5605 }
 0xbe8   : > { %v5692_v32 = vadd.f32 %v10915_v9, %v10912_v36  ;;  %v10937_v25 = vadd.f32 %v10798_v46, %v5422_v17  ;;  %v5652_v46 = vmax.f32 %v5636_v29, 0.0 }
 0xbea   : > { %v5708_v59 = vmax.f32 %v5692_v32, 0.0  ;;  %v5668_v30 = vmin.f32 %v5652_v46, 16.0 }
 0xbec   : > { %v5724_v28 = vmin.f32 %v5708_v59, 16.0 }
 0xbee   : > { %5765 = vrot.lane.b32.xlu1 %v5724_v28, %s6420_s17 }
 0xbef   : > { %v10927_v5 = vpop.permute.xlu1 %5607 }
 0xbf0   : > { %v5693_v51 = vadd.f32 %v10927_v5, %v10924_v57 }
 0xbf2   : > { %v5709_v32 = vmax.f32 %v5693_v51, 0.0  ;;  %v5420_v51 = vmul.f32 %v10725_v27, %v10747_v21 }
 0xbf4   : > { %v5725_v59 = vmin.f32 %v5709_v32, 16.0 }
 0xbf6   : > { %5767 = vrot.lane.b32.xlu2 %v5725_v59, %s6420_s17  ;;  %v10953_v59 = vadd.f32 %v10759_v63, %v5420_v51  ;;  %v5796_v63 = vsel %vm12629_vm13, %v10666_v33, %v5668_v30  ;;  %vm12644_vm13 = vmmov %vm12641_vm0 }
 0xbf7   : > { %v10940_v23 = vpop.permute.xlu2 %5615 }
 0xbf8   : > { %v5697_v60 = vadd.f32 %v10940_v23, %v10937_v25 }
 0xbfa   : > { %v5713_v17 = vmax.f32 %v5697_v60, 0.0 }
 0xbfc   : > { %v5729_v32 = vmin.f32 %v5713_v17, 16.0 }
 0xbfe   : > { %5775 = vrot.lane.b32.xlu0 %v5729_v32, %s6420_s17 }
 0xbff   : > { %v10956_v28 = vpop.permute.xlu0 %5611 }
 0xc00   : > { %v5647_v55 = vsub.f32 %v10953_v59, %v10956_v28  ;;  %v5695_v1 = vadd.f32 %v10956_v28, %v10953_v59 }
 0xc01   : > { %v5750_v29 = vpop.permute.xlu2 %5749 }
 0xc02   : > { %v5711_v41 = vmax.f32 %v5695_v1, 0.0  ;;  %v5812_v60 = vsel %vm12630_vm10, %v5796_v63, %v5750_v29  ;;  %v10976_v1 = vadd.f32 %v10777_v45, %v5421_v47  ;;  %v5423_v47 = vmul.f32 %v10725_v27, %v10783_v54  ;;  %vm12645_vm10 = vmmov %vm12642_vm2 }
 0xc03   : > { %v5828_v46 = vsel %vm12631_vm11, %v5812_v60, 0.0  ;;  %vm12646_vm11 = vmmov %vm12640_vm5 }
 0xc04   : > { %v5727_v51 = vmin.f32 %v5711_v41, 16.0  ;;  %5845 = vst.msk [vmem:[%s10967_s11 + $0x8] sm:$0xff] %vm5843_vm4, %v5828_v46  ;;  %v5651_v41 = vmax.f32 %v5635_v0, 0.0  ;;  %v10998_v3 = vadd.f32 %v10772_v42, %v5423_v47 }
 0xc06   : > { %5771 = vrot.lane.b32.xlu1 %v5727_v51, %s6420_s17  ;;  %v5667_v45 = vmin.f32 %v5651_v41, 16.0 }
 0xc07   : > { %v10979_v17 = vpop.permute.xlu1 %5613 }
 0xc08   : > { %v5648_v33 = vsub.f32 %v10976_v1, %v10979_v17  ;;  %v5696_v30 = vadd.f32 %v10979_v17, %v10976_v1  ;;  %v5795_v29 = vsel %vm12632_vm3, %v10660_v62, %v5667_v45  ;;  %v5655_v62 = vmax.f32 %v5639_v18, 0.0  ;;  %vm12647_vm3 = vmmov %vm12641_vm0 }
 0xc0a   : > { %v5712_v32 = vmax.f32 %v5696_v30, 0.0  ;;  %v5671_v41 = vmin.f32 %v5655_v62, 16.0  ;;  %v5659_v62 = vmax.f32 %v5643_v22, 0.0 }
 0xc0c   : > { %v5728_v63 = vmin.f32 %v5712_v32, 16.0  ;;  %v5669_v32 = vmin.f32 %v5653_v12, 16.0  ;;  %v5799_v49 = vsel %vm12637_vm1, %v10689_v20, %v5671_v41  ;;  %v5800_v20 = vsel %vm12641_vm0, %v10695_v40, %v5672_v24  ;;  %vm12653_vm1 = vmmov %vm12640_vm5 }
 0xc0e   : > { %5773 = vrot.lane.b32.xlu2 %v5728_v63, %s6420_s17  ;;  %v5797_v6 = vsel %vm12635_vm14, %v10679_v19, %v5669_v32  ;;  %vm12651_vm14 = vmmov %vm12641_vm0 }
 0xc11   : > { %v5748_v60 = vpop.permute.xlu1 %5747 }
 0xc12   : > { %v5811_v51 = vsel %vm12633_vm12, %v5795_v29, %v5748_v60  ;;  %vm12648_vm12 = vmmov %vm12642_vm2 }
 0xc13   : > { %v5827_v46 = vsel %vm12634_vm15, %v5811_v51, 0.0  ;;  %v5670_v51 = vmin.f32 %v5654_v52, 16.0  ;;  %vm12649_vm15 = vmmov %vm12640_vm5 }
 0xc14   : > { %5844 = vst.msk [vmem:[%s10967_s11] sm:$0xff] %vm5843_vm4, %v5827_v46  ;;  %v5658_v46 = vmax.f32 %v5642_v16, 0.0 }
 0xc15   : > { %v5798_v14 = vsel %vm12644_vm13, %v10684_v8, %v5670_v51  ;;  %vm12661_vm13 = vmmov %vm12641_vm0 }
 0xc16   : > { %v5674_v61 = vmin.f32 %v5658_v46, 16.0 }
 0xc17   : > { %v11003_v0 = vpop.permute.xlu0 %5617 }
 0xc18   : > { %v5650_v27 = vsub.f32 %v10998_v3, %v11003_v0  ;;  %v5698_v30 = vadd.f32 %v11003_v0, %v10998_v3  ;;  %v5802_v2 = vsel %vm12647_vm3, %v10707_v50, %v5674_v61  ;;  %vm12664_vm3 = vmmov %vm12641_vm0 }
 0xc1a   : > { %v5714_v42 = vmax.f32 %v5698_v30, 0.0  ;;  %v5675_v30 = vmin.f32 %v5659_v62, 16.0 }
 0xc1c   : > { %v5730_v63 = vmin.f32 %v5714_v42, 16.0  ;;  %v12650_v42 = vsub.f32 %v10876_v39, %v10879_v38  ;;  %v5803_v7 = vsel %vm12651_vm14, %v10713_v11, %v5675_v30  ;;  %vm12668_vm14 = vmmov %vm12641_vm0 }
 0xc1e   : > { %5777 = vrot.lane.b32.xlu1 %v5730_v63, %s6420_s17  ;;  %v5657_v32 = vmax.f32 %v12650_v42, 0.0  ;;  %v12654_v63 = vsub.f32 %v10924_v57, %v10927_v5 }
 0xc1f   : > { %v5752_v31 = vpop.permute.xlu0 %5751 }
 0xc20   : > { %v5813_v58 = vsel %vm12636_vm6, %v5797_v6, %v5752_v31  ;;  %v5756_v18 = vpop.permute.xlu2 %5755  ;;  %vm12652_vm6 = vmmov %vm12642_vm2  ;;  %v5673_v22 = vmin.f32 %v5657_v32, 16.0  ;;  %v5661_v31 = vmax.f32 %v12654_v63, 0.0 }
 0xc21   : > { %v5829_v45 = vsel %vm12638_vm8, %v5813_v58, 0.0  ;;  %v5815_v47 = vsel %vm12639_vm9, %v5799_v49, %v5756_v18  ;;  %vm12655_vm8 = vmmov %vm12641_vm0  ;;  %v12658_v58 = vsub.f32 %v10900_v44, %v10903_v43 }
 0xc22   : > { %5846 = vst.msk [vmem:[%s10967_s11 + $0x10] sm:$0xff] %vm5843_vm4, %v5829_v45  ;;  %v5831_v19 = vsel %vm12640_vm5, %v5815_v47, 0.0  ;;  %v5801_v39 = vsel %vm12655_vm8, %v10701_v53, %v5673_v22  ;;  %vm12656_vm9 = vmmov %vm12642_vm2  ;;  %v5677_v35 = vmin.f32 %v5661_v31, 16.0  ;;  %v12660_v47 = vsub.f32 %v10912_v36, %v10915_v9 }
 0xc23   : > { %5848 = vst.msk [vmem:[%s10967_s11 + $0x20] sm:$0xff] %vm5843_vm4, %v5831_v19  ;;  %vm12657_vm5 = vmmov %vm12653_vm1  ;;  %v5662_v49 = vmax.f32 %v12658_v58, 0.0 }
 0xc24   : > { %v5805_v57 = vsel %vm12641_vm0, %v10729_v48, %v5677_v35  ;;  %v5660_v19 = vmax.f32 %v12660_v47, 0.0  ;;  %vm12670_vm8 = vmmov %vm12641_vm0 }
 0xc25   : > { %v5678_v45 = vmin.f32 %v5662_v49, 16.0 }
 0xc26   : > { %v5676_v52 = vmin.f32 %v5660_v19, 16.0 }
 0xc27   : > { %v5806_v44 = vsel %vm12661_vm13, %v10737_v56, %v5678_v45  ;;  %vm12674_vm13 = vmmov %vm12641_vm0 }
 0xc28   : > { %v5758_v26 = vpop.permute.xlu0 %5757  ;;  %v5804_v36 = vsel %vm12664_vm3, %v10719_v13, %v5676_v52 }
 0xc29   : > { %v5816_v29 = vsel %vm12642_vm2, %v5800_v20, %v5758_v26  ;;  %v5664_v26 = vmax.f32 %v5648_v33, 0.0 }
 0xc2a   : > { %v5832_v60 = vsel %vm12643_vm7, %v5816_v29, 0.0  ;;  %vm12659_vm7 = vmmov %vm12653_vm1 }
 0xc2b   : > { %5849 = vst.msk [vmem:[%s10967_s11 + $0x28] sm:$0xff] %vm5843_vm4, %v5832_v60  ;;  %v5680_v29 = vmin.f32 %v5664_v26, 16.0  ;;  %v12667_v60 = vsub.f32 %v10937_v25, %v10940_v23 }
 0xc2d   : > { %v5665_v51 = vmax.f32 %v12667_v60, 0.0  ;;  %v5808_v1 = vsel %vm12668_vm14, %v10757_v4, %v5680_v29 }
 0xc2f   : > { %v5681_v46 = vmin.f32 %v5665_v51, 16.0 }
 0xc30   : > { %v5754_v12 = vpop.permute.xlu1 %5753 }
 0xc31   : > { %v5814_v10 = vsel %vm12645_vm10, %v5798_v14, %v5754_v12  ;;  %vm12662_vm10 = vmmov %vm12642_vm2  ;;  %v5663_v12 = vmax.f32 %v5647_v55, 0.0  ;;  %v5809_v25 = vsel %vm12670_vm8, %v10769_v34, %v5681_v46  ;;  %v5666_v34 = vmax.f32 %v5650_v27, 0.0 }
 0xc32   : > { %v5830_v40 = vsel %vm12646_vm11, %v5814_v10, 0.0  ;;  %vm12663_vm11 = vmmov %vm12653_vm1 }
 0xc33   : > { %5847 = vst.msk [vmem:[%s10967_s11 + $0x18] sm:$0xff] %vm5843_vm4, %v5830_v40  ;;  %v5679_v10 = vmin.f32 %v5663_v12, 16.0  ;;  %v5682_v28 = vmin.f32 %v5666_v34, 16.0 }
 0xc35   : > { %v5807_v61 = vsel %vm12641_vm0, %v10747_v21, %v5679_v10 }
 0xc38   : > { %v5762_v15 = vpop.permute.xlu2 %5761 }
 0xc39   : > { %v5818_v16 = vsel %vm12648_vm12, %v5802_v2, %v5762_v15  ;;  %vm12665_vm12 = vmmov %vm12642_vm2  ;;  %v5810_v2 = vsel %vm12674_vm13, %v10783_v54, %v5682_v28 }
 0xc3a   : > { %v5834_v8 = vsel %vm12649_vm15, %v5818_v16, 0.0  ;;  %vm12666_vm15 = vmmov %vm12653_vm1 }
 0xc3b   : > { %5851 = vst.msk [vmem:[%s10967_s11 + $0x38] sm:$0xff] %vm5843_vm4, %v5834_v8 }
 0xc40   : > { %v5764_v41 = vpop.permute.xlu0 %5763 }
 0xc41   : > { %v5819_v37 = vsel %vm12652_vm6, %v5803_v7, %v5764_v41  ;;  %vm12669_vm6 = vmmov %vm12642_vm2 }
 0xc42   : > { %v5835_v50 = vsel %vm12653_vm1, %v5819_v37, 0.0 }
 0xc43   : > { %5852 = vst.msk [vmem:[%s10967_s11 + $0x40] sm:$0xff] %vm5843_vm4, %v5835_v50 }
 0xc48   : > { %v5760_v6 = vpop.permute.xlu1 %5759 }
 0xc49   : > { %v5817_v38 = vsel %vm12656_vm9, %v5801_v39, %v5760_v6  ;;  %vm12671_vm9 = vmmov %vm12642_vm2 }
 0xc4a   : > { %v5833_v11 = vsel %vm12657_vm5, %v5817_v38, 0.0  ;;  %vm12672_vm5 = vmmov %vm12653_vm1 }
 0xc4b   : > { %5850 = vst.msk [vmem:[%s10967_s11 + $0x30] sm:$0xff] %vm5843_vm4, %v5833_v11 }
 0xc50   : > { %v5768_v5 = vpop.permute.xlu2 %5767 }
 0xc51   : > { %v5821_v18 = vsel %vm12642_vm2, %v5805_v57, %v5768_v5 }
 0xc52   : > { %v5837_v53 = vsel %vm12659_vm7, %v5821_v18, 0.0  ;;  %vm12673_vm7 = vmmov %vm12653_vm1 }
 0xc53   : > { %5854 = vst.msk [vmem:[%s10967_s11 + $0x50] sm:$0xff] %vm5843_vm4, %v5837_v53 }
 0xc58   : > { %v5770_v24 = vpop.permute.xlu0 %5769 }
 0xc59   : > { %v5822_v43 = vsel %vm12662_vm10, %v5806_v44, %v5770_v24  ;;  %vm12675_vm10 = vmmov %vm12642_vm2 }
 0xc5a   : > { %v5838_v48 = vsel %vm12663_vm11, %v5822_v43, 0.0  ;;  %vm12676_vm11 = vmmov %vm12653_vm1 }
 0xc5b   : > { %5855 = vst.msk [vmem:[%s10967_s11 + $0x58] sm:$0xff] %vm5843_vm4, %v5838_v48 }
 0xc60   : > { %v5766_v20 = vpop.permute.xlu1 %5765 }
 0xc61   : > { %v5820_v9 = vsel %vm12665_vm12, %v5804_v36, %v5766_v20 }
 0xc62   : > { %v5836_v56 = vsel %vm12666_vm15, %v5820_v9, 0.0 }
 0xc63   : > { %5853 = vst.msk [vmem:[%s10967_s11 + $0x48] sm:$0xff] %vm5843_vm4, %v5836_v56 }
 0xc68   : > { %v5774_v17 = vpop.permute.xlu2 %5773 }
 0xc69   : > { %v5824_v33 = vsel %vm12669_vm6, %v5808_v1, %v5774_v17 }
 0xc6a   : > { %v5840_v13 = vsel %vm12653_vm1, %v5824_v33, 0.0 }
 0xc6b   : > { %5857 = vst.msk [vmem:[%s10967_s11 + $0x68] sm:$0xff] %vm5843_vm4, %v5840_v13 }
 0xc70   : > { %v5776_v14 = vpop.permute.xlu0 %5775 }
 0xc71   : > { %v5825_v4 = vsel %vm12671_vm9, %v5809_v25, %v5776_v14 }
 0xc72   : > { %v5841_v23 = vsel %vm12672_vm5, %v5825_v4, 0.0 }
 0xc73   : > { %5858 = vst.msk [vmem:[%s10967_s11 + $0x70] sm:$0xff] %vm5843_vm4, %v5841_v23 }
 0xc78   : > { %v5772_v40 = vpop.permute.xlu1 %5771 }
 0xc79   : > { %v5823_v62 = vsel %vm12642_vm2, %v5807_v61, %v5772_v40 }
 0xc7a   : > { %v5839_v55 = vsel %vm12673_vm7, %v5823_v62, 0.0 }
 0xc7b   : > { %5856 = vst.msk [vmem:[%s10967_s11 + $0x60] sm:$0xff] %vm5843_vm4, %v5839_v55 }
 0xc90   : > { %v5778_v59 = vpop.permute.xlu1 %5777 }
 0xc91   : > { %v5826_v15 = vsel %vm12675_vm10, %v5810_v2, %v5778_v59 }
 0xc92   : > { %v5842_v16 = vsel %vm12676_vm11, %v5826_v15, 0.0 }
 0xc93   : > { %5859 = vst.msk [vmem:[%s10967_s11 + $0x78] sm:$0xff] %vm5843_vm4, %v5842_v16 }
 0xc94 PF: > { %s17_s28 = sadd.s32 1, %s6417_s28   ;;  %s12677_s24 = smov %s6409_s26 }
 0xc95   : > { %p14_p10 = scmp.ge.s32.totalorder %s17_s28, 6   ;;  %s12678_s25 = smov %s6413_s27 }
 0xc96   : > { %s12679_s26 = smov %s12682_s29  ;;  %s12680_s27 = smov %s12686_s30 }
 0xc97   :  { %16 = sbr.rel (!%p14_p10) target bundleno = 3 (0x3), region = 171 }

</bundles_post_ra>
